<compile_context>
chip_gen: v6e
topology: v6e:2x2x1
jax: 0.10.0
libtpu: 0.0.40
codegen_flags: <defaults>
</compile_context>

<pallas_src>
import functools

import jax
import jax.numpy as jnp
import numpy as np
from jax.experimental import pallas as pl
from jax.experimental.pallas import tpu as pltpu

EPS = 1e-5  # nn.InstanceNorm2d default eps


# ----------------------------------------------------------------------------
# Fused kernel: all `depth` stages for Bb packed batch elements.
#
#   skip scratch layout: (Bb*C*depth, Hbuf*Wb) f32
#     Wb   = padded row width (>= W + 2; chosen so H*Wb % 128 == 0 if cheap)
#     Hbuf = 1 + PAD + H + PAD + 1   (guard row + dilation halo + guard row)
#   stripe s (stage-s dense-concat block) occupies sublane rows
#     [s*Bb*C, (s+1)*Bb*C), row index within a stripe = b*C + c (batch-major).
#   interior element (b, c, h, w') lives at flat lane (1 + PAD + h)*Wb + w'.
# ----------------------------------------------------------------------------
def ds_ddb_kernel(x_ref, dw_ref, pwh_ref, pwl_ref, ch_ref, mask_ref,
                  out_ref, skip_ref, *, C, depth, H, W, Wb, Bb):
    BbC = Bb * C                         # rows per stripe
    PAD = 2 ** (depth - 1)
    ROW0 = 1                             # leading guard row
    FLAT = H * Wb                        # per-stripe interior slab length (lanes)
    base = (ROW0 + PAD) * Wb             # flat lane offset of the interior slab
    lanes = skip_ref.shape[1]
    n_rows = skip_ref.shape[0]           # Bb * C * depth
    inv_hw = 1.0 / float(H * W)
    use_roll = (FLAT % 128 == 0)         # roll path needs whole-vreg lane extent

    # Zero only the halo/guard lane ranges; stripe interiors are always
    # fully overwritten before being read.
    skip_ref[:, 0:base] = jnp.zeros((n_rows, base), jnp.float32)
    skip_ref[:, base + FLAT:lanes] = jnp.zeros(
        (n_rows, lanes - base - FLAT), jnp.float32)

    # Stripe 0 <- (column-padded, row-flattened) input, batch-major rows.
    skip_ref[0:BbC, base:base + FLAT] = x_ref[0].astype(jnp.float32)

    # Hoisted valid-pixel mask broadcast (1.0 real pixel, 0.0 pad column).
    valid = jnp.broadcast_to(mask_ref[...], (BbC, FLAT))

    out = None
    for i in range(depth):
        dil = 2 ** i
        rows = (i + 1) * BbC             # active scratch rows at this stage

        # ---- dilated depthwise 3x3, "same" pad (dil, 1), channels on sublanes ----
        def mac(a, tap, col):
            term = tap * dw_ref[0:rows, col:col + 1]    # per-row (channel) scale
            return term if a is None else a + term

        acc = None
        for kh in range(3):
            start = (ROW0 + PAD + (kh - 1) * dil) * Wb
            c0 = skip_ref[0:rows, start:start + FLAT]            # kw = 1 (center)
            acc = mac(acc, c0, i * 10 + kh * 3 + 1)
            if use_roll:
                # kw=0 needs tap[j] = center[j-1] -> roll(+1); kw=2 -> roll(-1).
                # Wrapped lanes land on masked pad columns only.
                left = pltpu.roll(c0, 1, 1)
                right = pltpu.roll(c0, FLAT - 1, 1)              # == shift -1
            else:
                left = skip_ref[0:rows, start - 1:start - 1 + FLAT]
                right = skip_ref[0:rows, start + 1:start + 1 + FLAT]
            acc = mac(acc, left, i * 10 + kh * 3 + 0)
            acc = mac(acc, right, i * 10 + kh * 3 + 2)
        acc = acc + dw_ref[0:rows, i * 10 + 9:i * 10 + 10]       # depthwise bias

        # ---- 1x1 pointwise (cin -> C) on the MXU, bf16 hi/lo 3-pass split ----
        a_hi = acc.astype(jnp.bfloat16)
        a_lo = (acc - a_hi.astype(jnp.float32)).astype(jnp.bfloat16)
        w_hi = pwh_ref[i * BbC:(i + 1) * BbC, 0:rows]            # (BbC, rows) bf16
        w_lo = pwl_ref[i * BbC:(i + 1) * BbC, 0:rows]
        z = (jnp.dot(w_hi, a_hi, preferred_element_type=jnp.float32)
             + jnp.dot(w_hi, a_lo, preferred_element_type=jnp.float32)
             + jnp.dot(w_lo, a_hi, preferred_element_type=jnp.float32))
        z = z + ch_ref[:, 4 * i + 0:4 * i + 1]                   # pointwise bias

        # ---- InstanceNorm2d: single-pass masked stats over the H*W valid pixels ----
        zm = z * valid
        s1 = jnp.sum(zm, axis=1, keepdims=True)
        s2 = jnp.sum(zm * z, axis=1, keepdims=True)
        mean = s1 * inv_hw
        var = jnp.maximum(s2 * inv_hw - mean * mean, 0.0)
        scale = jax.lax.rsqrt(var + EPS) * ch_ref[:, 4 * i + 1:4 * i + 2]
        zn = (z - mean) * scale + ch_ref[:, 4 * i + 2:4 * i + 3]

        # ---- PReLU (per-channel slope); re-zero pad columns before write-back ----
        alpha = ch_ref[:, 4 * i + 3:4 * i + 4]
        o = jnp.where(zn >= 0, zn, alpha * zn) * valid           # (BbC, FLAT)

        # dense concat: append as the next stripe of the skip scratch
        if i + 1 < depth:
            skip_ref[(i + 1) * BbC:(i + 2) * BbC, base:base + FLAT] = o
        out = o

    out_ref[0] = out.astype(out_ref.dtype)


# ----------------------------------------------------------------------------
# Host-side parameter packing (traceable, runs under jit).
# PyTorch concat order at stage i is [out_{i-1}, ..., out_0, x]; the scratch
# stores [x, out_0, ..., out_{i-1}], so the C-sized channel blocks of the
# depthwise / pointwise weights are reversed.  Every per-channel quantity is
# tiled across the Bb packed batch elements; the pointwise matrix is built
# batch-block-diagonal so one MXU dot handles all packed batches.
# ----------------------------------------------------------------------------
def _pack_params(params, C, depth, Bb):
    BbC = Bb * C
    n_rows = BbC * depth
    eye_b = jnp.eye(Bb, dtype=jnp.float32)

    dw_cols, pw_rows, ch_cols = [], [], []
    for i in range(depth):
        dww, dwb, pww, pwb, gamma, beta, alpha = params[i]
        rows = (i + 1) * BbC

        # depthwise taps + bias: stripe-reversed, batch-tiled, row = s*BbC + b*C + c
        dww_s = dww.reshape(3, 3, i + 1, C)[:, :, ::-1, :]                 # (3,3,s,c)
        taps = jnp.broadcast_to(dww_s[:, :, :, None, :],
                                (3, 3, i + 1, Bb, C)).reshape(9, rows).T   # (rows, 9)
        dwb_s = dwb.reshape(i + 1, C)[::-1]
        bias = jnp.broadcast_to(dwb_s[:, None, :], (i + 1, Bb, C)).reshape(rows, 1)
        dcol = jnp.concatenate([taps, bias], axis=1)                       # (rows, 10)
        dw_cols.append(jnp.pad(dcol, ((0, n_rows - rows), (0, 0))))

        # batch-block-diagonal pointwise matrix M[b*C+o, s*BbC+b*C+c] = w[(i-s)*C+c, o]
        pww_s = pww.reshape(i + 1, C, C)[::-1]                             # (s, c, o)
        T = jnp.transpose(pww_s, (2, 0, 1))                                # (o, s, c)
        M = (eye_b[:, None, None, :, None] *
             T[None, :, :, None, :]).reshape(BbC, rows)
        pw_rows.append(jnp.pad(M, ((0, 0), (0, n_rows - rows))))

        ch_cols.append(jnp.stack([jnp.tile(pwb.reshape(C), Bb),
                                  jnp.tile(gamma.reshape(C), Bb),
                                  jnp.tile(beta.reshape(C), Bb),
                                  jnp.tile(alpha.reshape(C), Bb)], axis=1))  # (BbC, 4)

    dw_pack = jnp.concatenate(dw_cols, axis=1)        # (n_rows, depth*10) f32
    pw_pack = jnp.concatenate(pw_rows, axis=0)        # (depth*BbC, n_rows) f32
    pw_hi = pw_pack.astype(jnp.bfloat16)              # bf16 hi/lo split for the MXU
    pw_lo = (pw_pack - pw_hi.astype(jnp.float32)).astype(jnp.bfloat16)
    ch_pack = jnp.concatenate(ch_cols, axis=1)        # (BbC, 4*depth) f32
    return dw_pack, pw_hi, pw_lo, ch_pack


# ----------------------------------------------------------------------------
# DS_DDB forward (single fused pallas_call) and a pure-JAX reference.
# ----------------------------------------------------------------------------
def ds_ddb_forward(x_nchw, params, depth=4, batch_block=None):
    B, C, H, W = x_nchw.shape

    # Lane-dense padded row width: smallest Wb >= W+2 with H*Wb % 128 == 0,
    # as long as it costs only a handful of extra zero columns.
    Wb = W + 2
    for cand in range(W + 2, W + 2 + 16):
        if (H * cand) % 128 == 0:
            Wb = cand
            break

    PAD = 2 ** (depth - 1)
    Hbuf = 2 * PAD + H + 2               # halo rows + 2 guard rows
    FLAT = H * Wb

    # Batch packing: fill sublanes.  (On v7x, keeping B//Bb >= 2 feeds both
    # TensorCores; at the tiny demo batch this collapses to one grid step.)
    if batch_block is None:
        batch_block = next(bb for bb in (4, 2, 1) if B % bb == 0)
    Bb = batch_block
    assert B % Bb == 0
    G = B // Bb
    BbC = Bb * C
    n_rows = BbC * depth

    dw_pack, pw_hi, pw_lo, ch_pack = _pack_params(params, C, depth, Bb)

    # One column-pad + row-flatten of the input (done once, not per stage).
    x_pad = jnp.pad(x_nchw, ((0, 0), (0, 0), (0, 0), (1, Wb - W - 1)))
    x_slab = x_pad.reshape(G, BbC, FLAT)

    col = np.arange(FLAT) % Wb
    mask = jnp.asarray(((col >= 1) & (col <= W)).astype(np.float32)).reshape(1, FLAT)

    kernel = functools.partial(ds_ddb_kernel, C=C, depth=depth,
                               H=H, W=W, Wb=Wb, Bb=Bb)
    out_slab = pl.pallas_call(
        kernel,
        out_shape=jax.ShapeDtypeStruct((G, BbC, FLAT), x_nchw.dtype),
        grid=(G,),
        in_specs=[
            pl.BlockSpec((1, BbC, FLAT), lambda g: (g, 0, 0)),
            pl.BlockSpec(dw_pack.shape, lambda g: (0, 0)),
            pl.BlockSpec(pw_hi.shape, lambda g: (0, 0)),
            pl.BlockSpec(pw_lo.shape, lambda g: (0, 0)),
            pl.BlockSpec(ch_pack.shape, lambda g: (0, 0)),
            pl.BlockSpec((1, FLAT), lambda g: (0, 0)),
        ],
        out_specs=pl.BlockSpec((1, BbC, FLAT), lambda g: (g, 0, 0)),
        scratch_shapes=[pltpu.VMEM((n_rows, Hbuf * Wb), jnp.float32)],
        compiler_params=pltpu.CompilerParams(
            dimension_semantics=("parallel",)),
    )(x_slab, dw_pack, pw_hi, pw_lo, ch_pack, mask)

    # Strip the per-row pad columns -> NCHW.
    return out_slab.reshape(B, C, H, Wb)[:, :, :, 1:1 + W]


def ds_ddb_reference(x_nchw, params, depth=4):
    x = jnp.transpose(x_nchw, (0, 2, 3, 1))
    skip = x
    out = x
    for i in range(depth):
        dil = 2 ** i
        dww, dwb, pww, pwb, gamma, beta, alpha = params[i]
        Cin = dww.shape[-1]
        w_hwio = dww[:, :, None, :]                    # (3,3,1,Cin) depthwise
        y = jax.lax.conv_general_dilated(
            skip, w_hwio, window_strides=(1, 1),
            padding=[(dil, dil), (1, 1)], rhs_dilation=(dil, 1),
            dimension_numbers=('NHWC', 'HWIO', 'NHWC'),
            feature_group_count=Cin,
            precision=jax.lax.Precision.HIGHEST) + dwb
        z = jnp.einsum('bhwc,co->bhwo', y, pww,
                       precision=jax.lax.Precision.HIGHEST) + pwb
        mean = jnp.mean(z, axis=(1, 2), keepdims=True)
        var = jnp.mean((z - mean) ** 2, axis=(1, 2), keepdims=True)
        zn = (z - mean) * jax.lax.rsqrt(var + EPS) * gamma + beta
        out = jnp.where(zn >= 0, zn, alpha * zn)
        skip = jnp.concatenate([out, skip], axis=-1)
    return jnp.transpose(out, (0, 3, 1, 2))


def init_params(key, C, depth=4):
    """Deterministic synthetic parameters (shapes follow the PyTorch module)."""
    params = []
    for i in range(depth):
        Cin = C * (i + 1)
        key, k0, k1, k2, k3, k4, k5 = jax.random.split(key, 7)
        dww = 0.2 * jax.random.normal(k0, (3, 3, Cin), jnp.float32)    # (c,1,3,3)->(3,3,c)
        dwb = 0.05 * jax.random.normal(k1, (1, 1, Cin), jnp.float32)
        pww = 0.3 * jax.random.normal(k2, (Cin, C), jnp.float32)       # (C,Cin,1,1)->(Cin,C)
        pwb = 0.05 * jax.random.normal(k3, (1, 1, C), jnp.float32)
        gamma = 1.0 + 0.1 * jax.random.normal(k4, (1, 1, C), jnp.float32)
        beta = 0.1 * jax.random.normal(k5, (1, 1, C), jnp.float32)
        alpha = jnp.full((1, 1, C), 0.25, jnp.float32)                 # PReLU init
        params.append((dww, dwb, pww, pwb, gamma, beta, alpha))
    return params


if __name__ == "__main__":
    B, C, H, W = 2, 4, 16, 16          # h.dense_channel = 4
    key = jax.random.PRNGKey(0)
    kx, kp = jax.random.split(key)
    x = jax.random.normal(kx, (B, C, H, W), jnp.float32)
    params = init_params(kp, C, depth=4)

    fwd = jax.jit(functools.partial(ds_ddb_forward, depth=4))
    out = jax.block_until_ready(fwd(x, params))
    ref = jax.block_until_ready(ds_ddb_reference(x, params, depth=4))

    assert out.shape == (B, C, H, W) and out.dtype == jnp.float32
    # Depthwise + norm path is exact f32 on the VPU; the MXU pointwise uses an
    # explicit bf16 hi/lo 3-pass split (~1e-5 relative), so the tolerance stays tight.
    np.testing.assert_allclose(np.asarray(out), np.asarray(ref),
                               rtol=2e-3, atol=2e-4)
    print("KERNEL_OK")
</pallas_src>

<mosaic_0001>
module attributes {stable_mosaic.version = 11 : i64} {
  func.func @ds_ddb_kernel(%arg0: i32, %arg1: memref<1x8x384xf32, #tpu.memory_space<vmem>>, %arg2: memref<32x40xf32, #tpu.memory_space<vmem>>, %arg3: memref<32x32xbf16, #tpu.memory_space<vmem>>, %arg4: memref<32x32xbf16, #tpu.memory_space<vmem>>, %arg5: memref<8x16xf32, #tpu.memory_space<vmem>>, %arg6: memref<1x384xf32, #tpu.memory_space<vmem>>, %arg7: memref<1x8x384xf32, #tpu.memory_space<vmem>>, %arg8: memref<32x816xf32, #tpu.memory_space<vmem>>) attributes {dimension_semantics = [#tpu.dimension_semantics<parallel>], iteration_bounds = array<i64: 1>, scalar_prefetch = 0 : i64, scratch_operands = 1 : i64, tpu.core_type = #tpu.core_type<tc>, window_params = [{transform_indices = @transform_0, window_bounds = array<i64: 1, 8, 384>}, {pipeline_mode = #tpu.pipeline_mode<synchronous>, transform_indices = @transform_1, window_bounds = array<i64: 32, 40>}, {pipeline_mode = #tpu.pipeline_mode<synchronous>, transform_indices = @transform_2, window_bounds = array<i64: 32, 32>}, {pipeline_mode = #tpu.pipeline_mode<synchronous>, transform_indices = @transform_3, window_bounds = array<i64: 32, 32>}, {pipeline_mode = #tpu.pipeline_mode<synchronous>, transform_indices = @transform_4, window_bounds = array<i64: 8, 16>}, {pipeline_mode = #tpu.pipeline_mode<synchronous>, transform_indices = @transform_5, window_bounds = array<i64: 1, 384>}, {transform_indices = @transform_6, window_bounds = array<i64: 1, 8, 384>}]} {
    %cst = arith.constant 0.000000e+00 : f32
    %0 = vector.broadcast %cst : f32 to vector<32x216xf32>
    %c0 = arith.constant 0 : index
    %c0_0 = arith.constant 0 : index
    %1 = vector.load %arg8[%c0, %c0_0] : memref<32x816xf32, #tpu.memory_space<vmem>>, vector<32x216xf32>
    tpu.vector_store %arg8[%c0, %c0_0], %0 {strides = array<i32>} : memref<32x816xf32, #tpu.memory_space<vmem>>, vector<32x216xf32>,
    %cst_1 = arith.constant 0.000000e+00 : f32
    %2 = vector.broadcast %cst_1 : f32 to vector<32x216xf32>
    %c0_2 = arith.constant 0 : index
    %c600 = arith.constant 600 : index
    %3 = vector.load %arg8[%c0_2, %c600] : memref<32x816xf32, #tpu.memory_space<vmem>>, vector<32x216xf32>
    tpu.vector_store %arg8[%c0_2, %c600], %2 {strides = array<i32>} : memref<32x816xf32, #tpu.memory_space<vmem>>, vector<32x216xf32>,
    %c0_3 = arith.constant 0 : index
    %c0_4 = arith.constant 0 : index
    %c0_5 = arith.constant 0 : index
    %4 = vector.load %arg1[%c0_3, %c0_4, %c0_5] : memref<1x8x384xf32, #tpu.memory_space<vmem>>, vector<1x8x384xf32>
    %5 = vector.shape_cast %4 : vector<1x8x384xf32> to vector<8x384xf32>
    %c0_6 = arith.constant 0 : index
    %c216 = arith.constant 216 : index
    %6 = vector.load %arg8[%c0_6, %c216] : memref<32x816xf32, #tpu.memory_space<vmem>>, vector<8x384xf32>
    tpu.vector_store %arg8[%c0_6, %c216], %5 {strides = array<i32>} : memref<32x816xf32, #tpu.memory_space<vmem>>, vector<8x384xf32>,
    %c0_7 = arith.constant 0 : index
    %c0_8 = arith.constant 0 : index
    %7 = vector.load %arg6[%c0_7, %c0_8] : memref<1x384xf32, #tpu.memory_space<vmem>>, vector<1x384xf32>
    %8 = vector.shape_cast %7 : vector<1x384xf32> to vector<1x384xf32>
    %9 = vector.broadcast %8 : vector<1x384xf32> to vector<8x384xf32>
    %c0_9 = arith.constant 0 : index
    %c192 = arith.constant 192 : index
    %10 = vector.load %arg8[%c0_9, %c192] : memref<32x816xf32, #tpu.memory_space<vmem>>, vector<8x384xf32>
    %c0_10 = arith.constant 0 : index
    %c1 = arith.constant 1 : index
    %11 = vector.load %arg2[%c0_10, %c1] : memref<32x40xf32, #tpu.memory_space<vmem>>, vector<8x1xf32>
    %12 = vector.broadcast %11 : vector<8x1xf32> to vector<8x384xf32>
    %13 = arith.mulf %10, %12 : vector<8x384xf32>
    %c1_i32 = arith.constant 1 : i32
    %14 = tpu.dynamic_rotate %10 by %c1_i32 dim 1 : vector<8x384xf32>, i32 -> vector<8x384xf32>
    %c383_i32 = arith.constant 383 : i32
    %15 = tpu.dynamic_rotate %10 by %c383_i32 dim 1 : vector<8x384xf32>, i32 -> vector<8x384xf32>
    %c0_11 = arith.constant 0 : index
    %c0_12 = arith.constant 0 : index
    %16 = vector.load %arg2[%c0_11, %c0_12] : memref<32x40xf32, #tpu.memory_space<vmem>>, vector<8x1xf32>
    %17 = vector.broadcast %16 : vector<8x1xf32> to vector<8x384xf32>
    %18 = arith.mulf %14, %17 : vector<8x384xf32>
    %19 = arith.addf %13, %18 : vector<8x384xf32>
    %c0_13 = arith.constant 0 : index
    %c2 = arith.constant 2 : index
    %20 = vector.load %arg2[%c0_13, %c2] : memref<32x40xf32, #tpu.memory_space<vmem>>, vector<8x1xf32>
    %21 = vector.broadcast %20 : vector<8x1xf32> to vector<8x384xf32>
    %22 = arith.mulf %15, %21 : vector<8x384xf32>
    %23 = arith.addf %19, %22 : vector<8x384xf32>
    %c0_14 = arith.constant 0 : index
    %c216_15 = arith.constant 216 : index
    %24 = vector.load %arg8[%c0_14, %c216_15] : memref<32x816xf32, #tpu.memory_space<vmem>>, vector<8x384xf32>
    %c0_16 = arith.constant 0 : index
    %c4 = arith.constant 4 : index
    %25 = vector.load %arg2[%c0_16, %c4] : memref<32x40xf32, #tpu.memory_space<vmem>>, vector<8x1xf32>
    %26 = vector.broadcast %25 : vector<8x1xf32> to vector<8x384xf32>
    %27 = arith.mulf %24, %26 : vector<8x384xf32>
    %28 = arith.addf %23, %27 : vector<8x384xf32>
    %c1_i32_17 = arith.constant 1 : i32
    %29 = tpu.dynamic_rotate %24 by %c1_i32_17 dim 1 : vector<8x384xf32>, i32 -> vector<8x384xf32>
    %c383_i32_18 = arith.constant 383 : i32
    %30 = tpu.dynamic_rotate %24 by %c383_i32_18 dim 1 : vector<8x384xf32>, i32 -> vector<8x384xf32>
    %c0_19 = arith.constant 0 : index
    %c3 = arith.constant 3 : index
    %31 = vector.load %arg2[%c0_19, %c3] : memref<32x40xf32, #tpu.memory_space<vmem>>, vector<8x1xf32>
    %32 = vector.broadcast %31 : vector<8x1xf32> to vector<8x384xf32>
    %33 = arith.mulf %29, %32 : vector<8x384xf32>
    %34 = arith.addf %28, %33 : vector<8x384xf32>
    %c0_20 = arith.constant 0 : index
    %c5 = arith.constant 5 : index
    %35 = vector.load %arg2[%c0_20, %c5] : memref<32x40xf32, #tpu.memory_space<vmem>>, vector<8x1xf32>
    %36 = vector.broadcast %35 : vector<8x1xf32> to vector<8x384xf32>
    %37 = arith.mulf %30, %36 : vector<8x384xf32>
    %38 = arith.addf %34, %37 : vector<8x384xf32>
    %c0_21 = arith.constant 0 : index
    %c240 = arith.constant 240 : index
    %39 = vector.load %arg8[%c0_21, %c240] : memref<32x816xf32, #tpu.memory_space<vmem>>, vector<8x384xf32>
    %c0_22 = arith.constant 0 : index
    %c7 = arith.constant 7 : index
    %40 = vector.load %arg2[%c0_22, %c7] : memref<32x40xf32, #tpu.memory_space<vmem>>, vector<8x1xf32>
    %41 = vector.broadcast %40 : vector<8x1xf32> to vector<8x384xf32>
    %42 = arith.mulf %39, %41 : vector<8x384xf32>
    %43 = arith.addf %38, %42 : vector<8x384xf32>
    %c1_i32_23 = arith.constant 1 : i32
    %44 = tpu.dynamic_rotate %39 by %c1_i32_23 dim 1 : vector<8x384xf32>, i32 -> vector<8x384xf32>
    %c383_i32_24 = arith.constant 383 : i32
    %45 = tpu.dynamic_rotate %39 by %c383_i32_24 dim 1 : vector<8x384xf32>, i32 -> vector<8x384xf32>
    %c0_25 = arith.constant 0 : index
    %c6 = arith.constant 6 : index
    %46 = vector.load %arg2[%c0_25, %c6] : memref<32x40xf32, #tpu.memory_space<vmem>>, vector<8x1xf32>
    %47 = vector.broadcast %46 : vector<8x1xf32> to vector<8x384xf32>
    %48 = arith.mulf %44, %47 : vector<8x384xf32>
    %49 = arith.addf %43, %48 : vector<8x384xf32>
    %c0_26 = arith.constant 0 : index
    %c8 = arith.constant 8 : index
    %50 = vector.load %arg2[%c0_26, %c8] : memref<32x40xf32, #tpu.memory_space<vmem>>, vector<8x1xf32>
    %51 = vector.broadcast %50 : vector<8x1xf32> to vector<8x384xf32>
    %52 = arith.mulf %45, %51 : vector<8x384xf32>
    %53 = arith.addf %49, %52 : vector<8x384xf32>
    %c0_27 = arith.constant 0 : index
    %c9 = arith.constant 9 : index
    %54 = vector.load %arg2[%c0_27, %c9] : memref<32x40xf32, #tpu.memory_space<vmem>>, vector<8x1xf32>
    %55 = vector.broadcast %54 : vector<8x1xf32> to vector<8x384xf32>
    %56 = arith.addf %53, %55 : vector<8x384xf32>
    %57 = arith.truncf %56 : vector<8x384xf32> to vector<8x384xbf16>
    %58 = arith.extf %57 : vector<8x384xbf16> to vector<8x384xf32>
    %59 = arith.subf %56, %58 : vector<8x384xf32>
    %60 = arith.truncf %59 : vector<8x384xf32> to vector<8x384xbf16>
    %c0_28 = arith.constant 0 : index
    %c0_29 = arith.constant 0 : index
    %61 = vector.load %arg3[%c0_28, %c0_29] : memref<32x32xbf16, #tpu.memory_space<vmem>>, vector<8x8xbf16>
    %c0_30 = arith.constant 0 : index
    %c0_31 = arith.constant 0 : index
    %62 = vector.load %arg4[%c0_30, %c0_31] : memref<32x32xbf16, #tpu.memory_space<vmem>>, vector<8x8xbf16>
    %cst_32 = arith.constant dense<0.000000e+00> : vector<8x384xf32>
    %63 = tpu.matmul %61, %57, %cst_32 {dimension_numbers = #tpu.dot_dimension_numbers<[1], [0], [0], [1], [0, 0, 1, 1], [], []>} : vector<8x8xbf16>, vector<8x384xbf16>, vector<8x384xf32> -> vector<8x384xf32>
    %cst_33 = arith.constant dense<0.000000e+00> : vector<8x384xf32>
    %64 = tpu.matmul %61, %60, %cst_33 {dimension_numbers = #tpu.dot_dimension_numbers<[1], [0], [0], [1], [0, 0, 1, 1], [], []>} : vector<8x8xbf16>, vector<8x384xbf16>, vector<8x384xf32> -> vector<8x384xf32>
    %65 = arith.addf %63, %64 : vector<8x384xf32>
    %cst_34 = arith.constant dense<0.000000e+00> : vector<8x384xf32>
    %66 = tpu.matmul %62, %57, %cst_34 {dimension_numbers = #tpu.dot_dimension_numbers<[1], [0], [0], [1], [0, 0, 1, 1], [], []>} : vector<8x8xbf16>, vector<8x384xbf16>, vector<8x384xf32> -> vector<8x384xf32>
    %67 = arith.addf %65, %66 : vector<8x384xf32>
    %c0_35 = arith.constant 0 : index
    %c0_36 = arith.constant 0 : index
    %68 = vector.load %arg5[%c0_35, %c0_36] : memref<8x16xf32, #tpu.memory_space<vmem>>, vector<8x1xf32>
    %69 = vector.broadcast %68 : vector<8x1xf32> to vector<8x384xf32>
    %70 = arith.addf %67, %69 : vector<8x384xf32>
    %71 = arith.mulf %70, %9 : vector<8x384xf32>
    %cst_37 = arith.constant dense<0.000000e+00> : vector<8xf32>
    %72 = vector.multi_reduction <add>, %71, %cst_37 [1] : vector<8x384xf32> to vector<8xf32>
    %73 = vector.shape_cast %72 : vector<8xf32> to vector<8x1xf32>
    %74 = arith.mulf %71, %70 : vector<8x384xf32>
    %cst_38 = arith.constant dense<0.000000e+00> : vector<8xf32>
    %75 = vector.multi_reduction <add>, %74, %cst_38 [1] : vector<8x384xf32> to vector<8xf32>
    %76 = vector.shape_cast %75 : vector<8xf32> to vector<8x1xf32>
    %cst_39 = arith.constant 3.906250e-03 : f32
    %77 = vector.broadcast %cst_39 : f32 to vector<8x1xf32>
    %78 = arith.mulf %73, %77 : vector<8x1xf32>
    %cst_40 = arith.constant 3.906250e-03 : f32
    %79 = vector.broadcast %cst_40 : f32 to vector<8x1xf32>
    %80 = arith.mulf %76, %79 : vector<8x1xf32>
    %81 = arith.mulf %78, %78 : vector<8x1xf32>
    %82 = arith.subf %80, %81 : vector<8x1xf32>
    %cst_41 = arith.constant 0.000000e+00 : f32
    %83 = vector.broadcast %cst_41 : f32 to vector<8x1xf32>
    %84 = arith.maximumf %82, %83 : vector<8x1xf32>
    %cst_42 = arith.constant 9.99999974E-6 : f32
    %85 = vector.broadcast %cst_42 : f32 to vector<8x1xf32>
    %86 = arith.addf %84, %85 : vector<8x1xf32>
    %87 = math.rsqrt %86 : vector<8x1xf32>
    %c0_43 = arith.constant 0 : index
    %c1_44 = arith.constant 1 : index
    %88 = vector.load %arg5[%c0_43, %c1_44] : memref<8x16xf32, #tpu.memory_space<vmem>>, vector<8x1xf32>
    %89 = arith.mulf %87, %88 : vector<8x1xf32>
    %90 = vector.broadcast %78 : vector<8x1xf32> to vector<8x384xf32>
    %91 = arith.subf %70, %90 : vector<8x384xf32>
    %92 = vector.broadcast %89 : vector<8x1xf32> to vector<8x384xf32>
    %93 = arith.mulf %91, %92 : vector<8x384xf32>
    %c0_45 = arith.constant 0 : index
    %c2_46 = arith.constant 2 : index
    %94 = vector.load %arg5[%c0_45, %c2_46] : memref<8x16xf32, #tpu.memory_space<vmem>>, vector<8x1xf32>
    %95 = vector.broadcast %94 : vector<8x1xf32> to vector<8x384xf32>
    %96 = arith.addf %93, %95 : vector<8x384xf32>
    %c0_47 = arith.constant 0 : index
    %c3_48 = arith.constant 3 : index
    %97 = vector.load %arg5[%c0_47, %c3_48] : memref<8x16xf32, #tpu.memory_space<vmem>>, vector<8x1xf32>
    %cst_49 = arith.constant 0.000000e+00 : f32
    %98 = vector.broadcast %cst_49 : f32 to vector<8x384xf32>
    %99 = arith.cmpf oge, %96, %98 : vector<8x384xf32>
    %100 = vector.broadcast %97 : vector<8x1xf32> to vector<8x384xf32>
    %101 = arith.mulf %100, %96 : vector<8x384xf32>
    %102 = arith.select %99, %96, %101 : vector<8x384xi1>, vector<8x384xf32>
    %103 = arith.mulf %102, %9 : vector<8x384xf32>
    %c8_50 = arith.constant 8 : index
    %c216_51 = arith.constant 216 : index
    %104 = vector.load %arg8[%c8_50, %c216_51] : memref<32x816xf32, #tpu.memory_space<vmem>>, vector<8x384xf32>
    tpu.vector_store %arg8[%c8_50, %c216_51], %103 {strides = array<i32>} : memref<32x816xf32, #tpu.memory_space<vmem>>, vector<8x384xf32>,
    %c0_52 = arith.constant 0 : index
    %c168 = arith.constant 168 : index
    %105 = vector.load %arg8[%c0_52, %c168] : memref<32x816xf32, #tpu.memory_space<vmem>>, vector<16x384xf32>
    %c0_53 = arith.constant 0 : index
    %c11 = arith.constant 11 : index
    %106 = vector.load %arg2[%c0_53, %c11] : memref<32x40xf32, #tpu.memory_space<vmem>>, vector<16x1xf32>
    %107 = vector.broadcast %106 : vector<16x1xf32> to vector<16x384xf32>
    %108 = arith.mulf %105, %107 : vector<16x384xf32>
    %c1_i32_54 = arith.constant 1 : i32
    %109 = tpu.dynamic_rotate %105 by %c1_i32_54 dim 1 : vector<16x384xf32>, i32 -> vector<16x384xf32>
    %c383_i32_55 = arith.constant 383 : i32
    %110 = tpu.dynamic_rotate %105 by %c383_i32_55 dim 1 : vector<16x384xf32>, i32 -> vector<16x384xf32>
    %c0_56 = arith.constant 0 : index
    %c10 = arith.constant 10 : index
    %111 = vector.load %arg2[%c0_56, %c10] : memref<32x40xf32, #tpu.memory_space<vmem>>, vector<16x1xf32>
    %112 = vector.broadcast %111 : vector<16x1xf32> to vector<16x384xf32>
    %113 = arith.mulf %109, %112 : vector<16x384xf32>
    %114 = arith.addf %108, %113 : vector<16x384xf32>
    %c0_57 = arith.constant 0 : index
    %c12 = arith.constant 12 : index
    %115 = vector.load %arg2[%c0_57, %c12] : memref<32x40xf32, #tpu.memory_space<vmem>>, vector<16x1xf32>
    %116 = vector.broadcast %115 : vector<16x1xf32> to vector<16x384xf32>
    %117 = arith.mulf %110, %116 : vector<16x384xf32>
    %118 = arith.addf %114, %117 : vector<16x384xf32>
    %c0_58 = arith.constant 0 : index
    %c216_59 = arith.constant 216 : index
    %119 = vector.load %arg8[%c0_58, %c216_59] : memref<32x816xf32, #tpu.memory_space<vmem>>, vector<16x384xf32>
    %c0_60 = arith.constant 0 : index
    %c14 = arith.constant 14 : index
    %120 = vector.load %arg2[%c0_60, %c14] : memref<32x40xf32, #tpu.memory_space<vmem>>, vector<16x1xf32>
    %121 = vector.broadcast %120 : vector<16x1xf32> to vector<16x384xf32>
    %122 = arith.mulf %119, %121 : vector<16x384xf32>
    %123 = arith.addf %118, %122 : vector<16x384xf32>
    %c1_i32_61 = arith.constant 1 : i32
    %124 = tpu.dynamic_rotate %119 by %c1_i32_61 dim 1 : vector<16x384xf32>, i32 -> vector<16x384xf32>
    %c383_i32_62 = arith.constant 383 : i32
    %125 = tpu.dynamic_rotate %119 by %c383_i32_62 dim 1 : vector<16x384xf32>, i32 -> vector<16x384xf32>
    %c0_63 = arith.constant 0 : index
    %c13 = arith.constant 13 : index
    %126 = vector.load %arg2[%c0_63, %c13] : memref<32x40xf32, #tpu.memory_space<vmem>>, vector<16x1xf32>
    %127 = vector.broadcast %126 : vector<16x1xf32> to vector<16x384xf32>
    %128 = arith.mulf %124, %127 : vector<16x384xf32>
    %129 = arith.addf %123, %128 : vector<16x384xf32>
    %c0_64 = arith.constant 0 : index
    %c15 = arith.constant 15 : index
    %130 = vector.load %arg2[%c0_64, %c15] : memref<32x40xf32, #tpu.memory_space<vmem>>, vector<16x1xf32>
    %131 = vector.broadcast %130 : vector<16x1xf32> to vector<16x384xf32>
    %132 = arith.mulf %125, %131 : vector<16x384xf32>
    %133 = arith.addf %129, %132 : vector<16x384xf32>
    %c0_65 = arith.constant 0 : index
    %c264 = arith.constant 264 : index
    %134 = vector.load %arg8[%c0_65, %c264] : memref<32x816xf32, #tpu.memory_space<vmem>>, vector<16x384xf32>
    %c0_66 = arith.constant 0 : index
    %c17 = arith.constant 17 : index
    %135 = vector.load %arg2[%c0_66, %c17] : memref<32x40xf32, #tpu.memory_space<vmem>>, vector<16x1xf32>
    %136 = vector.broadcast %135 : vector<16x1xf32> to vector<16x384xf32>
    %137 = arith.mulf %134, %136 : vector<16x384xf32>
    %138 = arith.addf %133, %137 : vector<16x384xf32>
    %c1_i32_67 = arith.constant 1 : i32
    %139 = tpu.dynamic_rotate %134 by %c1_i32_67 dim 1 : vector<16x384xf32>, i32 -> vector<16x384xf32>
    %c383_i32_68 = arith.constant 383 : i32
    %140 = tpu.dynamic_rotate %134 by %c383_i32_68 dim 1 : vector<16x384xf32>, i32 -> vector<16x384xf32>
    %c0_69 = arith.constant 0 : index
    %c16 = arith.constant 16 : index
    %141 = vector.load %arg2[%c0_69, %c16] : memref<32x40xf32, #tpu.memory_space<vmem>>, vector<16x1xf32>
    %142 = vector.broadcast %141 : vector<16x1xf32> to vector<16x384xf32>
    %143 = arith.mulf %139, %142 : vector<16x384xf32>
    %144 = arith.addf %138, %143 : vector<16x384xf32>
    %c0_70 = arith.constant 0 : index
    %c18 = arith.constant 18 : index
    %145 = vector.load %arg2[%c0_70, %c18] : memref<32x40xf32, #tpu.memory_space<vmem>>, vector<16x1xf32>
    %146 = vector.broadcast %145 : vector<16x1xf32> to vector<16x384xf32>
    %147 = arith.mulf %140, %146 : vector<16x384xf32>
    %148 = arith.addf %144, %147 : vector<16x384xf32>
    %c0_71 = arith.constant 0 : index
    %c19 = arith.constant 19 : index
    %149 = vector.load %arg2[%c0_71, %c19] : memref<32x40xf32, #tpu.memory_space<vmem>>, vector<16x1xf32>
    %150 = vector.broadcast %149 : vector<16x1xf32> to vector<16x384xf32>
    %151 = arith.addf %148, %150 : vector<16x384xf32>
    %152 = arith.truncf %151 : vector<16x384xf32> to vector<16x384xbf16>
    %153 = arith.extf %152 : vector<16x384xbf16> to vector<16x384xf32>
    %154 = arith.subf %151, %153 : vector<16x384xf32>
    %155 = arith.truncf %154 : vector<16x384xf32> to vector<16x384xbf16>
    %c8_72 = arith.constant 8 : index
    %c0_73 = arith.constant 0 : index
    %156 = vector.load %arg3[%c8_72, %c0_73] : memref<32x32xbf16, #tpu.memory_space<vmem>>, vector<8x16xbf16>
    %c8_74 = arith.constant 8 : index
    %c0_75 = arith.constant 0 : index
    %157 = vector.load %arg4[%c8_74, %c0_75] : memref<32x32xbf16, #tpu.memory_space<vmem>>, vector<8x16xbf16>
    %cst_76 = arith.constant dense<0.000000e+00> : vector<8x384xf32>
    %158 = tpu.matmul %156, %152, %cst_76 {dimension_numbers = #tpu.dot_dimension_numbers<[1], [0], [0], [1], [0, 0, 1, 1], [], []>} : vector<8x16xbf16>, vector<16x384xbf16>, vector<8x384xf32> -> vector<8x384xf32>
    %cst_77 = arith.constant dense<0.000000e+00> : vector<8x384xf32>
    %159 = tpu.matmul %156, %155, %cst_77 {dimension_numbers = #tpu.dot_dimension_numbers<[1], [0], [0], [1], [0, 0, 1, 1], [], []>} : vector<8x16xbf16>, vector<16x384xbf16>, vector<8x384xf32> -> vector<8x384xf32>
    %160 = arith.addf %158, %159 : vector<8x384xf32>
    %cst_78 = arith.constant dense<0.000000e+00> : vector<8x384xf32>
    %161 = tpu.matmul %157, %152, %cst_78 {dimension_numbers = #tpu.dot_dimension_numbers<[1], [0], [0], [1], [0, 0, 1, 1], [], []>} : vector<8x16xbf16>, vector<16x384xbf16>, vector<8x384xf32> -> vector<8x384xf32>
    %162 = arith.addf %160, %161 : vector<8x384xf32>
    %c0_79 = arith.constant 0 : index
    %c4_80 = arith.constant 4 : index
    %163 = vector.load %arg5[%c0_79, %c4_80] : memref<8x16xf32, #tpu.memory_space<vmem>>, vector<8x1xf32>
    %164 = vector.broadcast %163 : vector<8x1xf32> to vector<8x384xf32>
    %165 = arith.addf %162, %164 : vector<8x384xf32>
    %166 = arith.mulf %165, %9 : vector<8x384xf32>
    %cst_81 = arith.constant dense<0.000000e+00> : vector<8xf32>
    %167 = vector.multi_reduction <add>, %166, %cst_81 [1] : vector<8x384xf32> to vector<8xf32>
    %168 = vector.shape_cast %167 : vector<8xf32> to vector<8x1xf32>
    %169 = arith.mulf %166, %165 : vector<8x384xf32>
    %cst_82 = arith.constant dense<0.000000e+00> : vector<8xf32>
    %170 = vector.multi_reduction <add>, %169, %cst_82 [1] : vector<8x384xf32> to vector<8xf32>
    %171 = vector.shape_cast %170 : vector<8xf32> to vector<8x1xf32>
    %cst_83 = arith.constant 3.906250e-03 : f32
    %172 = vector.broadcast %cst_83 : f32 to vector<8x1xf32>
    %173 = arith.mulf %168, %172 : vector<8x1xf32>
    %cst_84 = arith.constant 3.906250e-03 : f32
    %174 = vector.broadcast %cst_84 : f32 to vector<8x1xf32>
    %175 = arith.mulf %171, %174 : vector<8x1xf32>
    %176 = arith.mulf %173, %173 : vector<8x1xf32>
    %177 = arith.subf %175, %176 : vector<8x1xf32>
    %cst_85 = arith.constant 0.000000e+00 : f32
    %178 = vector.broadcast %cst_85 : f32 to vector<8x1xf32>
    %179 = arith.maximumf %177, %178 : vector<8x1xf32>
    %cst_86 = arith.constant 9.99999974E-6 : f32
    %180 = vector.broadcast %cst_86 : f32 to vector<8x1xf32>
    %181 = arith.addf %179, %180 : vector<8x1xf32>
    %182 = math.rsqrt %181 : vector<8x1xf32>
    %c0_87 = arith.constant 0 : index
    %c5_88 = arith.constant 5 : index
    %183 = vector.load %arg5[%c0_87, %c5_88] : memref<8x16xf32, #tpu.memory_space<vmem>>, vector<8x1xf32>
    %184 = arith.mulf %182, %183 : vector<8x1xf32>
    %185 = vector.broadcast %173 : vector<8x1xf32> to vector<8x384xf32>
    %186 = arith.subf %165, %185 : vector<8x384xf32>
    %187 = vector.broadcast %184 : vector<8x1xf32> to vector<8x384xf32>
    %188 = arith.mulf %186, %187 : vector<8x384xf32>
    %c0_89 = arith.constant 0 : index
    %c6_90 = arith.constant 6 : index
    %189 = vector.load %arg5[%c0_89, %c6_90] : memref<8x16xf32, #tpu.memory_space<vmem>>, vector<8x1xf32>
    %190 = vector.broadcast %189 : vector<8x1xf32> to vector<8x384xf32>
    %191 = arith.addf %188, %190 : vector<8x384xf32>
    %c0_91 = arith.constant 0 : index
    %c7_92 = arith.constant 7 : index
    %192 = vector.load %arg5[%c0_91, %c7_92] : memref<8x16xf32, #tpu.memory_space<vmem>>, vector<8x1xf32>
    %cst_93 = arith.constant 0.000000e+00 : f32
    %193 = vector.broadcast %cst_93 : f32 to vector<8x384xf32>
    %194 = arith.cmpf oge, %191, %193 : vector<8x384xf32>
    %195 = vector.broadcast %192 : vector<8x1xf32> to vector<8x384xf32>
    %196 = arith.mulf %195, %191 : vector<8x384xf32>
    %197 = arith.select %194, %191, %196 : vector<8x384xi1>, vector<8x384xf32>
    %198 = arith.mulf %197, %9 : vector<8x384xf32>
    %c16_94 = arith.constant 16 : index
    %c216_95 = arith.constant 216 : index
    %199 = vector.load %arg8[%c16_94, %c216_95] : memref<32x816xf32, #tpu.memory_space<vmem>>, vector<8x384xf32>
    tpu.vector_store %arg8[%c16_94, %c216_95], %198 {strides = array<i32>} : memref<32x816xf32, #tpu.memory_space<vmem>>, vector<8x384xf32>,
    %c0_96 = arith.constant 0 : index
    %c120 = arith.constant 120 : index
    %200 = vector.load %arg8[%c0_96, %c120] : memref<32x816xf32, #tpu.memory_space<vmem>>, vector<24x384xf32>
    %c0_97 = arith.constant 0 : index
    %c21 = arith.constant 21 : index
    %201 = vector.load %arg2[%c0_97, %c21] : memref<32x40xf32, #tpu.memory_space<vmem>>, vector<24x1xf32>
    %202 = vector.broadcast %201 : vector<24x1xf32> to vector<24x384xf32>
    %203 = arith.mulf %200, %202 : vector<24x384xf32>
    %c1_i32_98 = arith.constant 1 : i32
    %204 = tpu.dynamic_rotate %200 by %c1_i32_98 dim 1 : vector<24x384xf32>, i32 -> vector<24x384xf32>
    %c383_i32_99 = arith.constant 383 : i32
    %205 = tpu.dynamic_rotate %200 by %c383_i32_99 dim 1 : vector<24x384xf32>, i32 -> vector<24x384xf32>
    %c0_100 = arith.constant 0 : index
    %c20 = arith.constant 20 : index
    %206 = vector.load %arg2[%c0_100, %c20] : memref<32x40xf32, #tpu.memory_space<vmem>>, vector<24x1xf32>
    %207 = vector.broadcast %206 : vector<24x1xf32> to vector<24x384xf32>
    %208 = arith.mulf %204, %207 : vector<24x384xf32>
    %209 = arith.addf %203, %208 : vector<24x384xf32>
    %c0_101 = arith.constant 0 : index
    %c22 = arith.constant 22 : index
    %210 = vector.load %arg2[%c0_101, %c22] : memref<32x40xf32, #tpu.memory_space<vmem>>, vector<24x1xf32>
    %211 = vector.broadcast %210 : vector<24x1xf32> to vector<24x384xf32>
    %212 = arith.mulf %205, %211 : vector<24x384xf32>
    %213 = arith.addf %209, %212 : vector<24x384xf32>
    %c0_102 = arith.constant 0 : index
    %c216_103 = arith.constant 216 : index
    %214 = vector.load %arg8[%c0_102, %c216_103] : memref<32x816xf32, #tpu.memory_space<vmem>>, vector<24x384xf32>
    %c0_104 = arith.constant 0 : index
    %c24 = arith.constant 24 : index
    %215 = vector.load %arg2[%c0_104, %c24] : memref<32x40xf32, #tpu.memory_space<vmem>>, vector<24x1xf32>
    %216 = vector.broadcast %215 : vector<24x1xf32> to vector<24x384xf32>
    %217 = arith.mulf %214, %216 : vector<24x384xf32>
    %218 = arith.addf %213, %217 : vector<24x384xf32>
    %c1_i32_105 = arith.constant 1 : i32
    %219 = tpu.dynamic_rotate %214 by %c1_i32_105 dim 1 : vector<24x384xf32>, i32 -> vector<24x384xf32>
    %c383_i32_106 = arith.constant 383 : i32
    %220 = tpu.dynamic_rotate %214 by %c383_i32_106 dim 1 : vector<24x384xf32>, i32 -> vector<24x384xf32>
    %c0_107 = arith.constant 0 : index
    %c23 = arith.constant 23 : index
    %221 = vector.load %arg2[%c0_107, %c23] : memref<32x40xf32, #tpu.memory_space<vmem>>, vector<24x1xf32>
    %222 = vector.broadcast %221 : vector<24x1xf32> to vector<24x384xf32>
    %223 = arith.mulf %219, %222 : vector<24x384xf32>
    %224 = arith.addf %218, %223 : vector<24x384xf32>
    %c0_108 = arith.constant 0 : index
    %c25 = arith.constant 25 : index
    %225 = vector.load %arg2[%c0_108, %c25] : memref<32x40xf32, #tpu.memory_space<vmem>>, vector<24x1xf32>
    %226 = vector.broadcast %225 : vector<24x1xf32> to vector<24x384xf32>
    %227 = arith.mulf %220, %226 : vector<24x384xf32>
    %228 = arith.addf %224, %227 : vector<24x384xf32>
    %c0_109 = arith.constant 0 : index
    %c312 = arith.constant 312 : index
    %229 = vector.load %arg8[%c0_109, %c312] : memref<32x816xf32, #tpu.memory_space<vmem>>, vector<24x384xf32>
    %c0_110 = arith.constant 0 : index
    %c27 = arith.constant 27 : index
    %230 = vector.load %arg2[%c0_110, %c27] : memref<32x40xf32, #tpu.memory_space<vmem>>, vector<24x1xf32>
    %231 = vector.broadcast %230 : vector<24x1xf32> to vector<24x384xf32>
    %232 = arith.mulf %229, %231 : vector<24x384xf32>
    %233 = arith.addf %228, %232 : vector<24x384xf32>
    %c1_i32_111 = arith.constant 1 : i32
    %234 = tpu.dynamic_rotate %229 by %c1_i32_111 dim 1 : vector<24x384xf32>, i32 -> vector<24x384xf32>
    %c383_i32_112 = arith.constant 383 : i32
    %235 = tpu.dynamic_rotate %229 by %c383_i32_112 dim 1 : vector<24x384xf32>, i32 -> vector<24x384xf32>
    %c0_113 = arith.constant 0 : index
    %c26 = arith.constant 26 : index
    %236 = vector.load %arg2[%c0_113, %c26] : memref<32x40xf32, #tpu.memory_space<vmem>>, vector<24x1xf32>
    %237 = vector.broadcast %236 : vector<24x1xf32> to vector<24x384xf32>
    %238 = arith.mulf %234, %237 : vector<24x384xf32>
    %239 = arith.addf %233, %238 : vector<24x384xf32>
    %c0_114 = arith.constant 0 : index
    %c28 = arith.constant 28 : index
    %240 = vector.load %arg2[%c0_114, %c28] : memref<32x40xf32, #tpu.memory_space<vmem>>, vector<24x1xf32>
    %241 = vector.broadcast %240 : vector<24x1xf32> to vector<24x384xf32>
    %242 = arith.mulf %235, %241 : vector<24x384xf32>
    %243 = arith.addf %239, %242 : vector<24x384xf32>
    %c0_115 = arith.constant 0 : index
    %c29 = arith.constant 29 : index
    %244 = vector.load %arg2[%c0_115, %c29] : memref<32x40xf32, #tpu.memory_space<vmem>>, vector<24x1xf32>
    %245 = vector.broadcast %244 : vector<24x1xf32> to vector<24x384xf32>
    %246 = arith.addf %243, %245 : vector<24x384xf32>
    %247 = arith.truncf %246 : vector<24x384xf32> to vector<24x384xbf16>
    %248 = arith.extf %247 : vector<24x384xbf16> to vector<24x384xf32>
    %249 = arith.subf %246, %248 : vector<24x384xf32>
    %250 = arith.truncf %249 : vector<24x384xf32> to vector<24x384xbf16>
    %c16_116 = arith.constant 16 : index
    %c0_117 = arith.constant 0 : index
    %251 = vector.load %arg3[%c16_116, %c0_117] : memref<32x32xbf16, #tpu.memory_space<vmem>>, vector<8x24xbf16>
    %c16_118 = arith.constant 16 : index
    %c0_119 = arith.constant 0 : index
    %252 = vector.load %arg4[%c16_118, %c0_119] : memref<32x32xbf16, #tpu.memory_space<vmem>>, vector<8x24xbf16>
    %cst_120 = arith.constant dense<0.000000e+00> : vector<8x384xf32>
    %253 = tpu.matmul %251, %247, %cst_120 {dimension_numbers = #tpu.dot_dimension_numbers<[1], [0], [0], [1], [0, 0, 1, 1], [], []>} : vector<8x24xbf16>, vector<24x384xbf16>, vector<8x384xf32> -> vector<8x384xf32>
    %cst_121 = arith.constant dense<0.000000e+00> : vector<8x384xf32>
    %254 = tpu.matmul %251, %250, %cst_121 {dimension_numbers = #tpu.dot_dimension_numbers<[1], [0], [0], [1], [0, 0, 1, 1], [], []>} : vector<8x24xbf16>, vector<24x384xbf16>, vector<8x384xf32> -> vector<8x384xf32>
    %255 = arith.addf %253, %254 : vector<8x384xf32>
    %cst_122 = arith.constant dense<0.000000e+00> : vector<8x384xf32>
    %256 = tpu.matmul %252, %247, %cst_122 {dimension_numbers = #tpu.dot_dimension_numbers<[1], [0], [0], [1], [0, 0, 1, 1], [], []>} : vector<8x24xbf16>, vector<24x384xbf16>, vector<8x384xf32> -> vector<8x384xf32>
    %257 = arith.addf %255, %256 : vector<8x384xf32>
    %c0_123 = arith.constant 0 : index
    %c8_124 = arith.constant 8 : index
    %258 = vector.load %arg5[%c0_123, %c8_124] : memref<8x16xf32, #tpu.memory_space<vmem>>, vector<8x1xf32>
    %259 = vector.broadcast %258 : vector<8x1xf32> to vector<8x384xf32>
    %260 = arith.addf %257, %259 : vector<8x384xf32>
    %261 = arith.mulf %260, %9 : vector<8x384xf32>
    %cst_125 = arith.constant dense<0.000000e+00> : vector<8xf32>
    %262 = vector.multi_reduction <add>, %261, %cst_125 [1] : vector<8x384xf32> to vector<8xf32>
    %263 = vector.shape_cast %262 : vector<8xf32> to vector<8x1xf32>
    %264 = arith.mulf %261, %260 : vector<8x384xf32>
    %cst_126 = arith.constant dense<0.000000e+00> : vector<8xf32>
    %265 = vector.multi_reduction <add>, %264, %cst_126 [1] : vector<8x384xf32> to vector<8xf32>
    %266 = vector.shape_cast %265 : vector<8xf32> to vector<8x1xf32>
    %cst_127 = arith.constant 3.906250e-03 : f32
    %267 = vector.broadcast %cst_127 : f32 to vector<8x1xf32>
    %268 = arith.mulf %263, %267 : vector<8x1xf32>
    %cst_128 = arith.constant 3.906250e-03 : f32
    %269 = vector.broadcast %cst_128 : f32 to vector<8x1xf32>
    %270 = arith.mulf %266, %269 : vector<8x1xf32>
    %271 = arith.mulf %268, %268 : vector<8x1xf32>
    %272 = arith.subf %270, %271 : vector<8x1xf32>
    %cst_129 = arith.constant 0.000000e+00 : f32
    %273 = vector.broadcast %cst_129 : f32 to vector<8x1xf32>
    %274 = arith.maximumf %272, %273 : vector<8x1xf32>
    %cst_130 = arith.constant 9.99999974E-6 : f32
    %275 = vector.broadcast %cst_130 : f32 to vector<8x1xf32>
    %276 = arith.addf %274, %275 : vector<8x1xf32>
    %277 = math.rsqrt %276 : vector<8x1xf32>
    %c0_131 = arith.constant 0 : index
    %c9_132 = arith.constant 9 : index
    %278 = vector.load %arg5[%c0_131, %c9_132] : memref<8x16xf32, #tpu.memory_space<vmem>>, vector<8x1xf32>
    %279 = arith.mulf %277, %278 : vector<8x1xf32>
    %280 = vector.broadcast %268 : vector<8x1xf32> to vector<8x384xf32>
    %281 = arith.subf %260, %280 : vector<8x384xf32>
    %282 = vector.broadcast %279 : vector<8x1xf32> to vector<8x384xf32>
    %283 = arith.mulf %281, %282 : vector<8x384xf32>
    %c0_133 = arith.constant 0 : index
    %c10_134 = arith.constant 10 : index
    %284 = vector.load %arg5[%c0_133, %c10_134] : memref<8x16xf32, #tpu.memory_space<vmem>>, vector<8x1xf32>
    %285 = vector.broadcast %284 : vector<8x1xf32> to vector<8x384xf32>
    %286 = arith.addf %283, %285 : vector<8x384xf32>
    %c0_135 = arith.constant 0 : index
    %c11_136 = arith.constant 11 : index
    %287 = vector.load %arg5[%c0_135, %c11_136] : memref<8x16xf32, #tpu.memory_space<vmem>>, vector<8x1xf32>
    %cst_137 = arith.constant 0.000000e+00 : f32
    %288 = vector.broadcast %cst_137 : f32 to vector<8x384xf32>
    %289 = arith.cmpf oge, %286, %288 : vector<8x384xf32>
    %290 = vector.broadcast %287 : vector<8x1xf32> to vector<8x384xf32>
    %291 = arith.mulf %290, %286 : vector<8x384xf32>
    %292 = arith.select %289, %286, %291 : vector<8x384xi1>, vector<8x384xf32>
    %293 = arith.mulf %292, %9 : vector<8x384xf32>
    %c24_138 = arith.constant 24 : index
    %c216_139 = arith.constant 216 : index
    %294 = vector.load %arg8[%c24_138, %c216_139] : memref<32x816xf32, #tpu.memory_space<vmem>>, vector<8x384xf32>
    tpu.vector_store %arg8[%c24_138, %c216_139], %293 {strides = array<i32>} : memref<32x816xf32, #tpu.memory_space<vmem>>, vector<8x384xf32>,
    %c0_140 = arith.constant 0 : index
    %c24_141 = arith.constant 24 : index
    %295 = vector.load %arg8[%c0_140, %c24_141] : memref<32x816xf32, #tpu.memory_space<vmem>>, vector<32x384xf32>
    %c0_142 = arith.constant 0 : index
    %c31 = arith.constant 31 : index
    %296 = vector.load %arg2[%c0_142, %c31] : memref<32x40xf32, #tpu.memory_space<vmem>>, vector<32x1xf32>
    %297 = vector.broadcast %296 : vector<32x1xf32> to vector<32x384xf32>
    %298 = arith.mulf %295, %297 : vector<32x384xf32>
    %c1_i32_143 = arith.constant 1 : i32
    %299 = tpu.dynamic_rotate %295 by %c1_i32_143 dim 1 : vector<32x384xf32>, i32 -> vector<32x384xf32>
    %c383_i32_144 = arith.constant 383 : i32
    %300 = tpu.dynamic_rotate %295 by %c383_i32_144 dim 1 : vector<32x384xf32>, i32 -> vector<32x384xf32>
    %c0_145 = arith.constant 0 : index
    %c30 = arith.constant 30 : index
    %301 = vector.load %arg2[%c0_145, %c30] : memref<32x40xf32, #tpu.memory_space<vmem>>, vector<32x1xf32>
    %302 = vector.broadcast %301 : vector<32x1xf32> to vector<32x384xf32>
    %303 = arith.mulf %299, %302 : vector<32x384xf32>
    %304 = arith.addf %298, %303 : vector<32x384xf32>
    %c0_146 = arith.constant 0 : index
    %c32 = arith.constant 32 : index
    %305 = vector.load %arg2[%c0_146, %c32] : memref<32x40xf32, #tpu.memory_space<vmem>>, vector<32x1xf32>
    %306 = vector.broadcast %305 : vector<32x1xf32> to vector<32x384xf32>
    %307 = arith.mulf %300, %306 : vector<32x384xf32>
    %308 = arith.addf %304, %307 : vector<32x384xf32>
    %c0_147 = arith.constant 0 : index
    %c216_148 = arith.constant 216 : index
    %309 = vector.load %arg8[%c0_147, %c216_148] : memref<32x816xf32, #tpu.memory_space<vmem>>, vector<32x384xf32>
    %c0_149 = arith.constant 0 : index
    %c34 = arith.constant 34 : index
    %310 = vector.load %arg2[%c0_149, %c34] : memref<32x40xf32, #tpu.memory_space<vmem>>, vector<32x1xf32>
    %311 = vector.broadcast %310 : vector<32x1xf32> to vector<32x384xf32>
    %312 = arith.mulf %309, %311 : vector<32x384xf32>
    %313 = arith.addf %308, %312 : vector<32x384xf32>
    %c1_i32_150 = arith.constant 1 : i32
    %314 = tpu.dynamic_rotate %309 by %c1_i32_150 dim 1 : vector<32x384xf32>, i32 -> vector<32x384xf32>
    %c383_i32_151 = arith.constant 383 : i32
    %315 = tpu.dynamic_rotate %309 by %c383_i32_151 dim 1 : vector<32x384xf32>, i32 -> vector<32x384xf32>
    %c0_152 = arith.constant 0 : index
    %c33 = arith.constant 33 : index
    %316 = vector.load %arg2[%c0_152, %c33] : memref<32x40xf32, #tpu.memory_space<vmem>>, vector<32x1xf32>
    %317 = vector.broadcast %316 : vector<32x1xf32> to vector<32x384xf32>
    %318 = arith.mulf %314, %317 : vector<32x384xf32>
    %319 = arith.addf %313, %318 : vector<32x384xf32>
    %c0_153 = arith.constant 0 : index
    %c35 = arith.constant 35 : index
    %320 = vector.load %arg2[%c0_153, %c35] : memref<32x40xf32, #tpu.memory_space<vmem>>, vector<32x1xf32>
    %321 = vector.broadcast %320 : vector<32x1xf32> to vector<32x384xf32>
    %322 = arith.mulf %315, %321 : vector<32x384xf32>
    %323 = arith.addf %319, %322 : vector<32x384xf32>
    %c0_154 = arith.constant 0 : index
    %c408 = arith.constant 408 : index
    %324 = vector.load %arg8[%c0_154, %c408] : memref<32x816xf32, #tpu.memory_space<vmem>>, vector<32x384xf32>
    %c0_155 = arith.constant 0 : index
    %c37 = arith.constant 37 : index
    %325 = vector.load %arg2[%c0_155, %c37] : memref<32x40xf32, #tpu.memory_space<vmem>>, vector<32x1xf32>
    %326 = vector.broadcast %325 : vector<32x1xf32> to vector<32x384xf32>
    %327 = arith.mulf %324, %326 : vector<32x384xf32>
    %328 = arith.addf %323, %327 : vector<32x384xf32>
    %c1_i32_156 = arith.constant 1 : i32
    %329 = tpu.dynamic_rotate %324 by %c1_i32_156 dim 1 : vector<32x384xf32>, i32 -> vector<32x384xf32>
    %c383_i32_157 = arith.constant 383 : i32
    %330 = tpu.dynamic_rotate %324 by %c383_i32_157 dim 1 : vector<32x384xf32>, i32 -> vector<32x384xf32>
    %c0_158 = arith.constant 0 : index
    %c36 = arith.constant 36 : index
    %331 = vector.load %arg2[%c0_158, %c36] : memref<32x40xf32, #tpu.memory_space<vmem>>, vector<32x1xf32>
    %332 = vector.broadcast %331 : vector<32x1xf32> to vector<32x384xf32>
    %333 = arith.mulf %329, %332 : vector<32x384xf32>
    %334 = arith.addf %328, %333 : vector<32x384xf32>
    %c0_159 = arith.constant 0 : index
    %c38 = arith.constant 38 : index
    %335 = vector.load %arg2[%c0_159, %c38] : memref<32x40xf32, #tpu.memory_space<vmem>>, vector<32x1xf32>
    %336 = vector.broadcast %335 : vector<32x1xf32> to vector<32x384xf32>
    %337 = arith.mulf %330, %336 : vector<32x384xf32>
    %338 = arith.addf %334, %337 : vector<32x384xf32>
    %c0_160 = arith.constant 0 : index
    %c39 = arith.constant 39 : index
    %339 = vector.load %arg2[%c0_160, %c39] : memref<32x40xf32, #tpu.memory_space<vmem>>, vector<32x1xf32>
    %340 = vector.broadcast %339 : vector<32x1xf32> to vector<32x384xf32>
    %341 = arith.addf %338, %340 : vector<32x384xf32>
    %342 = arith.truncf %341 : vector<32x384xf32> to vector<32x384xbf16>
    %343 = arith.extf %342 : vector<32x384xbf16> to vector<32x384xf32>
    %344 = arith.subf %341, %343 : vector<32x384xf32>
    %345 = arith.truncf %344 : vector<32x384xf32> to vector<32x384xbf16>
    %c24_161 = arith.constant 24 : index
    %c0_162 = arith.constant 0 : index
    %346 = vector.load %arg3[%c24_161, %c0_162] : memref<32x32xbf16, #tpu.memory_space<vmem>>, vector<8x32xbf16>
    %c24_163 = arith.constant 24 : index
    %c0_164 = arith.constant 0 : index
    %347 = vector.load %arg4[%c24_163, %c0_164] : memref<32x32xbf16, #tpu.memory_space<vmem>>, vector<8x32xbf16>
    %cst_165 = arith.constant dense<0.000000e+00> : vector<8x384xf32>
    %348 = tpu.matmul %346, %342, %cst_165 {dimension_numbers = #tpu.dot_dimension_numbers<[1], [0], [0], [1], [0, 0, 1, 1], [], []>} : vector<8x32xbf16>, vector<32x384xbf16>, vector<8x384xf32> -> vector<8x384xf32>
    %cst_166 = arith.constant dense<0.000000e+00> : vector<8x384xf32>
    %349 = tpu.matmul %346, %345, %cst_166 {dimension_numbers = #tpu.dot_dimension_numbers<[1], [0], [0], [1], [0, 0, 1, 1], [], []>} : vector<8x32xbf16>, vector<32x384xbf16>, vector<8x384xf32> -> vector<8x384xf32>
    %350 = arith.addf %348, %349 : vector<8x384xf32>
    %cst_167 = arith.constant dense<0.000000e+00> : vector<8x384xf32>
    %351 = tpu.matmul %347, %342, %cst_167 {dimension_numbers = #tpu.dot_dimension_numbers<[1], [0], [0], [1], [0, 0, 1, 1], [], []>} : vector<8x32xbf16>, vector<32x384xbf16>, vector<8x384xf32> -> vector<8x384xf32>
    %352 = arith.addf %350, %351 : vector<8x384xf32>
    %c0_168 = arith.constant 0 : index
    %c12_169 = arith.constant 12 : index
    %353 = vector.load %arg5[%c0_168, %c12_169] : memref<8x16xf32, #tpu.memory_space<vmem>>, vector<8x1xf32>
    %354 = vector.broadcast %353 : vector<8x1xf32> to vector<8x384xf32>
    %355 = arith.addf %352, %354 : vector<8x384xf32>
    %356 = arith.mulf %355, %9 : vector<8x384xf32>
    %cst_170 = arith.constant dense<0.000000e+00> : vector<8xf32>
    %357 = vector.multi_reduction <add>, %356, %cst_170 [1] : vector<8x384xf32> to vector<8xf32>
    %358 = vector.shape_cast %357 : vector<8xf32> to vector<8x1xf32>
    %359 = arith.mulf %356, %355 : vector<8x384xf32>
    %cst_171 = arith.constant dense<0.000000e+00> : vector<8xf32>
    %360 = vector.multi_reduction <add>, %359, %cst_171 [1] : vector<8x384xf32> to vector<8xf32>
    %361 = vector.shape_cast %360 : vector<8xf32> to vector<8x1xf32>
    %cst_172 = arith.constant 3.906250e-03 : f32
    %362 = vector.broadcast %cst_172 : f32 to vector<8x1xf32>
    %363 = arith.mulf %358, %362 : vector<8x1xf32>
    %cst_173 = arith.constant 3.906250e-03 : f32
    %364 = vector.broadcast %cst_173 : f32 to vector<8x1xf32>
    %365 = arith.mulf %361, %364 : vector<8x1xf32>
    %366 = arith.mulf %363, %363 : vector<8x1xf32>
    %367 = arith.subf %365, %366 : vector<8x1xf32>
    %cst_174 = arith.constant 0.000000e+00 : f32
    %368 = vector.broadcast %cst_174 : f32 to vector<8x1xf32>
    %369 = arith.maximumf %367, %368 : vector<8x1xf32>
    %cst_175 = arith.constant 9.99999974E-6 : f32
    %370 = vector.broadcast %cst_175 : f32 to vector<8x1xf32>
    %371 = arith.addf %369, %370 : vector<8x1xf32>
    %372 = math.rsqrt %371 : vector<8x1xf32>
    %c0_176 = arith.constant 0 : index
    %c13_177 = arith.constant 13 : index
    %373 = vector.load %arg5[%c0_176, %c13_177] : memref<8x16xf32, #tpu.memory_space<vmem>>, vector<8x1xf32>
    %374 = arith.mulf %372, %373 : vector<8x1xf32>
    %375 = vector.broadcast %363 : vector<8x1xf32> to vector<8x384xf32>
    %376 = arith.subf %355, %375 : vector<8x384xf32>
    %377 = vector.broadcast %374 : vector<8x1xf32> to vector<8x384xf32>
    %378 = arith.mulf %376, %377 : vector<8x384xf32>
    %c0_178 = arith.constant 0 : index
    %c14_179 = arith.constant 14 : index
    %379 = vector.load %arg5[%c0_178, %c14_179] : memref<8x16xf32, #tpu.memory_space<vmem>>, vector<8x1xf32>
    %380 = vector.broadcast %379 : vector<8x1xf32> to vector<8x384xf32>
    %381 = arith.addf %378, %380 : vector<8x384xf32>
    %c0_180 = arith.constant 0 : index
    %c15_181 = arith.constant 15 : index
    %382 = vector.load %arg5[%c0_180, %c15_181] : memref<8x16xf32, #tpu.memory_space<vmem>>, vector<8x1xf32>
    %cst_182 = arith.constant 0.000000e+00 : f32
    %383 = vector.broadcast %cst_182 : f32 to vector<8x384xf32>
    %384 = arith.cmpf oge, %381, %383 : vector<8x384xf32>
    %385 = vector.broadcast %382 : vector<8x1xf32> to vector<8x384xf32>
    %386 = arith.mulf %385, %381 : vector<8x384xf32>
    %387 = arith.select %384, %381, %386 : vector<8x384xi1>, vector<8x384xf32>
    %388 = arith.mulf %387, %9 : vector<8x384xf32>
    %c0_183 = arith.constant 0 : index
    %c0_184 = arith.constant 0 : index
    %c0_185 = arith.constant 0 : index
    %389 = vector.load %arg7[%c0_183, %c0_184, %c0_185] : memref<1x8x384xf32, #tpu.memory_space<vmem>>, vector<1x8x384xf32>
    %390 = vector.shape_cast %389 : vector<1x8x384xf32> to vector<8x384xf32>
    %391 = vector.shape_cast %388 : vector<8x384xf32> to vector<1x8x384xf32>
    tpu.vector_store %arg7[%c0_183, %c0_184, %c0_185], %391 {strides = array<i32>} : memref<1x8x384xf32, #tpu.memory_space<vmem>>, vector<1x8x384xf32>,
    return
  }
  func.func @transform_0(%arg0: i32) -> (i32, i32, i32) {
    %c0_i32 = arith.constant 0 : i32
    %c0_i32_0 = arith.constant 0 : i32
    %c0_i32_1 = arith.constant 0 : i32
    return %arg0, %c0_i32, %c0_i32_0 : i32, i32, i32
  }
  func.func @transform_1(%arg0: i32) -> (i32, i32) {
    %c0_i32 = arith.constant 0 : i32
    %c0_i32_0 = arith.constant 0 : i32
    %c0_i32_1 = arith.constant 0 : i32
    return %c0_i32, %c0_i32_0 : i32, i32
  }
  func.func @transform_2(%arg0: i32) -> (i32, i32) {
    %c0_i32 = arith.constant 0 : i32
    %c0_i32_0 = arith.constant 0 : i32
    %c0_i32_1 = arith.constant 0 : i32
    return %c0_i32, %c0_i32_0 : i32, i32
  }
  func.func @transform_3(%arg0: i32) -> (i32, i32) {
    %c0_i32 = arith.constant 0 : i32
    %c0_i32_0 = arith.constant 0 : i32
    %c0_i32_1 = arith.constant 0 : i32
    return %c0_i32, %c0_i32_0 : i32, i32
  }
  func.func @transform_4(%arg0: i32) -> (i32, i32) {
    %c0_i32 = arith.constant 0 : i32
    %c0_i32_0 = arith.constant 0 : i32
    %c0_i32_1 = arith.constant 0 : i32
    return %c0_i32, %c0_i32_0 : i32, i32
  }
  func.func @transform_5(%arg0: i32) -> (i32, i32) {
    %c0_i32 = arith.constant 0 : i32
    %c0_i32_0 = arith.constant 0 : i32
    %c0_i32_1 = arith.constant 0 : i32
    return %c0_i32, %c0_i32_0 : i32, i32
  }
  func.func @transform_6(%arg0: i32) -> (i32, i32, i32) {
    %c0_i32 = arith.constant 0 : i32
    %c0_i32_0 = arith.constant 0 : i32
    %c0_i32_1 = arith.constant 0 : i32
    return %arg0, %c0_i32, %c0_i32_0 : i32, i32, i32
  }
}

</mosaic_0001>

<bundles_post_ra>
// kernel: ds_ddb_forward.1
= control target key start
LH: loop header
LB: loop body
LE: loop exit
PB: predicated region body
PF: predicated region fallthrough
CT: control target
= control target key end

     0   :  { %vm25_vm0 = vcmask 719872   ;;  %vm33_vm1 = vcmask 1048256   ;;  %v5645_v2 = vmov 0.0   ;;  %s5646_s25 = smov 88   ;;  %v9472_v4 = vmov 0   ;;  %s5650_s28 = smov 40   ;;  %s9455_s0 = inlined_call_operand.vmem [shape: f32[1,8,384], index: 0, kind: input, shape index: {}]   ;;  %s9456_s1 = inlined_call_operand.vmem [shape: f32[32,40], index: 1, kind: input, shape index: {}]   ;;  %s9457_s4 = inlined_call_operand.vmem [shape: f32[8,16], index: 4, kind: input, shape index: {}]   ;;  %s9458_s2 = inlined_call_operand.vmem [shape: bf16[32,32], index: 2, kind: input, shape index: {}]   ;;  %s9459_s3 = inlined_call_operand.vmem [shape: bf16[32,32], index: 3, kind: input, shape index: {}]   ;;  %s9460_s5 = inlined_call_operand.vmem [shape: f32[1,384], index: 5, kind: input, shape index: {}]   ;;  %s9461_s6 = inlined_call_operand.vmem [shape: f32[1,8,384], index: 6, kind: output, shape index: {}]  }
   0x1   :  { %v49_v0 = vld [vmem:[%s9455_s0 + $0x10] sm:$0xff]  ;;  %v47_v1 = vld [vmem:[%s9455_s0] sm:$0xff]  ;;  %34 = vst.msk [vmem:[#allocation2 + $0x20] sm:$0xff] %vm33_vm1, %v5645_v2  ;;  %24 = vst [vmem:[#allocation2] sm:$0xff] %v5645_v2  ;;  %5325 = vmatprep.subr.bf16.mxu1 %v5645_v2  ;;  %5464 = vset.pattern.permute.xlu1 %v9472_v4  ;;  %v5648_v5 = vmov 2   ;;  %s5651_s29 = smov 16   ;;  %v71_v57 = vlaneseq }
   0x2   :  { %26 = vst.msk [vmem:[#allocation2 + $0x8] sm:$0xff] %vm25_vm0, %v5645_v2  ;;  %28 = vst.msk [vmem:[#allocation2 + $0x40] sm:$0xff] %vm25_vm0, %v5645_v2  ;;  %57 = vrot.lane.b32.xlu1 %v49_v0, %s5646_s25  ;;  %53 = vrot.lane.b32.xlu0 %v47_v1, %s5646_s25  ;;  %v48_v3 = vld [vmem:[%s9455_s0 + $0x8] sm:$0xff]  ;;  %s5649_s0 = smov 64   ;;  %v5805_v13 = vld [vmem:[%s9456_s1] sm:$0xff]  ;;  %v5652_v14 = vmov 4  }
   0x3   :  { %30 = vst.msk [vmem:[#allocation2 + $0x78] sm:$0xff] %vm25_vm0, %v5645_v2  ;;  %32 = vst.msk [vmem:[#allocation2 + $0xb0] sm:$0xff] %vm25_vm0, %v5645_v2  ;;  %515 = vmatprep.mubr.bf16.mxu0 %v9472_v4  ;;  %5465 = vset.pattern.permute.xlu0 %v5648_v5  ;;  %v9471_v15 = vmov 5   ;;  %v5654_v16 = vmov 3   ;;  %v9470_v17 = vmov 8   ;;  %v5656_v18 = vmov 7  }
   0x4   :  { %38 = vst.msk [vmem:[#allocation2 + $0x58] sm:$0xff] %vm33_vm1, %v5645_v2  ;;  %41 = vst.msk [vmem:[#allocation2 + $0x90] sm:$0xff] %vm33_vm1, %v5645_v2  ;;  %v5657_v19 = vmov 1   ;;  %v9474_v20 = vmov 6   ;;  %v9467_v21 = vmov 9   ;;  %vm112_vm2 = vcmask 523264  }
   0x5   :  { %44 = vst.msk [vmem:[#allocation2 + $0xc8] sm:$0xff] %vm33_vm1, %v5645_v2  ;;  %s5660_s8 = smov 1   ;;  %s5661_s9 = smov 127   ;;  %vm233_vm3 = vcmask 326656   ;;  %vm350_vm4 = vcmask 130048   ;;  %v5875_v60 = vand.u32 127, %v71_v57 }
   0x6   :  { %55 = vrot.lane.b32.xlu0 %v48_v3, %s5646_s25  ;;  %s5662_s10 = smov 104   ;;  %s5663_s11 = smov 80   ;;  %vm213_vm7 = vcmask 850944   ;;  %vm330_vm8 = vcmask 654336   ;;  %vm5664_vm9 = vmmov 0   ;;  %vm473_vm10 = vcmask 1043456  }
   0x7   :  { %9585 = vst [vmem:[#allocation3_spill] sm:$0xff] %v5875_v60  ;;  %vm127_vm5 = vcmp.lt.s32.totalorder %v5875_v60, 1  ;;  %vm137_vm6 = vcmp.lt.s32.totalorder %v5875_v60, 127  ;;  %5327 = vmatprep.mubr.msk.bf16.mxu1 %vm5664_vm9, %v5645_v2  ;;  %vm469_vm11 = vcmask 64512   ;;  %vm1369_vm15 = vcmask 982016   ;;  %s5676_s24 = smov 32  }
   0x8   :  { %s5678_s30 = smov 72   ;;  %s5697_s14 = smov 24  }
  0x74   :  { %v58_v6 = vpop.permute.xlu1 %57  ;;  %v54_v7 = vpop.permute.xlu0 %53 }
  0x75   :  { %68 = vst.msk [vmem:[#allocation2 + $0x20] sm:$0xff] %vm25_vm0, %v58_v6 }
  0x76   :  { %65 = vst.msk [vmem:[#allocation2 + $0x8] sm:$0xff] %vm33_vm1, %v54_v7 }
  0x78   :  { %v56_v8 = vpop.permute.xlu0 %55 }
  0x79   :  { %v5771_v9 = vsel %vm25_vm0, %v54_v7, %v56_v8  ;;  %v5774_v10 = vsel %vm25_vm0, %v56_v8, %v58_v6 }
  0x7a   :  { %66 = vst [vmem:[#allocation2 + $0x10] sm:$0xff] %v5771_v9  ;;  %67 = vst [vmem:[#allocation2 + $0x18] sm:$0xff] %v5774_v10 }
  0x7c   :  { %v5778_v11 = vld [vmem:[#allocation2 + $0x20] sm:$0xff] }
  0x7d   :  { %v5780_v12 = vld [vmem:[#allocation2 + $0x8] sm:$0xff]  ;;  %110 = vrot.lane.b32.xlu0 %v5778_v11, %s5649_s0 }
  0x7e   :  { %104 = vrot.lane.b32.xlu1 %v5780_v12, %s5649_s0 }
  0x81   :  { %231 = vrot.lane.b32.xlu0 %v5778_v11, %s5650_s28 }
  0x82   :  { %225 = vrot.lane.b32.xlu1 %v5780_v12, %s5650_s28 }
  0x85   :  { %106 = vrot.lane.b32.xlu0 %v5771_v9, %s5649_s0 }
  0x86   :  { %108 = vrot.lane.b32.xlu1 %v5774_v10, %s5649_s0 }
  0x89   :  { %227 = vrot.lane.b32.xlu0 %v5771_v9, %s5650_s28 }
  0x8a   :  { %229 = vrot.lane.b32.xlu1 %v5774_v10, %s5650_s28 }
  0x8d   :  { %344 = vrot.lane.b32.xlu0 %v5771_v9, %s5651_s29 }
  0x8e   :  { %342 = vrot.lane.b32.xlu1 %v5780_v12, %s5651_s29 }
  0x91   :  { %348 = vrot.lane.b32.xlu0 %v5778_v11, %s5651_s29 }
  0x92   :  { %346 = vrot.lane.b32.xlu1 %v5774_v10, %s5651_s29  ;;  %s5677_s29 = smov 8  }
  0x95   :  { %168 = vperm.xlu0 %5465, %v5805_v13  }
  0x96   :  { %142 = vperm.xlu1 %5464, %v5805_v13  }
  0x99   :  { %5468 = vset.pattern.permute.xlu0 %v9471_v15 }
  0x9a   :  { %5466 = vset.pattern.permute.xlu1 %v5652_v14  ;;  %285 = vperm.xlu0 %5468, %v5805_v13  }
  0x9b   :  { %194 = vperm.xlu1 %5466, %v5805_v13  }
  0x9e   :  { %5471 = vset.pattern.permute.xlu0 %v9470_v17 }
  0x9f   :  { %5467 = vset.pattern.permute.xlu1 %v5654_v16  ;;  %402 = vperm.xlu0 %5471, %v5805_v13  }
  0xa0   :  { %259 = vperm.xlu1 %5467, %v5805_v13  }
  0xa3   :  { %5472 = vset.pattern.permute.xlu0 %v5657_v19 }
  0xa4   :  { %5469 = vset.pattern.permute.xlu1 %v5656_v18 }
  0xa5   :  { %311 = vperm.xlu1 %5469, %v5805_v13  }
  0xa9   :  { %5470 = vset.pattern.permute.xlu1 %v9474_v20 }
  0xaa   :  { %376 = vperm.xlu1 %5470, %v5805_v13  }
  0xae   :  { %5473 = vset.pattern.permute.xlu1 %v9467_v21 }
  0xef   :  { %v111_v23 = vpop.permute.xlu0 %110 }
  0xf0   :  { %v105_v22 = vpop.permute.xlu1 %104 }
  0xf3   :  { %v232_v25 = vpop.permute.xlu0 %231 }
  0xf4   :  { %v226_v24 = vpop.permute.xlu1 %225 }
  0xf7   :  { %v107_v27 = vpop.permute.xlu0 %106 }
  0xf8   :  { %v109_v26 = vpop.permute.xlu1 %108  ;;  %v113_v29 = vsel %vm112_vm2, %v105_v22, %v107_v27 }
  0xf9   :  { %v115_v28 = vsel %vm112_vm2, %v109_v26, %v111_v23  ;;  %119 = vrot.lane.b32.xlu1 %v113_v29, %s5660_s8  ;;  %v114_v30 = vsel %vm112_vm2, %v107_v27, %v109_v26 }
  0xfa   :  { %123 = vrot.lane.b32.xlu0 %v115_v28, %s5660_s8 }
  0xfb   :  { %v228_v32 = vpop.permute.xlu0 %227 }
  0xfc   :  { %v230_v31 = vpop.permute.xlu1 %229  ;;  %v234_v34 = vsel %vm233_vm3, %v226_v24, %v228_v32 }
  0xfd   :  { %121 = vrot.lane.b32.xlu1 %v114_v30, %s5660_s8  ;;  %v236_v33 = vsel %vm233_vm3, %v230_v31, %v232_v25  ;;  %v235_v37 = vsel %vm233_vm3, %v228_v32, %v230_v31 }
  0xfe   :  { %131 = vrot.lane.b32.xlu0 %v113_v29, %s5661_s9 }
  0xff   :  { %v345_v36 = vpop.permute.xlu0 %344 }
 0x100   :  { %v343_v35 = vpop.permute.xlu1 %342 }
 0x101   :  { %133 = vrot.lane.b32.xlu1 %v114_v30, %s5661_s9  ;;  %v351_v41 = vsel %vm350_vm4, %v343_v35, %v345_v36 }
 0x102   :  { %135 = vrot.lane.b32.xlu0 %v115_v28, %s5661_s9 }
 0x103   :  { %v349_v39 = vpop.permute.xlu0 %348 }
 0x104   :  { %v347_v38 = vpop.permute.xlu1 %346 }
 0x105   :  { %240 = vrot.lane.b32.xlu1 %v234_v34, %s5660_s8  ;;  %v353_v42 = vsel %vm350_vm4, %v347_v38, %v349_v39  ;;  %v352_v43 = vsel %vm350_vm4, %v345_v36, %v347_v38 }
 0x106   :  { %244 = vrot.lane.b32.xlu0 %v236_v33, %s5660_s8 }
 0x109   :  { %242 = vrot.lane.b32.xlu1 %v235_v37, %s5660_s8 }
 0x10a   :  { %249 = vrot.lane.b32.xlu0 %v234_v34, %s5661_s9 }
 0x10d   :  { %251 = vrot.lane.b32.xlu1 %v235_v37, %s5661_s9 }
 0x10e   :  { %253 = vrot.lane.b32.xlu0 %v236_v33, %s5661_s9 }
 0x110   :  { %v169_v55 = vpop.permute.xlu0 %168 }
 0x111   :  { %v143_v40 = vpop.permute.xlu1 %142  ;;  %357 = vrot.lane.b32.xlu1 %v351_v41, %s5660_s8 }
 0x112   :  { %361 = vrot.lane.b32.xlu0 %v353_v42, %s5660_s8 }
 0x115   :  { %359 = vrot.lane.b32.xlu1 %v352_v43, %s5660_s8  ;;  %v286_v56 = vpop.permute.xlu0 %285 }
 0x116   :  { %368 = vrot.lane.b32.xlu0 %v352_v43, %s5661_s9  ;;  %v195_v44 = vpop.permute.xlu1 %194 }
 0x117   :  { %v197_v46 = vmul.f32 %v195_v44, %v5780_v12  ;;  %v198_v47 = vmul.f32 %v195_v44, %v5771_v9  ;;  %v199_v48 = vmul.f32 %v195_v44, %v5774_v10  ;;  %v200_v50 = vmul.f32 %v195_v44, %v5778_v11 }
 0x119   :  { %366 = vrot.lane.b32.xlu1 %v351_v41, %s5661_s9 }
 0x11a   :  { %93 = vperm.xlu0 %5472, %v5805_v13   ;;  %v5872_v59 = vpop.permute.xlu0 %402 }
 0x11b   :  { %v5850_v45 = vpop.permute.xlu1 %259 }
 0x11d   :  { %370 = vrot.lane.b32.xlu1 %v353_v42, %s5661_s9 }
 0x11e   :  { %205 = vrot.lane.b32.xlu0 %v197_v46, %s5662_s10 }
 0x11f   :  { %5476 = vset.pattern.permute.xlu0 %v5654_v16 }
 0x120   :  { %v312_v49 = vpop.permute.xlu1 %311 }
 0x121   :  { %207 = vrot.lane.b32.xlu1 %v198_v47, %s5662_s10  ;;  %v314_v51 = vmul.f32 %v312_v49, %v5780_v12  ;;  %v315_v52 = vmul.f32 %v312_v49, %v5771_v9  ;;  %v316_v53 = vmul.f32 %v312_v49, %v5774_v10  ;;  %v317_v54 = vmul.f32 %v312_v49, %v5778_v11 }
 0x122   :  { %209 = vrot.lane.b32.xlu0 %v199_v48, %s5662_s10 }
 0x125   :  { %211 = vrot.lane.b32.xlu1 %v200_v50, %s5662_s10  ;;  %v377_v58 = vpop.permute.xlu1 %376 }
 0x126   :  { %322 = vrot.lane.b32.xlu0 %v314_v51, %s5663_s11 }
 0x129   :  { %324 = vrot.lane.b32.xlu1 %v315_v52, %s5663_s11 }
 0x12a   :  { %326 = vrot.lane.b32.xlu0 %v316_v53, %s5663_s11 }
 0x12d   :  { %328 = vrot.lane.b32.xlu1 %v317_v54, %s5663_s11 }
 0x131   :  { %428 = vperm.xlu1 %5473, %v5805_v13  }
 0x135   :  { %5474 = vset.pattern.permute.xlu1 %v9472_v4 }
 0x16b   :  { %v120_v61 = vpop.permute.xlu1 %119 }
 0x16c   :  { %v124_v62 = vpop.permute.xlu0 %123 }
 0x16d   :  { %v130_v63 = vsel %vm127_vm5, %v124_v62, %v120_v61 }
 0x16e   :  { %v145_v0 = vmul.f32 %v143_v40, %v130_v63 }
 0x16f   :  { %v122_v1 = vpop.permute.xlu1 %121 }
 0x170   :  { %151 = vrot.lane.b32.xlu1 %v145_v0, %s5649_s0  ;;  %v132_v3 = vpop.permute.xlu0 %131  ;;  %v128_v6 = vsel %vm127_vm5, %v122_v1, %v124_v62  ;;  %v129_v7 = vsel %vm127_vm5, %v120_v61, %v122_v1 }
 0x171   :  { %v146_v8 = vmul.f32 %v143_v40, %v129_v7  ;;  %v147_v16 = vmul.f32 %v143_v40, %v128_v6 }
 0x173   :  { %v134_v22 = vpop.permute.xlu1 %133  ;;  %155 = vrot.lane.b32.xlu0 %v147_v16, %s5649_s0 }
 0x174   :  { %153 = vrot.lane.b32.xlu1 %v146_v8, %s5649_s0  ;;  %v136_v23 = vpop.permute.xlu0 %135  ;;  %v139_v24 = vsel %vm137_vm6, %v132_v3, %v134_v22 }
 0x175   :  { %v138_v25 = vsel %vm137_vm6, %v134_v22, %v136_v23  ;;  %v171_v26 = vmul.f32 %v169_v55, %v139_v24  ;;  %v140_v28 = vsel %vm137_vm6, %v136_v23, %v132_v3 }
 0x176   :  { %v172_v27 = vmul.f32 %v169_v55, %v138_v25  ;;  %v173_v32 = vmul.f32 %v169_v55, %v140_v28 }
 0x177   :  { %v241_v29 = vpop.permute.xlu1 %240 }
 0x178   :  { %177 = vrot.lane.b32.xlu1 %v171_v26, %s5649_s0  ;;  %179 = vrot.lane.b32.xlu0 %v172_v27, %s5649_s0  ;;  %v245_v30 = vpop.permute.xlu0 %244 }
 0x179   :  { %v248_v31 = vsel %vm127_vm5, %v245_v30, %v241_v29 }
 0x17a   :  { %v262_v33 = vmul.f32 %v5850_v45, %v248_v31 }
 0x17b   :  { %v243_v34 = vpop.permute.xlu1 %242 }
 0x17c   :  { %181 = vrot.lane.b32.xlu1 %v173_v32, %s5649_s0  ;;  %268 = vrot.lane.b32.xlu0 %v262_v33, %s5649_s0  ;;  %v250_v35 = vpop.permute.xlu0 %249  ;;  %v246_v36 = vsel %vm127_vm5, %v243_v34, %v245_v30  ;;  %v247_v37 = vsel %vm127_vm5, %v241_v29, %v243_v34 }
 0x17d   :  { %v263_v38 = vmul.f32 %v5850_v45, %v247_v37  ;;  %v264_v39 = vmul.f32 %v5850_v45, %v246_v36 }
 0x17f   :  { %v252_v40 = vpop.permute.xlu1 %251 }
 0x180   :  { %270 = vrot.lane.b32.xlu1 %v263_v38, %s5649_s0  ;;  %272 = vrot.lane.b32.xlu0 %v264_v39, %s5649_s0  ;;  %v254_v41 = vpop.permute.xlu0 %253  ;;  %v256_v42 = vsel %vm137_vm6, %v250_v35, %v252_v40 }
 0x181   :  { %v255_v43 = vsel %vm137_vm6, %v252_v40, %v254_v41  ;;  %v288_v44 = vmul.f32 %v286_v56, %v256_v42  ;;  %v257_v47 = vsel %vm137_vm6, %v254_v41, %v250_v35 }
 0x182   :  { %v289_v46 = vmul.f32 %v286_v56, %v255_v43  ;;  %v290_v50 = vmul.f32 %v286_v56, %v257_v47 }
 0x183   :  { %v358_v48 = vpop.permute.xlu1 %357 }
 0x184   :  { %294 = vrot.lane.b32.xlu1 %v288_v44, %s5649_s0  ;;  %296 = vrot.lane.b32.xlu0 %v289_v46, %s5649_s0  ;;  %v362_v45 = vpop.permute.xlu0 %361 }
 0x185   :  { %v365_v49 = vsel %vm127_vm5, %v362_v45, %v358_v48 }
 0x186   :  { %v379_v51 = vmul.f32 %v377_v58, %v365_v49 }
 0x187   :  { %v360_v52 = vpop.permute.xlu1 %359 }
 0x188   :  { %298 = vrot.lane.b32.xlu1 %v290_v50, %s5649_s0  ;;  %385 = vrot.lane.b32.xlu0 %v379_v51, %s5649_s0  ;;  %v363_v53 = vsel %vm127_vm5, %v360_v52, %v362_v45  ;;  %v364_v54 = vsel %vm127_vm5, %v358_v48, %v360_v52  ;;  %v369_v62 = vpop.permute.xlu0 %368 }
 0x189   :  { %v380_v55 = vmul.f32 %v377_v58, %v364_v54  ;;  %v381_v61 = vmul.f32 %v377_v58, %v363_v53 }
 0x18b   :  { %v367_v63 = vpop.permute.xlu1 %366 }
 0x18c   :  { %387 = vrot.lane.b32.xlu1 %v380_v55, %s5649_s0  ;;  %389 = vrot.lane.b32.xlu0 %v381_v61, %s5649_s0  ;;  %v373_v56 = vsel %vm137_vm6, %v367_v63, %v369_v62 }
 0x18d   :  { %v405_v0 = vmul.f32 %v5872_v59, %v373_v56 }
 0x18f   :  { %v371_v1 = vpop.permute.xlu1 %370 }
 0x190   :  { %411 = vrot.lane.b32.xlu0 %v405_v0, %s5649_s0  ;;  %v372_v3 = vsel %vm137_vm6, %v369_v62, %v371_v1  ;;  %v374_v58 = vsel %vm137_vm6, %v371_v1, %v367_v63 }
 0x191   :  { %v407_v6 = vmul.f32 %v5872_v59, %v374_v58  ;;  %v406_v7 = vmul.f32 %v5872_v59, %v372_v3 }
 0x193   :  { %413 = vrot.lane.b32.xlu1 %v406_v7, %s5649_s0  ;;  %v208_v8 = vpop.permute.xlu1 %207 }
 0x194   :  { %415 = vrot.lane.b32.xlu0 %v407_v6, %s5649_s0 }
 0x195   :  { %v94_v16 = vpop.permute.xlu0 %93 }
 0x196   :  { %v96_v34 = vmul.f32 %v94_v16, %v5780_v12  ;;  %v99_v38 = vmul.f32 %v94_v16, %v5778_v11  ;;  %v98_v41 = vmul.f32 %v94_v16, %v5774_v10  ;;  %v97_v51 = vmul.f32 %v94_v16, %v5771_v9 }
 0x197   :  { %v212_v22 = vpop.permute.xlu1 %211 }
 0x199   :  { %v206_v23 = vpop.permute.xlu0 %205 }
 0x19a   :  { %v214_v44 = vsel %vm213_vm7, %v206_v23, %v208_v8 }
 0x19b   :  { %v5939_v24 = vpop.permute.xlu1 %324 }
 0x19d   :  { %v210_v25 = vpop.permute.xlu0 %209 }
 0x19e   :  { %v216_v62 = vsel %vm213_vm7, %v210_v25, %v212_v22  ;;  %v215_v16 = vsel %vm213_vm7, %v208_v8, %v210_v25 }
 0x19f   :  { %v329_v26 = vpop.permute.xlu1 %328 }
 0x1a1   :  { %v323_v27 = vpop.permute.xlu0 %322 }
 0x1a5   :  { %v327_v29 = vpop.permute.xlu0 %326 }
 0x1a6   :  { %v333_v8 = vsel %vm330_vm8, %v327_v29, %v329_v26 }
 0x1ac   :  { %v5941_v28 = vpop.permute.xlu1 %428 }
 0x1e2   :  { %v152_v30 = vpop.permute.xlu1 %151 }
 0x1e3   :  { %v163_v35 = vadd.f32 %v152_v30, %v96_v34 }
 0x1e5   :  { %v156_v32 = vpop.permute.xlu0 %155 }
 0x1e6   :  { %v154_v31 = vpop.permute.xlu1 %153  ;;  %v166_v42 = vadd.f32 %v156_v32, %v99_v38 }
 0x1e7   :  { %v158_v39 = vsel %vm112_vm2, %v154_v31, %v156_v32  ;;  %v157_v45 = vsel %vm112_vm2, %v152_v30, %v154_v31  ;;  %v331_v32 = vsel %vm330_vm8, %v323_v27, %v5939_v24  ;;  %v332_v27 = vsel %vm330_vm8, %v5939_v24, %v327_v29 }
 0x1e8   :  { %v165_v46 = vadd.f32 %v158_v39, %v98_v41  ;;  %v164_v54 = vadd.f32 %v157_v45, %v97_v51 }
 0x1ea   :  { %v178_v59 = vpop.permute.xlu1 %177  ;;  %v180_v33 = vpop.permute.xlu0 %179 }
 0x1eb   :  { %v189_v40 = vadd.f32 %v178_v59, %v163_v35  ;;  %v183_v53 = vsel %vm112_vm2, %v178_v59, %v180_v33 }
 0x1ec   :  { %v190_v0 = vadd.f32 %v183_v53, %v164_v54 }
 0x1ed   :  { %v221_v50 = vadd.f32 %v214_v44, %v189_v40 }
 0x1ee   :  { %v182_v36 = vpop.permute.xlu1 %181  ;;  %v269_v37 = vpop.permute.xlu0 %268  ;;  %v222_v59 = vadd.f32 %v215_v16, %v190_v0 }
 0x1ef   :  { %v184_v43 = vsel %vm112_vm2, %v180_v33, %v182_v36  ;;  %v192_v49 = vadd.f32 %v182_v36, %v166_v42  ;;  %v280_v63 = vadd.f32 %v269_v37, %v221_v50 }
 0x1f0   :  { %v191_v52 = vadd.f32 %v184_v43, %v165_v46 }
 0x1f1   :  { %v224_v56 = vadd.f32 %v212_v22, %v192_v49 }
 0x1f2   :  { %v271_v47 = vpop.permute.xlu1 %270  ;;  %v273_v48 = vpop.permute.xlu0 %272  ;;  %v223_v1 = vadd.f32 %v216_v62, %v191_v52 }
 0x1f3   :  { %v275_v3 = vsel %vm112_vm2, %v271_v47, %v273_v48  ;;  %v274_v23 = vsel %vm112_vm2, %v269_v37, %v271_v47  ;;  %v283_v30 = vadd.f32 %v273_v48, %v224_v56 }
 0x1f4   :  { %v282_v22 = vadd.f32 %v275_v3, %v223_v1  ;;  %v281_v36 = vadd.f32 %v274_v23, %v222_v59 }
 0x1f6   :  { %v295_v55 = vpop.permute.xlu1 %294  ;;  %v297_v61 = vpop.permute.xlu0 %296 }
 0x1f7   :  { %v306_v58 = vadd.f32 %v295_v55, %v280_v63  ;;  %v300_v33 = vsel %vm112_vm2, %v295_v55, %v297_v61 }
 0x1f8   :  { %v307_v40 = vadd.f32 %v300_v33, %v281_v36 }
 0x1f9   :  { %v338_v35 = vadd.f32 %v331_v32, %v306_v58 }
 0x1fa   :  { %v299_v6 = vpop.permute.xlu1 %298  ;;  %v386_v7 = vpop.permute.xlu0 %385  ;;  %v339_v48 = vadd.f32 %v332_v27, %v307_v40 }
 0x1fb   :  { %v301_v31 = vsel %vm112_vm2, %v297_v61, %v299_v6  ;;  %v309_v34 = vadd.f32 %v299_v6, %v283_v30  ;;  %v397_v25 = vadd.f32 %v386_v7, %v338_v35 }
 0x1fc   :  { %v308_v38 = vadd.f32 %v301_v31, %v282_v22 }
 0x1fd   :  { %v341_v37 = vadd.f32 %v329_v26, %v309_v34  ;;  %v5984_v34 = vld [vmem:[%s9457_s4] sm:$0xff] }
 0x1fe   :  { %v390_v39 = vpop.permute.xlu0 %389  ;;  %v388_v41 = vpop.permute.xlu1 %387  ;;  %v340_v42 = vadd.f32 %v333_v8, %v308_v38  ;;  %v451_v8 = vld [vmem:[%s9458_s2] sm:$0xf] }
 0x1ff   :  { %v391_v44 = vsel %vm112_vm2, %v386_v7, %v388_v41  ;;  %v392_v46 = vsel %vm112_vm2, %v388_v41, %v390_v39  ;;  %v400_v45 = vadd.f32 %v390_v39, %v341_v37 }
 0x200   :  { %v398_v50 = vadd.f32 %v391_v44, %v339_v48  ;;  %v399_v51 = vadd.f32 %v392_v46, %v340_v42 }
 0x202   :  { %v412_v43 = vpop.permute.xlu0 %411 }
 0x203   :  { %v423_v47 = vadd.f32 %v412_v43, %v397_v25 }
 0x205   :  { %v431_v49 = vadd.f32 %v5941_v28, %v423_v47  ;;  %v414_v52 = vpop.permute.xlu1 %413 }
 0x206   :  { %v416_v53 = vpop.permute.xlu0 %415  ;;  %v417_v26 = vsel %vm112_vm2, %v412_v43, %v414_v52 }
 0x207   :  { %v435_v54 = vpack.c.bf16 %v431_v49, %v431_v49  ;;  %v418_v55 = vsel %vm112_vm2, %v414_v52, %v416_v53  ;;  %v426_v61 = vadd.f32 %v416_v53, %v400_v45  ;;  %v424_v24 = vadd.f32 %v417_v26, %v398_v50  ;;  %v452_v50 = vld [vmem:[%s9459_s3] sm:$0xf] }
 0x208   :  { %v425_v29 = vadd.f32 %v418_v55, %v399_v51 }
 0x209   :  { %v434_v62 = vadd.f32 %v5941_v28, %v426_v61  ;;  %v439_v63 = vunpack.c.l.bf16 %v435_v54  ;;  %v432_v56 = vadd.f32 %v5941_v28, %v424_v24 }
 0x20a   :  { %v433_v0 = vadd.f32 %v5941_v28, %v425_v29  ;;  %v72_v29 = vshrl.u32 %v71_v57, 7 }
 0x20b   :  { %v438_v1 = vpack.c.bf16 %v434_v62, %v434_v62  ;;  %v443_v3 = vsub.f32 %v431_v49, %v439_v63  ;;  %v436_v58 = vpack.c.bf16 %v432_v56, %v432_v56 }
 0x20c   :  { %v437_v6 = vpack.c.bf16 %v433_v0, %v433_v0  ;;  %v81_v57 = vsub.s32 2, %v72_v29 }
 0x20d   :  { %v447_v7 = vpack.c.bf16 %v443_v3, %v443_v3  ;;  %v440_v16 = vunpack.c.l.bf16 %v436_v58  ;;  %v442_v30 = vunpack.c.l.bf16 %v438_v1 }
 0x20e   :  { %v441_v23 = vunpack.c.l.bf16 %v437_v6 }
 0x20f   :  { %457 = vrot.lane.b32.xlu1 %v447_v7, %s5649_s0  ;;  %v444_v31 = vsub.f32 %v432_v56, %v440_v16  ;;  %v446_v33 = vsub.f32 %v434_v62, %v442_v30 }
 0x210   :  { %v445_v32 = vsub.f32 %v433_v0, %v441_v23  ;;  %v77_v23 = vsub.s32 1, %v72_v29 }
 0x211   :  { %v448_v59 = vpack.c.bf16 %v444_v31, %v444_v31  ;;  %v450_v28 = vpack.c.bf16 %v446_v33, %v446_v33 }
 0x212   :  { %v449_v22 = vpack.c.bf16 %v445_v32, %v445_v32 }
 0x213   :  { %459 = vrot.lane.b32.xlu0 %v448_v59, %s5649_s0 }
 0x214   :  { %461 = vrot.lane.b32.xlu1 %v449_v22, %s5649_s0 }
 0x217   :  { %463 = vrot.lane.b32.xlu0 %v450_v28, %s5649_s0 }
 0x218   :  { %568 = vrot.lane.b32.xlu1 %v435_v54, %s5649_s0 }
 0x21b   :  { %570 = vrot.lane.b32.xlu0 %v436_v58, %s5649_s0 }
 0x21c   :  { %572 = vrot.lane.b32.xlu1 %v437_v6, %s5649_s0  ;;  %v69_v6 = vld [vmem:[%s9460_s5] sm:$0x7]  ;;  %s5666_s5 = smov 120  }
 0x21f   :  { %574 = vrot.lane.b32.xlu0 %v438_v1, %s5649_s0  ;;  %v73_v1 = vsub.s32 0, %v72_v29 }
 0x220   :  { %759 = vperm.xlu1 %5474, %v5984_v34  }
 0x221   :  { %v6029_v22 = vrot.slane %v69_v6, %v73_v1 }
 0x223   :  { %9586 = vst [vmem:[#allocation4_spill] sm:$0xff] %v6029_v22 }
 0x224   :  { %5475 = vset.pattern.permute.xlu1 %v5648_v5 }
 0x281   :  { %v458_v35 = vpop.permute.xlu1 %457 }
 0x285   :  { %v460_v38 = vpop.permute.xlu0 %459 }
 0x286   :  { %v462_v36 = vpop.permute.xlu1 %461  ;;  %v466_v40 = vsel %vm112_vm2, %v458_v35, %v460_v38 }
 0x287   :  { %v467_v39 = vsel %vm112_vm2, %v460_v38, %v462_v36  ;;  %v475_v41 = vsel %vm473_vm10, %v466_v40, 0 }
 0x288   :  { %5265 = vmatprep.subr.msk.bf16.mxu0 %vm473_vm10, %v467_v39  ;;  %v6033_v39 = vrot.slane %v69_v6, %v77_v23 }
 0x289   :  { %498 = vmatpush1.bf16.msra.mxu0 %v475_v41  ;;  %v464_v5 = vpop.permute.xlu0 %463 }
 0x28a   :  { %v569_v25 = vpop.permute.xlu1 %568  ;;  %v468_v37 = vsel %vm112_vm2, %v462_v36, %v464_v5  ;;  %9587 = vst [vmem:[#allocation5_spill] sm:$0xff] %v6033_v39  ;;  %v6037_v5 = vrot.slane %v69_v6, %v81_v57 }
 0x28b   :  { %v481_v42 = vsel %vm473_vm10, %v468_v37, 0 }
 0x28c   :  { %5266 = vmatmul.mubr.msk.bf16.vlgmr.msra.gmra.mxu0 %vm469_vm11, %v451_v8  ;;  %5326 = vmatpush3.bf16.msra.mxu1 %v481_v42  ;;  %9588 = vst [vmem:[#allocation6_spill] sm:$0xff] %v6037_v5 }
 0x28d   :  { %620 = vmatprep.mubr.bf16.mxu0 %v9472_v4  ;;  %v571_v27 = vpop.permute.xlu0 %570  ;;  %5331 = vmatprep.subr.bf16.mxu1 %v5645_v2 }
 0x28e   :  { %v573_v43 = vpop.permute.xlu1 %572  ;;  %v576_v44 = vsel %vm112_vm2, %v569_v25, %v571_v27 }
 0x28f   :  { %v577_v46 = vsel %vm112_vm2, %v571_v27, %v573_v43  ;;  %5328 = vmatmul.mubr.msk.bf16.vlgmr.msra.gmra.mxu1 %vm469_vm11, %v451_v8  ;;  %v580_v47 = vsel %vm473_vm10, %v576_v44, 0 }
 0x290   :  { %5268 = vmatprep.subr.msk.bf16.mxu0 %vm473_vm10, %v577_v46  ;;  %5333 = vmatprep.mubr.msk.bf16.mxu1 %vm5664_vm9, %v5645_v2 }
 0x291   :  { %603 = vmatpush1.bf16.msra.mxu0 %v580_v47  ;;  %v575_v48 = vpop.permute.xlu0 %574 }
 0x292   :  { %5271 = vmatprep.subr.msk.bf16.mxu0 %vm473_vm10, %v577_v46  ;;  %v578_v45 = vsel %vm112_vm2, %v573_v43, %v575_v48 }
 0x293   :  { %v586_v49 = vsel %vm473_vm10, %v578_v45, 0 }
 0x294   :  { %5269 = vmatmul.mubr.msk.bf16.vlgmr.msra.gmra.mxu0 %vm469_vm11, %v451_v8  ;;  %5332 = vmatpush3.bf16.msra.mxu1 %v586_v49 }
 0x295   :  { %687 = vmatpush1.bf16.msra.mxu0 %v580_v47  ;;  %5337 = vmatprep.subr.bf16.mxu1 %v5645_v2 }
 0x296   :  { %704 = vmatprep.mubr.bf16.mxu0 %v9472_v4 }
 0x297   :  { %5334 = vmatmul.mubr.msk.bf16.vlgmr.msra.gmra.mxu1 %vm469_vm11, %v451_v8 }
 0x298   :  { %5338 = vmatpush3.bf16.msra.mxu1 %v586_v49  ;;  %5339 = vmatprep.mubr.msk.bf16.mxu1 %vm5664_vm9, %v5645_v2 }
 0x299   :  { %5343 = vmatprep.subr.bf16.mxu1 %v5645_v2 }
 0x29b   :  { %v760_v16 = vpop.permute.xlu1 %759 }
 0x29c   :  { %5272 = vmatmul.mubr.msk.bf16.vlgmr.msra.gmra.mxu0 %vm469_vm11, %v452_v50 }
 0x29d   :  { %1618 = vmatprep.mubr.bf16.mxu0 %v9472_v4 }
 0x29f   :  { %5340 = vmatmul.mubr.msk.bf16.vlgmr.msra.gmra.mxu1 %vm469_vm11, %v452_v50 }
 0x2a0   :  { %5345 = vmatprep.mubr.msk.bf16.mxu1 %vm5664_vm9, %v5645_v2 }
 0x34c   :  { %v517_v51 = vpop.f32.mrf.mxu0 }
 0x34e   :  { %v519_v52 = vpop.f32.mrf.mxu0 }
 0x34f   :  { %v558_v54 = vpop.f32.mrf.mxu1 }
 0x350   :  { %v521_v53 = vpop.f32.mrf.mxu0 }
 0x351   :  { %v5329_v55 = vpop.f32.mrf.mxu1 }
 0x352   :  { %v522_v26 = vpop.f32.mrf.mxu0  ;;  %v9466_v55 = vmov 12  }
 0x353   :  { %v561_v61 = vpop.f32.mrf.mxu1  ;;  %v9469_v26 = vmov 10  }
 0x354   :  { %v622_v24 = vpop.f32.mrf.mxu0 }
 0x355   :  { %v5330_v62 = vpop.f32.mrf.mxu1  ;;  %v623_v7 = vadd.f32 %v622_v24, %v517_v51 }
 0x356   :  { %v624_v63 = vpop.f32.mrf.mxu0 }
 0x357   :  { %v663_v0 = vpop.f32.mrf.mxu1  ;;  %v625_v32 = vadd.f32 %v624_v63, %v519_v52 }
 0x358   :  { %v626_v56 = vpop.f32.mrf.mxu0  ;;  %v664_v35 = vadd.f32 %v663_v0, %v558_v54 }
 0x359   :  { %v5335_v58 = vpop.f32.mrf.mxu1 }
 0x35a   :  { %v627_v3 = vpop.f32.mrf.mxu0 }
 0x35b   :  { %v666_v30 = vpop.f32.mrf.mxu1 }
 0x35c   :  { %v706_v31 = vpop.f32.mrf.mxu0  ;;  %v9465_v30 = vmov 13  }
 0x35d   :  { %v753_v59 = vadd.f32 %v706_v31, %v623_v7  ;;  %v5336_v33 = vpop.f32.mrf.mxu1 }
 0x35e   :  { %v708_v28 = vpop.f32.mrf.mxu0 }
 0x35f   :  { %v6031_v36 = vadd.f32 %v760_v16, %v753_v59  ;;  %v754_v38 = vadd.f32 %v708_v28, %v625_v32  ;;  %v747_v41 = vpop.f32.mrf.mxu1  ;;  %v9462_v28 = vmov 15  }
 0x360   :  { %v710_v40 = vpop.f32.mrf.mxu0  ;;  %v755_v25 = vadd.f32 %v747_v41, %v664_v35 }
 0x361   :  { %v6035_v8 = vadd.f32 %v760_v16, %v754_v38  ;;  %v765_v37 = vmul.f32 %v6031_v36, %v6029_v22  ;;  %v5341_v43 = vpop.f32.mrf.mxu1 }
 0x362   :  { %v711_v42 = vpop.f32.mrf.mxu0  ;;  %v6041_v27 = vadd.f32 %v760_v16, %v755_v25 }
 0x363   :  { %v766_v44 = vmul.f32 %v6035_v8, %v6033_v39  ;;  %v750_v46 = vpop.f32.mrf.mxu1  ;;  %v772_v45 = vmul.f32 %v765_v37, %v6031_v36 }
 0x364   :  { %v767_v47 = vmul.f32 %v6041_v27, %v6037_v5 }
 0x365   :  { %v768_v48 = vadd.f32 %v766_v44, %v765_v37  ;;  %v773_v49 = vmul.f32 %v766_v44, %v6035_v8  ;;  %v5342_v50 = vpop.f32.mrf.mxu1 }
 0x366   :  { %v774_v52 = vmul.f32 %v767_v47, %v6041_v27 }
 0x367   :  { %v769_v51 = vadd.f32 %v768_v48, %v767_v47  ;;  %v775_v53 = vadd.f32 %v773_v49, %v772_v45 }
 0x369   :  { %770 = vadd.xlane.f32.xlu0 %v769_v51  ;;  %v776_v54 = vadd.f32 %v775_v53, %v774_v52 }
 0x36b   :  { %777 = vadd.xlane.f32.xlu1 %v776_v54 }
 0x37c   :  { %799 = vperm.xlu1 %5475, %v5984_v34  }
 0x37f   :  { %809 = vperm.xlu0 %5476, %v5984_v34  }
 0x380   :  { %876 = vrot.lane.b32.xlu1 %v5780_v12, %s5646_s25 }
 0x381   :  { %5484 = vset.pattern.permute.xlu1 %v9469_v26 }
 0x383   :  { %878 = vrot.lane.b32.xlu0 %v5771_v9, %s5646_s25 }
 0x384   :  { %880 = vrot.lane.b32.xlu1 %v5774_v10, %s5646_s25  ;;  %5477 = vset.pattern.permute.xlu0 %v5657_v19  ;;  %v6073_v19 = vld [vmem:[%s9456_s1 + $0x8] sm:$0xff] }
 0x387   :  { %882 = vrot.lane.b32.xlu0 %v5778_v11, %s5646_s25 }
 0x388   :  { %1106 = vrot.lane.b32.xlu1 %v5780_v12, %s5650_s28  ;;  %v9464_v12 = vmov 14  }
 0x38c   :  { %1110 = vrot.lane.b32.xlu1 %v5774_v10, %s5650_s28 }
 0x390   :  { %1353 = vrot.lane.b32.xlu1 %v5771_v9, %s5666_s5 }
 0x394   :  { %1357 = vrot.lane.b32.xlu1 %v5778_v11, %s5666_s5 }
 0x398   :  { %945 = vperm.xlu1 %5484, %v6073_v19  }
 0x39c   :  { %5485 = vset.pattern.permute.xlu1 %v9466_v55 }
 0x39d   :  { %993 = vperm.xlu1 %5485, %v5805_v13  }
 0x3a1   :  { %5488 = vset.pattern.permute.xlu1 %v9464_v12 }
 0x3f2   :  { %v771_v61 = vpop.xlane.xlu0 %770 }
 0x3f3   :  { %v779_v24 = vmul.f32 0.00390625, %v771_v61 }
 0x3f4   :  { %v778_v29 = vpop.xlane.xlu1 %777 }
 0x3f5   :  { %v780_v62 = vmul.f32 0.00390625, %v778_v29  ;;  %v781_v63 = vmul.f32 %v779_v24, %v779_v24 }
 0x3f7   :  { %v782_v56 = vsub.f32 %v780_v62, %v781_v63  ;;  %v5672_v63 = vmov 16  }
 0x3f8   :  { %v800_v0 = vpop.permute.xlu1 %799 }
 0x3f9   :  { %v783_v1 = vmax.f32 %v782_v56, 0.0 }
 0x3fa   :  { %v810_v3 = vpop.permute.xlu0 %809 }
 0x3fb   :  { %v784_v58 = vadd.f32 1e-05, %v783_v1 }
 0x3fc   :  { %v877_v6 = vpop.permute.xlu1 %876 }
 0x3fd   :  { %5597 = vrsqrt.f32 %v784_v58 }
 0x3fe   :  { %v879_v7 = vpop.permute.xlu0 %878 }
 0x3ff   :  { %v892_v16 = vsel %vm25_vm0, %v877_v6, %v879_v7  ;;  %v6146_v6 = vld [vmem:[%s9456_s1] sm:$0xff] }
 0x400   :  { %904 = vrot.lane.b32.xlu1 %v892_v16, %s5660_s8  ;;  %v881_v23 = vpop.permute.xlu1 %880 }
 0x401   :  { %v893_v32 = vsel %vm25_vm0, %v879_v7, %v881_v23 }
 0x402   :  { %v883_v57 = vpop.permute.xlu0 %882 }
 0x403   :  { %v894_v33 = vsel %vm25_vm0, %v881_v23, %v883_v57 }
 0x404   :  { %1049 = vperm.xlu1 %5488, %v6073_v19   ;;  %v1107_v41 = vpop.permute.xlu1 %1106 }
 0x408   :  { %922 = vrot.lane.b32.xlu1 %v892_v16, %s5661_s9 }
 0x409   :  { %5489 = vset.pattern.permute.xlu1 %v9465_v30 }
 0x40a   :  { %v5598_v31 = vpop.eup %5597 }
 0x40b   :  { %v786_v59 = vmul.f32 %v5598_v31, %v5984_v34 }
 0x40c   :  { %926 = vrot.lane.b32.xlu1 %v893_v32, %s5661_s9 }
 0x40d   :  { %792 = vperm.xlu0 %5477, %v786_v59  }
 0x410   :  { %930 = vrot.lane.b32.xlu1 %v894_v33, %s5661_s9 }
 0x411   :  { %1108 = vrot.lane.b32.xlu0 %v5771_v9, %s5650_s28  ;;  %v5671_v9 = vmov 17  }
 0x412   :  { %5483 = vset.pattern.permute.xlu0 %v9469_v26 }
 0x414   :  { %1171 = vperm.xlu1 %5489, %v5805_v13  }
 0x415   :  { %1112 = vrot.lane.b32.xlu0 %v5778_v11, %s5650_s28  ;;  %v789_v11 = vsub.f32 %v6041_v27, %v779_v24 }
 0x418   :  { %5491 = vset.pattern.permute.xlu1 %v9462_v28 }
 0x419   :  { %1355 = vrot.lane.b32.xlu0 %v5774_v10, %s5666_s5  ;;  %1223 = vperm.xlu1 %5491, %v5805_v13   ;;  %v788_v10 = vsub.f32 %v6035_v8, %v779_v24  ;;  %v1111_v8 = vpop.permute.xlu1 %1110 }
 0x41d   :  { %5479 = vrot.lane.b32.xlu0 %v5645_v2, %s5666_s5  ;;  %1227 = vperm.xlu1 %5491, %v6073_v19   ;;  %v787_v2 = vsub.f32 %v6031_v36, %v779_v24  ;;  %v1354_v54 = vpop.permute.xlu1 %1353 }
 0x421   :  { %941 = vperm.xlu0 %5483, %v5805_v13   ;;  %5493 = vset.pattern.permute.xlu1 %v5671_v9  ;;  %v1358_v29 = vpop.permute.xlu1 %1357 }
 0x425   :  { %5486 = vset.pattern.permute.xlu0 %v9466_v55  ;;  %v6131_v56 = vpop.permute.xlu1 %945 }
 0x426   :  { %997 = vperm.xlu0 %5486, %v6073_v19  }
 0x429   :  { %v6135_v1 = vpop.permute.xlu1 %993 }
 0x42a   :  { %908 = vrot.lane.b32.xlu0 %v893_v32, %s5660_s8  ;;  %v5674_v32 = vmov 18  }
 0x42b   :  { %5487 = vset.pattern.permute.xlu0 %v9464_v12 }
 0x42e   :  { %912 = vrot.lane.b32.xlu0 %v894_v33, %s5660_s8 }
 0x432   :  { %1045 = vperm.xlu0 %5487, %v5805_v13  }
 0x436   :  { %5490 = vset.pattern.permute.xlu0 %v9465_v30 }
 0x437   :  { %1175 = vperm.xlu0 %5490, %v6073_v19  }
 0x43b   :  { %5492 = vset.pattern.permute.xlu0 %v5671_v9 }
 0x472   :  { %v905_v23 = vpop.permute.xlu1 %904 }
 0x47f   :  { %v6154_v57 = vpop.permute.xlu1 %1049 }
 0x483   :  { %v923_v9 = vpop.permute.xlu1 %922 }
 0x488   :  { %v793_v34 = vpop.permute.xlu0 %792 }
 0x489   :  { %v795_v35 = vmul.f32 %v793_v34, %v787_v2  ;;  %v796_v38 = vmul.f32 %v793_v34, %v788_v10  ;;  %v797_v40 = vmul.f32 %v793_v34, %v789_v11  ;;  %v927_v34 = vpop.permute.xlu1 %926 }
 0x48b   :  { %v802_v25 = vadd.f32 %v800_v0, %v795_v35  ;;  %v803_v37 = vadd.f32 %v800_v0, %v796_v38  ;;  %v804_v42 = vadd.f32 %v800_v0, %v797_v40  ;;  %v936_v38 = vsel %vm137_vm6, %v923_v9, %v927_v34 }
 0x48c   :  { %v1109_v43 = vpop.permute.xlu0 %1108 }
 0x48d   :  { %v812_v44 = vmul.f32 %v810_v3, %v802_v25  ;;  %v813_v46 = vmul.f32 %v810_v3, %v803_v37  ;;  %v814_v47 = vmul.f32 %v810_v3, %v804_v42  ;;  %v1122_v48 = vsel %vm233_vm3, %v1107_v41, %v1109_v43 }
 0x48e   :  { %vm805_vm12 = vcmp.ge.f32.partialorder %v802_v25, 0.0  ;;  %1134 = vrot.lane.b32.xlu0 %v1122_v48, %s5660_s8  ;;  %vm806_vm13 = vcmp.ge.f32.partialorder %v803_v37, 0.0  ;;  %vm807_vm14 = vcmp.ge.f32.partialorder %v804_v42, 0.0  ;;  %v1123_v50 = vsel %vm233_vm3, %v1109_v43, %v1111_v8 }
 0x48f   :  { %v815_v36 = vsel %vm805_vm12, %v802_v25, %v812_v44  ;;  %v816_v49 = vsel %vm806_vm13, %v803_v37, %v813_v46  ;;  %v817_v51 = vsel %vm807_vm14, %v804_v42, %v814_v47  ;;  %v1000_v41 = vmul.f32 %v6135_v1, %v936_v38  ;;  %v931_v37 = vpop.permute.xlu1 %930 }
 0x490   :  { %v1113_v27 = vpop.permute.xlu0 %1112  ;;  %v818_v45 = vmul.f32 %v815_v36, %v6029_v22  ;;  %v819_v52 = vmul.f32 %v816_v49, %v6033_v39  ;;  %v820_v53 = vmul.f32 %v817_v51, %v6037_v5  ;;  %vm1322_vm12 = vcmask 261120  }
 0x491   :  { %v1124_v24 = vsel %vm233_vm3, %v1111_v8, %v1113_v27 }
 0x492   :  { %824 = vrot.lane.b32.xlu1 %v818_v45, %s5646_s25  ;;  %1138 = vrot.lane.b32.xlu0 %v1123_v50, %s5660_s8 }
 0x493   :  { %v6177_v42 = vpop.permute.xlu1 %1171 }
 0x494   :  { %v1356_v61 = vpop.permute.xlu0 %1355 }
 0x495   :  { %v1370_v3 = vsel %vm1369_vm15, %v1354_v54, %v1356_v61  ;;  %v1371_v16 = vsel %vm1369_vm15, %v1356_v61, %v1358_v29 }
 0x496   :  { %826 = vrot.lane.b32.xlu1 %v819_v52, %s5646_s25  ;;  %828 = vrot.lane.b32.xlu0 %v820_v53, %s5646_s25  ;;  %v938_v53 = vsel %vm137_vm6, %v931_v37, %v923_v9 }
 0x497   :  { %v6179_v44 = vpop.permute.xlu1 %1223  ;;  %v1002_v61 = vmul.f32 %v6135_v1, %v938_v53 }
 0x498   :  { %v6127_v62 = vpop.permute.xlu0 %5479 }
 0x499   :  { %v5481_v7 = vunpack.i.l.bf16 %v6127_v62 }
 0x49a   :  { %1287 = vperm.xlu1 %5493, %v6073_v19   ;;  %1142 = vrot.lane.b32.xlu0 %v1124_v24, %s5660_s8 }
 0x49b   :  { %v1372_v59 = vsel %vm1369_vm15, %v1358_v29, %v5481_v7  ;;  %v6183_v47 = vpop.permute.xlu1 %1227 }
 0x49c   :  { %v942_v0 = vpop.permute.xlu0 %941 }
 0x49e   :  { %1152 = vrot.lane.b32.xlu1 %v1122_v48, %s5661_s9  ;;  %1283 = vperm.xlu0 %5492, %v5805_v13   ;;  %v9468_v13 = vmov 11  }
 0x49f   :  { %5494 = vset.pattern.permute.xlu1 %v5672_v63 }
 0x4a1   :  { %v6139_v58 = vpop.permute.xlu0 %997 }
 0x4a2   :  { %1156 = vrot.lane.b32.xlu1 %v1123_v50, %s5661_s9  ;;  %5495 = vset.pattern.permute.xlu0 %v5672_v63  ;;  %v6223_v63 = vld [vmem:[#allocation2 + $0x10] sm:$0xff] }
 0x4a3   :  { %1423 = vperm.xlu0 %5495, %v6073_v19  }
 0x4a5   :  { %v909_v31 = vpop.permute.xlu0 %908 }
 0x4a6   :  { %1160 = vrot.lane.b32.xlu1 %v1124_v24, %s5661_s9  ;;  %v918_v40 = vsel %vm127_vm5, %v905_v23, %v909_v31  ;;  %v934_v24 = vsel %vm137_vm6, %v927_v34, %v931_v37 }
 0x4a7   :  { %1382 = vrot.lane.b32.xlu0 %v1370_v3, %s5660_s8  ;;  %v949_v25 = vmul.f32 %v942_v0, %v918_v40 }
 0x4a8   :  { %5497 = vset.pattern.permute.xlu0 %v9468_v13 }
 0x4a9   :  { %v913_v33 = vpop.permute.xlu0 %912 }
 0x4aa   :  { %1419 = vperm.xlu1 %5494, %v6146_v6   ;;  %v920_v2 = vsel %vm127_vm5, %v913_v33, %v905_v23  ;;  %v916_v11 = vsel %vm127_vm5, %v909_v31, %v913_v33 }
 0x4ab   :  { %1386 = vrot.lane.b32.xlu0 %v1371_v16, %s5660_s8  ;;  %v948_v10 = vmul.f32 %v942_v0, %v920_v2  ;;  %v950_v35 = vmul.f32 %v942_v0, %v916_v11 }
 0x4ad   :  { %v1046_v43 = vpop.permute.xlu0 %1045 }
 0x4ae   :  { %5496 = vset.pattern.permute.xlu1 %v5674_v32  ;;  %v1053_v0 = vmul.f32 %v6223_v63, %v1046_v43  ;;  %v6241_v32 = vld [vmem:[#allocation2 + $0x20] sm:$0xff] }
 0x4af   :  { %1471 = vperm.xlu1 %5496, %v6146_v6   ;;  %1390 = vrot.lane.b32.xlu0 %v1372_v59, %s5660_s8 }
 0x4b2   :  { %v6181_v46 = vpop.permute.xlu0 %1175 }
 0x4b3   :  { %1475 = vperm.xlu1 %5496, %v6073_v19   ;;  %1400 = vrot.lane.b32.xlu0 %v1370_v3, %s5661_s9  ;;  %v1001_v3 = vmul.f32 %v6135_v1, %v934_v24 }
 0x4b7   :  { %5498 = vset.pattern.permute.xlu1 %v9468_v13  ;;  %1404 = vrot.lane.b32.xlu0 %v1371_v16, %s5661_s9  ;;  %v6233_v16 = vld [vmem:[#allocation2 + $0x18] sm:$0xff] }
 0x4b8   :  { %857 = vperm.xlu1 %5498, %v6073_v19   ;;  %v1054_v23 = vmul.f32 %v6233_v16, %v1046_v43 }
 0x4bb   :  { %1408 = vrot.lane.b32.xlu0 %v1372_v59, %s5661_s9  ;;  %v1055_v59 = vmul.f32 %v6241_v32, %v1046_v43 }
 0x4bc   :  { %960 = vrot.lane.b32.xlu1 %v948_v10, %s5650_s28  ;;  %v6249_v10 = vld [vmem:[#allocation2 + $0x8] sm:$0xff] }
 0x4bd   :  { %v1052_v11 = vmul.f32 %v6249_v10, %v1046_v43 }
 0x4bf   :  { %852 = vperm.xlu0 %5497, %v6146_v6  }
 0x4c0   :  { %964 = vrot.lane.b32.xlu1 %v950_v35, %s5650_s28 }
 0x4c3   :  { %962 = vrot.lane.b32.xlu0 %v949_v25, %s5650_s28  ;;  %v5675_v25 = vmov 19  }
 0x4c4   :  { %1012 = vrot.lane.b32.xlu1 %v1000_v41, %s5650_s28  ;;  %5500 = vset.pattern.permute.xlu0 %v5675_v25 }
 0x4c5   :  { %5499 = vset.pattern.permute.xlu1 %v5675_v25 }
 0x500   :  { %v1135_v48 = vpop.permute.xlu0 %1134 }
 0x504   :  { %v825_v36 = vpop.permute.xlu1 %824  ;;  %v1139_v8 = vpop.permute.xlu0 %1138 }
 0x505   :  { %836 = vst.msk [vmem:[#allocation2 + $0x40] sm:$0xff] %vm33_vm1, %v825_v36  ;;  %v1148_v31 = vsel %vm127_vm5, %v1135_v48, %v1139_v8 }
 0x506   :  { %v1179_v33 = vmul.f32 %v6177_v42, %v1148_v31 }
 0x508   :  { %v827_v27 = vpop.permute.xlu1 %826  ;;  %v829_v49 = vpop.permute.xlu0 %828 }
 0x509   :  { %v6187_v45 = vsel %vm25_vm0, %v825_v36, %v827_v27  ;;  %v6191_v50 = vsel %vm25_vm0, %v827_v27, %v829_v49  ;;  %839 = vst.msk [vmem:[#allocation2 + $0x58] sm:$0xff] %vm25_vm0, %v829_v49 }
 0x50a   :  { %9589 = vst [vmem:[#allocation7_spill] sm:$0xff] %v6187_v45  ;;  %837 = vst [vmem:[#allocation2 + $0x48] sm:$0xff] %v6187_v45  ;;  %v1057_v27 = vmul.f32 %v6154_v57, %v6187_v45  ;;  %v1058_v49 = vmul.f32 %v6154_v57, %v6191_v50 }
 0x50b   :  { %9590 = vst [vmem:[#allocation8_spill] sm:$0xff] %v6191_v50  ;;  %838 = vst [vmem:[#allocation2 + $0x50] sm:$0xff] %v6191_v50 }
 0x50c   :  { %v6195_v51 = vld [vmem:[#allocation2 + $0x40] sm:$0xff]  ;;  %v1143_v9 = vpop.permute.xlu0 %1142 }
 0x50d   :  { %9591 = vst [vmem:[#allocation9_spill] sm:$0xff] %v6195_v51  ;;  %884 = vrot.lane.b32.xlu1 %v6195_v51, %s5646_s25  ;;  %v1150_v34 = vsel %vm127_vm5, %v1143_v9, %v1135_v48  ;;  %v1146_v40 = vsel %vm127_vm5, %v1139_v8, %v1143_v9  ;;  %v1056_v48 = vmul.f32 %v6154_v57, %v6195_v51 }
 0x50e   :  { %v1178_v38 = vmul.f32 %v6177_v42, %v1150_v34  ;;  %v1180_v37 = vmul.f32 %v6177_v42, %v1146_v40  ;;  %v5482_v40 = vunpack.i.h.bf16 %v6127_v62 }
 0x510   :  { %v6201_v52 = vld [vmem:[#allocation2 + $0x58] sm:$0xff] }
 0x511   :  { %1114 = vrot.lane.b32.xlu1 %v6195_v51, %s5650_s28  ;;  %890 = vrot.lane.b32.xlu0 %v6201_v52, %s5646_s25  ;;  %v1059_v41 = vmul.f32 %v6154_v57, %v6201_v52 }
 0x515   :  { %1365 = vrot.lane.b32.xlu1 %v6201_v52, %s5666_s5  ;;  %1120 = vrot.lane.b32.xlu0 %v6201_v52, %s5650_s28  ;;  %v6211_v54 = vpop.permute.xlu1 %1287 }
 0x519   :  { %888 = vrot.lane.b32.xlu1 %v6191_v50, %s5646_s25  ;;  %886 = vrot.lane.b32.xlu0 %v6187_v45, %s5646_s25  ;;  %v1153_v29 = vpop.permute.xlu1 %1152  ;;  %v6283_v53 = vpop.permute.xlu0 %1283 }
 0x51d   :  { %1016 = vrot.lane.b32.xlu1 %v1002_v61, %s5650_s28  ;;  %1116 = vrot.lane.b32.xlu0 %v6187_v45, %s5650_s28  ;;  %v1157_v7 = vpop.permute.xlu1 %1156 }
 0x51e   :  { %v1166_v43 = vsel %vm137_vm6, %v1153_v29, %v1157_v7  ;;  %v6285_v61 = vpop.permute.xlu0 %1423 }
 0x51f   :  { %v1230_v36 = vmul.f32 %v6179_v44, %v1166_v43 }
 0x521   :  { %1070 = vrot.lane.b32.xlu1 %v1053_v0, %s5663_s11  ;;  %1014 = vrot.lane.b32.xlu0 %v1001_v3, %s5650_s28  ;;  %v1161_v1 = vpop.permute.xlu1 %1160 }
 0x522   :  { %v1164_v2 = vsel %vm137_vm6, %v1157_v7, %v1161_v1  ;;  %v1168_v8 = vsel %vm137_vm6, %v1161_v1, %v1153_v29  ;;  %v6287_v24 = vpop.permute.xlu0 %1382 }
 0x523   :  { %v1231_v35 = vmul.f32 %v6179_v44, %v1164_v2  ;;  %v1232_v42 = vmul.f32 %v6179_v44, %v1168_v8 }
 0x525   :  { %1118 = vrot.lane.b32.xlu1 %v6191_v50, %s5650_s28  ;;  %1363 = vrot.lane.b32.xlu0 %v6191_v50, %s5666_s5  ;;  %v6289_v29 = vpop.permute.xlu1 %1419 }
 0x526   :  { %v6291_v0 = vpop.permute.xlu0 %1386 }
 0x529   :  { %1361 = vrot.lane.b32.xlu1 %v6187_v45, %s5666_s5  ;;  %1072 = vrot.lane.b32.xlu0 %v1054_v23, %s5663_s11 }
 0x52a   :  { %v6293_v3 = vpop.permute.xlu1 %1471  ;;  %v6295_v44 = vpop.permute.xlu0 %1390 }
 0x52d   :  { %1074 = vrot.lane.b32.xlu1 %v1055_v59, %s5663_s11  ;;  %1192 = vrot.lane.b32.xlu0 %v1179_v33, %s5650_s28 }
 0x52e   :  { %v6297_v7 = vpop.permute.xlu1 %1475  ;;  %v6299_v23 = vpop.permute.xlu0 %1400 }
 0x531   :  { %1068 = vrot.lane.b32.xlu1 %v1052_v11, %s5663_s11  ;;  %1244 = vrot.lane.b32.xlu0 %v1231_v35, %s5650_s28 }
 0x532   :  { %v6303_v31 = vpop.permute.xlu0 %1404 }
 0x533   :  { %v6301_v57 = vpop.permute.xlu1 %857 }
 0x534   :  { %v865_v60 = vmul.f32 %v6301_v57, %v6187_v45  ;;  %v866_v5 = vmul.f32 %v6301_v57, %v6191_v50 }
 0x535   :  { %1190 = vrot.lane.b32.xlu1 %v1178_v38, %s5650_s28  ;;  %1082 = vrot.lane.b32.xlu0 %v1059_v41, %s5663_s11 }
 0x536   :  { %v6307_v59 = vpop.permute.xlu0 %1408 }
 0x537   :  { %v6305_v1 = vpop.permute.xlu1 %960 }
 0x539   :  { %1194 = vrot.lane.b32.xlu1 %v1180_v37, %s5650_s28  ;;  %1076 = vrot.lane.b32.xlu0 %v1056_v48, %s5663_s11 }
 0x53a   :  { %v6311_v9 = vpop.permute.xlu0 %852 }
 0x53b   :  { %v6309_v33 = vpop.permute.xlu1 %964  ;;  %v861_v15 = vmul.f32 %v6223_v63, %v6311_v9 }
 0x53d   :  { %1242 = vrot.lane.b32.xlu1 %v1230_v36, %s5650_s28  ;;  %1078 = vrot.lane.b32.xlu0 %v1057_v27, %s5663_s11 }
 0x53e   :  { %v6315_v34 = vpop.permute.xlu0 %962 }
 0x53f   :  { %v6313_v2 = vpop.permute.xlu1 %1012 }
 0x541   :  { %1246 = vrot.lane.b32.xlu1 %v1232_v42, %s5650_s28 }
 0x545   :  { %1080 = vrot.lane.b32.xlu1 %v1058_v49, %s5663_s11 }
 0x57f   :  { %v885_v11 = vpop.permute.xlu1 %884 }
 0x583   :  { %v1115_v35 = vpop.permute.xlu1 %1114  ;;  %v891_v38 = vpop.permute.xlu0 %890 }
 0x587   :  { %v1366_v41 = vpop.permute.xlu1 %1365  ;;  %v1121_v25 = vpop.permute.xlu0 %1120 }
 0x588   :  { %v1375_v37 = vsel %vm1369_vm15, %v1366_v41, %v5482_v40 }
 0x589   :  { %1392 = vrot.lane.b32.xlu1 %v1375_v37, %s5660_s8 }
 0x58b   :  { %v889_v43 = vpop.permute.xlu1 %888  ;;  %v887_v48 = vpop.permute.xlu0 %886 }
 0x58c   :  { %v895_v36 = vsel %vm25_vm0, %v885_v11, %v887_v48  ;;  %v896_v27 = vsel %vm25_vm0, %v887_v48, %v889_v43  ;;  %v897_v42 = vsel %vm25_vm0, %v889_v43, %v891_v38 }
 0x58d   :  { %1410 = vrot.lane.b32.xlu1 %v1375_v37, %s5661_s9  ;;  %924 = vrot.lane.b32.xlu0 %v895_v36, %s5661_s9 }
 0x58f   :  { %v6323_v8 = vpop.permute.xlu1 %1016  ;;  %v1117_v49 = vpop.permute.xlu0 %1116 }
 0x590   :  { %v1125_v11 = vsel %vm233_vm3, %v1115_v35, %v1117_v49  ;;  %v1291_v35 = vmul.f32 %v6233_v16, %v6283_v53 }
 0x591   :  { %906 = vrot.lane.b32.xlu1 %v895_v36, %s5660_s8  ;;  %928 = vrot.lane.b32.xlu0 %v896_v27, %s5661_s9 }
 0x593   :  { %v6328_v62 = vpop.permute.xlu1 %1070  ;;  %v6339_v48 = vpop.permute.xlu0 %1014 }
 0x594   :  { %v1024_v20 = vsel %vm233_vm3, %v6313_v2, %v6339_v48  ;;  %v1025_v22 = vsel %vm233_vm3, %v6339_v48, %v6323_v8 }
 0x595   :  { %910 = vrot.lane.b32.xlu1 %v896_v27, %s5660_s8  ;;  %932 = vrot.lane.b32.xlu0 %v897_v42, %s5661_s9  ;;  %v1294_v27 = vmul.f32 %v6211_v54, %v6187_v45 }
 0x597   :  { %v1119_v40 = vpop.permute.xlu1 %1118  ;;  %v1364_v36 = vpop.permute.xlu0 %1363 }
 0x598   :  { %v1126_v37 = vsel %vm233_vm3, %v1117_v49, %v1119_v40  ;;  %v1127_v38 = vsel %vm233_vm3, %v1119_v40, %v1121_v25  ;;  %v1296_v25 = vmul.f32 %v6211_v54, %v6201_v52  ;;  %v1374_v49 = vsel %vm1369_vm15, %v1364_v36, %v1366_v41 }
 0x599   :  { %914 = vrot.lane.b32.xlu1 %v897_v42, %s5660_s8  ;;  %1154 = vrot.lane.b32.xlu0 %v1125_v11, %s5661_s9  ;;  %v1416_v41 = vsel %vm137_vm6, %v6307_v59, %v6299_v23 }
 0x59b   :  { %v1362_v43 = vpop.permute.xlu1 %1361 }
 0x59c   :  { %v1373_v42 = vsel %vm1369_vm15, %v1362_v43, %v1364_v36  ;;  %v1295_v43 = vmul.f32 %v6211_v54, %v6191_v50  ;;  %v867_v50 = vmul.f32 %v6301_v57, %v6201_v52 }
 0x59d   :  { %1136 = vrot.lane.b32.xlu1 %v1125_v11, %s5660_s8  ;;  %1158 = vrot.lane.b32.xlu0 %v1126_v37, %s5661_s9  ;;  %v1396_v11 = vsel %vm127_vm5, %v6287_v24, %v6291_v0 }
 0x59e   :  { %v1427_v40 = vmul.f32 %v6289_v29, %v1396_v11 }
 0x5a1   :  { %1140 = vrot.lane.b32.xlu1 %v1126_v37, %s5660_s8  ;;  %1162 = vrot.lane.b32.xlu0 %v1127_v38, %s5661_s9  ;;  %v1290_v37 = vmul.f32 %v6223_v63, %v6283_v53 }
 0x5a5   :  { %1144 = vrot.lane.b32.xlu1 %v1127_v38, %s5660_s8  ;;  %1308 = vrot.lane.b32.xlu0 %v1291_v35, %s5676_s24  ;;  %v1480_v38 = vmul.f32 %v6293_v3, %v1416_v41  ;;  %v1292_v35 = vmul.f32 %v6241_v32, %v6283_v53 }
 0x5a9   :  { %1384 = vrot.lane.b32.xlu1 %v1373_v42, %s5660_s8  ;;  %1314 = vrot.lane.b32.xlu0 %v1294_v27, %s5676_s24  ;;  %v1394_v27 = vsel %vm127_vm5, %v6291_v0, %v6295_v44  ;;  %v1412_v0 = vsel %vm137_vm6, %v6303_v31, %v6307_v59 }
 0x5ad   :  { %1388 = vrot.lane.b32.xlu1 %v1374_v49, %s5660_s8  ;;  %1318 = vrot.lane.b32.xlu0 %v1296_v25, %s5676_s24 }
 0x5b1   :  { %1402 = vrot.lane.b32.xlu1 %v1373_v42, %s5661_s9  ;;  %1440 = vrot.lane.b32.xlu0 %v1427_v40, %s5650_s28 }
 0x5b5   :  { %1406 = vrot.lane.b32.xlu1 %v1374_v49, %s5661_s9  ;;  %1527 = vperm.xlu0 %5500, %v6073_v19   ;;  %v1398_v19 = vsel %vm127_vm5, %v6295_v44, %v6287_v24  ;;  %v1414_v24 = vsel %vm137_vm6, %v6299_v23, %v6303_v31  ;;  %v6408_v44 = vpop.permute.xlu1 %1074 }
 0x5b6   :  { %v1426_v36 = vmul.f32 %v6289_v29, %v1398_v19  ;;  %v1478_v42 = vmul.f32 %v6293_v3, %v1414_v24 }
 0x5b9   :  { %1306 = vrot.lane.b32.xlu1 %v1290_v37, %s5676_s24  ;;  %1494 = vrot.lane.b32.xlu0 %v1480_v38, %s5650_s28  ;;  %v6411_v23 = vpop.permute.xlu1 %1068 }
 0x5ba   :  { %5501 = vset.pattern.permute.xlu0 %v5652_v14  ;;  %v1428_v14 = vmul.f32 %v6289_v29, %v1394_v27  ;;  %v1479_v29 = vmul.f32 %v6293_v3, %v1412_v0  ;;  %v1084_v63 = vsel %vm330_vm8, %v6411_v23, %v6328_v62 }
 0x5bd   :  { %1310 = vrot.lane.b32.xlu1 %v1292_v35, %s5676_s24  ;;  %v6415_v25 = vpop.permute.xlu1 %1190 }
 0x5c1   :  { %1316 = vrot.lane.b32.xlu1 %v1295_v43, %s5676_s24  ;;  %v6419_v11 = vpop.permute.xlu1 %1194 }
 0x5c5   :  { %1438 = vrot.lane.b32.xlu1 %v1426_v36, %s5650_s28  ;;  %v6423_v59 = vpop.permute.xlu1 %1242 }
 0x5c9   :  { %1442 = vrot.lane.b32.xlu1 %v1428_v14, %s5650_s28  ;;  %v6427_v3 = vpop.permute.xlu1 %1246 }
 0x5cd   :  { %1523 = vperm.xlu1 %5499, %v6146_v6   ;;  %v6413_v6 = vpop.permute.xlu0 %1072  ;;  %v6431_v41 = vpop.permute.xlu1 %1080 }
 0x5d1   :  { %1490 = vrot.lane.b32.xlu1 %v1478_v42, %s5650_s28  ;;  %v6417_v49 = vpop.permute.xlu0 %1192 }
 0x5d2   :  { %5503 = vset.pattern.permute.xlu1 %v5656_v18 }
 0x5d5   :  { %1492 = vrot.lane.b32.xlu1 %v1479_v29, %s5650_s28  ;;  %v6421_v31 = vpop.permute.xlu0 %1244 }
 0x5d9   :  { %v6425_v18 = vpop.permute.xlu0 %1082 }
 0x5dd   :  { %v6429_v40 = vpop.permute.xlu0 %1076 }
 0x5e1   :  { %v6435_v38 = vpop.permute.xlu0 %1078 }
 0x5fb   :  { %v6433_v37 = vpop.permute.xlu1 %1392 }
 0x5ff   :  { %v6437_v35 = vpop.permute.xlu1 %1410  ;;  %v925_v43 = vpop.permute.xlu0 %924 }
 0x603   :  { %v907_v19 = vpop.permute.xlu1 %906  ;;  %v929_v36 = vpop.permute.xlu0 %928 }
 0x607   :  { %v911_v27 = vpop.permute.xlu1 %910  ;;  %v933_v24 = vpop.permute.xlu0 %932 }
 0x608   :  { %v919_v14 = vsel %vm127_vm5, %v907_v19, %v911_v27  ;;  %v935_v0 = vsel %vm137_vm6, %v929_v36, %v933_v24 }
 0x609   :  { %v952_v42 = vmul.f32 %v6131_v56, %v919_v14  ;;  %v1004_v30 = vmul.f32 %v6139_v58, %v935_v0 }
 0x60b   :  { %v915_v29 = vpop.permute.xlu1 %914  ;;  %968 = vrot.lane.b32.xlu1 %v952_v42, %s5650_s28  ;;  %v1155_v12 = vpop.permute.xlu0 %1154  ;;  %v937_v42 = vsel %vm137_vm6, %v925_v43, %v929_v36 }
 0x60c   :  { %v921_v28 = vsel %vm127_vm5, %v915_v29, %v907_v19  ;;  %v917_v21 = vsel %vm127_vm5, %v911_v27, %v915_v29  ;;  %v1003_v27 = vmul.f32 %v6139_v58, %v937_v42 }
 0x60d   :  { %v951_v55 = vmul.f32 %v6131_v56, %v921_v28  ;;  %v953_v26 = vmul.f32 %v6131_v56, %v917_v21 }
 0x60f   :  { %966 = vrot.lane.b32.xlu0 %v951_v55, %s5650_s28  ;;  %v1137_v14 = vpop.permute.xlu1 %1136  ;;  %1020 = vrot.lane.b32.xlu1 %v1004_v30, %s5650_s28  ;;  %v1159_v13 = vpop.permute.xlu0 %1158  ;;  %v939_v30 = vsel %vm137_vm6, %v933_v24, %v925_v43 }
 0x613   :  { %970 = vrot.lane.b32.xlu0 %v953_v26, %s5650_s28  ;;  %v1141_v19 = vpop.permute.xlu1 %1140  ;;  %v1163_v0 = vpop.permute.xlu0 %1162  ;;  %v1005_v26 = vmul.f32 %v6139_v58, %v939_v30 }
 0x614   :  { %v1149_v28 = vsel %vm127_vm5, %v1137_v14, %v1141_v19  ;;  %v1165_v21 = vsel %vm137_vm6, %v1159_v13, %v1163_v0 }
 0x615   :  { %v1182_v55 = vmul.f32 %v6181_v46, %v1149_v28  ;;  %v1234_v36 = vmul.f32 %v6183_v47, %v1165_v21  ;;  %v1169_v21 = vsel %vm137_vm6, %v1163_v0, %v1155_v12 }
 0x617   :  { %v1145_v56 = vpop.permute.xlu1 %1144  ;;  %1018 = vrot.lane.b32.xlu0 %v1003_v27, %s5650_s28  ;;  %1198 = vrot.lane.b32.xlu1 %v1182_v55, %s5650_s28  ;;  %v1167_v55 = vsel %vm137_vm6, %v1155_v12, %v1159_v13 }
 0x618   :  { %v1151_v29 = vsel %vm127_vm5, %v1145_v56, %v1137_v14  ;;  %v1147_v24 = vsel %vm127_vm5, %v1141_v19, %v1145_v56  ;;  %v1233_v19 = vmul.f32 %v6183_v47, %v1167_v55 }
 0x619   :  { %v1181_v43 = vmul.f32 %v6181_v46, %v1151_v29  ;;  %v1183_v27 = vmul.f32 %v6181_v46, %v1147_v24 }
 0x61b   :  { %v1385_v42 = vpop.permute.xlu1 %1384  ;;  %1022 = vrot.lane.b32.xlu0 %v1005_v26, %s5650_s28  ;;  %1250 = vrot.lane.b32.xlu1 %v1234_v36, %s5650_s28  ;;  %v1235_v26 = vmul.f32 %v6183_v47, %v1169_v21 }
 0x61c   :  { %v1399_v36 = vsel %vm127_vm5, %v6433_v37, %v1385_v42 }
 0x61d   :  { %v1429_v12 = vmul.f32 %v6285_v61, %v1399_v36 }
 0x61f   :  { %v1389_v28 = vpop.permute.xlu1 %1388  ;;  %1196 = vrot.lane.b32.xlu0 %v1181_v43, %s5650_s28  ;;  %v6509_v43 = vld [vmem:[#allocation2] sm:$0xff] }
 0x620   :  { %v1397_v58 = vsel %vm127_vm5, %v1385_v42, %v1389_v28  ;;  %v1395_v47 = vsel %vm127_vm5, %v1389_v28, %v6433_v37  ;;  %v1297_v24 = vmul.f32 %v6509_v43, %v6211_v54 }
 0x621   :  { %v1430_v14 = vmul.f32 %v6285_v61, %v1397_v58  ;;  %v1431_v42 = vmul.f32 %v6285_v61, %v1395_v47  ;;  %v1293_v61 = vmul.f32 %v6509_v43, %v6283_v53  ;;  %v860_v47 = vmul.f32 %v6249_v10, %v6311_v9 }
 0x622   :  { %v973_v10 = vsel %vm233_vm3, %v6315_v34, %v6309_v33 }
 0x623   :  { %v1403_v30 = vpop.permute.xlu1 %1402  ;;  %1200 = vrot.lane.b32.xlu0 %v1183_v27, %s5650_s28  ;;  %1446 = vrot.lane.b32.xlu1 %v1430_v14, %s5650_s28  ;;  %v6527_v27 = vpop.permute.xlu0 %1308 }
 0x624   :  { %v1417_v29 = vsel %vm137_vm6, %v6437_v35, %v1403_v30 }
 0x625   :  { %v1483_v0 = vmul.f32 %v6297_v7, %v1417_v29 }
 0x627   :  { %v1407_v56 = vpop.permute.xlu1 %1406  ;;  %1248 = vrot.lane.b32.xlu0 %v1233_v19, %s5650_s28  ;;  %v6531_v14 = vpop.permute.xlu0 %1314 }
 0x628   :  { %v1415_v46 = vsel %vm137_vm6, %v1403_v30, %v1407_v56  ;;  %v1413_v58 = vsel %vm137_vm6, %v1407_v56, %v6437_v35 }
 0x629   :  { %v1481_v13 = vmul.f32 %v6297_v7, %v1415_v46  ;;  %v1482_v37 = vmul.f32 %v6297_v7, %v1413_v58  ;;  %v864_v58 = vmul.f32 %v6301_v57, %v6195_v51  ;;  %v1087_v57 = vsel %vm330_vm8, %v6429_v40, %v6435_v38 }
 0x62b   :  { %1252 = vrot.lane.b32.xlu0 %v1235_v26, %s5650_s28  ;;  %1496 = vrot.lane.b32.xlu1 %v1481_v13, %s5650_s28  ;;  %v6523_v28 = vpop.permute.xlu1 %1306  ;;  %v6535_v7 = vpop.permute.xlu0 %1318 }
 0x62f   :  { %1444 = vrot.lane.b32.xlu0 %v1429_v12, %s5650_s28  ;;  %1500 = vrot.lane.b32.xlu1 %v1483_v0, %s5650_s28  ;;  %v6525_v54 = vpop.permute.xlu1 %1310  ;;  %v6539_v19 = vpop.permute.xlu0 %1440 }
 0x633   :  { %1448 = vrot.lane.b32.xlu0 %v1431_v42, %s5650_s28  ;;  %1320 = vrot.lane.b32.xlu1 %v1297_v24, %s5676_s24  ;;  %v6529_v35 = vpop.permute.xlu1 %1316  ;;  %v6543_v21 = vpop.permute.xlu0 %1527 }
 0x637   :  { %1498 = vrot.lane.b32.xlu0 %v1482_v37, %s5650_s28  ;;  %v6533_v55 = vpop.permute.xlu1 %1438  ;;  %v6547_v46 = vpop.permute.xlu0 %1494  ;;  %v972_v37 = vsel %vm233_vm3, %v6305_v1, %v6315_v34  ;;  %v863_v34 = vmul.f32 %v6241_v32, %v6311_v9  ;;  %v1085_v32 = vsel %vm330_vm8, %v6328_v62, %v6413_v6  ;;  %v1202_v62 = vsel %vm233_vm3, %v6415_v25, %v6417_v49 }
 0x63b   :  { %1312 = vrot.lane.b32.xlu0 %v1293_v61, %s5676_s24  ;;  %v6537_v30 = vpop.permute.xlu1 %1442  ;;  %v984_v61 = vadd.f32 %v6305_v1, %v860_v47  ;;  %v862_v1 = vmul.f32 %v6233_v16, %v6311_v9  ;;  %v985_v47 = vadd.f32 %v972_v37, %v861_v15  ;;  %v1086_v9 = vsel %vm330_vm8, %v6413_v6, %v6408_v44 }
 0x63d   :  { %v1036_v39 = vadd.f32 %v6313_v2, %v984_v61  ;;  %v986_v15 = vadd.f32 %v973_v10, %v862_v1  ;;  %v1037_v37 = vadd.f32 %v1024_v20, %v985_v47 }
 0x63f   :  { %v1098_v2 = vadd.f32 %v1084_v63, %v1036_v39  ;;  %v1038_v48 = vadd.f32 %v1025_v22, %v986_v15  ;;  %v1099_v1 = vadd.f32 %v1085_v32, %v1037_v37  ;;  %v1203_v22 = vsel %vm233_vm3, %v6417_v49, %v6419_v11 }
 0x640   :  { %v1255_v49 = vsel %vm233_vm3, %v6421_v31, %v6427_v3 }
 0x641   :  { %v1100_v47 = vadd.f32 %v1086_v9, %v1038_v48 }
 0x648   :  { %v6541_v53 = vpop.permute.xlu1 %1523 }
 0x64c   :  { %v6545_v56 = vpop.permute.xlu1 %1490 }
 0x650   :  { %v6549_v26 = vpop.permute.xlu1 %1492 }
 0x67d   :  { %v969_v36 = vpop.permute.xlu1 %968 }
 0x681   :  { %v967_v13 = vpop.permute.xlu0 %966  ;;  %v1021_v0 = vpop.permute.xlu1 %1020 }
 0x682   :  { %v988_v4 = vadd.f32 %v967_v13, %v864_v58  ;;  %v974_v51 = vsel %vm233_vm3, %v967_v13, %v969_v36 }
 0x683   :  { %v989_v61 = vadd.f32 %v974_v51, %v865_v60  ;;  %v1254_v60 = vsel %vm233_vm3, %v6423_v59, %v6421_v31  ;;  %v1216_v51 = vadd.f32 %v1203_v22, %v1100_v47  ;;  %v1323_v31 = vsel %vm1322_vm12, %v6523_v28, %v6527_v27 }
 0x685   :  { %v971_v29 = vpop.permute.xlu0 %970 }
 0x689   :  { %v1019_v12 = vpop.permute.xlu0 %1018  ;;  %v1199_v24 = vpop.permute.xlu1 %1198 }
 0x68a   :  { %v1040_v58 = vadd.f32 %v1019_v12, %v988_v4  ;;  %v975_v4 = vsel %vm233_vm3, %v969_v36, %v971_v29  ;;  %v1026_v20 = vsel %vm233_vm3, %v1019_v12, %v1021_v0  ;;  %v987_v36 = vadd.f32 %v6309_v33, %v863_v34 }
 0x68b   :  { %v990_v10 = vadd.f32 %v975_v4, %v866_v5  ;;  %v1214_v12 = vadd.f32 %v6415_v25, %v1098_v2  ;;  %v1041_v63 = vadd.f32 %v1026_v20, %v989_v61  ;;  %v1324_v2 = vsel %vm1322_vm12, %v6527_v27, %v6525_v54 }
 0x68c   :  { %v1102_v13 = vadd.f32 %v1087_v57, %v1040_v58  ;;  %v1215_v58 = vadd.f32 %v1202_v62, %v1099_v1  ;;  %v1039_v62 = vadd.f32 %v6323_v8, %v987_v36  ;;  %v1450_v8 = vsel %vm233_vm3, %v6533_v55, %v6539_v19 }
 0x68d   :  { %v1023_v42 = vpop.permute.xlu0 %1022  ;;  %v1251_v45 = vpop.permute.xlu1 %1250  ;;  %v1266_v34 = vadd.f32 %v6423_v59, %v1214_v12  ;;  %v1502_v36 = vsel %vm233_vm3, %v6545_v56, %v6549_v26 }
 0x68e   :  { %v1027_v23 = vsel %vm233_vm3, %v1021_v0, %v1023_v42  ;;  %v991_v0 = vadd.f32 %v971_v29, %v867_v50  ;;  %v1088_v50 = vsel %vm330_vm8, %v6435_v38, %v6431_v41  ;;  %v1089_v29 = vsel %vm330_vm8, %v6431_v41, %v6425_v18 }
 0x68f   :  { %v1042_v33 = vadd.f32 %v1027_v23, %v990_v10  ;;  %v1267_v59 = vadd.f32 %v1254_v60, %v1215_v58  ;;  %v1337_v61 = vadd.f32 %v6523_v28, %v1266_v34  ;;  %v1451_v28 = vsel %vm233_vm3, %v6539_v19, %v6537_v30 }
 0x690   :  { %v1043_v15 = vadd.f32 %v1023_v42, %v991_v0  ;;  %v1103_v42 = vadd.f32 %v1088_v50, %v1041_v63 }
 0x691   :  { %v1197_v17 = vpop.permute.xlu0 %1196  ;;  %v1104_v9 = vadd.f32 %v1089_v29, %v1042_v33  ;;  %v1338_v10 = vadd.f32 %v1323_v31, %v1267_v59 }
 0x692   :  { %v1218_v40 = vadd.f32 %v1197_v17, %v1102_v13  ;;  %v1204_v4 = vsel %vm233_vm3, %v1197_v17, %v1199_v24  ;;  %v1268_v17 = vadd.f32 %v1255_v49, %v1216_v51  ;;  %v1101_v51 = vadd.f32 %v6408_v44, %v1039_v62 }
 0x693   :  { %v1219_v48 = vadd.f32 %v1204_v4, %v1103_v42 }
 0x694   :  { %v1339_v27 = vadd.f32 %v1324_v2, %v1268_v17  ;;  %v1217_v4 = vadd.f32 %v6419_v11, %v1101_v51  ;;  %v6719_v51 = vld [vmem:[#allocation2 + $0x20] sm:$0xff] }
 0x695   :  { %v1201_v16 = vpop.permute.xlu0 %1200  ;;  %v1447_v6 = vpop.permute.xlu1 %1446 }
 0x696   :  { %v1205_v32 = vsel %vm233_vm3, %v1199_v24, %v1201_v16  ;;  %v1105_v24 = vadd.f32 %v6425_v18, %v1043_v15  ;;  %v1327_v18 = vsel %vm1322_vm12, %v6529_v35, %v6535_v7  ;;  %v1464_v58 = vadd.f32 %v1451_v28, %v1339_v27 }
 0x697   :  { %v1220_v20 = vadd.f32 %v1205_v32, %v1104_v9  ;;  %v1269_v44 = vadd.f32 %v6427_v3, %v1217_v4 }
 0x698   :  { %v1221_v47 = vadd.f32 %v1201_v16, %v1105_v24  ;;  %v1462_v16 = vadd.f32 %v6533_v55, %v1337_v61  ;;  %v1463_v55 = vadd.f32 %v1450_v8, %v1338_v10 }
 0x699   :  { %v1249_v39 = vpop.permute.xlu0 %1248 }
 0x69a   :  { %v1270_v5 = vadd.f32 %v1249_v39, %v1218_v40  ;;  %v1256_v38 = vsel %vm233_vm3, %v1249_v39, %v1251_v45  ;;  %v1514_v34 = vadd.f32 %v6545_v56, %v1462_v16  ;;  %v1515_v49 = vadd.f32 %v1502_v36, %v1463_v55  ;;  %v6701_v55 = vld [vmem:[#allocation2 + $0x18] sm:$0xff] }
 0x69b   :  { %v1271_v39 = vadd.f32 %v1256_v38, %v1219_v48 }
 0x69c   :  { %v1341_v41 = vadd.f32 %v6531_v14, %v1270_v5  ;;  %v1530_v56 = vadd.f32 %v6541_v53, %v1514_v34  ;;  %v1531_v9 = vadd.f32 %v6541_v53, %v1515_v49  ;;  %v5679_v34 = vmov 22   ;;  %v6748_v49 = vld [vmem:[%s9456_s1 + $0x10] sm:$0xff] }
 0x69d   :  { %v1497_v37 = vpop.permute.xlu1 %1496  ;;  %v1253_v25 = vpop.permute.xlu0 %1252 }
 0x69e   :  { %v1257_v57 = vsel %vm233_vm3, %v1251_v45, %v1253_v25  ;;  %v1326_v45 = vsel %vm1322_vm12, %v6531_v14, %v6529_v35  ;;  %v1503_v14 = vsel %vm233_vm3, %v6549_v26, %v6547_v46  ;;  %v1273_v40 = vadd.f32 %v1253_v25, %v1221_v47 }
 0x69f   :  { %v1272_v22 = vadd.f32 %v1257_v57, %v1220_v20  ;;  %v1342_v60 = vadd.f32 %v1326_v45, %v1271_v39  ;;  %v1516_v15 = vadd.f32 %v1503_v14, %v1464_v58  ;;  %v9593_v58 = vld [vmem:[#allocation9_spill] sm:$0xff] }
 0x6a1   :  { %v1501_v23 = vpop.permute.xlu1 %1500  ;;  %v1445_v13 = vpop.permute.xlu0 %1444  ;;  %v1343_v5 = vadd.f32 %v1327_v18, %v1272_v22  ;;  %v1532_v2 = vadd.f32 %v6541_v53, %v1516_v15 }
 0x6a2   :  { %v1466_v1 = vadd.f32 %v1445_v13, %v1341_v41  ;;  %v1452_v0 = vsel %vm233_vm3, %v1445_v13, %v1447_v6 }
 0x6a3   :  { %v1467_v25 = vadd.f32 %v1452_v0, %v1342_v60  ;;  %v9594_v60 = vld [vmem:[#allocation7_spill] sm:$0xff] }
 0x6a4   :  { %v1518_v63 = vadd.f32 %v1497_v37, %v1466_v1 }
 0x6a5   :  { %v1321_v35 = vpop.permute.xlu1 %1320  ;;  %v1449_v12 = vpop.permute.xlu0 %1448 }
 0x6a6   :  { %v1328_v33 = vsel %vm1322_vm12, %v6535_v7, %v1321_v35  ;;  %v1453_v19 = vsel %vm233_vm3, %v1447_v6, %v1449_v12  ;;  %v1534_v7 = vadd.f32 %v6543_v21, %v1518_v63  ;;  %v9592_v63 = vmov 6  }
 0x6a7   :  { %v1344_v26 = vadd.f32 %v1328_v33, %v1273_v40  ;;  %v1468_v50 = vadd.f32 %v1453_v19, %v1343_v5  ;;  %v6693_v33 = vld [vmem:[#allocation2 + $0x8] sm:$0xff]  ;;  %v6697_v19 = vld [vmem:[#allocation2 + $0x10] sm:$0xff] }
 0x6a8   :  { %v1538_v41 = vpack.c.bf16 %v1534_v7, %v1530_v56  ;;  %v9595_v5 = vld [vmem:[#allocation8_spill] sm:$0xff] }
 0x6a9   :  { %v1499_v29 = vpop.permute.xlu0 %1498  ;;  %v1469_v42 = vadd.f32 %v1449_v12, %v1344_v26  ;;  %v5680_v26 = vmov 20  }
 0x6aa   :  { %v1504_v6 = vsel %vm233_vm3, %v1497_v37, %v1499_v29  ;;  %v1505_v32 = vsel %vm233_vm3, %v1499_v29, %v1501_v23  ;;  %v1542_v1 = vunpack.c.l.bf16 %v1538_v41  ;;  %v1546_v27 = vunpack.c.h.bf16 %v1538_v41 }
 0x6ab   :  { %v1519_v59 = vadd.f32 %v1504_v6, %v1467_v25  ;;  %v1520_v31 = vadd.f32 %v1505_v32, %v1468_v50  ;;  %v1521_v3 = vadd.f32 %v1501_v23, %v1469_v42 }
 0x6ac   :  { %v1550_v16 = vsub.f32 %v1530_v56, %v1542_v1  ;;  %v1554_v36 = vsub.f32 %v1534_v7, %v1546_v27  ;;  %v1562_v7 = vld [vmem:[%s9458_s2 + $0x4] sm:$0xf] }
 0x6ad   :  { %v1535_v38 = vadd.f32 %v6543_v21, %v1519_v59  ;;  %v1536_v11 = vadd.f32 %v6543_v21, %v1520_v31  ;;  %v1313_v57 = vpop.permute.xlu0 %1312  ;;  %v9596_v59 = vmov 0  }
 0x6ae   :  { %v1325_v37 = vsel %vm1322_vm12, %v6525_v54, %v1313_v57  ;;  %v1537_v54 = vadd.f32 %v6543_v21, %v1521_v3  ;;  %v1558_v35 = vpack.c.bf16 %v1554_v36, %v1550_v16  ;;  %v5504_v21 = vpack.i.bf16 %v6509_v43, %v6509_v43 }
 0x6af   :  { %v1539_v17 = vpack.c.bf16 %v1535_v38, %v1531_v9  ;;  %v1540_v48 = vpack.c.bf16 %v1536_v11, %v1532_v2  ;;  %v1340_v24 = vadd.f32 %v1325_v37, %v1269_v44 }
 0x6b1   :  { %v1547_v20 = vunpack.c.h.bf16 %v1539_v17  ;;  %v1548_v13 = vunpack.c.h.bf16 %v1540_v48  ;;  %v1465_v62 = vadd.f32 %v6537_v30, %v1340_v24  ;;  %v1544_v61 = vunpack.c.l.bf16 %v1540_v48 }
 0x6b2   :  { %v1543_v10 = vunpack.c.l.bf16 %v1539_v17 }
 0x6b3   :  { %v1555_v47 = vsub.f32 %v1535_v38, %v1547_v20  ;;  %v1556_v39 = vsub.f32 %v1536_v11, %v1548_v13  ;;  %v1517_v22 = vadd.f32 %v6547_v46, %v1465_v62  ;;  %v1552_v45 = vsub.f32 %v1532_v2, %v1544_v61  ;;  %v1563_v38 = vld [vmem:[%s9459_s3 + $0x4] sm:$0xf] }
 0x6b4   :  { %v1551_v18 = vsub.f32 %v1531_v9, %v1543_v10 }
 0x6b5   :  { %v1533_v8 = vadd.f32 %v6541_v53, %v1517_v22  ;;  %v1560_v28 = vpack.c.bf16 %v1556_v39, %v1552_v45  ;;  %v6683_v53 = vld [vmem:[%s9457_s4] sm:$0xff] }
 0x6b6   :  { %v1559_v23 = vpack.c.bf16 %v1555_v47, %v1551_v18 }
 0x6b7   :  { %v1541_v14 = vpack.c.bf16 %v1537_v54, %v1533_v8  ;;  %1572 = vrot.lane.b32.xlu1 %v1560_v28, %s5646_s25 }
 0x6b8   :  { %1570 = vrot.lane.b32.xlu0 %v1559_v23, %s5646_s25 }
 0x6b9   :  { %v1545_v30 = vunpack.c.l.bf16 %v1541_v14  ;;  %v1549_v40 = vunpack.c.h.bf16 %v1541_v14 }
 0x6bb   :  { %v1553_v12 = vsub.f32 %v1533_v8, %v1545_v30  ;;  %v1557_v46 = vsub.f32 %v1537_v54, %v1549_v40  ;;  %v9597_v30 = vld [vmem:[#allocation4_spill] sm:$0xff] }
 0x6bc   :  { %1568 = vrot.lane.b32.xlu0 %v1558_v35, %s5646_s25 }
 0x6bd   :  { %v1561_v0 = vpack.c.bf16 %v1557_v46, %v1553_v12 }
 0x6bf   :  { %1574 = vrot.lane.b32.xlu1 %v1561_v0, %s5646_s25 }
 0x6c0   :  { %1673 = vrot.lane.b32.xlu0 %v1539_v17, %s5646_s25 }
 0x6c3   :  { %1675 = vrot.lane.b32.xlu1 %v1540_v48, %s5646_s25 }
 0x6c4   :  { %1671 = vrot.lane.b32.xlu0 %v1538_v41, %s5646_s25 }
 0x6c7   :  { %1677 = vrot.lane.b32.xlu1 %v1541_v14, %s5646_s25 }
 0x6c8   :  { %1856 = vperm.xlu0 %5501, %v6683_v53  }
 0x6cb   :  { %1906 = vperm.xlu1 %5503, %v6683_v53  }
 0x6cc   :  { %5502 = vset.pattern.permute.xlu0 %v9592_v63 }
 0x6cd   :  { %1896 = vperm.xlu0 %5502, %v6683_v53  }
 0x6cf   :  { %5505 = vrot.lane.b32.xlu1 %v5504_v21, %s5677_s29 }
 0x6d0   :  { %5515 = vset.pattern.permute.xlu1 %v5679_v34 }
 0x6d1   :  { %1993 = vrot.lane.b32.xlu0 %v6693_v33, %s5677_s29 }
 0x6d2   :  { %5514 = vset.pattern.permute.xlu0 %v5680_v26 }
 0x6d3   :  { %1995 = vrot.lane.b32.xlu1 %v6697_v19, %s5677_s29 }
 0x6d5   :  { %1997 = vrot.lane.b32.xlu0 %v6701_v55, %s5677_s29 }
 0x6d7   :  { %1999 = vrot.lane.b32.xlu1 %v6509_v43, %s5677_s29 }
 0x6d9   :  { %2001 = vrot.lane.b32.xlu0 %v9593_v58, %s5677_s29 }
 0x6db   :  { %2003 = vrot.lane.b32.xlu1 %v9594_v60, %s5677_s29 }
 0x6dd   :  { %2005 = vrot.lane.b32.xlu0 %v9595_v5, %s5677_s29 }
 0x6df   :  { %2360 = vrot.lane.b32.xlu1 %v6693_v33, %s5650_s28 }
 0x6e1   :  { %2362 = vrot.lane.b32.xlu0 %v6697_v19, %s5650_s28 }
 0x6e3   :  { %2364 = vrot.lane.b32.xlu1 %v6701_v55, %s5650_s28 }
 0x6e5   :  { %2366 = vrot.lane.b32.xlu0 %v6719_v51, %s5650_s28 }
 0x6e7   :  { %2368 = vrot.lane.b32.xlu1 %v9593_v58, %s5650_s28 }
 0x6e9   :  { %2370 = vrot.lane.b32.xlu0 %v9594_v60, %s5650_s28 }
 0x6eb   :  { %2372 = vrot.lane.b32.xlu1 %v9595_v5, %s5650_s28 }
 0x6ed   :  { %2374 = vrot.lane.b32.xlu0 %v6201_v52, %s5650_s28 }
 0x6ef   :  { %2729 = vrot.lane.b32.xlu1 %v6697_v19, %s5678_s30 }
 0x6f1   :  { %5510 = vrot.lane.b32.xlu0 %v5504_v21, %s5678_s30  ;;  %v9598_v21 = vld [vmem:[#allocation5_spill] sm:$0xff] }
 0x6f3   :  { %2733 = vrot.lane.b32.xlu1 %v6719_v51, %s5678_s30 }
 0x6f5   :  { %2731 = vrot.lane.b32.xlu0 %v6701_v55, %s5678_s30 }
 0x6f7   :  { %2739 = vrot.lane.b32.xlu1 %v9595_v5, %s5678_s30 }
 0x6f9   :  { %2737 = vrot.lane.b32.xlu0 %v9594_v60, %s5678_s30  ;;  %v9599_v60 = vld [vmem:[#allocation6_spill] sm:$0xff] }
 0x6fb   :  { %2743 = vrot.lane.b32.xlu1 %v6509_v43, %s5678_s30 }
 0x6fd   :  { %2741 = vrot.lane.b32.xlu0 %v6201_v52, %s5678_s30 }
 0x6ff   :  { %2174 = vperm.xlu1 %5515, %v6748_v49  }
 0x701   :  { %2096 = vperm.xlu0 %5514, %v6748_v49  }
 0x703   :  { %5516 = vset.pattern.permute.xlu1 %v5680_v26 }
 0x729   :  { %v1573_v15 = vpop.permute.xlu1 %1572 }
 0x72a   :  { %v1571_v25 = vpop.permute.xlu0 %1570 }
 0x72b   :  { %v1578_v50 = vsel %vm25_vm0, %v1571_v25, %v1573_v15 }
 0x72c   :  { %1600 = vmatprep.subr.bf16.mxu0 %v1578_v50 }
 0x72e   :  { %v1569_v29 = vpop.permute.xlu0 %1568 }
 0x72f   :  { %v1577_v4 = vsel %vm25_vm0, %v1569_v29, %v1571_v25 }
 0x730   :  { %1601 = vmatpush1.bf16.msra.mxu0 %v1577_v4 }
 0x731   :  { %v1575_v6 = vpop.permute.xlu1 %1574 }
 0x732   :  { %v1579_v52 = vsel %vm25_vm0, %v1573_v15, %v1575_v6  ;;  %v1674_v32 = vpop.permute.xlu0 %1673 }
 0x733   :  { %5274 = vmatmul.mubr.msk.bf16.vlgmr.msra.gmra.mxu0 %vm350_vm4, %v1562_v7  ;;  %5344 = vmatpush3.bf16.msra.mxu1 %v1579_v52 }
 0x734   :  { %1717 = vmatprep.mubr.bf16.mxu0 %v9596_v59  ;;  %5349 = vmatprep.subr.bf16.mxu1 %v6509_v43 }
 0x735   :  { %v1676_v31 = vpop.permute.xlu1 %1675 }
 0x736   :  { %v1672_v44 = vpop.permute.xlu0 %1671  ;;  %5346 = vmatmul.mubr.msk.bf16.vlgmr.msra.gmra.mxu1 %vm350_vm4, %v1562_v7  ;;  %v1680_v56 = vsel %vm25_vm0, %v1674_v32, %v1676_v31 }
 0x737   :  { %v1679_v42 = vsel %vm25_vm0, %v1672_v44, %v1674_v32  ;;  %1699 = vmatprep.subr.bf16.mxu0 %v1680_v56  ;;  %5351 = vmatprep.mubr.msk.bf16.mxu1 %vm5664_vm9, %v6509_v43  ;;  %v6804_v32 = vld [vmem:[%s9456_s1 + $0x8] sm:$0xff]  ;;  %v6812_v44 = vld [vmem:[%s9456_s1] sm:$0xff] }
 0x738   :  { %1700 = vmatpush1.bf16.msra.mxu0 %v1679_v42 }
 0x739   :  { %v1678_v9 = vpop.permute.xlu1 %1677  ;;  %1783 = vmatprep.subr.bf16.mxu0 %v1680_v56 }
 0x73a   :  { %v1681_v2 = vsel %vm25_vm0, %v1676_v31, %v1678_v9 }
 0x73b   :  { %5276 = vmatmul.mubr.msk.bf16.vlgmr.msra.gmra.mxu0 %vm350_vm4, %v1562_v7  ;;  %5350 = vmatpush3.bf16.msra.mxu1 %v1681_v2 }
 0x73c   :  { %1784 = vmatpush1.bf16.msra.mxu0 %v1679_v42  ;;  %5355 = vmatprep.subr.bf16.mxu1 %v6509_v43 }
 0x73d   :  { %1801 = vmatprep.mubr.bf16.mxu0 %v9596_v59 }
 0x73e   :  { %5352 = vmatmul.mubr.msk.bf16.vlgmr.msra.gmra.mxu1 %vm350_vm4, %v1562_v7 }
 0x73f   :  { %5356 = vmatpush3.bf16.msra.mxu1 %v1681_v2  ;;  %5357 = vmatprep.mubr.msk.bf16.mxu1 %vm5664_vm9, %v6509_v43 }
 0x740   :  { %5361 = vmatprep.subr.bf16.mxu1 %v6509_v43 }
 0x743   :  { %5278 = vmatmul.mubr.msk.bf16.vlgmr.msra.gmra.mxu0 %vm350_vm4, %v1563_v38  ;;  %v1857_v18 = vpop.permute.xlu0 %1856 }
 0x744   :  { %3127 = vmatprep.mubr.bf16.mxu0 %v9596_v59 }
 0x746   :  { %5358 = vmatmul.mubr.msk.bf16.vlgmr.msra.gmra.mxu1 %vm350_vm4, %v1563_v38  ;;  %v6799_v52 = vpop.permute.xlu1 %1906  ;;  %v5681_v38 = vmov 23   ;;  %vm2753_vm4 = vcmask 588800  }
 0x747   :  { %5365 = vmatprep.mubr.msk.bf16.mxu1 %vm5664_vm9, %v6509_v43 }
 0x748   :  { %v6806_v31 = vpop.permute.xlu0 %1896 }
 0x74a   :  { %v6814_v56 = vpop.permute.xlu1 %5505 }
 0x74b   :  { %v5508_v9 = vunpack.i.h.bf16 %v6814_v56 }
 0x74c   :  { %v1994_v42 = vpop.permute.xlu0 %1993 }
 0x74e   :  { %v1996_v2 = vpop.permute.xlu1 %1995 }
 0x7f3   :  { %v1620_v11 = vpop.f32.mrf.mxu0 }
 0x7f5   :  { %v1622_v57 = vpop.f32.mrf.mxu0 }
 0x7f6   :  { %v1661_v41 = vpop.f32.mrf.mxu1 }
 0x7f7   :  { %v1624_v37 = vpop.f32.mrf.mxu0 }
 0x7f8   :  { %v5347_v17 = vpop.f32.mrf.mxu1  ;;  %v5682_v37 = vmov 24  }
 0x7f9   :  { %v1625_v48 = vpop.f32.mrf.mxu0 }
 0x7fa   :  { %v1664_v24 = vpop.f32.mrf.mxu1  ;;  %v2016_v48 = vsel %vm469_vm11, %v1994_v42, %v1996_v2 }
 0x7fb   :  { %v1719_v3 = vpop.f32.mrf.mxu0 }
 0x7fc   :  { %v5348_v20 = vpop.f32.mrf.mxu1  ;;  %v1720_v27 = vadd.f32 %v1719_v3, %v1620_v11  ;;  %v1998_v11 = vpop.permute.xlu0 %1997 }
 0x7fd   :  { %v1721_v13 = vpop.f32.mrf.mxu0 }
 0x7fe   :  { %v1760_v62 = vpop.f32.mrf.mxu1  ;;  %v1722_v22 = vadd.f32 %v1721_v13, %v1622_v57  ;;  %v2015_v57 = vsel %vm469_vm11, %v5508_v9, %v1994_v42  ;;  %v9600_v42 = vmov 5  }
 0x7ff   :  { %v1723_v61 = vpop.f32.mrf.mxu0  ;;  %v1761_v54 = vadd.f32 %v1760_v62, %v1661_v41  ;;  %v2000_v41 = vpop.permute.xlu1 %1999 }
 0x800   :  { %v5353_v10 = vpop.f32.mrf.mxu1  ;;  %v2002_v17 = vpop.permute.xlu0 %2001  ;;  %v5683_v61 = vmov 25  }
 0x801   :  { %v1724_v1 = vpop.f32.mrf.mxu0  ;;  %v2018_v24 = vsel %vm469_vm11, %v2000_v41, %v2002_v17 }
 0x802   :  { %v1763_v47 = vpop.f32.mrf.mxu1 }
 0x803   :  { %v1803_v39 = vpop.f32.mrf.mxu0  ;;  %v2004_v3 = vpop.permute.xlu1 %2003 }
 0x804   :  { %v1850_v45 = vadd.f32 %v1803_v39, %v1720_v27  ;;  %v5354_v43 = vpop.f32.mrf.mxu1  ;;  %v2019_v20 = vsel %vm469_vm11, %v2002_v17, %v2004_v3  ;;  %v2006_v13 = vpop.permute.xlu0 %2005  ;;  %v5684_v39 = vmov 27  }
 0x805   :  { %v1805_v8 = vpop.f32.mrf.mxu0  ;;  %v2020_v62 = vsel %vm469_vm11, %v2004_v3, %v2006_v13 }
 0x806   :  { %v6784_v28 = vadd.f32 %v1857_v18, %v1850_v45  ;;  %v1851_v23 = vadd.f32 %v1805_v8, %v1722_v22  ;;  %v1844_v16 = vpop.f32.mrf.mxu1 }
 0x807   :  { %v1852_v36 = vadd.f32 %v1844_v16, %v1761_v54  ;;  %v1807_v14 = vpop.f32.mrf.mxu0  ;;  %v2361_v10 = vpop.permute.xlu1 %2360  ;;  %v5685_v54 = vmov 26  }
 0x808   :  { %v1862_v40 = vmul.f32 %v6784_v28, %v9597_v30  ;;  %v6788_v35 = vadd.f32 %v1857_v18, %v1851_v23  ;;  %v5359_v12 = vpop.f32.mrf.mxu1  ;;  %v2363_v1 = vpop.permute.xlu0 %2362 }
 0x809   :  { %v6790_v46 = vadd.f32 %v1857_v18, %v1852_v36  ;;  %v1808_v0 = vpop.f32.mrf.mxu0  ;;  %v2384_v36 = vsel %vm233_vm3, %v2361_v10, %v2363_v1 }
 0x80a   :  { %v1863_v63 = vmul.f32 %v6788_v35, %v9598_v21  ;;  %v1847_v58 = vpop.f32.mrf.mxu1  ;;  %v1869_v26 = vmul.f32 %v1862_v40, %v6784_v28 }
 0x80b   :  { %v1864_v5 = vmul.f32 %v6790_v46, %v9599_v60  ;;  %v2365_v27 = vpop.permute.xlu1 %2364 }
 0x80c   :  { %v1870_v15 = vmul.f32 %v1863_v63, %v6788_v35  ;;  %v5360_v25 = vpop.f32.mrf.mxu1  ;;  %v1865_v50 = vadd.f32 %v1863_v63, %v1862_v40  ;;  %v2367_v47 = vpop.permute.xlu0 %2366  ;;  %v2385_v14 = vsel %vm233_vm3, %v2363_v1, %v2365_v27  ;;  %v5686_v63 = vmov 28  }
 0x80d   :  { %v1871_v29 = vmul.f32 %v1864_v5, %v6790_v46  ;;  %v2386_v40 = vsel %vm233_vm3, %v2365_v27, %v2367_v47  ;;  %v5618_v27 = vld [vmem:[#allocation2 + $0x10] sm:$0xff] }
 0x80e   :  { %v1866_v4 = vadd.f32 %v1865_v50, %v1864_v5  ;;  %v1872_v7 = vadd.f32 %v1870_v15, %v1869_v26 }
 0x80f   :  { %v2369_v22 = vpop.permute.xlu1 %2368 }
 0x810   :  { %1867 = vadd.xlane.f32.xlu1 %v1866_v4  ;;  %v1873_v6 = vadd.f32 %v1872_v7, %v1871_v29  ;;  %v2371_v45 = vpop.permute.xlu0 %2370  ;;  %v5687_v29 = vmov 21  }
 0x811   :  { %v2387_v43 = vsel %vm233_vm3, %v2369_v22, %v2371_v45 }
 0x812   :  { %1874 = vadd.xlane.f32.xlu0 %v1873_v6 }
 0x813   :  { %v2373_v18 = vpop.permute.xlu1 %2372 }
 0x814   :  { %v2388_v8 = vsel %vm233_vm3, %v2371_v45, %v2373_v18  ;;  %v2375_v23 = vpop.permute.xlu0 %2374 }
 0x815   :  { %v2389_v16 = vsel %vm233_vm3, %v2373_v18, %v2375_v23 }
 0x817   :  { %v6869_v0 = vpop.permute.xlu1 %2729 }
 0x818   :  { %v6865_v12 = vpop.permute.xlu0 %5510 }
 0x81b   :  { %v6875_v5 = vpop.permute.xlu1 %2733 }
 0x81c   :  { %v6872_v58 = vpop.permute.xlu0 %2731 }
 0x81d   :  { %v2754_v23 = vsel %vm2753_vm4, %v6869_v0, %v6872_v58 }
 0x81f   :  { %v2740_v15 = vpop.permute.xlu1 %2739 }
 0x820   :  { %v2738_v26 = vpop.permute.xlu0 %2737 }
 0x821   :  { %2092 = vperm.xlu1 %5516, %v6804_v32   ;;  %v2757_v25 = vsel %vm2753_vm4, %v2738_v26, %v2740_v15 }
 0x823   :  { %v2744_v7 = vpop.permute.xlu1 %2743 }
 0x824   :  { %v2742_v50 = vpop.permute.xlu0 %2741 }
 0x825   :  { %5517 = vset.pattern.permute.xlu1 %v5679_v34  ;;  %v2758_v4 = vsel %vm2753_vm4, %v2740_v15, %v2742_v50  ;;  %v2759_v6 = vsel %vm2753_vm4, %v2742_v50, %v2744_v7 }
 0x826   :  { %2166 = vperm.xlu1 %5517, %v6812_v44  }
 0x827   :  { %v6894_v9 = vpop.permute.xlu1 %2174 }
 0x828   :  { %2088 = vperm.xlu0 %5514, %v6812_v44  }
 0x82a   :  { %5520 = vset.pattern.permute.xlu1 %v5681_v38 }
 0x82b   :  { %2465 = vperm.xlu1 %5520, %v6748_v49  }
 0x82c   :  { %5518 = vset.pattern.permute.xlu0 %v5679_v34  ;;  %v2017_v34 = vsel %vm469_vm11, %v1996_v2, %v1998_v11  ;;  %v6896_v2 = vpop.permute.xlu0 %2096 }
 0x82d   :  { %2170 = vperm.xlu0 %5518, %v6804_v32  }
 0x82f   :  { %2033 = vrot.lane.b32.xlu1 %v2015_v57, %s5660_s8 }
 0x830   :  { %5521 = vset.pattern.permute.xlu1 %v5682_v37 }
 0x831   :  { %5519 = vset.pattern.permute.xlu0 %v5682_v37 }
 0x832   :  { %2264 = vperm.xlu0 %5519, %v6748_v49  }
 0x833   :  { %2039 = vrot.lane.b32.xlu1 %v2016_v48, %s5660_s8 }
 0x836   :  { %2035 = vrot.lane.b32.xlu0 %v2018_v24, %s5660_s8 }
 0x837   :  { %2045 = vrot.lane.b32.xlu1 %v2017_v34, %s5660_s8 }
 0x83a   :  { %2041 = vrot.lane.b32.xlu0 %v2019_v20, %s5660_s8 }
 0x83b   :  { %2256 = vperm.xlu1 %5521, %v6812_v44  }
 0x83e   :  { %2047 = vrot.lane.b32.xlu0 %v2020_v62, %s5660_s8 }
 0x83f   :  { %5522 = vset.pattern.permute.xlu1 %v5683_v61 }
 0x840   :  { %2543 = vperm.xlu1 %5522, %v6748_v49  }
 0x842   :  { %2260 = vperm.xlu0 %5519, %v6804_v32  }
 0x844   :  { %2060 = vrot.lane.b32.xlu1 %v2015_v57, %s5661_s9 }
 0x845   :  { %5524 = vset.pattern.permute.xlu1 %v5681_v38 }
 0x846   :  { %2062 = vrot.lane.b32.xlu0 %v2018_v24, %s5661_s9 }
 0x847   :  { %5523 = vset.pattern.permute.xlu0 %v5681_v38 }
 0x848   :  { %2066 = vrot.lane.b32.xlu1 %v2016_v48, %s5661_s9 }
 0x84a   :  { %2068 = vrot.lane.b32.xlu0 %v2019_v20, %s5661_s9 }
 0x84c   :  { %2072 = vrot.lane.b32.xlu1 %v2017_v34, %s5661_s9 }
 0x84e   :  { %2074 = vrot.lane.b32.xlu0 %v2020_v62, %s5661_s9 }
 0x850   :  { %2461 = vperm.xlu1 %5524, %v6804_v32  }
 0x852   :  { %2457 = vperm.xlu0 %5523, %v6812_v44  }
 0x854   :  { %5525 = vset.pattern.permute.xlu1 %v5684_v39 }
 0x855   :  { %2633 = vperm.xlu1 %5525, %v6748_v49  }
 0x856   :  { %5527 = vset.pattern.permute.xlu0 %v5683_v61 }
 0x857   :  { %2539 = vperm.xlu0 %5527, %v6804_v32  }
 0x859   :  { %5526 = vset.pattern.permute.xlu1 %v5683_v61 }
 0x85a   :  { %2535 = vperm.xlu1 %5526, %v6812_v44  }
 0x85b   :  { %2404 = vrot.lane.b32.xlu0 %v2387_v43, %s5660_s8 }
 0x85c   :  { %5530 = vset.pattern.permute.xlu0 %v5684_v39 }
 0x85e   :  { %5528 = vset.pattern.permute.xlu1 %v5685_v54 }
 0x85f   :  { %2410 = vrot.lane.b32.xlu0 %v2388_v8, %s5660_s8  ;;  %2835 = vperm.xlu1 %5528, %v6748_v49  }
 0x863   :  { %2416 = vrot.lane.b32.xlu0 %v2389_v16, %s5660_s8  ;;  %2402 = vrot.lane.b32.xlu1 %v2384_v36, %s5660_s8 }
 0x864   :  { %5529 = vset.pattern.permute.xlu1 %v5684_v39 }
 0x867   :  { %2629 = vperm.xlu0 %5530, %v6804_v32   ;;  %2408 = vrot.lane.b32.xlu1 %v2385_v14, %s5660_s8 }
 0x86b   :  { %2431 = vrot.lane.b32.xlu0 %v2387_v43, %s5661_s9  ;;  %2414 = vrot.lane.b32.xlu1 %v2386_v40, %s5660_s8 }
 0x86c   :  { %5532 = vset.pattern.permute.xlu0 %v5685_v54 }
 0x86f   :  { %2437 = vrot.lane.b32.xlu0 %v2388_v8, %s5661_s9  ;;  %2625 = vperm.xlu1 %5529, %v6812_v44  }
 0x873   :  { %2443 = vrot.lane.b32.xlu0 %v2389_v16, %s5661_s9  ;;  %5531 = vset.pattern.permute.xlu1 %v5686_v63 }
 0x874   :  { %2913 = vperm.xlu1 %5531, %v6748_v49  }
 0x877   :  { %2827 = vperm.xlu0 %5532, %v6812_v44  }
 0x878   :  { %2429 = vrot.lane.b32.xlu1 %v2384_v36, %s5661_s9 }
 0x879   :  { %5533 = vset.pattern.permute.xlu1 %v5685_v54 }
 0x87b   :  { %5534 = vset.pattern.permute.xlu0 %v5686_v63 }
 0x87c   :  { %2905 = vperm.xlu0 %5534, %v6812_v44   ;;  %2435 = vrot.lane.b32.xlu1 %v2385_v14, %s5661_s9  ;;  %v5513_v14 = vunpack.i.h.bf16 %v6865_v12 }
 0x87e   :  { %v2756_v50 = vsel %vm2753_vm4, %v6875_v5, %v5513_v14 }
 0x880   :  { %2774 = vrot.lane.b32.xlu0 %v2757_v25, %s5660_s8  ;;  %2441 = vrot.lane.b32.xlu1 %v2386_v40, %s5661_s9 }
 0x881   :  { %5538 = vset.pattern.permute.xlu0 %v5687_v29 }
 0x884   :  { %2780 = vrot.lane.b32.xlu0 %v2758_v4, %s5660_s8  ;;  %2831 = vperm.xlu1 %5533, %v6804_v32  }
 0x888   :  { %2786 = vrot.lane.b32.xlu0 %v2759_v6, %s5660_s8  ;;  %5535 = vset.pattern.permute.xlu1 %v5686_v63  ;;  %v2755_v63 = vsel %vm2753_vm4, %v6872_v58, %v6875_v5 }
 0x889   :  { %2909 = vperm.xlu1 %5535, %v6804_v32  }
 0x88c   :  { %2801 = vrot.lane.b32.xlu0 %v2757_v25, %s5661_s9 }
 0x88d   :  { %5536 = vset.pattern.permute.xlu1 %v9600_v42 }
 0x890   :  { %2807 = vrot.lane.b32.xlu0 %v2758_v4, %s5661_s9 }
 0x894   :  { %2813 = vrot.lane.b32.xlu0 %v2759_v6, %s5661_s9 }
 0x898   :  { %1954 = vperm.xlu0 %5538, %v6812_v44  }
 0x899   :  { %v1868_v38 = vpop.xlane.xlu1 %1867 }
 0x89a   :  { %v6899_v11 = vmul.f32 0.00390625, %v1868_v38 }
 0x89b   :  { %v1875_v57 = vpop.xlane.xlu0 %1874 }
 0x89c   :  { %v1877_v41 = vmul.f32 0.00390625, %v1875_v57  ;;  %v1878_v37 = vmul.f32 %v6899_v11, %v6899_v11 }
 0x89d   :  { %v6903_v17 = vpop.permute.xlu1 %2092 }
 0x89e   :  { %v1879_v48 = vsub.f32 %v1877_v41, %v1878_v37 }
 0x8a0   :  { %v1880_v24 = vmax.f32 %v1879_v48, 0.0 }
 0x8a1   :  { %v6905_v34 = vpop.permute.xlu1 %2166 }
 0x8a2   :  { %v1881_v3 = vadd.f32 1e-05, %v1880_v24 }
 0x8a3   :  { %v6907_v20 = vpop.permute.xlu0 %2088 }
 0x8a4   :  { %5599 = vrsqrt.f32 %v1881_v3 }
 0x8a6   :  { %v6909_v13 = vpop.permute.xlu1 %2465 }
 0x8a8   :  { %v6911_v62 = vpop.permute.xlu0 %2170 }
 0x8aa   :  { %v2034_v61 = vpop.permute.xlu1 %2033 }
 0x8ad   :  { %v6913_v10 = vpop.permute.xlu0 %2264 }
 0x8ae   :  { %v2040_v1 = vpop.permute.xlu1 %2039 }
 0x8af   :  { %v2054_v47 = vsel %vm127_vm5, %v2034_v61, %v2040_v1 }
 0x8b0   :  { %v2100_v39 = vmul.f32 %v6907_v20, %v2054_v47 }
 0x8b1   :  { %v5600_v22 = vpop.eup %5599  ;;  %v6918_v45 = vpop.permute.xlu0 %2035 }
 0x8b2   :  { %2119 = vrot.lane.b32.xlu0 %v2100_v39, %s5666_s5  ;;  %v2046_v43 = vpop.permute.xlu1 %2045  ;;  %v1883_v18 = vmul.f32 %v5600_v22, %v6683_v53 }
 0x8b3   :  { %v2057_v22 = vsel %vm127_vm5, %v2046_v43, %v2034_v61  ;;  %v6992_v61 = vld [vmem:[#allocation2 + $0x50] sm:$0xff] }
 0x8b4   :  { %1889 = vperm.xlu1 %5536, %v1883_v18  }
 0x8b5   :  { %v2042_v54 = vpop.permute.xlu0 %2041 }
 0x8b6   :  { %v6922_v8 = vpop.permute.xlu1 %2256 }
 0x8b7   :  { %v2268_v47 = vmul.f32 %v6922_v8, %v6697_v19 }
 0x8b8   :  { %2772 = vrot.lane.b32.xlu1 %v2754_v23, %s5660_s8 }
 0x8b9   :  { %v2048_v16 = vpop.permute.xlu0 %2047  ;;  %5537 = vset.pattern.permute.xlu1 %v5687_v29 }
 0x8ba   :  { %v2058_v36 = vsel %vm127_vm5, %v2048_v16, %v6918_v45  ;;  %v2052_v0 = vsel %vm127_vm5, %v2042_v54, %v2048_v16 }
 0x8bb   :  { %v2102_v53 = vmul.f32 %v6903_v17, %v2058_v36  ;;  %v6933_v40 = vpop.permute.xlu1 %2543  ;;  %v2104_v15 = vmul.f32 %v6903_v17, %v2052_v0  ;;  %v2099_v36 = vmul.f32 %v6907_v20, %v2057_v22 }
 0x8bc   :  { %2778 = vrot.lane.b32.xlu1 %v2755_v63, %s5660_s8 }
 0x8bd   :  { %v6941_v26 = vpop.permute.xlu0 %2260  ;;  %2123 = vrot.lane.b32.xlu0 %v2102_v53, %s5666_s5  ;;  %v2051_v53 = vsel %vm127_vm5, %v2040_v1, %v2046_v43 }
 0x8be   :  { %v2101_v0 = vmul.f32 %v6907_v20, %v2051_v53 }
 0x8bf   :  { %v2061_v25 = vpop.permute.xlu1 %2060 }
 0x8c0   :  { %2784 = vrot.lane.b32.xlu1 %v2756_v50, %s5660_s8 }
 0x8c1   :  { %v2063_v29 = vpop.permute.xlu0 %2062  ;;  %2127 = vrot.lane.b32.xlu0 %v2104_v15, %s5666_s5 }
 0x8c3   :  { %v2067_v58 = vpop.permute.xlu1 %2066 }
 0x8c4   :  { %v2081_v4 = vsel %vm137_vm6, %v2061_v25, %v2067_v58  ;;  %2799 = vrot.lane.b32.xlu1 %v2754_v23, %s5661_s9  ;;  %v6981_v23 = vld [vmem:[#allocation2 + $0x40] sm:$0xff] }
 0x8c5   :  { %v2177_v7 = vmul.f32 %v6905_v34, %v2081_v4  ;;  %v2069_v6 = vpop.permute.xlu0 %2068  ;;  %v2271_v16 = vmul.f32 %v6981_v23, %v6941_v26 }
 0x8c7   :  { %2195 = vrot.lane.b32.xlu0 %v2177_v7, %s5666_s5  ;;  %v2073_v42 = vpop.permute.xlu1 %2072 }
 0x8c8   :  { %v2084_v5 = vsel %vm137_vm6, %v2073_v42, %v2061_v25  ;;  %2805 = vrot.lane.b32.xlu1 %v2755_v63, %s5661_s9  ;;  %v2273_v63 = vmul.f32 %v6992_v61, %v6941_v26  ;;  %v2055_v25 = vsel %vm127_vm5, %v6918_v45, %v2042_v54  ;;  %v2078_v4 = vsel %vm137_vm6, %v2067_v58, %v2073_v42 }
 0x8c9   :  { %v2179_v38 = vmul.f32 %v6905_v34, %v2084_v5  ;;  %v2075_v57 = vpop.permute.xlu0 %2074  ;;  %v2103_v43 = vmul.f32 %v6903_v17, %v2055_v25  ;;  %v2178_v20 = vmul.f32 %v6905_v34, %v2078_v4  ;;  %v2082_v45 = vsel %vm137_vm6, %v2063_v29, %v2069_v6 }
 0x8ca   :  { %v2079_v41 = vsel %vm137_vm6, %v2069_v6, %v2075_v57  ;;  %v2180_v34 = vmul.f32 %v6911_v62, %v2082_v45  ;;  %v2085_v6 = vsel %vm137_vm6, %v2075_v57, %v2063_v29  ;;  %v2267_v29 = vmul.f32 %v6922_v8, %v6693_v33 }
 0x8cb   :  { %2199 = vrot.lane.b32.xlu0 %v2179_v38, %s5666_s5  ;;  %v6961_v37 = vpop.permute.xlu1 %2461  ;;  %v2181_v48 = vmul.f32 %v6911_v62, %v2079_v41 }
 0x8cc   :  { %2811 = vrot.lane.b32.xlu1 %v2756_v50, %s5661_s9 }
 0x8cd   :  { %v6965_v24 = vpop.permute.xlu0 %2457 }
 0x8cf   :  { %2203 = vrot.lane.b32.xlu0 %v2181_v48, %s5666_s5 }
 0x8d0   :  { %1964 = vperm.xlu1 %5537, %v6748_v49   ;;  %v6969_v3 = vpop.permute.xlu1 %2633 }
 0x8d2   :  { %v6973_v39 = vpop.permute.xlu0 %2539 }
 0x8d3   :  { %2293 = vrot.lane.b32.xlu0 %v2268_v47, %s5676_s24  ;;  %v2182_v47 = vmul.f32 %v6911_v62, %v2085_v6  ;;  %v1885_v6 = vsub.f32 %v6788_v35, %v6899_v11 }
 0x8d4   :  { %1959 = vperm.xlu1 %5537, %v6804_v32  }
 0x8d5   :  { %v6979_v18 = vpop.permute.xlu1 %2535 }
 0x8d6   :  { %v6986_v14 = vpop.permute.xlu0 %2404 }
 0x8d7   :  { %2299 = vrot.lane.b32.xlu0 %v2271_v16, %s5676_s24 }
 0x8d8   :  { %2117 = vrot.lane.b32.xlu1 %v2099_v36, %s5666_s5 }
 0x8da   :  { %v6997_v15 = vpop.permute.xlu1 %2835  ;;  %v7003_v1 = vpop.permute.xlu0 %2410 }
 0x8db   :  { %2303 = vrot.lane.b32.xlu0 %v2273_v63, %s5676_s24  ;;  %v5688_v63 = vmov 29  }
 0x8dc   :  { %2121 = vrot.lane.b32.xlu1 %v2101_v0, %s5666_s5  ;;  %5540 = vset.pattern.permute.xlu0 %v5688_v63 }
 0x8dd   :  { %5539 = vset.pattern.permute.xlu1 %v5688_v63 }
 0x8de   :  { %v7007_v50 = vpop.permute.xlu1 %2402  ;;  %v2417_v7 = vpop.permute.xlu0 %2416 }
 0x8df   :  { %v2427_v58 = vsel %vm127_vm5, %v2417_v7, %v6986_v14  ;;  %v2421_v41 = vsel %vm127_vm5, %v7003_v1, %v2417_v7 }
 0x8e0   :  { %2125 = vrot.lane.b32.xlu1 %v2103_v43, %s5666_s5  ;;  %v2471_v38 = vmul.f32 %v6961_v37, %v2427_v58  ;;  %v2473_v16 = vmul.f32 %v6961_v37, %v2421_v41 }
 0x8e2   :  { %v7013_v5 = vpop.permute.xlu1 %2408  ;;  %v7037_v48 = vpop.permute.xlu0 %2629 }
 0x8e3   :  { %v2423_v17 = vsel %vm127_vm5, %v7007_v50, %v7013_v5 }
 0x8e4   :  { %v2469_v54 = vmul.f32 %v6965_v24, %v2423_v17  ;;  %2197 = vrot.lane.b32.xlu1 %v2178_v20, %s5666_s5 }
 0x8e6   :  { %2488 = vrot.lane.b32.xlu0 %v2469_v54, %s5666_s5  ;;  %v7028_v42 = vpop.permute.xlu1 %2414  ;;  %v7048_v57 = vpop.permute.xlu0 %2431 }
 0x8e8   :  { %2201 = vrot.lane.b32.xlu1 %v2180_v34, %s5666_s5  ;;  %v1884_v34 = vsub.f32 %v6784_v28, %v6899_v11 }
 0x8ea   :  { %2492 = vrot.lane.b32.xlu0 %v2471_v38, %s5666_s5  ;;  %v7041_v22 = vpop.permute.xlu1 %2625  ;;  %v2438_v53 = vpop.permute.xlu0 %2437  ;;  %v1886_v38 = vsub.f32 %v6790_v46, %v6899_v11 }
 0x8ec   :  { %2205 = vrot.lane.b32.xlu1 %v2182_v47, %s5666_s5 }
 0x8ee   :  { %2496 = vrot.lane.b32.xlu0 %v2473_v16, %s5666_s5  ;;  %v2444_v4 = vpop.permute.xlu0 %2443 }
 0x8ef   :  { %v7050_v36 = vpop.permute.xlu1 %2913  ;;  %v2448_v45 = vsel %vm137_vm6, %v2438_v53, %v2444_v4 }
 0x8f0   :  { %2291 = vrot.lane.b32.xlu1 %v2267_v29, %s5676_s24  ;;  %v2550_v17 = vmul.f32 %v6973_v39, %v2448_v45 }
 0x8f3   :  { %v2430_v62 = vpop.permute.xlu1 %2429 }
 0x8f7   :  { %v2436_v0 = vpop.permute.xlu1 %2435 }
 0x8f8   :  { %v2450_v25 = vsel %vm137_vm6, %v2430_v62, %v2436_v0 }
 0x8f9   :  { %v2546_v43 = vmul.f32 %v6979_v18, %v2450_v25 }
 0x8fb   :  { %2564 = vrot.lane.b32.xlu0 %v2546_v43, %s5666_s5  ;;  %v2442_v33 = vpop.permute.xlu1 %2441 }
 0x8fc   :  { %v2453_v20 = vsel %vm137_vm6, %v2442_v33, %v2430_v62 }
 0x8fd   :  { %v2548_v7 = vmul.f32 %v6979_v18, %v2453_v20 }
 0x8ff   :  { %2568 = vrot.lane.b32.xlu0 %v2548_v7, %s5666_s5  ;;  %v7065_v54 = vpop.permute.xlu1 %2831 }
 0x903   :  { %2572 = vrot.lane.b32.xlu0 %v2550_v17, %s5666_s5  ;;  %v2269_v17 = vmul.f32 %v6922_v8, %v6701_v55 }
 0x904   :  { %v7067_v58 = vpop.permute.xlu1 %2909 }
 0x92f   :  { %v1890_v41 = vpop.permute.xlu1 %1889 }
 0x930   :  { %v1892_v47 = vmul.f32 %v1890_v41, %v1884_v34  ;;  %v1893_v16 = vmul.f32 %v1890_v41, %v1885_v6  ;;  %v1894_v29 = vmul.f32 %v1890_v41, %v1886_v38  ;;  %v7090_v34 = vld [vmem:[#allocation2 + $0x48] sm:$0xff]  ;;  %v2426_v6 = vsel %vm127_vm5, %v7028_v42, %v7007_v50 }
 0x931   :  { %v2468_v38 = vmul.f32 %v6965_v24, %v2426_v6  ;;  %v2420_v41 = vsel %vm127_vm5, %v7013_v5, %v7028_v42 }
 0x932   :  { %v1899_v62 = vadd.f32 %v6806_v31, %v1892_v47  ;;  %v1900_v63 = vadd.f32 %v6806_v31, %v1893_v16  ;;  %v1901_v25 = vadd.f32 %v6806_v31, %v1894_v29  ;;  %v2470_v47 = vmul.f32 %v6965_v24, %v2420_v41 }
 0x933   :  { %v2424_v16 = vsel %vm127_vm5, %v6986_v14, %v7003_v1  ;;  %v7112_v29 = vpop.permute.xlu1 %2772  ;;  %v2451_v24 = vsel %vm137_vm6, %v7048_v57, %v2438_v53  ;;  %v2270_v41 = vmul.f32 %v6922_v8, %v6719_v51  ;;  %v2636_v8 = vmul.f32 %v7041_v22, %v6697_v19 }
 0x934   :  { %v1909_v43 = vmul.f32 %v6799_v52, %v1899_v62  ;;  %v1910_v28 = vmul.f32 %v6799_v52, %v1900_v63  ;;  %vm1902_vm8 = vcmp.ge.f32.partialorder %v1899_v62, 0.0  ;;  %vm1903_vm13 = vcmp.ge.f32.partialorder %v1900_v63, 0.0 }
 0x935   :  { %v1911_v46 = vmul.f32 %v6799_v52, %v1901_v25  ;;  %vm1904_vm14 = vcmp.ge.f32.partialorder %v1901_v25, 0.0  ;;  %v2272_v52 = vmul.f32 %v7090_v34, %v6941_v26  ;;  %v2472_v50 = vmul.f32 %v6961_v37, %v2424_v16  ;;  %v7193_v16 = vld [vmem:[#allocation2 + $0x58] sm:$0xff] }
 0x936   :  { %v1912_v35 = vsel %vm1902_vm8, %v1899_v62, %v1909_v43  ;;  %v1913_v11 = vsel %vm1903_vm13, %v1900_v63, %v1910_v28  ;;  %v2447_v62 = vsel %vm137_vm6, %v2436_v0, %v2442_v33  ;;  %v2549_v14 = vmul.f32 %v6973_v39, %v2451_v24 }
 0x937   :  { %v1915_v20 = vmul.f32 %v1912_v35, %v9597_v30  ;;  %v1916_v7 = vmul.f32 %v1913_v11, %v9598_v21  ;;  %v1914_v45 = vsel %vm1904_vm14, %v1901_v25, %v1911_v46  ;;  %v2547_v5 = vmul.f32 %v6979_v18, %v2447_v62  ;;  %v7121_v42 = vpop.permute.xlu1 %2778 }
 0x938   :  { %v1917_v31 = vmul.f32 %v1914_v45, %v9599_v60  ;;  %v2454_v37 = vsel %vm137_vm6, %v2444_v4, %v7048_v57  ;;  %v2637_v19 = vmul.f32 %v7041_v22, %v6701_v55 }
 0x939   :  { %1921 = vrot.lane.b32.xlu1 %v1915_v20, %s5646_s25  ;;  %v2551_v1 = vmul.f32 %v6973_v39, %v2454_v37  ;;  %v2640_v37 = vmul.f32 %v7090_v34, %v7037_v48 }
 0x93b   :  { %v7130_v0 = vpop.permute.xlu1 %2784 }
 0x93d   :  { %1923 = vrot.lane.b32.xlu1 %v1916_v7, %s5646_s25  ;;  %v7163_v7 = vpop.permute.xlu0 %2827 }
 0x93f   :  { %v7133_v18 = vpop.permute.xlu1 %2799 }
 0x941   :  { %1925 = vrot.lane.b32.xlu1 %v1917_v31, %s5646_s25 }
 0x943   :  { %v7136_v53 = vpop.permute.xlu1 %2805 }
 0x945   :  { %2295 = vrot.lane.b32.xlu1 %v2269_v17, %s5676_s24 }
 0x947   :  { %v7138_v33 = vpop.permute.xlu1 %2811 }
 0x949   :  { %2301 = vrot.lane.b32.xlu1 %v2272_v52, %s5676_s24  ;;  %v7174_v52 = vpop.permute.xlu0 %2905 }
 0x94b   :  { %v7140_v63 = vpop.permute.xlu1 %1964 }
 0x94d   :  { %2486 = vrot.lane.b32.xlu1 %v2468_v38, %s5666_s5  ;;  %v7180_v38 = vpop.permute.xlu0 %2774 }
 0x94f   :  { %v7142_v25 = vpop.permute.xlu1 %1959 }
 0x951   :  { %2490 = vrot.lane.b32.xlu1 %v2470_v47, %s5666_s5  ;;  %v7188_v47 = vpop.permute.xlu0 %2780 }
 0x953   :  { %v7144_v57 = vpop.permute.xlu1 %2117 }
 0x955   :  { %2494 = vrot.lane.b32.xlu1 %v2472_v50, %s5666_s5  ;;  %v2274_v50 = vmul.f32 %v7193_v16, %v6941_v26  ;;  %v7200_v62 = vpop.permute.xlu0 %2786  ;;  %v2641_v26 = vmul.f32 %v6992_v61, %v7037_v48 }
 0x957   :  { %v7146_v4 = vpop.permute.xlu1 %2121 }
 0x959   :  { %2566 = vrot.lane.b32.xlu1 %v2547_v5, %s5666_s5  ;;  %v2638_v5 = vmul.f32 %v7041_v22, %v6719_v51  ;;  %v7209_v24 = vpop.permute.xlu0 %2801 }
 0x95b   :  { %v7148_v39 = vpop.permute.xlu1 %2125 }
 0x95d   :  { %2570 = vrot.lane.b32.xlu1 %v2549_v14, %s5666_s5  ;;  %v7220_v14 = vpop.permute.xlu0 %2807 }
 0x95f   :  { %v7150_v43 = vpop.permute.xlu1 %2197 }
 0x961   :  { %2574 = vrot.lane.b32.xlu1 %v2551_v1, %s5666_s5 }
 0x963   :  { %v7152_v28 = vpop.permute.xlu1 %2201 }
 0x965   :  { %2991 = vperm.xlu1 %5539, %v6748_v49  }
 0x967   :  { %v7154_v35 = vpop.permute.xlu1 %2205 }
 0x96b   :  { %v7156_v49 = vpop.permute.xlu1 %2291 }
 0x9ab   :  { %v1922_v20 = vpop.permute.xlu1 %1921 }
 0x9ac   :  { %1933 = vst.msk [vmem:[#allocation2 + $0x78] sm:$0xff] %vm33_vm1, %v1922_v20 }
 0x9af   :  { %v1924_v46 = vpop.permute.xlu1 %1923 }
 0x9b0   :  { %v7160_v11 = vsel %vm25_vm0, %v1922_v20, %v1924_v46  ;;  %v7232_v20 = vpop.permute.xlu0 %2813 }
 0x9b1   :  { %9602 = vst [vmem:[#allocation9_spill] sm:$0xff] %v7160_v11  ;;  %1934 = vst [vmem:[#allocation2 + $0x80] sm:$0xff] %v7160_v11  ;;  %v2276_v51 = vmul.f32 %v6913_v10, %v7160_v11 }
 0x9b3   :  { %v1926_v45 = vpop.permute.xlu1 %1925  ;;  %v7165_v31 = vld [vmem:[#allocation2 + $0x78] sm:$0xff] }
 0x9b4   :  { %9603 = vst [vmem:[#allocation7_spill] sm:$0xff] %v7165_v31  ;;  %v7168_v17 = vsel %vm25_vm0, %v1924_v46, %v1926_v45  ;;  %1936 = vst.msk [vmem:[#allocation2 + $0x90] sm:$0xff] %vm25_vm0, %v1926_v45  ;;  %2009 = vrot.lane.b32.xlu1 %v7165_v31, %s5677_s29  ;;  %v2275_v1 = vmul.f32 %v6913_v10, %v7165_v31  ;;  %v7238_v45 = vpop.permute.xlu0 %1954 }
 0x9b5   :  { %9604 = vst [vmem:[#allocation8_spill] sm:$0xff] %v7168_v17  ;;  %1935 = vst [vmem:[#allocation2 + $0x88] sm:$0xff] %v7168_v17  ;;  %v2645_v55 = vmul.f32 %v6969_v3, %v7168_v17 }
 0x9b8   :  { %2376 = vrot.lane.b32.xlu1 %v7165_v31, %s5650_s28 }
 0x9bb   :  { %v2622_v6 = vld [vmem:[#allocation2 + $0x90] sm:$0xff] }
 0x9bc   :  { %2749 = vrot.lane.b32.xlu1 %v2622_v6, %s5678_s30  ;;  %2382 = vrot.lane.b32.xlu0 %v2622_v6, %s5650_s28  ;;  %v2278_v46 = vmul.f32 %v2622_v6, %v6913_v10 }
 0x9c0   :  { %2011 = vrot.lane.b32.xlu1 %v7160_v11, %s5677_s29  ;;  %2378 = vrot.lane.b32.xlu0 %v7160_v11, %s5650_s28 }
 0x9c4   :  { %2297 = vrot.lane.b32.xlu0 %v2270_v41, %s5676_s24  ;;  %2013 = vrot.lane.b32.xlu1 %v7168_v17, %s5677_s29  ;;  %v2646_v41 = vmul.f32 %v6969_v3, %v2622_v6 }
 0x9c8   :  { %2747 = vrot.lane.b32.xlu0 %v7168_v17, %s5678_s30  ;;  %2305 = vrot.lane.b32.xlu1 %v2274_v50, %s5676_s24  ;;  %v7242_v50 = vpop.permute.xlu0 %2119 }
 0x9cc   :  { %2660 = vrot.lane.b32.xlu0 %v2636_v8, %s5649_s0  ;;  %2380 = vrot.lane.b32.xlu1 %v7168_v17, %s5650_s28  ;;  %v2277_v8 = vmul.f32 %v6913_v10, %v7168_v17 }
 0x9d0   :  { %2664 = vrot.lane.b32.xlu0 %v2638_v5, %s5649_s0  ;;  %2745 = vrot.lane.b32.xlu1 %v7160_v11, %s5678_s30  ;;  %v7247_v5 = vpop.permute.xlu0 %2123 }
 0x9d4   :  { %2670 = vrot.lane.b32.xlu0 %v2641_v26, %s5649_s0  ;;  %2662 = vrot.lane.b32.xlu1 %v2637_v19, %s5649_s0  ;;  %v2644_v26 = vmul.f32 %v6969_v3, %v7160_v11  ;;  %v7252_v19 = vpop.permute.xlu0 %2127 }
 0x9d8   :  { %2309 = vrot.lane.b32.xlu0 %v2276_v51, %s5676_s24  ;;  %2668 = vrot.lane.b32.xlu1 %v2640_v37, %s5649_s0  ;;  %v7254_v51 = vpop.permute.xlu1 %2295  ;;  %v7256_v6 = vpop.permute.xlu0 %2195 }
 0x9dc   :  { %2678 = vrot.lane.b32.xlu0 %v2645_v55, %s5649_s0  ;;  %2307 = vrot.lane.b32.xlu1 %v2275_v1, %s5676_s24  ;;  %v7258_v37 = vpop.permute.xlu1 %2301  ;;  %v7260_v1 = vpop.permute.xlu0 %2199 }
 0x9dd   :  { %9605 = vst [vmem:[#allocation10_spill] sm:$0xff] %v7258_v37 }
 0x9e0   :  { %2313 = vrot.lane.b32.xlu1 %v2278_v46, %s5676_s24  ;;  %v7262_v10 = vpop.permute.xlu1 %2486  ;;  %v7264_v55 = vpop.permute.xlu0 %2203 }
 0x9e1   :  { %9606 = vst [vmem:[#allocation11_spill] sm:$0xff] %v7262_v10 }
 0x9e4   :  { %2680 = vrot.lane.b32.xlu1 %v2646_v41, %s5649_s0  ;;  %v7266_v46 = vpop.permute.xlu1 %2490  ;;  %v7268_v41 = vpop.permute.xlu0 %2293 }
 0x9e5   :  { %9607 = vst [vmem:[#allocation12_spill] sm:$0xff] %v7266_v46 }
 0x9e8   :  { %2311 = vrot.lane.b32.xlu1 %v2277_v8, %s5676_s24  ;;  %v7270_v8 = vpop.permute.xlu1 %2494 }
 0x9e9   :  { %9608 = vst [vmem:[#allocation13_spill] sm:$0xff] %v7270_v8  ;;  %v5507_v8 = vunpack.i.l.bf16 %v6814_v56 }
 0x9ec   :  { %2676 = vrot.lane.b32.xlu1 %v2644_v26, %s5649_s0  ;;  %v7272_v26 = vpop.permute.xlu0 %2299  ;;  %v7274_v60 = vpop.permute.xlu1 %2566 }
 0x9ed   :  { %9609 = vst [vmem:[#allocation14_spill] sm:$0xff] %v7274_v60 }
 0x9f0   :  { %v7276_v21 = vpop.permute.xlu0 %2303  ;;  %v7280_v59 = vpop.permute.xlu1 %2570 }
 0x9f1   :  { %9610 = vst [vmem:[#allocation15_spill] sm:$0xff] %v7276_v21  ;;  %9612 = vst [vmem:[#allocation17_spill] sm:$0xff] %v7280_v59 }
 0x9f4   :  { %v7278_v30 = vpop.permute.xlu0 %2488  ;;  %v7284_v31 = vpop.permute.xlu1 %2574 }
 0x9f5   :  { %9611 = vst [vmem:[#allocation16_spill] sm:$0xff] %v7278_v30  ;;  %9614 = vst [vmem:[#allocation19_spill] sm:$0xff] %v7284_v31  ;;  %v5512_v31 = vunpack.i.l.bf16 %v6865_v12 }
 0x9f8   :  { %v7282_v17 = vpop.permute.xlu0 %2492  ;;  %v7286_v11 = vpop.permute.xlu1 %2991 }
 0x9f9   :  { %9613 = vst [vmem:[#allocation18_spill] sm:$0xff] %v7282_v17  ;;  %9615 = vst [vmem:[#allocation20_spill] sm:$0xff] %v7286_v11 }
 0x9fc   :  { %v7288_v46 = vpop.permute.xlu0 %2496 }
 0x9fd   :  { %9616 = vst [vmem:[#allocation21_spill] sm:$0xff] %v7288_v46 }
 0xa00   :  { %v7291_v10 = vpop.permute.xlu0 %2564 }
 0xa01   :  { %9617 = vst [vmem:[#allocation22_spill] sm:$0xff] %v7291_v10 }
 0xa04   :  { %v7295_v21 = vpop.permute.xlu0 %2568 }
 0xa05   :  { %9618 = vst [vmem:[#allocation23_spill] sm:$0xff] %v7295_v21 }
 0xa08   :  { %v7301_v56 = vpop.permute.xlu0 %2572 }
 0xa09   :  { %9619 = vst [vmem:[#allocation24_spill] sm:$0xff] %v7301_v56 }
 0xa26   :  { %v2010_v37 = vpop.permute.xlu1 %2009 }
 0xa27   :  { %v2021_v60 = vsel %vm469_vm11, %v5507_v8, %v2010_v37 }
 0xa28   :  { %2037 = vrot.lane.b32.xlu1 %v2021_v60, %s5660_s8 }
 0xa2a   :  { %v2377_v30 = vpop.permute.xlu1 %2376 }
 0xa2c   :  { %2064 = vrot.lane.b32.xlu1 %v2021_v60, %s5661_s9 }
 0xa2e   :  { %v2750_v59 = vpop.permute.xlu1 %2749  ;;  %v2383_v8 = vpop.permute.xlu0 %2382 }
 0xa2f   :  { %v2762_v11 = vsel %vm2753_vm4, %v2750_v59, %v5512_v31 }
 0xa30   :  { %2788 = vrot.lane.b32.xlu1 %v2762_v11, %s5660_s8 }
 0xa32   :  { %v2012_v10 = vpop.permute.xlu1 %2011  ;;  %v2379_v31 = vpop.permute.xlu0 %2378 }
 0xa33   :  { %v2022_v46 = vsel %vm469_vm11, %v2010_v37, %v2012_v10  ;;  %v2390_v37 = vsel %vm233_vm3, %v2377_v30, %v2379_v31 }
 0xa34   :  { %2815 = vrot.lane.b32.xlu1 %v2762_v11, %s5661_s9  ;;  %2043 = vrot.lane.b32.xlu0 %v2022_v46, %s5660_s8 }
 0xa36   :  { %v2014_v21 = vpop.permute.xlu1 %2013  ;;  %v7316_v17 = vpop.permute.xlu0 %2297 }
 0xa37   :  { %v2023_v60 = vsel %vm469_vm11, %v2012_v10, %v2014_v21 }
 0xa38   :  { %2076 = vrot.lane.b32.xlu0 %v2023_v60, %s5661_s9  ;;  %2049 = vrot.lane.b32.xlu1 %v2023_v60, %s5660_s8 }
 0xa3a   :  { %v7309_v12 = vpop.permute.xlu1 %2305  ;;  %v2748_v10 = vpop.permute.xlu0 %2747 }
 0xa3c   :  { %2070 = vrot.lane.b32.xlu1 %v2022_v46, %s5661_s9  ;;  %v2761_v46 = vsel %vm2753_vm4, %v2748_v10, %v2750_v59 }
 0xa3e   :  { %v2381_v56 = vpop.permute.xlu1 %2380 }
 0xa3f   :  { %v2391_v11 = vsel %vm233_vm3, %v2379_v31, %v2381_v56  ;;  %v2392_v21 = vsel %vm233_vm3, %v2381_v56, %v2383_v8  ;;  %v7327_v31 = vld [vmem:[#allocation2] sm:$0xff]  ;;  %v2796_v8 = vsel %vm127_vm5, %v7130_v0, %v7112_v29 }
 0xa40   :  { %2406 = vrot.lane.b32.xlu1 %v2390_v37, %s5660_s8  ;;  %2412 = vrot.lane.b32.xlu0 %v2391_v11, %s5660_s8  ;;  %9620 = vst [vmem:[#allocation25_spill] sm:$0xff] %v7327_v31  ;;  %v2647_v56 = vmul.f32 %v7327_v31, %v6969_v3  ;;  %v2838_v59 = vmul.f32 %v7163_v7, %v2796_v8 }
 0xa41   :  { %v2790_v3 = vsel %vm127_vm5, %v7121_v42, %v7130_v0  ;;  %v2791_v0 = vsel %vm127_vm5, %v7188_v47, %v7200_v62 }
 0xa42   :  { %v2746_v60 = vpop.permute.xlu1 %2745 }
 0xa43   :  { %v2760_v30 = vsel %vm2753_vm4, %v2746_v60, %v2748_v10  ;;  %v2840_v10 = vmul.f32 %v7163_v7, %v2790_v3  ;;  %v2843_v60 = vmul.f32 %v7065_v54, %v2791_v0  ;;  %vm36_vm4 = vcmask 392192  }
 0xa44   :  { %2418 = vrot.lane.b32.xlu1 %v2392_v21, %s5660_s8  ;;  %2433 = vrot.lane.b32.xlu0 %v2390_v37, %s5661_s9  ;;  %v2642_v37 = vmul.f32 %v7193_v16, %v7037_v48  ;;  %v2797_v16 = vsel %vm127_vm5, %v7200_v62, %v7180_v38  ;;  %43 = vst.msk [vmem:[#allocation2 + $0xa0] sm:$0xff] %vm36_vm4, %v7327_v31  ;;  %37 = vst.msk [vmem:[#allocation2 + $0x30] sm:$0xff] %vm36_vm4, %v7327_v31 }
 0xa45   :  { %40 = vst.msk [vmem:[#allocation2 + $0x68] sm:$0xff] %vm36_vm4, %v7327_v31  ;;  %46 = vst.msk [vmem:[#allocation2 + $0xd8] sm:$0xff] %vm36_vm4, %v7327_v31 }
 0xa48   :  { %2439 = vrot.lane.b32.xlu1 %v2391_v11, %s5661_s9  ;;  %2445 = vrot.lane.b32.xlu0 %v2392_v21, %s5661_s9  ;;  %v2793_v11 = vsel %vm127_vm5, %v7112_v29, %v7121_v42  ;;  %v2841_v29 = vmul.f32 %v7065_v54, %v2797_v16  ;;  %v2794_v42 = vsel %vm127_vm5, %v7180_v38, %v7188_v47 }
 0xa49   :  { %v2839_v21 = vmul.f32 %v7163_v7, %v2793_v11  ;;  %v2842_v7 = vmul.f32 %v7065_v54, %v2794_v42  ;;  %v2820_v38 = vsel %vm137_vm6, %v7133_v18, %v7136_v53  ;;  %v2817_v47 = vsel %vm137_vm6, %v7136_v53, %v7138_v33 }
 0xa4a   :  { %v2916_v54 = vmul.f32 %v7174_v52, %v2820_v38  ;;  %v2917_v62 = vmul.f32 %v7174_v52, %v2817_v47 }
 0xa4c   :  { %2782 = vrot.lane.b32.xlu0 %v2761_v46, %s5660_s8  ;;  %2776 = vrot.lane.b32.xlu1 %v2760_v30, %s5660_s8 }
 0xa50   :  { %2682 = vrot.lane.b32.xlu0 %v2647_v56, %s5649_s0  ;;  %2803 = vrot.lane.b32.xlu1 %v2760_v30, %s5661_s9  ;;  %v2821_v30 = vsel %vm137_vm6, %v7209_v24, %v7220_v14  ;;  %v7400_v56 = vpop.permute.xlu1 %2662 }
 0xa54   :  { %2856 = vrot.lane.b32.xlu0 %v2838_v59, %s5666_s5  ;;  %2672 = vrot.lane.b32.xlu1 %v2642_v37, %s5649_s0  ;;  %v7402_v8 = vpop.permute.xlu1 %2668 }
 0xa58   :  { %2860 = vrot.lane.b32.xlu0 %v2840_v10, %s5666_s5  ;;  %2858 = vrot.lane.b32.xlu1 %v2839_v21, %s5666_s5  ;;  %v7404_v59 = vpop.permute.xlu1 %2307 }
 0xa5c   :  { %2809 = vrot.lane.b32.xlu0 %v2761_v46, %s5661_s9  ;;  %2862 = vrot.lane.b32.xlu1 %v2841_v29, %s5666_s5  ;;  %v2823_v46 = vsel %vm137_vm6, %v7138_v33, %v7133_v18  ;;  %v7406_v18 = vpop.permute.xlu1 %2313  ;;  %v7408_v33 = vpop.permute.xlu0 %2660 }
 0xa5d   :  { %v2918_v53 = vmul.f32 %v7174_v52, %v2823_v46 }
 0xa60   :  { %2864 = vrot.lane.b32.xlu0 %v2842_v7, %s5666_s5  ;;  %2866 = vrot.lane.b32.xlu1 %v2843_v60, %s5666_s5  ;;  %v7410_v37 = vpop.permute.xlu1 %2680  ;;  %v7412_v11 = vpop.permute.xlu0 %2664 }
 0xa64   :  { %2983 = vperm.xlu0 %5540, %v6812_v44   ;;  %2987 = vperm.xlu1 %5539, %v6804_v32   ;;  %v9621_v44 = vmov 8   ;;  %v2919_v32 = vmul.f32 %v7067_v58, %v2821_v30  ;;  %v7414_v3 = vpop.permute.xlu1 %2311  ;;  %v7416_v52 = vpop.permute.xlu0 %2670 }
 0xa68   :  { %2936 = vrot.lane.b32.xlu0 %v2917_v62, %s5666_s5  ;;  %2934 = vrot.lane.b32.xlu1 %v2916_v54, %s5666_s5  ;;  %v7418_v21 = vpop.permute.xlu1 %2676  ;;  %v7420_v16 = vpop.permute.xlu0 %2309 }
 0xa69   :  { %5541 = vset.pattern.permute.xlu1 %v9621_v44  ;;  %9622 = vst [vmem:[#allocation26_spill] sm:$0xff] %v7418_v21 }
 0xa6c   :  { %2940 = vrot.lane.b32.xlu0 %v2919_v32, %s5666_s5  ;;  %2938 = vrot.lane.b32.xlu1 %v2918_v53, %s5666_s5  ;;  %v7422_v42 = vpop.permute.xlu0 %2678 }
 0xa9a   :  { %v2038_v10 = vpop.permute.xlu1 %2037 }
 0xa9e   :  { %v2065_v29 = vpop.permute.xlu1 %2064 }
 0xaa2   :  { %v2789_v0 = vpop.permute.xlu1 %2788 }
 0xaa6   :  { %v2044_v7 = vpop.permute.xlu0 %2043  ;;  %v7424_v60 = vpop.permute.xlu1 %2815 }
 0xaa7   :  { %v2056_v38 = vsel %vm127_vm5, %v2038_v10, %v2044_v7 }
 0xaa8   :  { %v2106_v47 = vmul.f32 %v6896_v2, %v2056_v38 }
 0xaaa   :  { %2131 = vrot.lane.b32.xlu0 %v2106_v47, %s5666_s5  ;;  %v2050_v54 = vpop.permute.xlu1 %2049  ;;  %v2077_v44 = vpop.permute.xlu0 %2076 }
 0xaab   :  { %v2059_v62 = vsel %vm127_vm5, %v2050_v54, %v2038_v10  ;;  %v2053_v46 = vsel %vm127_vm5, %v2044_v7, %v2050_v54  ;;  %v2086_v21 = vsel %vm137_vm6, %v2077_v44, %v2065_v29 }
 0xaac   :  { %v2105_v30 = vmul.f32 %v6896_v2, %v2059_v62  ;;  %v2107_v38 = vmul.f32 %v6896_v2, %v2053_v46  ;;  %v2185_v54 = vmul.f32 %v6894_v9, %v2086_v21 }
 0xaae   :  { %2129 = vrot.lane.b32.xlu1 %v2105_v30, %s5666_s5  ;;  %v2071_v32 = vpop.permute.xlu1 %2070 }
 0xaaf   :  { %v2083_v53 = vsel %vm137_vm6, %v2065_v29, %v2071_v32  ;;  %v2080_v10 = vsel %vm137_vm6, %v2071_v32, %v2077_v44 }
 0xab0   :  { %v2183_v47 = vmul.f32 %v6894_v9, %v2083_v53  ;;  %v2184_v30 = vmul.f32 %v6894_v9, %v2080_v10 }
 0xab2   :  { %v2413_v62 = vpop.permute.xlu0 %2412  ;;  %2133 = vrot.lane.b32.xlu1 %v2107_v38, %s5666_s5  ;;  %2207 = vrot.lane.b32.xlu0 %v2183_v47, %s5666_s5  ;;  %v2407_v7 = vpop.permute.xlu1 %2406 }
 0xab3   :  { %v2425_v2 = vsel %vm127_vm5, %v2407_v7, %v2413_v62 }
 0xab4   :  { %v2475_v32 = vmul.f32 %v6909_v13, %v2425_v2 }
 0xab6   :  { %v2434_v46 = vpop.permute.xlu0 %2433  ;;  %2211 = vrot.lane.b32.xlu0 %v2185_v54, %s5666_s5  ;;  %2209 = vrot.lane.b32.xlu1 %v2184_v30, %s5666_s5  ;;  %v2419_v29 = vpop.permute.xlu1 %2418 }
 0xab7   :  { %v2428_v44 = vsel %vm127_vm5, %v2419_v29, %v2407_v7  ;;  %v2422_v21 = vsel %vm127_vm5, %v2413_v62, %v2419_v29 }
 0xab8   :  { %v2474_v53 = vmul.f32 %v6909_v13, %v2428_v44  ;;  %v2476_v10 = vmul.f32 %v6909_v13, %v2422_v21 }
 0xaba   :  { %v2446_v9 = vpop.permute.xlu0 %2445  ;;  %2500 = vrot.lane.b32.xlu1 %v2475_v32, %s5666_s5  ;;  %2498 = vrot.lane.b32.xlu0 %v2474_v53, %s5666_s5  ;;  %v2440_v38 = vpop.permute.xlu1 %2439 }
 0xabb   :  { %v2449_v47 = vsel %vm137_vm6, %v2440_v38, %v2446_v9  ;;  %v2452_v54 = vsel %vm137_vm6, %v2434_v46, %v2440_v38  ;;  %v2455_v13 = vsel %vm137_vm6, %v2446_v9, %v2434_v46 }
 0xabc   :  { %v2553_v7 = vmul.f32 %v6933_v40, %v2449_v47  ;;  %v2552_v29 = vmul.f32 %v6933_v40, %v2452_v54  ;;  %v2554_v53 = vmul.f32 %v6933_v40, %v2455_v13  ;;  %v2818_v13 = vsel %vm137_vm6, %v7220_v14, %v7232_v20 }
 0xabe   :  { %v2783_v30 = vpop.permute.xlu0 %2782  ;;  %2502 = vrot.lane.b32.xlu0 %v2476_v10, %s5666_s5  ;;  %2578 = vrot.lane.b32.xlu1 %v2553_v7, %s5666_s5  ;;  %v2777_v62 = vpop.permute.xlu1 %2776 }
 0xabf   :  { %v2795_v2 = vsel %vm127_vm5, %v2777_v62, %v2783_v30  ;;  %v2798_v21 = vsel %vm127_vm5, %v2789_v0, %v2777_v62  ;;  %v2792_v46 = vsel %vm127_vm5, %v2783_v30, %v2789_v0 }
 0xac0   :  { %v2845_v44 = vmul.f32 %v6997_v15, %v2795_v2  ;;  %v2844_v47 = vmul.f32 %v6997_v15, %v2798_v21  ;;  %v2846_v10 = vmul.f32 %v6997_v15, %v2792_v46  ;;  %v2824_v15 = vsel %vm137_vm6, %v7232_v20, %v7209_v24 }
 0xac1   :  { %v2920_v24 = vmul.f32 %v7067_v58, %v2818_v13 }
 0xac2   :  { %v7474_v32 = vpop.permute.xlu0 %2682  ;;  %2576 = vrot.lane.b32.xlu0 %v2552_v29, %s5666_s5  ;;  %2870 = vrot.lane.b32.xlu1 %v2845_v44, %s5666_s5  ;;  %v2804_v7 = vpop.permute.xlu1 %2803  ;;  %v2921_v29 = vmul.f32 %v7067_v58, %v2824_v15 }
 0xac3   :  { %v2825_v30 = vsel %vm137_vm6, %v7424_v60, %v2804_v7 }
 0xac4   :  { %v2924_v44 = vmul.f32 %v7050_v36, %v2825_v30 }
 0xac6   :  { %v7481_v38 = vpop.permute.xlu0 %2856  ;;  %2580 = vrot.lane.b32.xlu0 %v2554_v53, %s5666_s5  ;;  %v7524_v53 = vpop.permute.xlu1 %2672 }
 0xaca   :  { %v7487_v9 = vpop.permute.xlu0 %2860  ;;  %2868 = vrot.lane.b32.xlu0 %v2844_v47, %s5666_s5  ;;  %v7526_v14 = vpop.permute.xlu1 %2858 }
 0xace   :  { %v2810_v40 = vpop.permute.xlu0 %2809  ;;  %2872 = vrot.lane.b32.xlu0 %v2846_v10, %s5666_s5  ;;  %v7528_v20 = vpop.permute.xlu1 %2862 }
 0xacf   :  { %v2819_v54 = vsel %vm137_vm6, %v2810_v40, %v7424_v60  ;;  %v2822_v62 = vsel %vm137_vm6, %v2804_v7, %v2810_v40  ;;  %v2643_v60 = vmul.f32 %v7327_v31, %v7037_v48 }
 0xad0   :  { %v2922_v2 = vmul.f32 %v7050_v36, %v2822_v62  ;;  %v2923_v0 = vmul.f32 %v7050_v36, %v2819_v54  ;;  %v2639_v36 = vmul.f32 %v7327_v31, %v7041_v22  ;;  %v1971_v62 = vmul.f32 %v7327_v31, %v7142_v25 }
 0xad2   :  { %2948 = vrot.lane.b32.xlu0 %v2923_v0, %s5666_s5  ;;  %2946 = vrot.lane.b32.xlu1 %v2922_v2, %s5666_s5  ;;  %v7530_v21 = vpop.permute.xlu0 %2864  ;;  %v7532_v58 = vpop.permute.xlu1 %2866  ;;  %v1967_v0 = vmul.f32 %v7327_v31, %v7238_v45  ;;  %v2157_v15 = vadd.f32 %v7247_v5, %v1971_v62  ;;  %v2135_v62 = vsel %vm1369_vm15, %v7144_v57, %v7242_v50 }
 0xad3   :  { %9623 = vst [vmem:[#allocation27_spill] sm:$0xff] %v7530_v21  ;;  %9624 = vst [vmem:[#allocation28_spill] sm:$0xff] %v7532_v58 }
 0xad6   :  { %2944 = vrot.lane.b32.xlu0 %v2921_v29, %s5666_s5  ;;  %2950 = vrot.lane.b32.xlu1 %v2924_v44, %s5666_s5  ;;  %v5616_v44 = vld [vmem:[#allocation2 + $0x18] sm:$0xff] }
 0xad7   :  { %v1970_v13 = vmul.f32 %v5616_v44, %v7238_v45  ;;  %v2136_v44 = vsel %vm1369_vm15, %v7242_v50, %v7146_v4 }
 0xada   :  { %2674 = vrot.lane.b32.xlu0 %v2643_v60, %s5649_s0  ;;  %2942 = vrot.lane.b32.xlu1 %v2920_v24, %s5666_s5  ;;  %v2235_v24 = vadd.f32 %v7152_v28, %v2157_v15  ;;  %v5617_v60 = vld [vmem:[#allocation2 + $0x8] sm:$0xff]  ;;  %v2156_v15 = vadd.f32 %v7146_v4, %v1970_v13  ;;  %v2213_v4 = vsel %vm1369_vm15, %v7256_v6, %v7150_v43 }
 0xade   :  { %2666 = vrot.lane.b32.xlu1 %v2639_v36, %s5649_s0  ;;  %v1968_v36 = vmul.f32 %v5617_v60, %v7238_v45  ;;  %v2137_v60 = vsel %vm1369_vm15, %v7247_v5, %v7148_v39 }
 0xadf   :  { %v7534_v48 = vpop.permute.xlu0 %2983  ;;  %v7536_v47 = vpop.permute.xlu1 %2987 }
 0xae0   :  { %9625 = vst [vmem:[#allocation29_spill] sm:$0xff] %v7534_v48  ;;  %9626 = vst [vmem:[#allocation30_spill] sm:$0xff] %v7536_v47  ;;  %v1969_v48 = vmul.f32 %v5618_v27, %v7238_v45  ;;  %v1974_v47 = vmul.f32 %v6992_v61, %v7142_v25  ;;  %v1973_v27 = vmul.f32 %v7090_v34, %v7142_v25 }
 0xae1   :  { %v2138_v61 = vsel %vm1369_vm15, %v7148_v39, %v7252_v19  ;;  %v2215_v34 = vsel %vm1369_vm15, %v7152_v28, %v7264_v55  ;;  %v2154_v39 = vadd.f32 %v2135_v62, %v1968_v36  ;;  %v2234_v28 = vadd.f32 %v7260_v1, %v2156_v15 }
 0xae2   :  { %v2155_v50 = vadd.f32 %v2136_v44, %v1969_v48  ;;  %v2317_v15 = vsel %vm1322_vm12, %v7254_v51, %v7316_v17 }
 0xae3   :  { %v7538_v46 = vpop.permute.xlu0 %2936  ;;  %v7540_v10 = vpop.permute.xlu1 %2934  ;;  %v2232_v36 = vadd.f32 %v2213_v4, %v2154_v39  ;;  %v9636_v4 = vld [vmem:[#allocation7_spill] sm:$0xff] }
 0xae4   :  { %9627 = vst [vmem:[#allocation31_spill] sm:$0xff] %v7538_v46  ;;  %9628 = vst [vmem:[#allocation32_spill] sm:$0xff] %v7540_v10  ;;  %v1972_v46 = vmul.f32 %v6981_v23, %v7142_v25  ;;  %v2214_v23 = vsel %vm1369_vm15, %v7150_v43, %v7260_v1  ;;  %v2340_v25 = vadd.f32 %v7272_v26, %v2235_v24  ;;  %v9632_v10 = vld [vmem:[#allocation10_spill] sm:$0xff] }
 0xae5   :  { %v2315_v43 = vsel %vm1322_vm12, %v7156_v49, %v7268_v41  ;;  %v2159_v24 = vadd.f32 %v2138_v61, %v1973_v27  ;;  %v2233_v48 = vadd.f32 %v2214_v23, %v2155_v50  ;;  %v2318_v1 = vsel %vm1322_vm12, %v7272_v26, %v9632_v10  ;;  %v9633_v27 = vld [vmem:[#allocation15_spill] sm:$0xff]  ;;  %v9635_v61 = vld [vmem:[#allocation9_spill] sm:$0xff] }
 0xae6   :  { %v2158_v5 = vadd.f32 %v2137_v60, %v1972_v46  ;;  %v2337_v60 = vadd.f32 %v2315_v43, %v2232_v36  ;;  %v1976_v26 = vmul.f32 %v7140_v63, %v9636_v4  ;;  %v9644_v4 = vld [vmem:[#allocation8_spill] sm:$0xff] }
 0xae7   :  { %v7542_v22 = vpop.permute.xlu0 %2940  ;;  %v7544_v7 = vpop.permute.xlu1 %2938 }
 0xae8   :  { %9629 = vst [vmem:[#allocation33_spill] sm:$0xff] %v7542_v22  ;;  %9630 = vst [vmem:[#allocation34_spill] sm:$0xff] %v7544_v7  ;;  %v2153_v7 = vadd.f32 %v7144_v57, %v1967_v0  ;;  %v1975_v57 = vmul.f32 %v7327_v31, %v7140_v63  ;;  %v2160_v0 = vadd.f32 %v7252_v19, %v1974_v47 }
 0xae9   :  { %v2216_v31 = vsel %vm1369_vm15, %v7264_v55, %v7154_v35  ;;  %v2236_v46 = vadd.f32 %v2215_v34, %v2158_v5  ;;  %v9631_v55 = vld [vmem:[#allocation18_spill] sm:$0xff]  ;;  %v9637_v34 = vld [vmem:[#allocation16_spill] sm:$0xff]  ;;  %v9639_v5 = vld [vmem:[#allocation13_spill] sm:$0xff] }
 0xaea   :  { %v2231_v58 = vadd.f32 %v7256_v6, %v2153_v7  ;;  %v2238_v19 = vadd.f32 %v7154_v35, %v2160_v0  ;;  %v2316_v6 = vsel %vm1322_vm12, %v7268_v41, %v7254_v51  ;;  %v2526_v7 = vadd.f32 %v9631_v55, %v2340_v25  ;;  %v9638_v51 = vld [vmem:[#allocation12_spill] sm:$0xff]  ;;  %v9640_v0 = vld [vmem:[#allocation21_spill] sm:$0xff] }
 0xaeb   :  { %v2237_v44 = vadd.f32 %v2216_v31, %v2159_v24  ;;  %v2319_v35 = vsel %vm1322_vm12, %v9632_v10, %v9633_v27  ;;  %v1977_v41 = vmul.f32 %v7140_v63, %v9635_v61  ;;  %v2320_v31 = vsel %vm1322_vm12, %v9633_v27, %v7309_v12  ;;  %v9643_v27 = vld [vmem:[#allocation23_spill] sm:$0xff] }
 0xaec   :  { %v2336_v47 = vadd.f32 %v7156_v49, %v2231_v58  ;;  %v9634_v49 = vld [vmem:[#allocation11_spill] sm:$0xff]  ;;  %v2338_v23 = vadd.f32 %v2316_v6, %v2233_v48  ;;  %v2505_v10 = vsel %vm1369_vm15, %v9637_v34, %v9638_v51  ;;  %v2341_v50 = vadd.f32 %v2318_v1, %v2236_v46  ;;  %v9641_v48 = vld [vmem:[#allocation14_spill] sm:$0xff] }
 0xaed   :  { %v2504_v17 = vsel %vm1369_vm15, %v9634_v49, %v9637_v34  ;;  %v2506_v12 = vsel %vm1369_vm15, %v9631_v55, %v9639_v5  ;;  %v2507_v43 = vsel %vm1369_vm15, %v9639_v5, %v9640_v0  ;;  %v2339_v24 = vadd.f32 %v2317_v15, %v2234_v28  ;;  %v9645_v28 = vld [vmem:[#allocation24_spill] sm:$0xff] }
 0xaee   :  { %v2522_v58 = vadd.f32 %v9634_v49, %v2336_v47  ;;  %v2342_v36 = vadd.f32 %v2319_v35, %v2237_v44  ;;  %v9642_v47 = vld [vmem:[#allocation22_spill] sm:$0xff]  ;;  %v2583_v49 = vsel %vm1369_vm15, %v9641_v48, %v9643_v27  ;;  %v2343_v61 = vadd.f32 %v2320_v31, %v2238_v19  ;;  %v9646_v44 = vld [vmem:[#allocation17_spill] sm:$0xff]  ;;  %v9647_v31 = vld [vmem:[#allocation19_spill] sm:$0xff] }
 0xaef   :  { %v2582_v6 = vsel %vm1369_vm15, %v9642_v47, %v9641_v48  ;;  %v2523_v46 = vadd.f32 %v2504_v17, %v2337_v60  ;;  %v2524_v1 = vadd.f32 %v2505_v10, %v2338_v23  ;;  %v1978_v55 = vmul.f32 %v7140_v63, %v9644_v4 }
 0xaf0   :  { %v2600_v34 = vadd.f32 %v9642_v47, %v2522_v58  ;;  %v2527_v22 = vadd.f32 %v2506_v12, %v2341_v50  ;;  %v2528_v5 = vadd.f32 %v2507_v43, %v2342_v36  ;;  %v2584_v15 = vsel %vm1369_vm15, %v9646_v44, %v9645_v28 }
 0xaf1   :  { %v2601_v19 = vadd.f32 %v2582_v6, %v2523_v46  ;;  %v2602_v60 = vadd.f32 %v2583_v49, %v2524_v1  ;;  %v2585_v63 = vsel %vm1369_vm15, %v9645_v28, %v9647_v31  ;;  %v2525_v58 = vadd.f32 %v9638_v51, %v2339_v24 }
 0xaf2   :  { %v2529_v23 = vadd.f32 %v9640_v0, %v2343_v61  ;;  %v2604_v43 = vadd.f32 %v9646_v44, %v2526_v7  ;;  %v2605_v36 = vadd.f32 %v2584_v15, %v2527_v22  ;;  %v2684_v48 = vsel %vm112_vm2, %v7408_v33, %v7400_v56  ;;  %v9648_v15 = vld [vmem:[#allocation26_spill] sm:$0xff] }
 0xaf3   :  { %v2685_v51 = vsel %vm112_vm2, %v7400_v56, %v7412_v11  ;;  %v2606_v7 = vadd.f32 %v2585_v63, %v2528_v5  ;;  %v2687_v22 = vsel %vm112_vm2, %v7402_v8, %v7416_v52  ;;  %v2705_v56 = vadd.f32 %v7408_v33, %v2600_v34 }
 0xaf4   :  { %v2706_v49 = vadd.f32 %v2684_v48, %v2601_v19  ;;  %v2709_v61 = vadd.f32 %v7402_v8, %v2604_v43  ;;  %v2323_v46 = vsel %vm1322_vm12, %v7414_v3, %v7406_v18  ;;  %v2321_v33 = vsel %vm1322_vm12, %v7404_v59, %v7420_v16 }
 0xaf5   :  { %v2691_v34 = vsel %vm112_vm2, %v7422_v42, %v7410_v37  ;;  %v2322_v8 = vsel %vm1322_vm12, %v7420_v16, %v7414_v3  ;;  %v2688_v5 = vsel %vm112_vm2, %v7416_v52, %v7524_v53  ;;  %v2692_v3 = vsel %vm112_vm2, %v7410_v37, %v7474_v32 }
 0xaf6   :  { %v2874_v52 = vsel %vm1369_vm15, %v7481_v38, %v7526_v14  ;;  %v2896_v16 = vadd.f32 %v7528_v20, %v2709_v61  ;;  %v2892_v37 = vadd.f32 %v7481_v38, %v2705_v56  ;;  %v2711_v32 = vadd.f32 %v2688_v5, %v2606_v7 }
 0xaf7   :  { %v2893_v43 = vadd.f32 %v2874_v52, %v2706_v49 }
 0xb1c   :  { %v7546_v40 = vpop.permute.xlu0 %2131 }
 0xb20   :  { %v7548_v54 = vpop.permute.xlu1 %2129 }
 0xb21   :  { %v2139_v35 = vsel %vm1369_vm15, %v7548_v54, %v7546_v40  ;;  %v2161_v17 = vadd.f32 %v7548_v54, %v1975_v57 }
 0xb22   :  { %v2162_v47 = vadd.f32 %v2139_v35, %v1976_v26  ;;  %v7698_v26 = vadd.f32 %v9643_v27, %v2525_v58  ;;  %v2710_v27 = vadd.f32 %v2687_v22, %v2605_v36  ;;  %v2690_v35 = vsel %vm112_vm2, %v9648_v15, %v7422_v42  ;;  %v9651_v36 = vld [vmem:[#allocation32_spill] sm:$0xff] }
 0xb23   :  { %v2970_v48 = vadd.f32 %v9651_v36, %v2892_v37 }
 0xb24   :  { %v7552_v2 = vpop.permute.xlu0 %2207  ;;  %v7557_v30 = vpop.permute.xlu1 %2133 }
 0xb25   :  { %v2164_v10 = vadd.f32 %v7557_v30, %v1978_v55  ;;  %v2239_v54 = vadd.f32 %v7552_v2, %v2161_v17  ;;  %v2140_v57 = vsel %vm1369_vm15, %v7546_v40, %v7557_v30  ;;  %v7705_v40 = vadd.f32 %v9647_v31, %v2529_v23 }
 0xb26   :  { %v2707_v30 = vadd.f32 %v2685_v51, %v2602_v60  ;;  %v2163_v1 = vadd.f32 %v2140_v57, %v1977_v41  ;;  %v2875_v17 = vsel %vm1369_vm15, %v7526_v14, %v7487_v9  ;;  %v9652_v51 = vld [vmem:[#allocation28_spill] sm:$0xff]  ;;  %v9653_v57 = vld [vmem:[#allocation31_spill] sm:$0xff] }
 0xb27   :  { %v2344_v4 = vadd.f32 %v7404_v59, %v2239_v54  ;;  %v2952_v14 = vsel %vm1369_vm15, %v9651_v36, %v9653_v57 }
 0xb28   :  { %v7559_v29 = vpop.permute.xlu0 %2211  ;;  %v7604_v13 = vpop.permute.xlu1 %2209 }
 0xb29   :  { %v2217_v50 = vsel %vm1369_vm15, %v7552_v2, %v7604_v13  ;;  %v2242_v0 = vadd.f32 %v7559_v29, %v2164_v10  ;;  %v2218_v2 = vsel %vm1369_vm15, %v7604_v13, %v7559_v29  ;;  %v9649_v10 = vld [vmem:[#allocation27_spill] sm:$0xff] }
 0xb2a   :  { %v2240_v6 = vadd.f32 %v2217_v50, %v2162_v47  ;;  %v2241_v18 = vadd.f32 %v2218_v2, %v2163_v1  ;;  %v2877_v54 = vsel %vm1369_vm15, %v9649_v10, %v9652_v51  ;;  %v9655_v2 = vld [vmem:[#allocation30_spill] sm:$0xff] }
 0xb2b   :  { %v2347_v55 = vadd.f32 %v2323_v46, %v2242_v0 }
 0xb2c   :  { %v7591_v45 = vpop.permute.xlu0 %2498  ;;  %v7645_v25 = vpop.permute.xlu1 %2500  ;;  %v2345_v41 = vadd.f32 %v2321_v33, %v2240_v6  ;;  %v2346_v23 = vadd.f32 %v2322_v8, %v2241_v18  ;;  %v9654_v6 = vld [vmem:[#allocation34_spill] sm:$0xff]  ;;  %v9656_v8 = vld [vmem:[#allocation29_spill] sm:$0xff] }
 0xb2d   :  { %v2530_v28 = vadd.f32 %v7591_v45, %v2344_v4  ;;  %v2508_v59 = vsel %vm1369_vm15, %v7591_v45, %v7645_v25  ;;  %v2953_v56 = vsel %vm1369_vm15, %v9653_v57, %v9654_v6  ;;  %v2898_v4 = vadd.f32 %v2877_v54, %v2711_v32 }
 0xb2e   :  { %v2531_v58 = vadd.f32 %v2508_v59, %v2345_v41  ;;  %v2994_v18 = vadd.f32 %v9656_v8, %v2970_v48 }
 0xb30   :  { %v7614_v62 = vpop.permute.xlu0 %2502  ;;  %v2579_v12 = vpop.permute.xlu1 %2578 }
 0xb31   :  { %v2533_v44 = vadd.f32 %v7614_v62, %v2347_v55  ;;  %v2509_v45 = vsel %vm1369_vm15, %v7645_v25, %v7614_v62  ;;  %v2876_v62 = vsel %vm1369_vm15, %v7528_v20, %v9649_v10  ;;  %v9650_v25 = vld [vmem:[#allocation33_spill] sm:$0xff]  ;;  %v2971_v55 = vadd.f32 %v2952_v14, %v2893_v43 }
 0xb32   :  { %v2974_v50 = vadd.f32 %v9650_v25, %v2896_v16  ;;  %v2532_v38 = vadd.f32 %v2509_v45, %v2346_v23 }
 0xb34   :  { %v7647_v39 = vpop.permute.xlu0 %2576  ;;  %v2871_v29 = vpop.permute.xlu1 %2870  ;;  %v2998_v61 = vadd.f32 %v9655_v2, %v2974_v50 }
 0xb35   :  { %v2586_v19 = vsel %vm1369_vm15, %v7647_v39, %v2579_v12  ;;  %v2608_v60 = vadd.f32 %v7647_v39, %v2530_v28 }
 0xb36   :  { %v2609_v47 = vadd.f32 %v2586_v19, %v2531_v58  ;;  %v7776_v16 = vpack.c.bf16 %v2998_v61, %v2994_v18 }
 0xb37   :  { %v2713_v20 = vadd.f32 %v9648_v15, %v2608_v60 }
 0xb38   :  { %v7670_v21 = vpop.permute.xlu0 %2580  ;;  %v2714_v41 = vadd.f32 %v2690_v35, %v2609_v47  ;;  %v3014_v48 = vunpack.c.l.bf16 %v7776_v16 }
 0xb39   :  { %v2611_v42 = vadd.f32 %v7670_v21, %v2533_v44  ;;  %v2587_v39 = vsel %vm1369_vm15, %v2579_v12, %v7670_v21  ;;  %v2894_v21 = vadd.f32 %v2875_v17, %v2707_v30  ;;  %v2897_v12 = vadd.f32 %v2876_v62, %v2710_v27 }
 0xb3a   :  { %v2610_v49 = vadd.f32 %v2587_v39, %v2532_v38 }
 0xb3b   :  { %v2716_v0 = vadd.f32 %v2692_v3, %v2611_v42  ;;  %v2972_v44 = vadd.f32 %v2953_v56, %v2894_v21 }
 0xb3c   :  { %v2869_v24 = vpop.permute.xlu0 %2868  ;;  %v2715_v3 = vadd.f32 %v2691_v34, %v2610_v49 }
 0xb3d   :  { %v2878_v46 = vsel %vm1369_vm15, %v2869_v24, %v2871_v29  ;;  %v2900_v1 = vadd.f32 %v2869_v24, %v2713_v20 }
 0xb3e   :  { %v2901_v15 = vadd.f32 %v2878_v46, %v2714_v41 }
 0xb40   :  { %v2873_v13 = vpop.permute.xlu0 %2872 }
 0xb41   :  { %v2903_v33 = vadd.f32 %v2873_v13, %v2716_v0  ;;  %v2879_v5 = vsel %vm1369_vm15, %v2871_v29, %v2873_v13  ;;  %v2995_v13 = vadd.f32 %v9656_v8, %v2971_v55 }
 0xb42   :  { %v2902_v19 = vadd.f32 %v2879_v5, %v2715_v3 }
 0xb44   :  { %v2949_v31 = vpop.permute.xlu0 %2948  ;;  %v2947_v63 = vpop.permute.xlu1 %2946 }
 0xb45   :  { %v2956_v30 = vsel %vm1369_vm15, %v2947_v63, %v2949_v31  ;;  %v2978_v27 = vadd.f32 %v2947_v63, %v2900_v1  ;;  %v9657_v63 = vld [vmem:[#allocation20_spill] sm:$0xff] }
 0xb46   :  { %v2979_v60 = vadd.f32 %v2956_v30, %v2901_v15 }
 0xb47   :  { %v3002_v37 = vadd.f32 %v9657_v63, %v2978_v27 }
 0xb48   :  { %v7764_v7 = vpop.permute.xlu0 %2944  ;;  %v2951_v22 = vpop.permute.xlu1 %2950  ;;  %v3003_v43 = vadd.f32 %v9657_v63, %v2979_v60  ;;  %v7826_v60 = vld [vmem:[#allocation2 + $0x78] sm:$0xff] }
 0xb49   :  { %v2981_v28 = vadd.f32 %v2951_v22, %v2903_v33  ;;  %v2957_v45 = vsel %vm1369_vm15, %v2949_v31, %v2951_v22  ;;  %v2996_v31 = vadd.f32 %v9656_v8, %v2972_v44  ;;  %v3010_v38 = vpack.c.bf16 %v3002_v37, %v3002_v37 }
 0xb4a   :  { %v2980_v17 = vadd.f32 %v2957_v45, %v2902_v19  ;;  %v3011_v49 = vpack.c.bf16 %v3003_v43, %v3003_v43  ;;  %v3026_v33 = vsub.f32 %v2994_v18, %v3014_v48  ;;  %v7824_v19 = vld [vmem:[%s9457_s4] sm:$0xff]  ;;  %v7903_v48 = vld [vmem:[%s9456_s1 + $0x18] sm:$0xff] }
 0xb4b   :  { %v3005_v34 = vadd.f32 %v9657_v63, %v2981_v28 }
 0xb4c   :  { %v2943_v59 = vpop.permute.xlu1 %2942  ;;  %v2675_v52 = vpop.permute.xlu0 %2674  ;;  %v3004_v14 = vadd.f32 %v9657_v63, %v2980_v17  ;;  %v3023_v30 = vunpack.c.l.bf16 %v3011_v49  ;;  %v9658_v63 = vld [vmem:[#allocation25_spill] sm:$0xff]  ;;  %v3471_v17 = vld [vmem:[#allocation2 + $0x8] sm:$0xff] }
 0xb4d   :  { %v2954_v24 = vsel %vm1369_vm15, %v9650_v25, %v2943_v59  ;;  %v2955_v35 = vsel %vm1369_vm15, %v2943_v59, %v7764_v7  ;;  %v2689_v32 = vsel %vm112_vm2, %v7524_v53, %v2675_v52  ;;  %v3018_v25 = vunpack.c.h.bf16 %v7776_v16 }
 0xb4e   :  { %v2975_v29 = vadd.f32 %v2954_v24, %v2897_v12  ;;  %v2976_v42 = vadd.f32 %v2955_v35, %v2898_v4  ;;  %v2712_v53 = vadd.f32 %v2689_v32, %v7705_v40  ;;  %v3013_v47 = vpack.c.bf16 %v3005_v34, %v3005_v34  ;;  %v3472_v32 = vld [vmem:[#allocation2 + $0x10] sm:$0xff] }
 0xb4f   :  { %v3022_v4 = vunpack.c.l.bf16 %v3010_v38  ;;  %v3012_v55 = vpack.c.bf16 %v3004_v14, %v3004_v14  ;;  %v3035_v44 = vsub.f32 %v3003_v43, %v3023_v30  ;;  %v4381_v43 = vld [vmem:[#allocation2 + $0xa0] sm:$0xff]  ;;  %vm3082_vm15 = vcmask 195584  }
 0xb50   :  { %v2999_v58 = vadd.f32 %v9655_v2, %v2975_v29  ;;  %v2667_v23 = vpop.permute.xlu1 %2666  ;;  %v3000_v10 = vadd.f32 %v9655_v2, %v2976_v42  ;;  %v2899_v12 = vadd.f32 %v9652_v51, %v2712_v53  ;;  %v3025_v46 = vunpack.c.l.bf16 %v3013_v47  ;;  %v7831_v42 = vld [vmem:[#allocation2 + $0x88] sm:$0xff]  ;;  %v4385_v53 = vld [vmem:[#allocation2 + $0xd8] sm:$0xff] }
 0xb51   :  { %v2686_v62 = vsel %vm112_vm2, %v7412_v11, %v2667_v23  ;;  %v3034_v51 = vsub.f32 %v3002_v37, %v3022_v4  ;;  %v3024_v59 = vunpack.c.l.bf16 %v3012_v55  ;;  %v3043_v52 = vpack.c.bf16 %v3035_v44, %v3035_v44  ;;  %v7849_v23 = vld [vmem:[#allocation2 + $0x80] sm:$0xff] }
 0xb52   :  { %v3007_v50 = vpack.c.bf16 %v2999_v58, %v2995_v13  ;;  %v2708_v39 = vadd.f32 %v2686_v62, %v7698_v26  ;;  %v3008_v36 = vpack.c.bf16 %v3000_v10, %v2996_v31  ;;  %v3030_v26 = vsub.f32 %v2998_v61, %v3018_v25  ;;  %v7861_v62 = vld [vmem:[#allocation2 + $0x90] sm:$0xff]  ;;  %v7865_v25 = vld [vmem:[#allocation2 + $0x48] sm:$0xff] }
 0xb53   :  { %v3037_v61 = vsub.f32 %v3005_v34, %v3025_v46  ;;  %v3042_v3 = vpack.c.bf16 %v3034_v51, %v3034_v51  ;;  %v9659_v37 = vmov 10   ;;  %v9660_v34 = vmov 11   ;;  %v3046_v51 = vld [vmem:[%s9458_s2 + $0x8] sm:$0xf] }
 0xb54   :  { %v3019_v54 = vunpack.c.h.bf16 %v3007_v50  ;;  %v3015_v57 = vunpack.c.l.bf16 %v3007_v50  ;;  %v3020_v20 = vunpack.c.h.bf16 %v3008_v36  ;;  %v2895_v11 = vadd.f32 %v7487_v9, %v2708_v39  ;;  %v7878_v39 = vld [vmem:[#allocation2 + $0x58] sm:$0xff] }
 0xb55   :  { %v3016_v0 = vunpack.c.l.bf16 %v3008_v36  ;;  %v2977_v9 = vadd.f32 %v7764_v7, %v2899_v12  ;;  %v3038_v28 = vpack.c.bf16 %v3030_v26, %v3026_v33  ;;  %v3036_v7 = vsub.f32 %v3004_v14, %v3024_v59  ;;  %v7921_v26 = vld [vmem:[%s9456_s1 + $0x8] sm:$0xff] }
 0xb56   :  { %v3031_v22 = vsub.f32 %v2999_v58, %v3019_v54  ;;  %v3027_v21 = vsub.f32 %v2995_v13, %v3015_v57  ;;  %v3032_v56 = vsub.f32 %v3000_v10, %v3020_v20  ;;  %v2973_v41 = vadd.f32 %v9654_v6, %v2895_v11  ;;  %v7844_v58 = vld [vmem:[#allocation2 + $0x40] sm:$0xff]  ;;  %v7857_v10 = vld [vmem:[#allocation2 + $0x18] sm:$0xff] }
 0xb57   :  { %v3028_v40 = vsub.f32 %v2996_v31, %v3016_v0  ;;  %v3001_v18 = vadd.f32 %v9655_v2, %v2977_v9  ;;  %v3045_v6 = vpack.c.bf16 %v3037_v61, %v3037_v61  ;;  %v3044_v24 = vpack.c.bf16 %v3036_v7, %v3036_v7  ;;  %v3477_v31 = vld [vmem:[#allocation2 + $0x50] sm:$0xff] }
 0xb58   :  { %v3039_v1 = vpack.c.bf16 %v3031_v22, %v3027_v21  ;;  %v2997_v27 = vadd.f32 %v9656_v8, %v2973_v41  ;;  %v5689_v2 = vmov 30   ;;  %v5690_v11 = vmov 32  }
 0xb59   :  { %v3040_v5 = vpack.c.bf16 %v3032_v56, %v3028_v40  ;;  %5565 = vset.pattern.permute.xlu0 %v5689_v2 }
 0xb5a   :  { %3058 = vrot.lane.b32.xlu0 %v3039_v1, %s5677_s29  ;;  %v3009_v15 = vpack.c.bf16 %v3001_v18, %v2997_v27 }
 0xb5b   :  { %3060 = vrot.lane.b32.xlu1 %v3040_v5, %s5677_s29  ;;  %v5691_v5 = vmov 34  }
 0xb5c   :  { %v3017_v8 = vunpack.c.l.bf16 %v3009_v15  ;;  %v3021_v45 = vunpack.c.h.bf16 %v3009_v15 }
 0xb5e   :  { %3192 = vrot.lane.b32.xlu0 %v3010_v38, %s5677_s29  ;;  %v3029_v35 = vsub.f32 %v2997_v27, %v3017_v8  ;;  %v3033_v29 = vsub.f32 %v3001_v18, %v3021_v45  ;;  %v4373_v38 = vld [vmem:[#allocation2 + $0x30] sm:$0xff] }
 0xb5f   :  { %3056 = vrot.lane.b32.xlu1 %v3038_v28, %s5677_s29 }
 0xb60   :  { %v3041_v13 = vpack.c.bf16 %v3033_v29, %v3029_v35  ;;  %v3047_v35 = vld [vmem:[%s9459_s3 + $0x8] sm:$0xf] }
 0xb62   :  { %3070 = vrot.lane.b32.xlu0 %v3045_v6, %s5677_s29 }
 0xb63   :  { %3064 = vrot.lane.b32.xlu1 %v3042_v3, %s5677_s29 }
 0xb66   :  { %3066 = vrot.lane.b32.xlu0 %v3043_v52, %s5677_s29 }
 0xb67   :  { %3068 = vrot.lane.b32.xlu1 %v3044_v24, %s5677_s29  ;;  %v5623_v24 = vld [vmem:[#allocation2] sm:$0xff] }
 0xb6a   :  { %3196 = vrot.lane.b32.xlu0 %v3012_v55, %s5677_s29 }
 0xb6b   :  { %3194 = vrot.lane.b32.xlu1 %v3011_v49, %s5677_s29 }
 0xb6e   :  { %3186 = vrot.lane.b32.xlu0 %v3007_v50, %s5677_s29  ;;  %v3881_v50 = vld [vmem:[#allocation2 + $0x20] sm:$0xff] }
 0xb6f   :  { %3062 = vrot.lane.b32.xlu1 %v3041_v13, %s5677_s29 }
 0xb72   :  { %3198 = vrot.lane.b32.xlu0 %v3013_v47, %s5677_s29  ;;  %v7912_v47 = vld [vmem:[%s9456_s1 + $0x10] sm:$0xff] }
 0xb73   :  { %3188 = vrot.lane.b32.xlu1 %v3008_v36, %s5677_s29  ;;  %v4377_v36 = vld [vmem:[#allocation2 + $0x68] sm:$0xff] }
 0xb76   :  { %3190 = vrot.lane.b32.xlu0 %v3009_v15, %s5677_s29  ;;  %v9661_v15 = vmov 0  }
 0xb77   :  { %3184 = vrot.lane.b32.xlu1 %v7776_v16, %s5677_s29  ;;  %v5549_v16 = vpack.i.bf16 %v9658_v63, %v9658_v63 }
 0xb7a   :  { %3560 = vrot.lane.b32.xlu0 %v7826_v60, %s5662_s10 }
 0xb7b   :  { %3389 = vperm.xlu1 %5541, %v7824_v19  }
 0xb7e   :  { %3564 = vrot.lane.b32.xlu0 %v7831_v42, %s5662_s10 }
 0xb7f   :  { %5542 = vset.pattern.permute.xlu1 %v9659_v37 }
 0xb80   :  { %3429 = vperm.xlu1 %5542, %v7824_v19  }
 0xb82   :  { %5550 = vrot.lane.b32.xlu0 %v5549_v16, %s5662_s10 }
 0xb84   :  { %5543 = vset.pattern.permute.xlu1 %v9660_v34 }
 0xb85   :  { %3439 = vperm.xlu1 %5543, %v7824_v19  }
 0xb86   :  { %3546 = vrot.lane.b32.xlu0 %v3472_v32, %s5662_s10 }
 0xb89   :  { %5545 = vrot.lane.b32.xlu1 %v5549_v16, %s5662_s10 }
 0xb8a   :  { %3552 = vrot.lane.b32.xlu0 %v7844_v58, %s5662_s10  ;;  %5564 = vset.pattern.permute.xlu1 %v5689_v2 }
 0xb8d   :  { %3562 = vrot.lane.b32.xlu1 %v7849_v23, %s5662_s10 }
 0xb8e   :  { %3556 = vrot.lane.b32.xlu0 %v3477_v31, %s5662_s10 }
 0xb91   :  { %3544 = vrot.lane.b32.xlu1 %v3471_v17, %s5662_s10 }
 0xb92   :  { %4052 = vrot.lane.b32.xlu0 %v7849_v23, %s5650_s28 }
 0xb95   :  { %3548 = vrot.lane.b32.xlu1 %v7857_v10, %s5662_s10 }
 0xb96   :  { %4056 = vrot.lane.b32.xlu0 %v7861_v62, %s5650_s28 }
 0xb99   :  { %3554 = vrot.lane.b32.xlu1 %v7865_v25, %s5662_s10 }
 0xb9a   :  { %4036 = vrot.lane.b32.xlu0 %v3472_v32, %s5650_s28 }
 0xb9d   :  { %4050 = vrot.lane.b32.xlu1 %v7826_v60, %s5650_s28 }
 0xb9e   :  { %4040 = vrot.lane.b32.xlu0 %v3881_v50, %s5650_s28 }
 0xba1   :  { %4054 = vrot.lane.b32.xlu1 %v7831_v42, %s5650_s28 }
 0xba2   :  { %4044 = vrot.lane.b32.xlu0 %v7865_v25, %s5650_s28 }
 0xba5   :  { %4034 = vrot.lane.b32.xlu1 %v3471_v17, %s5650_s28 }
 0xba6   :  { %4048 = vrot.lane.b32.xlu0 %v7878_v39, %s5650_s28 }
 0xba9   :  { %4038 = vrot.lane.b32.xlu1 %v7857_v10, %s5650_s28 }
 0xbaa   :  { %4468 = vrot.lane.b32.xlu0 %v7861_v62, %s5662_s10 }
 0xbad   :  { %4042 = vrot.lane.b32.xlu1 %v7844_v58, %s5650_s28 }
 0xbae   :  { %4472 = vrot.lane.b32.xlu0 %v4381_v43, %s5662_s10 }
 0xbb1   :  { %4046 = vrot.lane.b32.xlu1 %v3477_v31, %s5650_s28 }
 0xbb2   :  { %4450 = vrot.lane.b32.xlu0 %v7857_v10, %s5662_s10 }
 0xbb5   :  { %4466 = vrot.lane.b32.xlu1 %v7831_v42, %s5662_s10 }
 0xbb6   :  { %5560 = vrot.lane.b32.xlu0 %v5549_v16, %s5662_s10 }
 0xbb9   :  { %5555 = vrot.lane.b32.xlu1 %v5549_v16, %s5662_s10 }
 0xbba   :  { %4458 = vrot.lane.b32.xlu0 %v3477_v31, %s5662_s10 }
 0xbbd   :  { %4480 = vrot.lane.b32.xlu1 %v4385_v53, %s5662_s10 }
 0xbbe   :  { %4464 = vrot.lane.b32.xlu0 %v4377_v36, %s5662_s10  ;;  %v7988_v36 = vld [vmem:[%s9456_s1] sm:$0xff] }
 0xbbf   :  { %9665 = vst [vmem:[#allocation11_spill] sm:$0xff] %v7988_v36 }
 0xbc1   :  { %4452 = vrot.lane.b32.xlu1 %v3881_v50, %s5662_s10 }
 0xbc2   :  { %3683 = vperm.xlu0 %5565, %v7903_v48  }
 0xbc5   :  { %4456 = vrot.lane.b32.xlu1 %v4373_v38, %s5662_s10 }
 0xbc9   :  { %4460 = vrot.lane.b32.xlu1 %v7878_v39, %s5662_s10 }
 0xbcc   :  { %v3059_v54 = vpop.permute.xlu0 %3058 }
 0xbcd   :  { %v3061_v57 = vpop.permute.xlu1 %3060  ;;  %3679 = vperm.xlu1 %5564, %v7912_v47  }
 0xbce   :  { %v3074_v4 = vsel %vm469_vm11, %v3059_v54, %v3061_v57 }
 0xbd0   :  { %v3193_v14 = vpop.permute.xlu0 %3192 }
 0xbd1   :  { %v3057_v20 = vpop.permute.xlu1 %3056  ;;  %5566 = vset.pattern.permute.xlu1 %v5690_v11 }
 0xbd2   :  { %3783 = vperm.xlu1 %5566, %v7912_v47   ;;  %v3073_v41 = vsel %vm469_vm11, %v3057_v20, %v3059_v54 }
 0xbd4   :  { %v3071_v0 = vpop.permute.xlu0 %3070 }
 0xbd5   :  { %v3065_v22 = vpop.permute.xlu1 %3064 }
 0xbd6   :  { %3787 = vperm.xlu1 %5566, %v7903_v48  }
 0xbd8   :  { %v3067_v21 = vpop.permute.xlu0 %3066 }
 0xbd9   :  { %v3076_v12 = vsel %vm469_vm11, %v3065_v22, %v3067_v21  ;;  %v3069_v56 = vpop.permute.xlu1 %3068 }
 0xbda   :  { %v3078_v40 = vsel %vm469_vm11, %v3069_v56, %v3071_v0  ;;  %v3077_v49 = vsel %vm469_vm11, %v3067_v21, %v3069_v56  ;;  %v3087_v46 = vsel %vm473_vm10, %v3076_v12, 0  ;;  %5567 = vset.pattern.permute.xlu1 %v5689_v2 }
 0xbdb   :  { %5280 = vmatprep.subr.msk.bf16.mxu0 %vm473_vm10, %v3077_v49  ;;  %v3093_v1 = vsel %vm473_vm10, %v3078_v40, 0  ;;  %3675 = vperm.xlu1 %5567, %v7921_v26  }
 0xbdc   :  { %3108 = vmatpush1.bf16.msra.mxu0 %v3087_v46  ;;  %5362 = vmatpush3.bf16.msra.mxu1 %v3093_v1  ;;  %v3197_v33 = vpop.permute.xlu0 %3196 }
 0xbdd   :  { %3109 = vmatprep.subr.bf16.mxu0 %v3074_v4  ;;  %v3195_v55 = vpop.permute.xlu1 %3194  ;;  %5363 = vmatprep.subr.bf16.mxu1 %v9658_v63 }
 0xbde   :  { %v3203_v9 = vsel %vm469_vm11, %v3193_v14, %v3195_v55  ;;  %v3204_v30 = vsel %vm469_vm11, %v3195_v55, %v3197_v33 }
 0xbdf   :  { %5568 = vset.pattern.permute.xlu1 %v5691_v5  ;;  %v3210_v59 = vsel %vm473_vm10, %v3203_v9, 0 }
 0xbe0   :  { %3110 = vmatpush1.bf16.msra.mxu0 %v3073_v41  ;;  %v3187_v61 = vpop.permute.xlu0 %3186  ;;  %3907 = vperm.xlu1 %5568, %v7903_v48  }
 0xbe1   :  { %5283 = vmatprep.subr.msk.bf16.mxu0 %vm473_vm10, %v3204_v30  ;;  %v3063_v27 = vpop.permute.xlu1 %3062 }
 0xbe2   :  { %v3075_v28 = vsel %vm469_vm11, %v3061_v57, %v3063_v27  ;;  %v5692_v57 = vmov 33  }
 0xbe3   :  { %5364 = vmatpush3.bf16.msra.mxu1 %v3075_v28  ;;  %5281 = vmatmul.mubr.msk.bf16.vlgmr.msra.gmra.mxu0 %vm3082_vm15, %v3046_v51 }
 0xbe4   :  { %3231 = vmatpush1.bf16.msra.mxu0 %v3210_v59  ;;  %v3199_v18 = vpop.permute.xlu0 %3198  ;;  %5369 = vmatprep.subr.bf16.mxu1 %v9658_v63 }
 0xbe5   :  { %v3205_v6 = vsel %vm469_vm11, %v3197_v33, %v3199_v18  ;;  %v3189_v44 = vpop.permute.xlu1 %3188  ;;  %3250 = vmatprep.mubr.bf16.mxu0 %v9661_v15  ;;  %5569 = vset.pattern.permute.xlu1 %v5690_v11  ;;  %v5693_v33 = vmov 35  }
 0xbe6   :  { %v3216_v3 = vsel %vm473_vm10, %v3205_v6, 0  ;;  %5366 = vmatmul.mubr.msk.bf16.vlgmr.msra.gmra.mxu1 %vm3082_vm15, %v3046_v51  ;;  %v3201_v7 = vsel %vm469_vm11, %v3187_v61, %v3189_v44 }
 0xbe7   :  { %3232 = vmatprep.subr.bf16.mxu0 %v3201_v7  ;;  %5370 = vmatpush3.bf16.msra.mxu1 %v3216_v3 }
 0xbe8   :  { %v3191_v52 = vpop.permute.xlu0 %3190  ;;  %5371 = vmatprep.subr.bf16.mxu1 %v5623_v24  ;;  %5373 = vmatprep.mubr.msk.bf16.mxu1 %vm5664_vm9, %v5623_v24 }
 0xbe9   :  { %v3202_v8 = vsel %vm469_vm11, %v3189_v44, %v3191_v52  ;;  %v3185_v45 = vpop.permute.xlu1 %3184  ;;  %v5695_v52 = vmov 38  }
 0xbea   :  { %v3200_v2 = vsel %vm469_vm11, %v3185_v45, %v3187_v61 }
 0xbeb   :  { %3233 = vmatpush1.bf16.msra.mxu0 %v3200_v2  ;;  %5372 = vmatpush3.bf16.msra.mxu1 %v3202_v8 }
 0xbec   :  { %5286 = vmatprep.subr.msk.bf16.mxu0 %vm473_vm10, %v3204_v30  ;;  %5377 = vmatprep.subr.bf16.mxu1 %v5623_v24  ;;  %v3561_v37 = vpop.permute.xlu0 %3560 }
 0xbee   :  { %5284 = vmatmul.mubr.msk.bf16.vlgmr.msra.gmra.mxu0 %vm3082_vm15, %v3046_v51  ;;  %5374 = vmatmul.mubr.msk.bf16.vlgmr.msra.gmra.mxu1 %vm3082_vm15, %v3046_v51 }
 0xbef   :  { %3315 = vmatpush1.bf16.msra.mxu0 %v3210_v59  ;;  %5378 = vmatpush3.bf16.msra.mxu1 %v3216_v3  ;;  %v5694_v59 = vmov 36  }
 0xbf0   :  { %3316 = vmatprep.subr.bf16.mxu0 %v3201_v7  ;;  %5379 = vmatprep.subr.bf16.mxu1 %v5623_v24  ;;  %v3565_v17 = vpop.permute.xlu0 %3564 }
 0xbf1   :  { %3334 = vmatprep.mubr.bf16.mxu0 %v9661_v15  ;;  %5381 = vmatprep.mubr.msk.bf16.mxu1 %vm5664_vm9, %v5623_v24 }
 0xbf3   :  { %3317 = vmatpush1.bf16.msra.mxu0 %v3200_v2  ;;  %5380 = vmatpush3.bf16.msra.mxu1 %v3202_v8 }
 0xbf4   :  { %5385 = vmatprep.subr.bf16.mxu1 %v5623_v24  ;;  %v5551_v53 = vpop.permute.xlu0 %5550 }
 0xbf5   :  { %v5553_v20 = vunpack.i.h.bf16 %v5551_v53  ;;  %v5552_v0 = vunpack.i.l.bf16 %v5551_v53 }
 0xbf6   :  { %5287 = vmatmul.mubr.msk.bf16.vlgmr.msra.gmra.mxu0 %vm3082_vm15, %v3047_v35  ;;  %5382 = vmatmul.mubr.msk.bf16.vlgmr.msra.gmra.mxu1 %vm3082_vm15, %v3047_v35  ;;  %v7965_v29 = vpop.permute.xlu1 %3389 }
 0xbf7   :  { %4940 = vmatprep.mubr.bf16.mxu0 %v9661_v15  ;;  %5389 = vmatprep.mubr.msk.bf16.mxu1 %vm5664_vm9, %v5623_v24 }
 0xbf8   :  { %v3547_v54 = vpop.permute.xlu0 %3546 }
 0xbfb   :  { %v7969_v13 = vpop.permute.xlu1 %3429 }
 0xbfc   :  { %9662 = vst [vmem:[#allocation18_spill] sm:$0xff] %v7969_v13  ;;  %v3553_v22 = vpop.permute.xlu0 %3552 }
 0xbfd   :  { %v3577_v21 = vsel %vm213_vm7, %v5553_v20, %v3553_v22 }
 0xc00   :  { %v7971_v63 = vpop.permute.xlu1 %3439  ;;  %v3557_v49 = vpop.permute.xlu0 %3556 }
 0xc01   :  { %9663 = vst [vmem:[#allocation10_spill] sm:$0xff] %v7971_v63 }
 0xc04   :  { %v7973_v16 = vpop.permute.xlu1 %5545  ;;  %v4053_v55 = vpop.permute.xlu0 %4052 }
 0xc05   :  { %9664 = vst [vmem:[#allocation15_spill] sm:$0xff] %v7973_v16  ;;  %v5547_v34 = vunpack.i.l.bf16 %v7973_v16 }
 0xc07   :  { %v3580_v32 = vsel %vm213_vm7, %v5547_v34, %v3561_v37 }
 0xc08   :  { %v3563_v31 = vpop.permute.xlu1 %3562  ;;  %3638 = vrot.lane.b32.xlu1 %v3580_v32, %s5661_s9  ;;  %3602 = vrot.lane.b32.xlu0 %v3580_v32, %s5660_s8  ;;  %v4057_v61 = vpop.permute.xlu0 %4056 }
 0xc09   :  { %v3581_v50 = vsel %vm213_vm7, %v3561_v37, %v3563_v31  ;;  %v3582_v43 = vsel %vm213_vm7, %v3563_v31, %v3565_v17 }
 0xc0c   :  { %3646 = vrot.lane.b32.xlu1 %v3581_v50, %s5661_s9  ;;  %3610 = vrot.lane.b32.xlu0 %v3581_v50, %s5660_s8  ;;  %v3545_v38 = vpop.permute.xlu1 %3544  ;;  %v8034_v27 = vpop.permute.xlu0 %4036 }
 0xc0d   :  { %v3575_v40 = vsel %vm213_vm7, %v3545_v38, %v3547_v54 }
 0xc10   :  { %3654 = vrot.lane.b32.xlu1 %v3582_v43, %s5661_s9  ;;  %3618 = vrot.lane.b32.xlu0 %v3582_v43, %s5660_s8  ;;  %v3549_v14 = vpop.permute.xlu1 %3548  ;;  %v8040_v18 = vpop.permute.xlu0 %4040 }
 0xc11   :  { %v3576_v1 = vsel %vm213_vm7, %v3547_v54, %v3549_v14 }
 0xc14   :  { %3775 = vperm.xlu1 %5569, %v7988_v36   ;;  %3671 = vperm.xlu0 %5565, %v7988_v36   ;;  %v3555_v12 = vpop.permute.xlu1 %3554  ;;  %v4045_v44 = vpop.permute.xlu0 %4044 }
 0xc15   :  { %v3578_v56 = vsel %vm213_vm7, %v3553_v22, %v3555_v12  ;;  %v3579_v46 = vsel %vm213_vm7, %v3555_v12, %v3557_v49 }
 0xc18   :  { %5572 = vset.pattern.permute.xlu1 %v5692_v57  ;;  %5570 = vset.pattern.permute.xlu0 %v5690_v11  ;;  %v3574_v11 = vsel %vm213_vm7, %v5552_v0, %v3545_v38  ;;  %v4051_v4 = vpop.permute.xlu1 %4050  ;;  %v4049_v8 = vpop.permute.xlu0 %4048 }
 0xc19   :  { %4171 = vperm.xlu1 %5572, %v7912_v47   ;;  %3779 = vperm.xlu0 %5570, %v7921_v26   ;;  %v4072_v41 = vsel %vm233_vm3, %v4051_v4, %v4053_v55 }
 0xc1d   :  { %4175 = vperm.xlu1 %5572, %v7903_v48   ;;  %5571 = vset.pattern.permute.xlu0 %v5691_v5 }
 0xc1e   :  { %3903 = vperm.xlu0 %5571, %v7912_v47  }
 0xc21   :  { %3600 = vrot.lane.b32.xlu1 %v3577_v21, %s5660_s8 }
 0xc22   :  { %3598 = vrot.lane.b32.xlu0 %v3574_v11, %s5660_s8  ;;  %5573 = vset.pattern.permute.xlu1 %v5691_v5  ;;  %v4055_v5 = vpop.permute.xlu1 %4054 }
 0xc23   :  { %v4073_v9 = vsel %vm233_vm3, %v4053_v55, %v4055_v5  ;;  %v4074_v30 = vsel %vm233_vm3, %v4055_v5, %v4057_v61 }
 0xc25   :  { %3608 = vrot.lane.b32.xlu1 %v3578_v56, %s5660_s8 }
 0xc26   :  { %3606 = vrot.lane.b32.xlu0 %v3575_v40, %s5660_s8  ;;  %v8031_v51 = vpop.permute.xlu1 %4034 }
 0xc29   :  { %3616 = vrot.lane.b32.xlu1 %v3579_v46, %s5660_s8 }
 0xc2a   :  { %3614 = vrot.lane.b32.xlu0 %v3576_v1, %s5660_s8  ;;  %v8037_v28 = vpop.permute.xlu1 %4038 }
 0xc2d   :  { %3899 = vperm.xlu1 %5573, %v7921_v26  }
 0xc2e   :  { %3895 = vperm.xlu0 %5571, %v7988_v36   ;;  %v4043_v6 = vpop.permute.xlu1 %4042 }
 0xc2f   :  { %v8045_v3 = vsel %vm233_vm3, %v4043_v6, %v4045_v44 }
 0xc31   :  { %5574 = vset.pattern.permute.xlu1 %v5693_v33 }
 0xc32   :  { %4275 = vperm.xlu1 %5574, %v7912_v47   ;;  %3642 = vrot.lane.b32.xlu0 %v3575_v40, %s5661_s9  ;;  %v4047_v7 = vpop.permute.xlu1 %4046 }
 0xc33   :  { %5575 = vset.pattern.permute.xlu0 %v5692_v57  ;;  %v8051_v24 = vsel %vm233_vm3, %v4045_v44, %v4047_v7  ;;  %v8056_v45 = vsel %vm233_vm3, %v4047_v7, %v4049_v8 }
 0xc36   :  { %3634 = vrot.lane.b32.xlu1 %v3574_v11, %s5661_s9  ;;  %3650 = vrot.lane.b32.xlu0 %v3576_v1, %s5661_s9  ;;  %v8060_v2 = vpop.permute.xlu1 %4466 }
 0xc37   :  { %5577 = vset.pattern.permute.xlu1 %v5692_v57 }
 0xc3a   :  { %3636 = vrot.lane.b32.xlu1 %v3577_v21, %s5661_s9  ;;  %4094 = vrot.lane.b32.xlu0 %v4072_v41, %s5660_s8  ;;  %v8062_v35 = vpop.permute.xlu1 %5555 }
 0xc3b   :  { %9666 = vst [vmem:[#allocation9_spill] sm:$0xff] %v8062_v35 }
 0xc3e   :  { %3644 = vrot.lane.b32.xlu1 %v3578_v56, %s5661_s9  ;;  %4102 = vrot.lane.b32.xlu0 %v4073_v9, %s5660_s8  ;;  %v8064_v37 = vpop.permute.xlu1 %4480 }
 0xc42   :  { %3652 = vrot.lane.b32.xlu1 %v3579_v46, %s5661_s9  ;;  %4110 = vrot.lane.b32.xlu0 %v4074_v30, %s5660_s8  ;;  %v8066_v34 = vpop.permute.xlu1 %4452 }
 0xc46   :  { %4167 = vperm.xlu1 %5577, %v7921_v26   ;;  %4163 = vperm.xlu0 %5575, %v7988_v36   ;;  %v8068_v32 = vpop.permute.xlu1 %4456 }
 0xc4a   :  { %4130 = vrot.lane.b32.xlu1 %v4072_v41, %s5661_s9  ;;  %5576 = vset.pattern.permute.xlu0 %v5693_v33  ;;  %v8070_v31 = vpop.permute.xlu1 %4460 }
 0xc4b   :  { %5578 = vset.pattern.permute.xlu1 %v5693_v33  ;;  %4279 = vperm.xlu0 %5576, %v7903_v48  }
 0xc4e   :  { %4138 = vrot.lane.b32.xlu1 %v4073_v9, %s5661_s9  ;;  %v8072_v17 = vpop.permute.xlu1 %3679 }
 0xc52   :  { %4146 = vrot.lane.b32.xlu1 %v4074_v30, %s5661_s9  ;;  %v8074_v50 = vpop.permute.xlu1 %3783 }
 0xc56   :  { %4267 = vperm.xlu1 %5578, %v7988_v36   ;;  %v8076_v14 = vpop.permute.xlu1 %3787 }
 0xc57   :  { %9667 = vst [vmem:[#allocation7_spill] sm:$0xff] %v8076_v14 }
 0xc5a   :  { %5579 = vset.pattern.permute.xlu1 %v5694_v59  ;;  %v8078_v11 = vpop.permute.xlu1 %3675 }
 0xc5b   :  { %4587 = vperm.xlu1 %5579, %v7912_v47  }
 0xc5e   :  { %v8080_v4 = vpop.permute.xlu1 %3907 }
 0xc5f   :  { %4591 = vperm.xlu1 %5579, %v7903_v48   ;;  %9668 = vst [vmem:[#allocation16_spill] sm:$0xff] %v8080_v4 }
 0xc63   :  { %4092 = vrot.lane.b32.xlu1 %v8045_v3, %s5660_s8 }
 0xc64   :  { %5580 = vset.pattern.permute.xlu1 %v5695_v52 }
 0xc67   :  { %4100 = vrot.lane.b32.xlu1 %v8051_v24, %s5660_s8 }
 0xc6b   :  { %4108 = vrot.lane.b32.xlu1 %v8056_v45, %s5660_s8 }
 0xca3   :  { %v3129_v43 = vpop.f32.mrf.mxu0 }
 0xca5   :  { %v3131_v53 = vpop.f32.mrf.mxu0 }
 0xca6   :  { %v3170_v38 = vpop.f32.mrf.mxu1 }
 0xca7   :  { %v3133_v54 = vpop.f32.mrf.mxu0 }
 0xca8   :  { %v5367_v57 = vpop.f32.mrf.mxu1 }
 0xca9   :  { %v3134_v20 = vpop.f32.mrf.mxu0 }
 0xcaa   :  { %v3173_v0 = vpop.f32.mrf.mxu1 }
 0xcac   :  { %v5368_v22 = vpop.f32.mrf.mxu1 }
 0xcad   :  { %v8088_v22 = vpop.permute.xlu1 %3638 }
 0xcae   :  { %v3252_v21 = vpop.f32.mrf.mxu0  ;;  %v3293_v12 = vpop.f32.mrf.mxu1 }
 0xcaf   :  { %v3253_v55 = vadd.f32 %v3252_v21, %v3129_v43  ;;  %v3294_v41 = vadd.f32 %v3293_v12, %v3170_v38  ;;  %v9670_v43 = vld [vmem:[#allocation4_spill] sm:$0xff] }
 0xcb0   :  { %v3254_v56 = vpop.f32.mrf.mxu0  ;;  %v5375_v40 = vpop.f32.mrf.mxu1 }
 0xcb1   :  { %v3255_v61 = vadd.f32 %v3254_v56, %v3131_v53  ;;  %v9671_v56 = vld [vmem:[#allocation5_spill] sm:$0xff] }
 0xcb2   :  { %v3256_v49 = vpop.f32.mrf.mxu0  ;;  %v3296_v46 = vpop.f32.mrf.mxu1 }
 0xcb3   :  { %v9672_v49 = vld [vmem:[#allocation6_spill] sm:$0xff] }
 0xcb4   :  { %v3257_v1 = vpop.f32.mrf.mxu0  ;;  %v5376_v33 = vpop.f32.mrf.mxu1 }
 0xcb6   :  { %v3336_v5 = vpop.f32.mrf.mxu0  ;;  %v3377_v9 = vpop.f32.mrf.mxu1 }
 0xcb7   :  { %v3383_v30 = vadd.f32 %v3336_v5, %v3253_v55  ;;  %v3385_v6 = vadd.f32 %v3377_v9, %v3294_v41  ;;  %v8102_v9 = vpop.permute.xlu1 %3646 }
 0xcb8   :  { %v3338_v44 = vpop.f32.mrf.mxu0  ;;  %v5383_v7 = vpop.f32.mrf.mxu1 }
 0xcb9   :  { %v8083_v8 = vadd.f32 %v7965_v29, %v3383_v30  ;;  %v8086_v54 = vadd.f32 %v7965_v29, %v3385_v6  ;;  %v3384_v57 = vadd.f32 %v3338_v44, %v3255_v61  ;;  %v4469_v30 = vpop.permute.xlu0 %4468 }
 0xcba   :  { %v3340_v20 = vpop.f32.mrf.mxu0  ;;  %v3380_v0 = vpop.f32.mrf.mxu1 }
 0xcbb   :  { %9669 = vst [vmem:[#allocation12_spill] sm:$0xff] %v8086_v54  ;;  %v3395_v38 = vmul.f32 %v8083_v8, %v9670_v43  ;;  %v8093_v53 = vadd.f32 %v7965_v29, %v3384_v57  ;;  %v3397_v46 = vmul.f32 %v8086_v54, %v9672_v49  ;;  %v8104_v6 = vpop.permute.xlu1 %3654 }
 0xcbc   :  { %v3341_v21 = vpop.f32.mrf.mxu0  ;;  %v5384_v12 = vpop.f32.mrf.mxu1 }
 0xcbd   :  { %v3396_v40 = vmul.f32 %v8093_v53, %v9671_v56  ;;  %v3402_v1 = vmul.f32 %v3395_v38, %v8083_v8  ;;  %v3404_v41 = vmul.f32 %v3397_v46, %v8086_v54  ;;  %v4473_v44 = vpop.permute.xlu0 %4472  ;;  %v4066_v21 = vsel %vm233_vm3, %v8031_v51, %v8034_v27 }
 0xcbf   :  { %v3403_v33 = vmul.f32 %v3396_v40, %v8093_v53  ;;  %v3398_v55 = vadd.f32 %v3396_v40, %v3395_v38  ;;  %v8106_v7 = vpop.permute.xlu1 %3775  ;;  %v4067_v40 = vsel %vm233_vm3, %v8034_v27, %v8037_v28  ;;  %v4488_v27 = vsel %vm213_vm7, %v8060_v2, %v4469_v30 }
 0xcc1   :  { %v3405_v5 = vadd.f32 %v3403_v33, %v3402_v1  ;;  %v3399_v29 = vadd.f32 %v3398_v55, %v3397_v46  ;;  %v4451_v57 = vpop.permute.xlu0 %4450  ;;  %v4068_v1 = vsel %vm233_vm3, %v8037_v28, %v8040_v18  ;;  %v5557_v55 = vunpack.i.l.bf16 %v8062_v35 }
 0xcc3   :  { %v3406_v61 = vadd.f32 %v3405_v5, %v3404_v41  ;;  %3400 = vadd.xlane.f32.xlu0 %v3399_v29  ;;  %v8108_v20 = vpop.permute.xlu1 %4171  ;;  %v4489_v41 = vsel %vm213_vm7, %v4469_v30, %v5557_v55  ;;  %v4490_v2 = vsel %vm213_vm7, %v5557_v55, %v4473_v44  ;;  %v9523_v29 = vunpack.i.h.bf16 %v8062_v35 }
 0xcc4   :  { %v9534_v35 = vmov 37  }
 0xcc5   :  { %3407 = vadd.xlane.f32.xlu1 %v3406_v61  ;;  %v8111_v0 = vpop.permute.xlu0 %5560  ;;  %v4493_v61 = vsel %vm213_vm7, %v9523_v29, %v8064_v37  ;;  %v9675_v29 = vmov 9  }
 0xcc6   :  { %v5562_v37 = vunpack.i.l.bf16 %v8111_v0 }
 0xcc7   :  { %v8113_v38 = vpop.permute.xlu1 %4175 }
 0xcc8   :  { %9673 = vst [vmem:[#allocation13_spill] sm:$0xff] %v8113_v38  ;;  %v3660_v38 = vsel %vm137_vm6, %v8102_v9, %v8104_v6 }
 0xcc9   :  { %v8121_v12 = vpop.permute.xlu0 %4458  ;;  %v3797_v16 = vmul.f32 %v8074_v50, %v3660_v38 }
 0xccb   :  { %v8126_v46 = vpop.permute.xlu1 %3600 }
 0xccd   :  { %v8131_v51 = vpop.permute.xlu0 %4464 }
 0xccf   :  { %v8138_v33 = vpop.permute.xlu1 %3608 }
 0xcd3   :  { %v8148_v28 = vpop.permute.xlu1 %3616 }
 0xcd6   :  { %4695 = vperm.xlu1 %5580, %v7903_v48  }
 0xcd7   :  { %v8159_v5 = vpop.permute.xlu1 %3899 }
 0xcd9   :  { %4271 = vperm.xlu0 %5576, %v7921_v26  }
 0xcda   :  { %4126 = vrot.lane.b32.xlu1 %v4066_v21, %s5661_s9 }
 0xcdb   :  { %5581 = vset.pattern.permute.xlu1 %v5694_v59  ;;  %v8171_v30 = vpop.permute.xlu1 %4275 }
 0xcdd   :  { %4090 = vrot.lane.b32.xlu0 %v4066_v21, %s5660_s8  ;;  %v4482_v21 = vsel %vm213_vm7, %v4451_v57, %v8066_v34  ;;  %v4484_v57 = vsel %vm213_vm7, %v5562_v37, %v8068_v32 }
 0xcde   :  { %4134 = vrot.lane.b32.xlu1 %v4067_v40, %s5661_s9  ;;  %5582 = vset.pattern.permute.xlu0 %v5694_v59  ;;  %v8145_v59 = vpop.permute.xlu0 %3683 }
 0xcdf   :  { %9674 = vst [vmem:[#allocation21_spill] sm:$0xff] %v8145_v59 }
 0xce1   :  { %4098 = vrot.lane.b32.xlu0 %v4067_v40, %s5660_s8 }
 0xce2   :  { %4142 = vrot.lane.b32.xlu1 %v4068_v1, %s5661_s9  ;;  %v8153_v18 = vpop.permute.xlu0 %3602 }
 0xce5   :  { %4106 = vrot.lane.b32.xlu0 %v4068_v1, %s5660_s8 }
 0xce6   :  { %4510 = vrot.lane.b32.xlu1 %v4488_v27, %s5660_s8 }
 0xce9   :  { %4128 = vrot.lane.b32.xlu0 %v8045_v3, %s5661_s9  ;;  %v8165_v3 = vpop.permute.xlu0 %3610 }
 0xcea   :  { %4518 = vrot.lane.b32.xlu1 %v4489_v41, %s5660_s8 }
 0xced   :  { %4136 = vrot.lane.b32.xlu0 %v8051_v24, %s5661_s9  ;;  %v8176_v24 = vpop.permute.xlu0 %3618 }
 0xcee   :  { %4526 = vrot.lane.b32.xlu1 %v4490_v2, %s5660_s8 }
 0xcf1   :  { %4144 = vrot.lane.b32.xlu0 %v8056_v45, %s5661_s9  ;;  %v8180_v45 = vpop.permute.xlu1 %3634  ;;  %v8182_v44 = vpop.permute.xlu0 %3671 }
 0xcf2   :  { %4579 = vperm.xlu1 %5581, %v7988_v36  }
 0xcf5   :  { %4528 = vrot.lane.b32.xlu0 %v4493_v61, %s5660_s8  ;;  %v8190_v40 = vpop.permute.xlu1 %3636  ;;  %v8193_v1 = vpop.permute.xlu0 %3779 }
 0xcf6   :  { %4546 = vrot.lane.b32.xlu1 %v4488_v27, %s5661_s9  ;;  %v9524_v27 = vmov 31  }
 0xcf7   :  { %5584 = vset.pattern.permute.xlu1 %v5695_v52 }
 0xcf9   :  { %4583 = vperm.xlu0 %5582, %v7921_v26   ;;  %v8201_v55 = vpop.permute.xlu1 %3644 }
 0xcfa   :  { %4564 = vrot.lane.b32.xlu1 %v4493_v61, %s5661_s9  ;;  %v8205_v61 = vpop.permute.xlu0 %3903 }
 0xcfd   :  { %5583 = vset.pattern.permute.xlu0 %v5695_v52  ;;  %v4483_v52 = vsel %vm213_vm7, %v8066_v34, %v5562_v37 }
 0xcfe   :  { %4687 = vperm.xlu1 %5584, %v7921_v26   ;;  %4691 = vperm.xlu0 %5583, %v7912_v47   ;;  %v8212_v34 = vpop.permute.xlu0 %3598 }
 0xd02   :  { %4506 = vrot.lane.b32.xlu1 %v4482_v21, %s5660_s8  ;;  %4554 = vrot.lane.b32.xlu0 %v4489_v41, %s5661_s9  ;;  %v8209_v41 = vpop.permute.xlu1 %3652 }
 0xd03   :  { %5586 = vset.pattern.permute.xlu1 %v9524_v27  ;;  %v8218_v27 = vpop.permute.xlu0 %3606 }
 0xd06   :  { %4514 = vrot.lane.b32.xlu1 %v4483_v52, %s5660_s8  ;;  %4562 = vrot.lane.b32.xlu0 %v4490_v2, %s5661_s9  ;;  %v8216_v2 = vpop.permute.xlu1 %4167 }
 0xd07   :  { %v8224_v37 = vpop.permute.xlu0 %3614 }
 0xd0a   :  { %4522 = vrot.lane.b32.xlu1 %v4484_v57, %s5660_s8  ;;  %4683 = vperm.xlu0 %5583, %v7988_v36   ;;  %v8221_v32 = vpop.permute.xlu1 %4130 }
 0xd0b   :  { %9676 = vst [vmem:[#allocation14_spill] sm:$0xff] %v8221_v32  ;;  %v8233_v15 = vpop.permute.xlu0 %3895 }
 0xd0e   :  { %4542 = vrot.lane.b32.xlu1 %v4482_v21, %s5661_s9  ;;  %5585 = vset.pattern.permute.xlu0 %v9675_v29  ;;  %v8227_v21 = vpop.permute.xlu1 %4138 }
 0xd0f   :  { %v8244_v59 = vpop.permute.xlu0 %3642 }
 0xd12   :  { %4550 = vrot.lane.b32.xlu1 %v4483_v52, %s5661_s9  ;;  %v3628_v52 = vsel %vm127_vm5, %v8153_v18, %v8165_v3  ;;  %v8241_v14 = vpop.permute.xlu1 %4146 }
 0xd13   :  { %v8260_v32 = vpop.permute.xlu0 %3650 }
 0xd16   :  { %4558 = vrot.lane.b32.xlu1 %v4484_v57, %s5661_s9  ;;  %v3693_v57 = vmul.f32 %v8072_v17, %v3628_v52  ;;  %v3626_v52 = vsel %vm127_vm5, %v8212_v34, %v8218_v27 }
 0xd17   :  { %v3687_v4 = vmul.f32 %v8182_v44, %v3626_v52  ;;  %v8271_v52 = vpop.permute.xlu0 %4094 }
 0xd1a   :  { %3502 = vperm.xlu1 %5586, %v7912_v47  }
 0xd1e   :  { %3492 = vperm.xlu1 %5586, %v7988_v36   ;;  %v8254_v36 = vpop.permute.xlu1 %4267 }
 0xd1f   :  { %9678 = vst [vmem:[#allocation22_spill] sm:$0xff] %v8254_v36 }
 0xd22   :  { %3497 = vperm.xlu1 %5586, %v7921_v26  }
 0xd26   :  { %3724 = vrot.lane.b32.xlu1 %v3693_v57, %s5697_s14  ;;  %v3631_v57 = vsel %vm127_vm5, %v8148_v28, %v8126_v46 }
 0xd27   :  { %5589 = vset.pattern.permute.xlu1 %v9534_v35  ;;  %v3689_v38 = vmul.f32 %v8078_v11, %v3631_v57  ;;  %v8268_v35 = vpop.permute.xlu1 %4587  ;;  %v8279_v57 = vpop.permute.xlu0 %4102 }
 0xd28   :  { %9679 = vst [vmem:[#allocation23_spill] sm:$0xff] %v8268_v35  ;;  %v3666_v35 = vsel %vm137_vm6, %v8260_v32, %v8180_v45 }
 0xd2a   :  { %3828 = vrot.lane.b32.xlu1 %v3797_v16, %s5697_s14  ;;  %v3623_v16 = vsel %vm127_vm5, %v8138_v33, %v8148_v28 }
 0xd2b   :  { %v3691_v36 = vmul.f32 %v8078_v11, %v3623_v16  ;;  %v8275_v49 = vpop.permute.xlu1 %4591  ;;  %v3918_v16 = vmul.f32 %v7826_v60, %v8205_v61  ;;  %v3792_v60 = vmul.f32 %v8106_v7, %v3666_v35 }
 0xd2c   :  { %9680 = vst [vmem:[#allocation8_spill] sm:$0xff] %v8275_v49 }
 0xd2e   :  { %3712 = vrot.lane.b32.xlu1 %v3687_v4, %s5697_s14  ;;  %v3920_v4 = vmul.f32 %v7831_v42, %v8205_v61 }
 0xd2f   :  { %v8282_v28 = vpop.permute.xlu1 %4092 }
 0xd32   :  { %3716 = vrot.lane.b32.xlu1 %v3689_v38, %s5697_s14  ;;  %v8285_v38 = vpop.permute.xlu0 %4110 }
 0xd33   :  { %9681 = vst [vmem:[#allocation24_spill] sm:$0xff] %v8285_v38  ;;  %v8297_v49 = vpop.permute.xlu1 %4100 }
 0xd34   :  { %9682 = vst [vmem:[#allocation17_spill] sm:$0xff] %v8297_v49 }
 0xd36   :  { %3720 = vrot.lane.b32.xlu1 %v3691_v36, %s5697_s14  ;;  %v3662_v36 = vsel %vm137_vm6, %v8180_v45, %v8244_v59  ;;  %v8294_v42 = vpop.permute.xlu0 %4163 }
 0xd37   :  { %v8307_v56 = vpop.permute.xlu1 %4108 }
 0xd3a   :  { %3962 = vrot.lane.b32.xlu1 %v3920_v4, %s5649_s0  ;;  %v3790_v4 = vmul.f32 %v8106_v7, %v3662_v36  ;;  %v8305_v38 = vpop.permute.xlu0 %4279 }
 0xd3b   :  { %9683 = vst [vmem:[#allocation19_spill] sm:$0xff] %v8305_v38  ;;  %v5563_v38 = vunpack.i.h.bf16 %v8111_v0 }
 0xd3e   :  { %4399 = vperm.xlu1 %5589, %v7903_v48  }
 0xd42   :  { %3958 = vrot.lane.b32.xlu1 %v3918_v16, %s5649_s0 }
 0xd46   :  { %3814 = vrot.lane.b32.xlu1 %v3790_v4, %s5697_s14 }
 0xd4a   :  { %3818 = vrot.lane.b32.xlu1 %v3792_v60, %s5697_s14  ;;  %v4485_v60 = vsel %vm213_vm7, %v8121_v12, %v8070_v31  ;;  %v3664_v12 = vsel %vm137_vm6, %v8088_v22, %v8102_v9 }
 0xd4c   :  { %v3401_v16 = vpop.xlane.xlu0 %3400 }
 0xd4d   :  { %v8310_v43 = vmul.f32 0.00390625, %v3401_v16  ;;  %v9684_v16 = vmov 31  }
 0xd4e   :  { %v3408_v36 = vpop.xlane.xlu1 %3407 }
 0xd4f   :  { %v3410_v49 = vmul.f32 0.00390625, %v3408_v36  ;;  %v3411_v63 = vmul.f32 %v8310_v43, %v8310_v43 }
 0xd51   :  { %v3412_v13 = vsub.f32 %v3410_v49, %v3411_v63  ;;  %v4486_v63 = vsel %vm213_vm7, %v8070_v31, %v5563_v38  ;;  %v9685_v49 = vmov 37  }
 0xd53   :  { %v3413_v45 = vmax.f32 %v3412_v13, 0.0  ;;  %v4487_v13 = vsel %vm213_vm7, %v5563_v38, %v8131_v51  ;;  %v3668_v51 = vsel %vm137_vm6, %v8104_v6, %v8088_v22  ;;  %v3627_v6 = vsel %vm127_vm5, %v8126_v46, %v8138_v33  ;;  %v8393_v33 = vpop.permute.xlu1 %4695 }
 0xd54   :  { %v8366_v22 = vpop.permute.xlu0 %4271 }
 0xd55   :  { %v3414_v54 = vadd.f32 1e-05, %v3413_v45 }
 0xd57   :  { %5601 = vrsqrt.f32 %v3414_v54  ;;  %v3624_v54 = vsel %vm127_vm5, %v8165_v3, %v8176_v24  ;;  %v3622_v3 = vsel %vm127_vm5, %v8218_v27, %v8224_v37  ;;  %v3919_v27 = vmul.f32 %v7849_v23, %v8205_v61 }
 0xd58   :  { %v3694_v0 = vmul.f32 %v8072_v17, %v3624_v54 }
 0xd64   :  { %v5602_v4 = vpop.eup %5601 }
 0xd65   :  { %v3416_v35 = vmul.f32 %v5602_v4, %v7824_v19  ;;  %v3632_v19 = vsel %vm127_vm5, %v8176_v24, %v8153_v18  ;;  %v3798_v18 = vmul.f32 %v8074_v50, %v3668_v51  ;;  %v3690_v24 = vmul.f32 %v8078_v11, %v3627_v6 }
 0xd66   :  { %v3692_v31 = vmul.f32 %v8072_v17, %v3632_v19  ;;  %v3630_v17 = vsel %vm127_vm5, %v8224_v37, %v8212_v34  ;;  %v8375_v34 = vpop.permute.xlu0 %4090  ;;  %v3658_v11 = vsel %vm137_vm6, %v8244_v59, %v8260_v32  ;;  %v8408_v59 = vpop.permute.xlu1 %4126  ;;  %v4120_v32 = vsel %vm127_vm5, %v8271_v52, %v8279_v57 }
 0xd67   :  { %3422 = vperm.xlu0 %5585, %v3416_v35   ;;  %v3686_v9 = vmul.f32 %v8182_v44, %v3630_v17  ;;  %v3791_v23 = vmul.f32 %v8106_v7, %v3658_v11  ;;  %v4185_v4 = vmul.f32 %v8108_v20, %v4120_v32  ;;  %v3912_v35 = vmul.f32 %v8233_v15, %v7857_v10 }
 0xd68   :  { %v3917_v19 = vmul.f32 %v8159_v5, %v7878_v39  ;;  %v4152_v10 = vsel %vm137_vm6, %v8227_v21, %v8241_v14  ;;  %v3418_v6 = vsub.f32 %v8093_v53, %v8310_v43 }
 0xd6a   :  { %v8381_v37 = vpop.permute.xlu0 %4098  ;;  %v8419_v45 = vpop.permute.xlu1 %4134 }
 0xd6b   :  { %4508 = vrot.lane.b32.xlu0 %v4485_v60, %s5660_s8 }
 0xd6c   :  { %5587 = vset.pattern.permute.xlu0 %v9684_v16  ;;  %v3915_v16 = vmul.f32 %v8159_v5, %v7865_v25  ;;  %v4289_v25 = vmul.f32 %v8171_v30, %v4152_v10 }
 0xd6e   :  { %v8390_v46 = vpop.permute.xlu0 %4106 }
 0xd6f   :  { %4516 = vrot.lane.b32.xlu0 %v4486_v63, %s5660_s8 }
 0xd73   :  { %4524 = vrot.lane.b32.xlu0 %v4487_v13, %s5660_s8 }
 0xd77   :  { %4544 = vrot.lane.b32.xlu0 %v4485_v60, %s5661_s9  ;;  %v8427_v60 = vpop.permute.xlu1 %4142 }
 0xd7b   :  { %4552 = vrot.lane.b32.xlu0 %v4486_v63, %s5661_s9 }
 0xd7f   :  { %4560 = vrot.lane.b32.xlu0 %v4487_v13, %s5661_s9  ;;  %v8435_v13 = vpop.permute.xlu1 %4510 }
 0xd83   :  { %3507 = vperm.xlu0 %5587, %v7903_v48   ;;  %v3796_v48 = vmul.f32 %v8074_v50, %v3664_v12  ;;  %v3688_v50 = vmul.f32 %v8182_v44, %v3622_v3  ;;  %v3921_v44 = vmul.f32 %v7861_v62, %v8205_v61  ;;  %v3663_v62 = vsel %vm137_vm6, %v8190_v40, %v8201_v55  ;;  %v8401_v61 = vpop.permute.xlu0 %4128  ;;  %v8447_v54 = vpop.permute.xlu1 %4518 }
 0xd84   :  { %v3793_v38 = vmul.f32 %v8193_v1, %v3663_v62  ;;  %v4118_v12 = vsel %vm127_vm5, %v8375_v34, %v8381_v37 }
 0xd85   :  { %v4179_v51 = vmul.f32 %v8294_v42, %v4118_v12 }
 0xd87   :  { %3722 = vrot.lane.b32.xlu0 %v3692_v31, %s5697_s14  ;;  %v8416_v36 = vpop.permute.xlu0 %4136  ;;  %v8453_v39 = vpop.permute.xlu1 %4526 }
 0xd88   :  { %5588 = vset.pattern.permute.xlu0 %v9685_v49 }
 0xd8b   :  { %3726 = vrot.lane.b32.xlu0 %v3694_v0, %s5697_s14  ;;  %v3914_v0 = vmul.f32 %v8159_v5, %v7844_v58 }
 0xd8f   :  { %3826 = vrot.lane.b32.xlu0 %v3796_v48, %s5697_s14 }
 0xd93   :  { %3830 = vrot.lane.b32.xlu0 %v3798_v18, %s5697_s14  ;;  %v8469_v18 = vpop.permute.xlu1 %4579 }
 0xd97   :  { %3710 = vrot.lane.b32.xlu0 %v3686_v9, %s5697_s14  ;;  %v8476_v9 = vpop.permute.xlu1 %4546 }
 0xd9b   :  { %3714 = vrot.lane.b32.xlu0 %v3688_v50, %s5697_s14  ;;  %v3417_v50 = vsub.f32 %v8083_v8, %v8310_v43 }
 0xd9f   :  { %3718 = vrot.lane.b32.xlu0 %v3690_v24, %s5697_s14  ;;  %v9686_v24 = vld [vmem:[#allocation12_spill] sm:$0xff] }
 0xda3   :  { %3960 = vrot.lane.b32.xlu0 %v3919_v27, %s5649_s0  ;;  %v3419_v27 = vsub.f32 %v9686_v24, %v8310_v43  ;;  %v3659_v24 = vsel %vm137_vm6, %v8201_v55, %v8209_v41 }
 0xda7   :  { %3964 = vrot.lane.b32.xlu0 %v3921_v44, %s5649_s0  ;;  %v8486_v44 = vpop.permute.xlu1 %4564 }
 0xdab   :  { %4395 = vperm.xlu0 %5588, %v7912_v47   ;;  %v3667_v47 = vsel %vm137_vm6, %v8209_v41, %v8190_v40  ;;  %v8423_v40 = vpop.permute.xlu0 %4144  ;;  %v8493_v53 = vpop.permute.xlu1 %4687 }
 0xdac   :  { %v3795_v7 = vmul.f32 %v8193_v1, %v3667_v47  ;;  %v9687_v47 = vld [vmem:[#allocation18_spill] sm:$0xff]  ;;  %9689 = vst [vmem:[#allocation26_spill] sm:$0xff] %v8493_v53 }
 0xdaf   :  { %3816 = vrot.lane.b32.xlu0 %v3791_v23, %s5697_s14  ;;  %v8432_v63 = vpop.permute.xlu0 %4528  ;;  %v8498_v12 = vpop.permute.xlu1 %4506 }
 0xdb3   :  { %3820 = vrot.lane.b32.xlu0 %v3793_v38, %s5697_s14  ;;  %v8444_v31 = vpop.permute.xlu0 %4583 }
 0xdb7   :  { %3824 = vrot.lane.b32.xlu0 %v3795_v7, %s5697_s14  ;;  %v8450_v49 = vpop.permute.xlu0 %4691 }
 0xdbb   :  { %4216 = vrot.lane.b32.xlu0 %v4185_v4, %s5697_s14  ;;  %v8462_v48 = vpop.permute.xlu0 %4554 }
 0xdbf   :  { %3946 = vrot.lane.b32.xlu0 %v3912_v35, %s5649_s0  ;;  %v8473_v17 = vpop.permute.xlu0 %4562  ;;  %v9688_v35 = vld [vmem:[#allocation10_spill] sm:$0xff] }
 0xdc3   :  { %3952 = vrot.lane.b32.xlu0 %v3915_v16, %s5649_s0  ;;  %v8478_v3 = vpop.permute.xlu0 %4683 }
 0xdc7   :  { %3956 = vrot.lane.b32.xlu0 %v3917_v19, %s5649_s0  ;;  %v9690_v19 = vld [vmem:[#allocation4_spill] sm:$0xff] }
 0xdcb   :  { %4320 = vrot.lane.b32.xlu0 %v4289_v25, %s5697_s14 }
 0xdcf   :  { %4391 = vperm.xlu0 %5588, %v7921_v26   ;;  %v4123_v26 = vsel %vm127_vm5, %v8307_v56, %v8282_v28 }
 0xdd0   :  { %v4181_v58 = vmul.f32 %v8216_v2, %v4123_v26 }
 0xdd3   :  { %3950 = vrot.lane.b32.xlu0 %v3914_v0, %s5649_s0 }
 0xdd7   :  { %4204 = vrot.lane.b32.xlu0 %v4179_v51, %s5697_s14  ;;  %v9691_v51 = vld [vmem:[#allocation5_spill] sm:$0xff] }
 0xddb   :  { %4208 = vrot.lane.b32.xlu0 %v4181_v58, %s5697_s14 }
 0xde2   :  { %v3423_v11 = vpop.permute.xlu0 %3422 }
 0xde3   :  { %v3425_v23 = vmul.f32 %v3423_v11, %v3417_v50  ;;  %v3426_v62 = vmul.f32 %v3423_v11, %v3418_v6  ;;  %v3427_v38 = vmul.f32 %v3423_v11, %v3419_v27  ;;  %v9692_v50 = vld [vmem:[#allocation6_spill] sm:$0xff]  ;;  %v8507_v27 = vpop.permute.xlu1 %4514  ;;  %v3794_v11 = vmul.f32 %v8193_v1, %v3659_v24 }
 0xde5   :  { %v3432_v7 = vadd.f32 %v9687_v47, %v3425_v23  ;;  %v3433_v32 = vadd.f32 %v9687_v47, %v3426_v62  ;;  %v3434_v4 = vadd.f32 %v9687_v47, %v3427_v38  ;;  %v9693_v23 = vld [vmem:[#allocation24_spill] sm:$0xff] }
 0xde6   :  { %v4124_v62 = vsel %vm127_vm5, %v9693_v23, %v8271_v52  ;;  %v4116_v55 = vsel %vm127_vm5, %v8279_v57, %v9693_v23  ;;  %v8528_v52 = vld [vmem:[#allocation2 + $0x10] sm:$0xff]  ;;  %v4114_v23 = vsel %vm127_vm5, %v8381_v37, %v8390_v46 }
 0xde7   :  { %v3442_v8 = vmul.f32 %v9688_v35, %v3432_v7  ;;  %v3443_v16 = vmul.f32 %v9688_v35, %v3433_v32  ;;  %vm3435_vm10 = vcmp.ge.f32.partialorder %v3432_v7, 0.0  ;;  %vm3436_vm11 = vcmp.ge.f32.partialorder %v3433_v32, 0.0  ;;  %v8517_v47 = vpop.permute.xlu1 %4522  ;;  %9694 = vst [vmem:[#allocation27_spill] sm:$0xff] %v8528_v52 }
 0xde8   :  { %v3444_v25 = vmul.f32 %v9688_v35, %v3434_v4  ;;  %vm3437_vm8 = vcmp.ge.f32.partialorder %v3434_v4, 0.0  ;;  %v4184_v38 = vmul.f32 %v8108_v20, %v4124_v62  ;;  %v4186_v1 = vmul.f32 %v8108_v20, %v4116_v55  ;;  %v8540_v20 = vld [vmem:[#allocation2 + $0x50] sm:$0xff] }
 0xde9   :  { %v3445_v43 = vsel %vm3435_vm10, %v3432_v7, %v3442_v8  ;;  %v3446_v0 = vsel %vm3436_vm11, %v3433_v32, %v3443_v16  ;;  %v3911_v7 = vmul.f32 %v8528_v52, %v8233_v15  ;;  %9696 = vst [vmem:[#allocation32_spill] sm:$0xff] %v8540_v20  ;;  %v3916_v35 = vmul.f32 %v8540_v20, %v8159_v5  ;;  %v9697_v8 = vld [vmem:[#allocation14_spill] sm:$0xff]  ;;  %v9700_v62 = vld [vmem:[#allocation17_spill] sm:$0xff] }
 0xdea   :  { %v3448_v10 = vmul.f32 %v3445_v43, %v9690_v19  ;;  %v3449_v26 = vmul.f32 %v3446_v0, %v9691_v51  ;;  %v3447_v58 = vsel %vm3437_vm8, %v3434_v4, %v3444_v25  ;;  %v8535_v4 = vld [vmem:[#allocation2 + $0x20] sm:$0xff]  ;;  %v4156_v16 = vsel %vm137_vm6, %v9697_v8, %v8227_v21 }
 0xdeb   :  { %v3450_v6 = vmul.f32 %v3447_v58, %v9692_v50  ;;  %v8525_v41 = vpop.permute.xlu1 %4542  ;;  %9695 = vst [vmem:[#allocation33_spill] sm:$0xff] %v8535_v4  ;;  %v3913_v57 = vmul.f32 %v8535_v4, %v8233_v15  ;;  %v4288_v25 = vmul.f32 %v8171_v30, %v4156_v16  ;;  %v4160_v0 = vsel %vm137_vm6, %v8241_v14, %v9697_v8  ;;  %v9698_v58 = vld [vmem:[#allocation11_spill] sm:$0xff]  ;;  %v9713_v4 = vld [vmem:[#allocation22_spill] sm:$0xff] }
 0xdec   :  { %3454 = vrot.lane.b32.xlu1 %v3448_v10, %s5646_s25  ;;  %v5699_v10 = vmov 39   ;;  %v4290_v5 = vmul.f32 %v8171_v30, %v4160_v0  ;;  %v4122_v14 = vsel %vm127_vm5, %v8390_v46, %v8375_v34  ;;  %v4119_v34 = vsel %vm127_vm5, %v8282_v28, %v9700_v62  ;;  %v8595_v46 = vpop.permute.xlu0 %4508 }
 0xded   :  { %5591 = vset.pattern.permute.xlu0 %v5699_v10  ;;  %v4178_v30 = vmul.f32 %v8294_v42, %v4122_v14  ;;  %v4182_v55 = vmul.f32 %v8216_v2, %v4119_v34  ;;  %v4154_v51 = vsel %vm137_vm6, %v8408_v59, %v8419_v45 }
 0xdef   :  { %v8533_v32 = vpop.permute.xlu1 %4550 }
 0xdf0   :  { %3456 = vrot.lane.b32.xlu1 %v3449_v26, %s5646_s25 }
 0xdf3   :  { %v8548_v43 = vpop.permute.xlu1 %4558 }
 0xdf4   :  { %3458 = vrot.lane.b32.xlu1 %v3450_v6, %s5646_s25  ;;  %v8564_v6 = vld [vmem:[#allocation2 + $0x8] sm:$0xff] }
 0xdf5   :  { %9699 = vst [vmem:[#allocation28_spill] sm:$0xff] %v8564_v6  ;;  %v3910_v24 = vmul.f32 %v8564_v6, %v8233_v15  ;;  %v4180_v15 = vmul.f32 %v8294_v42, %v4114_v23 }
 0xdf7   :  { %v8558_v26 = vpop.permute.xlu1 %3502 }
 0xdf8   :  { %3822 = vrot.lane.b32.xlu1 %v3794_v11, %s5697_s14 }
 0xdfb   :  { %v8561_v21 = vpop.permute.xlu1 %3492 }
 0xdfc   :  { %4214 = vrot.lane.b32.xlu1 %v4184_v38, %s5697_s14 }
 0xdff   :  { %v8574_v11 = vpop.permute.xlu1 %3497 }
 0xe00   :  { %4218 = vrot.lane.b32.xlu1 %v4186_v1, %s5697_s14 }
 0xe03   :  { %v8586_v38 = vpop.permute.xlu1 %3724 }
 0xe04   :  { %3944 = vrot.lane.b32.xlu1 %v3911_v7, %s5649_s0  ;;  %v8599_v7 = vpop.permute.xlu0 %4516 }
 0xe07   :  { %v8591_v1 = vpop.permute.xlu1 %3828 }
 0xe08   :  { %3948 = vrot.lane.b32.xlu1 %v3913_v57, %s5649_s0  ;;  %v8603_v28 = vpop.permute.xlu0 %4524 }
 0xe0b   :  { %v8593_v37 = vpop.permute.xlu1 %3712 }
 0xe0c   :  { %3954 = vrot.lane.b32.xlu1 %v3916_v35, %s5649_s0  ;;  %9701 = vst [vmem:[#allocation31_spill] sm:$0xff] %v8593_v37  ;;  %v8607_v8 = vpop.permute.xlu0 %4544  ;;  %v9735_v37 = vld [vmem:[#allocation15_spill] sm:$0xff] }
 0xe0d   :  { %9703 = vst [vmem:[#allocation30_spill] sm:$0xff] %v8607_v8  ;;  %v5548_v6 = vunpack.i.h.bf16 %v9735_v37 }
 0xe0f   :  { %v8597_v42 = vpop.permute.xlu1 %3716 }
 0xe10   :  { %4318 = vrot.lane.b32.xlu1 %v4288_v25, %s5697_s14  ;;  %9702 = vst [vmem:[#allocation34_spill] sm:$0xff] %v8597_v42 }
 0xe13   :  { %v8601_v57 = vpop.permute.xlu1 %3720 }
 0xe14   :  { %4322 = vrot.lane.b32.xlu1 %v4290_v5, %s5697_s14 }
 0xe17   :  { %v8605_v35 = vpop.permute.xlu1 %3962 }
 0xe18   :  { %4387 = vperm.xlu1 %5589, %v9698_v58  }
 0xe1b   :  { %v8609_v16 = vpop.permute.xlu1 %4399 }
 0xe1c   :  { %3942 = vrot.lane.b32.xlu1 %v3910_v24, %s5649_s0  ;;  %9704 = vst [vmem:[#allocation29_spill] sm:$0xff] %v8609_v16 }
 0xe1d   :  { %5590 = vset.pattern.permute.xlu1 %v5699_v10  ;;  %v8611_v10 = vpop.permute.xlu0 %4552 }
 0xe1e   :  { %9705 = vst [vmem:[#allocation20_spill] sm:$0xff] %v8611_v10  ;;  %v9738_v10 = vld [vmem:[#allocation9_spill] sm:$0xff] }
 0xe1f   :  { %v8613_v25 = vpop.permute.xlu1 %3958 }
 0xe20   :  { %4202 = vrot.lane.b32.xlu1 %v4178_v30, %s5697_s14 }
 0xe21   :  { %v8615_v0 = vpop.permute.xlu0 %4560 }
 0xe22   :  { %9706 = vst [vmem:[#allocation25_spill] sm:$0xff] %v8615_v0 }
 0xe23   :  { %v8617_v5 = vpop.permute.xlu1 %3814 }
 0xe24   :  { %4206 = vrot.lane.b32.xlu1 %v4180_v15, %s5697_s14  ;;  %9707 = vst [vmem:[#allocation3_spill] sm:$0xff] %v8617_v5 }
 0xe25   :  { %v8619_v58 = vpop.permute.xlu0 %3507 }
 0xe26   :  { %9708 = vst [vmem:[#allocation12_spill] sm:$0xff] %v8619_v58  ;;  %v4282_v58 = vmul.f32 %v9713_v4, %v4154_v51 }
 0xe27   :  { %v8621_v24 = vpop.permute.xlu1 %3818 }
 0xe28   :  { %4210 = vrot.lane.b32.xlu1 %v4182_v55, %s5697_s14  ;;  %9709 = vst [vmem:[#allocation18_spill] sm:$0xff] %v8621_v24 }
 0xe29   :  { %v8623_v30 = vpop.permute.xlu0 %3722 }
 0xe2d   :  { %v8629_v34 = vpop.permute.xlu0 %3726 }
 0xe5e   :  { %v3455_v14 = vpop.permute.xlu1 %3454 }
 0xe5f   :  { %3466 = vst.msk [vmem:[#allocation2 + $0xb0] sm:$0xff] %vm33_vm1, %v3455_v14 }
 0xe62   :  { %v3457_v23 = vpop.permute.xlu1 %3456 }
 0xe63   :  { %v8627_v15 = vsel %vm25_vm0, %v3455_v14, %v3457_v23  ;;  %v8643_v14 = vpop.permute.xlu0 %3826 }
 0xe64   :  { %9710 = vst [vmem:[#allocation10_spill] sm:$0xff] %v8627_v15 }
 0xe66   :  { %v3459_v55 = vpop.permute.xlu1 %3458  ;;  %v8631_v50 = vld [vmem:[#allocation2 + $0xb0] sm:$0xff] }
 0xe67   :  { %9711 = vst [vmem:[#allocation24_spill] sm:$0xff] %v8631_v50  ;;  %v8634_v19 = vsel %vm25_vm0, %v3457_v23, %v3459_v55  ;;  %3469 = vst.msk [vmem:[#allocation2 + $0xc8] sm:$0xff] %vm25_vm0, %v3459_v55  ;;  %3568 = vrot.lane.b32.xlu1 %v8631_v50, %s5662_s10  ;;  %v8653_v23 = vpop.permute.xlu0 %3830  ;;  %v4158_v55 = vsel %vm137_vm6, %v8427_v60, %v8408_v59 }
 0xe68   :  { %9712 = vst [vmem:[#allocation14_spill] sm:$0xff] %v8634_v19  ;;  %v4284_v51 = vmul.f32 %v9713_v4, %v4158_v55 }
 0xe6b   :  { %4058 = vrot.lane.b32.xlu1 %v8631_v50, %s5650_s28  ;;  %v8668_v16 = vpop.permute.xlu0 %3710 }
 0xe6c   :  { %9715 = vst [vmem:[#allocation17_spill] sm:$0xff] %v8668_v16 }
 0xe6e   :  { %v8648_v5 = vld [vmem:[#allocation2 + $0xc8] sm:$0xff] }
 0xe6f   :  { %9714 = vst [vmem:[#allocation11_spill] sm:$0xff] %v8648_v5  ;;  %4306 = vrot.lane.b32.xlu1 %v4282_v58, %s5697_s14  ;;  %4064 = vrot.lane.b32.xlu0 %v8648_v5, %s5650_s28  ;;  %v4115_v58 = vsel %vm127_vm5, %v9700_v62, %v8307_v56  ;;  %v8677_v55 = vpop.permute.xlu0 %3714  ;;  %v4150_v56 = vsel %vm137_vm6, %v8419_v45, %v8427_v60 }
 0xe70   :  { %v4183_v59 = vmul.f32 %v8216_v2, %v4115_v58  ;;  %v4151_v62 = vsel %vm137_vm6, %v8416_v36, %v8423_v40  ;;  %v4283_v2 = vmul.f32 %v9713_v4, %v4150_v56  ;;  %v4155_v45 = vsel %vm137_vm6, %v8401_v61, %v8416_v36 }
 0xe71   :  { %v4540_v60 = vsel %vm127_vm5, %v8453_v39, %v8435_v13  ;;  %v4285_v4 = vmul.f32 %v8366_v22, %v4155_v45  ;;  %v4532_v36 = vsel %vm127_vm5, %v8447_v54, %v8453_v39  ;;  %v4536_v39 = vsel %vm127_vm5, %v8435_v13, %v8447_v54  ;;  %v5629_v54 = vld [vmem:[%s9456_s1 + $0x18] sm:$0xff] }
 0xe73   :  { %4476 = vrot.lane.b32.xlu0 %v8648_v5, %s5662_s10  ;;  %3572 = vrot.lane.b32.xlu1 %v8634_v19, %s5662_s10  ;;  %v8701_v58 = vpop.permute.xlu0 %3718 }
 0xe74   :  { %9716 = vst [vmem:[#allocation22_spill] sm:$0xff] %v8701_v58 }
 0xe77   :  { %3570 = vrot.lane.b32.xlu0 %v8627_v15, %s5662_s10  ;;  %4310 = vrot.lane.b32.xlu1 %v4284_v51, %s5697_s14  ;;  %v4286_v51 = vmul.f32 %v8366_v22, %v4151_v62  ;;  %v4159_v62 = vsel %vm137_vm6, %v8423_v40, %v8401_v61  ;;  %v8719_v45 = vpop.permute.xlu0 %3960 }
 0xe7b   :  { %4212 = vrot.lane.b32.xlu0 %v4183_v59, %s5697_s14  ;;  %4062 = vrot.lane.b32.xlu1 %v8634_v19, %s5650_s28  ;;  %v9717_v59 = vld [vmem:[#allocation23_spill] sm:$0xff]  ;;  %v8728_v40 = vpop.permute.xlu0 %3964 }
 0xe7c   :  { %v4600_v56 = vmul.f32 %v9717_v59, %v4540_v60  ;;  %v4601_v61 = vmul.f32 %v9717_v59, %v4536_v39  ;;  %v8730_v60 = vpop.permute.xlu1 %3822 }
 0xe7f   :  { %4060 = vrot.lane.b32.xlu0 %v8627_v15, %s5650_s28  ;;  %4474 = vrot.lane.b32.xlu1 %v8634_v19, %s5662_s10 }
 0xe83   :  { %4308 = vrot.lane.b32.xlu0 %v4283_v2, %s5697_s14  ;;  %4314 = vrot.lane.b32.xlu1 %v4286_v51, %s5697_s14  ;;  %v4602_v2 = vmul.f32 %v9717_v59, %v4532_v36  ;;  %v4287_v51 = vmul.f32 %v8366_v22, %v4159_v62  ;;  %v5628_v22 = vld [vmem:[%s9456_s1 + $0x10] sm:$0xff]  ;;  %v8742_v59 = vpop.permute.xlu0 %4395  ;;  %v8746_v36 = vpop.permute.xlu1 %4214 }
 0xe87   :  { %4312 = vrot.lane.b32.xlu0 %v4285_v4, %s5697_s14  ;;  %4630 = vrot.lane.b32.xlu1 %v4600_v56, %s5697_s14  ;;  %v9718_v4 = vld [vmem:[#allocation16_spill] sm:$0xff]  ;;  %v8756_v39 = vpop.permute.xlu1 %4218 }
 0xe88   :  { %v3925_v13 = vmul.f32 %v9718_v4, %v8648_v5  ;;  %v3922_v56 = vmul.f32 %v9718_v4, %v8631_v50  ;;  %v3923_v62 = vmul.f32 %v9718_v4, %v8627_v15 }
 0xe8b   :  { %4316 = vrot.lane.b32.xlu0 %v4287_v51, %s5697_s14  ;;  %4634 = vrot.lane.b32.xlu1 %v4602_v2, %s5697_s14  ;;  %v3924_v2 = vmul.f32 %v9718_v4, %v8634_v19  ;;  %v8754_v51 = vpop.permute.xlu0 %3816 }
 0xe8c   :  { %9719 = vst [vmem:[#allocation23_spill] sm:$0xff] %v8754_v51 }
 0xe8f   :  { %4632 = vrot.lane.b32.xlu0 %v4601_v61, %s5697_s14  ;;  %4795 = vperm.xlu1 %5590, %v5628_v22   ;;  %v8759_v61 = vpop.permute.xlu0 %3820  ;;  %v8761_v22 = vpop.permute.xlu1 %3944 }
 0xe90   :  { %9720 = vst [vmem:[#allocation16_spill] sm:$0xff] %v8759_v61  ;;  %9721 = vst [vmem:[#allocation35_spill] sm:$0xff] %v8761_v22 }
 0xe93   :  { %4799 = vperm.xlu0 %5591, %v5629_v54   ;;  %3972 = vrot.lane.b32.xlu1 %v3925_v13, %s5649_s0  ;;  %v3825_v13 = vpop.permute.xlu0 %3824  ;;  %v8763_v54 = vpop.permute.xlu1 %3948 }
 0xe94   :  { %9722 = vst [vmem:[#allocation36_spill] sm:$0xff] %v8763_v54 }
 0xe97   :  { %3966 = vrot.lane.b32.xlu0 %v3922_v56, %s5649_s0  ;;  %3968 = vrot.lane.b32.xlu1 %v3923_v62, %s5649_s0  ;;  %v8765_v5 = vpop.permute.xlu0 %4216  ;;  %v8767_v56 = vpop.permute.xlu1 %3954 }
 0xe98   :  { %9723 = vst [vmem:[#allocation37_spill] sm:$0xff] %v8765_v5 }
 0xe9b   :  { %3970 = vrot.lane.b32.xlu0 %v3924_v2, %s5649_s0  ;;  %v8769_v62 = vpop.permute.xlu0 %3946  ;;  %v8771_v4 = vpop.permute.xlu1 %4318 }
 0xe9c   :  { %9724 = vst [vmem:[#allocation38_spill] sm:$0xff] %v8769_v62 }
 0xe9f   :  { %v8773_v19 = vpop.permute.xlu0 %3952  ;;  %v8775_v15 = vpop.permute.xlu1 %4322 }
 0xea0   :  { %9725 = vst [vmem:[#allocation39_spill] sm:$0xff] %v8773_v19  ;;  %9726 = vst [vmem:[#allocation40_spill] sm:$0xff] %v8775_v15 }
 0xea3   :  { %v8777_v2 = vpop.permute.xlu1 %4387  ;;  %v3957_v50 = vpop.permute.xlu0 %3956 }
 0xea4   :  { %9727 = vst [vmem:[#allocation41_spill] sm:$0xff] %v8777_v2 }
 0xea7   :  { %v8779_v61 = vpop.permute.xlu1 %3942  ;;  %v8781_v22 = vpop.permute.xlu0 %4320 }
 0xea8   :  { %9728 = vst [vmem:[#allocation42_spill] sm:$0xff] %v8779_v61  ;;  %9729 = vst [vmem:[#allocation43_spill] sm:$0xff] %v8781_v22  ;;  %v3517_v22 = vmul.f32 %v8540_v20, %v8574_v11 }
 0xeab   :  { %v8783_v51 = vpop.permute.xlu1 %4202  ;;  %v8785_v52 = vpop.permute.xlu0 %4391 }
 0xeac   :  { %9730 = vst [vmem:[#allocation44_spill] sm:$0xff] %v8783_v51  ;;  %9731 = vst [vmem:[#allocation45_spill] sm:$0xff] %v8785_v52 }
 0xeaf   :  { %v8787_v42 = vpop.permute.xlu1 %4206  ;;  %v8789_v62 = vpop.permute.xlu0 %3950 }
 0xeb0   :  { %9732 = vst [vmem:[#allocation46_spill] sm:$0xff] %v8787_v42  ;;  %9733 = vst [vmem:[#allocation47_spill] sm:$0xff] %v8789_v62  ;;  %v9739_v42 = vunpack.i.h.bf16 %v9738_v10 }
 0xeb3   :  { %v8791_v16 = vpop.permute.xlu1 %4210  ;;  %v8793_v19 = vpop.permute.xlu0 %4204 }
 0xeb4   :  { %9734 = vst [vmem:[#allocation48_spill] sm:$0xff] %v8793_v19 }
 0xeb7   :  { %v8799_v51 = vpop.permute.xlu0 %4208 }
 0xeb8   :  { %9736 = vst [vmem:[#allocation15_spill] sm:$0xff] %v8799_v51 }
 0xed9   :  { %v3569_v0 = vpop.permute.xlu1 %3568 }
 0xeda   :  { %v3583_v53 = vsel %vm213_vm7, %v5548_v6, %v3569_v0 }
 0xedb   :  { %3640 = vrot.lane.b32.xlu0 %v3583_v53, %s5661_s9  ;;  %3604 = vrot.lane.b32.xlu1 %v3583_v53, %s5660_s8 }
 0xedd   :  { %v4059_v52 = vpop.permute.xlu1 %4058 }
 0xee1   :  { %v8801_v61 = vpop.permute.xlu1 %4306  ;;  %v4065_v2 = vpop.permute.xlu0 %4064 }
 0xee2   :  { %9737 = vst [vmem:[#allocation49_spill] sm:$0xff] %v8801_v61 }
 0xee5   :  { %v3573_v62 = vpop.permute.xlu1 %3572  ;;  %v4477_v8 = vpop.permute.xlu0 %4476 }
 0xee6   :  { %v4492_v19 = vsel %vm213_vm7, %v4477_v8, %v9739_v42 }
 0xee7   :  { %4556 = vrot.lane.b32.xlu1 %v4492_v19, %s5661_s9  ;;  %4520 = vrot.lane.b32.xlu0 %v4492_v19, %s5660_s8 }
 0xee9   :  { %v8808_v6 = vpop.permute.xlu1 %4310  ;;  %v3571_v37 = vpop.permute.xlu0 %3570 }
 0xeea   :  { %v3584_v53 = vsel %vm213_vm7, %v3569_v0, %v3571_v37  ;;  %v3585_v24 = vsel %vm213_vm7, %v3571_v37, %v3573_v62  ;;  %v3737_v0 = vsel %vm3082_vm15, %v8701_v58, %v8601_v57  ;;  %v3765_v62 = vadd.f32 %v8601_v57, %v3517_v22  ;;  %v5630_v37 = vld [vmem:[#allocation2 + $0x48] sm:$0xff] }
 0xeeb   :  { %3648 = vrot.lane.b32.xlu0 %v3584_v53, %s5661_s9  ;;  %3612 = vrot.lane.b32.xlu1 %v3584_v53, %s5660_s8  ;;  %v3979_v22 = vsel %vm112_vm2, %v8767_v56, %v3957_v50 }
 0xeec   :  { %v3869_v57 = vadd.f32 %v3825_v13, %v3765_v62 }
 0xeed   :  { %v4063_v51 = vpop.permute.xlu1 %4062  ;;  %v4213_v54 = vpop.permute.xlu0 %4212 }
 0xeef   :  { %3656 = vrot.lane.b32.xlu0 %v3585_v24, %s5661_s9  ;;  %3620 = vrot.lane.b32.xlu1 %v3585_v24, %s5660_s8  ;;  %v3516_v24 = vmul.f32 %v5630_v37, %v8574_v11 }
 0xef1   :  { %v4475_v42 = vpop.permute.xlu1 %4474  ;;  %v4061_v10 = vpop.permute.xlu0 %4060  ;;  %v3764_v58 = vadd.f32 %v3737_v0, %v3516_v24  ;;  %v4229_v0 = vsel %vm3082_vm15, %v8791_v16, %v4213_v54 }
 0xef2   :  { %v4075_v19 = vsel %vm233_vm3, %v4059_v52, %v4061_v10  ;;  %v3841_v52 = vsel %vm3082_vm15, %v8730_v60, %v3825_v13  ;;  %v4076_v20 = vsel %vm233_vm3, %v4061_v10, %v4063_v51  ;;  %v4572_v10 = vsel %vm137_vm6, %v8476_v9, %v8462_v48 }
 0xef3   :  { %4132 = vrot.lane.b32.xlu0 %v4075_v19, %s5661_s9  ;;  %4096 = vrot.lane.b32.xlu1 %v4075_v19, %s5660_s8  ;;  %v3868_v37 = vadd.f32 %v3841_v52, %v3764_v58  ;;  %v4704_v24 = vmul.f32 %v8450_v49, %v4572_v10 }
 0xef5   :  { %v4315_v53 = vpop.permute.xlu1 %4314  ;;  %v4309_v15 = vpop.permute.xlu0 %4308  ;;  %v4008_v13 = vadd.f32 %v3979_v22, %v3868_v37 }
 0xef6   :  { %v8831_v5 = vsel %vm3082_vm15, %v8801_v61, %v4309_v15  ;;  %v8835_v19 = vsel %vm3082_vm15, %v4309_v15, %v8808_v6  ;;  %v4009_v61 = vadd.f32 %v3957_v50, %v3869_v57  ;;  %v4077_v15 = vsel %vm233_vm3, %v4063_v51, %v4065_v2 }
 0xef7   :  { %9740 = vst [vmem:[#allocation9_spill] sm:$0xff] %v8831_v5  ;;  %9741 = vst [vmem:[#allocation50_spill] sm:$0xff] %v8835_v19  ;;  %4140 = vrot.lane.b32.xlu0 %v4076_v20, %s5661_s9  ;;  %4104 = vrot.lane.b32.xlu1 %v4076_v20, %s5660_s8  ;;  %v4256_v50 = vadd.f32 %v4229_v0, %v4008_v13  ;;  %v4576_v51 = vsel %vm137_vm6, %v8473_v17, %v8476_v9 }
 0xef8   :  { %v4257_v58 = vadd.f32 %v4213_v54, %v4009_v61  ;;  %v4491_v2 = vsel %vm213_vm7, %v4475_v42, %v4477_v8  ;;  %v4706_v61 = vmul.f32 %v8450_v49, %v4576_v51  ;;  %v4568_v9 = vsel %vm137_vm6, %v8462_v48, %v8473_v17 }
 0xef9   :  { %v8845_v5 = vpop.permute.xlu0 %4312  ;;  %v8854_v62 = vpop.permute.xlu1 %4630  ;;  %v4538_v8 = vsel %vm127_vm5, %v8517_v47, %v8498_v12  ;;  %v4534_v17 = vsel %vm127_vm5, %v8498_v12, %v8507_v27  ;;  %v4530_v0 = vsel %vm127_vm5, %v8507_v27, %v8517_v47  ;;  %v4539_v12 = vsel %vm127_vm5, %v8603_v28, %v8595_v46 }
 0xefa   :  { %v8852_v20 = vsel %vm3082_vm15, %v8845_v5, %v4315_v53  ;;  %v4594_v48 = vmul.f32 %v8469_v18, %v4538_v8  ;;  %v4595_v13 = vmul.f32 %v8469_v18, %v4534_v17  ;;  %v4531_v47 = vsel %vm127_vm5, %v8599_v7, %v8603_v28  ;;  %v5632_v8 = vld [vmem:[%s9456_s1 + $0x8] sm:$0xff] }
 0xefb   :  { %9742 = vst [vmem:[#allocation51_spill] sm:$0xff] %v8852_v20  ;;  %4148 = vrot.lane.b32.xlu0 %v4077_v15, %s5661_s9  ;;  %4112 = vrot.lane.b32.xlu1 %v4077_v15, %s5660_s8  ;;  %v4705_v15 = vmul.f32 %v8450_v49, %v4568_v9  ;;  %v4596_v49 = vmul.f32 %v8469_v18, %v4530_v0  ;;  %v9751_v20 = vld [vmem:[#allocation7_spill] sm:$0xff] }
 0xefc   :  { %v4597_v18 = vmul.f32 %v8444_v31, %v4539_v12  ;;  %v4570_v51 = vsel %vm137_vm6, %v8525_v41, %v8533_v32  ;;  %v9749_v12 = vld [vmem:[#allocation8_spill] sm:$0xff] }
 0xefd   :  { %v4317_v52 = vpop.permute.xlu0 %4316  ;;  %v8872_v54 = vpop.permute.xlu1 %4634  ;;  %v4698_v28 = vmul.f32 %v8478_v3, %v4570_v51  ;;  %v8977_v51 = vld [vmem:[#allocation2] sm:$0xff] }
 0xefe   :  { %v4333_v57 = vsel %vm3082_vm15, %v4315_v53, %v4317_v52  ;;  %v8865_v22 = vadd.f32 %v4317_v52, %v4257_v58  ;;  %v4535_v58 = vsel %vm127_vm5, %v8595_v46, %v8599_v7  ;;  %v4599_v46 = vmul.f32 %v8444_v31, %v4531_v47  ;;  %v5631_v7 = vld [vmem:[%s9456_s1] sm:$0xff] }
 0xeff   :  { %v8867_v37 = vadd.f32 %v4333_v57, %v4256_v50  ;;  %4512 = vrot.lane.b32.xlu0 %v4491_v2, %s5660_s8  ;;  %4734 = vrot.lane.b32.xlu1 %v4704_v24, %s5697_s14  ;;  %v4598_v27 = vmul.f32 %v8444_v31, %v4535_v58  ;;  %v4566_v31 = vsel %vm137_vm6, %v8533_v32, %v8548_v43  ;;  %v9748_v32 = vmov 13  }
 0xf00   :  { %9743 = vst [vmem:[#allocation52_spill] sm:$0xff] %v8865_v22  ;;  %v5636_v22 = vld [vmem:[#allocation2 + $0x80] sm:$0xff] }
 0xf01   :  { %9744 = vst [vmem:[#allocation53_spill] sm:$0xff] %v8867_v37  ;;  %v4633_v10 = vpop.permute.xlu0 %4632 }
 0xf02   :  { %v8884_v42 = vsel %vm3082_vm15, %v8854_v62, %v4633_v10  ;;  %v8888_v53 = vsel %vm3082_vm15, %v4633_v10, %v8872_v54 }
 0xf03   :  { %4738 = vrot.lane.b32.xlu0 %v4706_v61, %s5697_s14  ;;  %4548 = vrot.lane.b32.xlu1 %v4491_v2, %s5661_s9 }
 0xf07   :  { %4618 = vrot.lane.b32.xlu0 %v4594_v48, %s5697_s14  ;;  %4736 = vrot.lane.b32.xlu1 %v4705_v15, %s5697_s14  ;;  %v9747_v15 = vmov 12   ;;  %v4699_v48 = vmul.f32 %v8478_v3, %v4566_v31 }
 0xf0a   :  { %v8914_v24 = vpop.permute.xlu1 %4795 }
 0xf0b   :  { %9745 = vst [vmem:[#allocation54_spill] sm:$0xff] %v8914_v24  ;;  %4622 = vrot.lane.b32.xlu0 %v4596_v49, %s5697_s14  ;;  %4620 = vrot.lane.b32.xlu1 %v4595_v13, %s5697_s14 }
 0xf0e   :  { %v8924_v50 = vpop.permute.xlu1 %3972  ;;  %v8926_v52 = vpop.permute.xlu0 %4799 }
 0xf0f   :  { %9746 = vst [vmem:[#allocation55_spill] sm:$0xff] %v8926_v52  ;;  %4626 = vrot.lane.b32.xlu0 %v4598_v27, %s5697_s14  ;;  %4624 = vrot.lane.b32.xlu1 %v4597_v18, %s5697_s14 }
 0xf12   :  { %v3969_v2 = vpop.permute.xlu1 %3968  ;;  %v3967_v57 = vpop.permute.xlu0 %3966 }
 0xf13   :  { %v8936_v61 = vsel %vm112_vm2, %v3967_v57, %v3969_v2  ;;  %4787 = vperm.xlu0 %5591, %v5631_v7   ;;  %4628 = vrot.lane.b32.xlu1 %v4599_v46, %s5697_s14 }
 0xf16   :  { %v8947_v10 = vpop.permute.xlu0 %3970 }
 0xf17   :  { %v8951_v9 = vsel %vm112_vm2, %v3969_v2, %v8947_v10  ;;  %4722 = vrot.lane.b32.xlu0 %v4698_v28, %s5697_s14  ;;  %4791 = vperm.xlu1 %5590, %v5632_v8   ;;  %v3518_v2 = vmul.f32 %v8977_v51, %v8558_v26 }
 0xf18   :  { %5592 = vset.pattern.permute.xlu0 %v9747_v15 }
 0xf19   :  { %v3766_v8 = vadd.f32 %v8623_v30, %v3518_v2 }
 0xf1b   :  { %4724 = vrot.lane.b32.xlu1 %v4699_v48, %s5697_s14  ;;  %v3980_v48 = vsel %vm112_vm2, %v8613_v25, %v8719_v45  ;;  %v3870_v24 = vadd.f32 %v8643_v14, %v3766_v8  ;;  %v3738_v8 = vsel %vm3082_vm15, %v8623_v30, %v8586_v38  ;;  %v3843_v30 = vsel %vm3082_vm15, %v8591_v1, %v8653_v23 }
 0xf1c   :  { %5593 = vset.pattern.permute.xlu1 %v9748_v32  ;;  %v9750_v32 = vld [vmem:[#allocation21_spill] sm:$0xff] }
 0xf4d   :  { %v3605_v17 = vpop.permute.xlu1 %3604  ;;  %v8961_v0 = vpop.permute.xlu0 %3640 }
 0xf59   :  { %v8963_v13 = vpop.permute.xlu1 %4556  ;;  %v8965_v49 = vpop.permute.xlu0 %4520 }
 0xf5a   :  { %v4533_v58 = vsel %vm127_vm5, %v8965_v49, %v8432_v63  ;;  %v4569_v18 = vsel %vm137_vm6, %v8963_v13, %v8486_v44 }
 0xf5b   :  { %v4605_v27 = vmul.f32 %v9749_v12, %v4533_v58  ;;  %v4708_v57 = vmul.f32 %v8393_v33, %v4569_v18  ;;  %v5634_v18 = vld [vmem:[#allocation2 + $0x88] sm:$0xff] }
 0xf5c   :  { %v3521_v52 = vmul.f32 %v5634_v18, %v8558_v26 }
 0xf5d   :  { %v3613_v47 = vpop.permute.xlu1 %3612  ;;  %4640 = vrot.lane.b32.xlu0 %v4605_v27, %s5697_s14  ;;  %v3649_v46 = vpop.permute.xlu0 %3648 }
 0xf5e   :  { %v3629_v7 = vsel %vm127_vm5, %v3605_v17, %v3613_v47 }
 0xf5f   :  { %v3696_v58 = vmul.f32 %v9750_v32, %v3629_v7 }
 0xf61   :  { %v3621_v28 = vpop.permute.xlu1 %3620  ;;  %4742 = vrot.lane.b32.xlu0 %v4708_v57, %s5697_s14  ;;  %v3657_v31 = vpop.permute.xlu0 %3656 }
 0xf62   :  { %v3633_v15 = vsel %vm127_vm5, %v3621_v28, %v3605_v17  ;;  %v3625_v57 = vsel %vm127_vm5, %v3613_v47, %v3621_v28  ;;  %v3661_v2 = vsel %vm137_vm6, %v3649_v46, %v3657_v31  ;;  %v5635_v17 = vld [vmem:[#allocation2 + $0x78] sm:$0xff]  ;;  %v3739_v47 = vsel %vm3082_vm15, %v8586_v38, %v8629_v34 }
 0xf63   :  { %v3695_v27 = vmul.f32 %v9750_v32, %v3633_v15  ;;  %v3519_v37 = vmul.f32 %v5635_v17, %v8558_v26  ;;  %v3769_v28 = vadd.f32 %v8629_v34, %v3521_v52  ;;  %v4010_v15 = vadd.f32 %v3980_v48, %v3870_v24 }
 0xf64   :  { %v3520_v17 = vmul.f32 %v5636_v22, %v8558_v26  ;;  %v3800_v19 = vmul.f32 %v9751_v20, %v3661_v2  ;;  %v3665_v26 = vsel %vm137_vm6, %v8961_v0, %v3649_v46  ;;  %v9032_v2 = vld [vmem:[#allocation2 + $0x18] sm:$0xff] }
 0xf65   :  { %3728 = vrot.lane.b32.xlu1 %v3695_v27, %s5697_s14  ;;  %v4097_v25 = vpop.permute.xlu1 %4096  ;;  %3730 = vrot.lane.b32.xlu0 %v3696_v58, %s5697_s14  ;;  %v9002_v7 = vpop.permute.xlu0 %4132  ;;  %v3842_v58 = vsel %vm3082_vm15, %v8643_v14, %v8591_v1  ;;  %v3697_v27 = vmul.f32 %v9750_v32, %v3625_v57  ;;  %v3873_v38 = vadd.f32 %v8653_v23, %v3769_v28 }
 0xf66   :  { %v4258_v34 = vadd.f32 %v8746_v36, %v4010_v15  ;;  %v3767_v22 = vadd.f32 %v3738_v8, %v3519_v37  ;;  %v3768_v24 = vadd.f32 %v3739_v47, %v3520_v17  ;;  %v3981_v1 = vsel %vm112_vm2, %v8719_v45, %v8605_v35  ;;  %v9752_v17 = vld [vmem:[#allocation37_spill] sm:$0xff] }
 0xf67   :  { %v4013_v23 = vadd.f32 %v8728_v40, %v3873_v38  ;;  %v3513_v37 = vmul.f32 %v9032_v2, %v8561_v21  ;;  %v3799_v46 = vmul.f32 %v9751_v20, %v3665_v26  ;;  %v4410_v45 = vmul.f32 %v5634_v18, %v8742_v59  ;;  %v9753_v18 = vld [vmem:[#allocation40_spill] sm:$0xff] }
 0xf68   :  { %v4362_v48 = vadd.f32 %v8771_v4, %v4258_v34  ;;  %v3871_v32 = vadd.f32 %v3842_v58, %v3767_v22  ;;  %v3872_v57 = vadd.f32 %v3843_v30, %v3768_v24  ;;  %v3669_v47 = vsel %vm137_vm6, %v3657_v31, %v8961_v0  ;;  %v9754_v22 = vld [vmem:[#allocation43_spill] sm:$0xff] }
 0xf69   :  { %3732 = vrot.lane.b32.xlu1 %v3697_v27, %s5697_s14  ;;  %v4105_v14 = vpop.permute.xlu1 %4104  ;;  %3834 = vrot.lane.b32.xlu0 %v3800_v19, %s5697_s14  ;;  %v4141_v52 = vpop.permute.xlu0 %4140  ;;  %v3982_v19 = vsel %vm112_vm2, %v8605_v35, %v8728_v40  ;;  %v4261_v8 = vadd.f32 %v8756_v39, %v4013_v23  ;;  %v3761_v28 = vadd.f32 %v8677_v55, %v3513_v37  ;;  %v5638_v27 = vld [vmem:[#allocation2 + $0xa0] sm:$0xff] }
 0xf6a   :  { %v4011_v15 = vadd.f32 %v3981_v1, %v3871_v32  ;;  %v4230_v58 = vsel %vm3082_vm15, %v8746_v36, %v9752_v17  ;;  %v4413_v30 = vmul.f32 %v5638_v27, %v8742_v59  ;;  %v4231_v40 = vsel %vm3082_vm15, %v9752_v17, %v8756_v39  ;;  %v9755_v1 = vld [vmem:[#allocation13_spill] sm:$0xff] }
 0xf6b   :  { %v4365_v0 = vadd.f32 %v9753_v18, %v4261_v8  ;;  %v4426_v31 = vadd.f32 %v4410_v45, %v4362_v48  ;;  %v4012_v26 = vadd.f32 %v3982_v19, %v3872_v57  ;;  %v4334_v36 = vsel %vm3082_vm15, %v8771_v4, %v9754_v22 }
 0xf6c   :  { %v3801_v24 = vmul.f32 %v9751_v20, %v3669_v47  ;;  %v4335_v32 = vsel %vm3082_vm15, %v9754_v22, %v9753_v18  ;;  %v4121_v48 = vsel %vm127_vm5, %v4097_v25, %v4105_v14  ;;  %v4259_v37 = vadd.f32 %v4230_v58, %v4011_v15  ;;  %v9756_v20 = vld [vmem:[#allocation18_spill] sm:$0xff]  ;;  %v9757_v58 = vld [vmem:[#allocation36_spill] sm:$0xff] }
 0xf6d   :  { %v4113_v38 = vpop.permute.xlu1 %4112  ;;  %3832 = vrot.lane.b32.xlu1 %v3799_v46, %s5697_s14  ;;  %v4149_v35 = vpop.permute.xlu0 %4148  ;;  %v4674_v39 = vadd.f32 %v8854_v62, %v4426_v31  ;;  %v4260_v46 = vadd.f32 %v4231_v40, %v4012_v26  ;;  %v3865_v8 = vadd.f32 %v9756_v20, %v3761_v28  ;;  %v4429_v45 = vadd.f32 %v4413_v30, %v4365_v0  ;;  %v5639_v40 = vld [vmem:[#allocation2 + $0x90] sm:$0xff] }
 0xf6e   :  { %v4125_v34 = vsel %vm127_vm5, %v4113_v38, %v4097_v25  ;;  %v4117_v57 = vsel %vm127_vm5, %v4105_v14, %v4113_v38  ;;  %v4412_v62 = vmul.f32 %v8977_v51, %v8742_v59  ;;  %v4363_v25 = vadd.f32 %v4334_v36, %v4259_v37 }
 0xf6f   :  { %v4187_v23 = vmul.f32 %v9755_v1, %v4125_v34  ;;  %v4364_v17 = vadd.f32 %v4335_v32, %v4260_v46  ;;  %v4188_v14 = vmul.f32 %v9755_v1, %v4121_v48  ;;  %v4189_v15 = vmul.f32 %v9755_v1, %v4117_v57  ;;  %v9758_v34 = vld [vmem:[#allocation46_spill] sm:$0xff] }
 0xf70   :  { %v4005_v27 = vadd.f32 %v9757_v58, %v3865_v8  ;;  %v4677_v38 = vadd.f32 %v8872_v54, %v4429_v45  ;;  %v4157_v28 = vsel %vm137_vm6, %v9002_v7, %v4141_v52  ;;  %v4153_v30 = vsel %vm137_vm6, %v4141_v52, %v4149_v35  ;;  %v9760_v52 = vld [vmem:[#allocation20_spill] sm:$0xff]  ;;  %v9761_v32 = vld [vmem:[#allocation30_spill] sm:$0xff] }
 0xf71   :  { %v4735_v19 = vpop.permute.xlu1 %4734  ;;  %3836 = vrot.lane.b32.xlu1 %v3801_v24, %s5697_s14  ;;  %4220 = vrot.lane.b32.xlu0 %v4187_v23, %s5697_s14  ;;  %v4513_v4 = vpop.permute.xlu0 %4512  ;;  %v4411_v18 = vmul.f32 %v5639_v40, %v8742_v59  ;;  %v4428_v36 = vadd.f32 %v4412_v62, %v4364_v17  ;;  %v9759_v24 = vld [vmem:[#allocation19_spill] sm:$0xff]  ;;  %v4571_v59 = vsel %vm137_vm6, %v9761_v32, %v9760_v52 }
 0xf72   :  { %v9075_v47 = vadd.f32 %v4735_v19, %v4674_v39  ;;  %v4253_v26 = vadd.f32 %v9758_v34, %v4005_v27  ;;  %v4291_v1 = vmul.f32 %v9759_v24, %v4157_v28  ;;  %v4292_v23 = vmul.f32 %v9759_v24, %v4153_v30 }
 0xf73   :  { %v4427_v54 = vadd.f32 %v4411_v18, %v4363_v25  ;;  %v4161_v48 = vsel %vm137_vm6, %v4149_v35, %v9002_v7  ;;  %v4676_v37 = vadd.f32 %v8888_v53, %v4428_v36  ;;  %v9762_v25 = vld [vmem:[#allocation41_spill] sm:$0xff] }
 0xf74   :  { %v4357_v39 = vadd.f32 %v8808_v6, %v4253_v26  ;;  %v5640_v6 = vld [vmem:[#allocation2 + $0x30] sm:$0xff] }
 0xf75   :  { %v4549_v0 = vpop.permute.xlu1 %4548  ;;  %4222 = vrot.lane.b32.xlu1 %v4188_v14, %s5697_s14  ;;  %4224 = vrot.lane.b32.xlu0 %v4189_v15, %s5697_s14  ;;  %v4739_v31 = vpop.permute.xlu0 %4738  ;;  %v4675_v57 = vadd.f32 %v8884_v42, %v4427_v54  ;;  %v4405_v17 = vmul.f32 %v5640_v6, %v9762_v25  ;;  %v9763_v14 = vld [vmem:[#allocation26_spill] sm:$0xff]  ;;  %v4293_v42 = vmul.f32 %v9759_v24, %v4161_v48  ;;  %v9768_v48 = vld [vmem:[#allocation28_spill] sm:$0xff] }
 0xf76   :  { %v9090_v22 = vadd.f32 %v4739_v31, %v4677_v38  ;;  %v4701_v7 = vmul.f32 %v9763_v14, %v4571_v59  ;;  %v4537_v15 = vsel %vm127_vm5, %v4513_v4, %v8965_v49  ;;  %v4574_v49 = vsel %vm137_vm6, %v8548_v43, %v8525_v41 }
 0xf77   :  { %v4421_v27 = vadd.f32 %v4405_v17, %v4357_v39  ;;  %v4604_v40 = vmul.f32 %v9749_v12, %v4537_v15  ;;  %v4577_v41 = vsel %vm137_vm6, %v8486_v44, %v4549_v0  ;;  %v3514_v59 = vmul.f32 %v8977_v51, %v8574_v11  ;;  %v9771_v17 = vld [vmem:[#allocation34_spill] sm:$0xff]  ;;  %v5641_v15 = vld [vmem:[#allocation2 + $0x40] sm:$0xff] }
 0xf79   :  { %v4737_v46 = vpop.permute.xlu1 %4736  ;;  %4324 = vrot.lane.b32.xlu0 %v4291_v1, %s5697_s14  ;;  %4326 = vrot.lane.b32.xlu1 %v4292_v23, %s5697_s14  ;;  %v9106_v8 = vpop.permute.xlu0 %4618 }
 0xf7a   :  { %v4750_v45 = vsel %vm3082_vm15, %v4735_v19, %v4737_v46  ;;  %v4751_v62 = vsel %vm3082_vm15, %v4737_v46, %v4739_v31  ;;  %v4541_v19 = vsel %vm127_vm5, %v8432_v63, %v4513_v4  ;;  %v4573_v63 = vsel %vm137_vm6, %v4549_v0, %v8963_v13  ;;  %v9765_v31 = vld [vmem:[#allocation25_spill] sm:$0xff] }
 0xf7b   :  { %v9113_v35 = vadd.f32 %v4750_v45, %v4675_v57  ;;  %v9115_v53 = vadd.f32 %v4751_v62, %v4676_v37  ;;  %v4603_v30 = vmul.f32 %v9749_v12, %v4541_v19  ;;  %v4700_v4 = vmul.f32 %v8478_v3, %v4574_v49  ;;  %v9769_v37 = vld [vmem:[#allocation31_spill] sm:$0xff]  ;;  %v9770_v46 = vld [vmem:[#allocation17_spill] sm:$0xff] }
 0xf7c   :  { %v4707_v18 = vmul.f32 %v8393_v33, %v4573_v63  ;;  %v4567_v12 = vsel %vm137_vm6, %v9760_v52, %v9765_v31  ;;  %v4709_v13 = vmul.f32 %v8393_v33, %v4577_v41  ;;  %v4575_v3 = vsel %vm137_vm6, %v9765_v31, %v9761_v32  ;;  %v9774_v63 = vld [vmem:[#allocation22_spill] sm:$0xff]  ;;  %v9776_v31 = vld [vmem:[#allocation3_spill] sm:$0xff] }
 0xf7d   :  { %4328 = vrot.lane.b32.xlu0 %v4293_v42, %s5697_s14  ;;  %4728 = vrot.lane.b32.xlu1 %v4701_v7, %s5697_s14  ;;  %v9125_v38 = vpop.permute.xlu0 %4622  ;;  %v4702_v43 = vmul.f32 %v9763_v14, %v4567_v12  ;;  %v4703_v26 = vmul.f32 %v9763_v14, %v4575_v3  ;;  %v9162_v44 = vpop.permute.xlu1 %4620  ;;  %v3510_v32 = vmul.f32 %v8977_v51, %v8561_v21  ;;  %v9772_v7 = vld [vmem:[#allocation27_spill] sm:$0xff] }
 0xf7e   :  { %v9128_v28 = vadd.f32 %v9125_v38, %v4421_v27  ;;  %v3511_v57 = vmul.f32 %v9768_v48, %v8561_v21  ;;  %v3734_v45 = vsel %vm3082_vm15, %v9770_v46, %v9769_v37  ;;  %v3762_v14 = vadd.f32 %v9771_v17, %v3514_v59  ;;  %v5642_v27 = vld [vmem:[#allocation2 + $0xd8] sm:$0xff]  ;;  %v9780_v59 = vld [vmem:[#allocation16_spill] sm:$0xff] }
 0xf7f   :  { %v3758_v62 = vadd.f32 %v9770_v46, %v3510_v32  ;;  %v3512_v42 = vmul.f32 %v9772_v7, %v8561_v21  ;;  %v3515_v19 = vmul.f32 %v5641_v15, %v8574_v11  ;;  %v3735_v49 = vsel %vm3082_vm15, %v9769_v37, %v8677_v55  ;;  %v9781_v37 = vld [vmem:[#allocation24_spill] sm:$0xff]  ;;  %v9782_v7 = vld [vmem:[#allocation35_spill] sm:$0xff]  ;;  %v9783_v15 = vld [vmem:[#allocation42_spill] sm:$0xff] }
 0xf80   :  { %9764 = vst [vmem:[#allocation8_spill] sm:$0xff] %v9128_v28  ;;  %v3759_v41 = vadd.f32 %v3734_v45, %v3511_v57  ;;  %v3866_v48 = vadd.f32 %v9780_v59, %v3762_v14  ;;  %v3974_v57 = vsel %vm112_vm2, %v9783_v15, %v9782_v7  ;;  %v3840_v14 = vsel %vm3082_vm15, %v9780_v59, %v8730_v60  ;;  %v9788_v59 = vld [vmem:[#allocation15_spill] sm:$0xff] }
 0xf81   :  { %4636 = vrot.lane.b32.xlu0 %v4603_v30, %s5697_s14  ;;  %4638 = vrot.lane.b32.xlu1 %v4604_v40, %s5697_s14  ;;  %v9164_v0 = vpop.permute.xlu0 %4626  ;;  %v9166_v54 = vpop.permute.xlu1 %4624  ;;  %v9773_v30 = vld [vmem:[#allocation29_spill] sm:$0xff]  ;;  %v3760_v45 = vadd.f32 %v3735_v49, %v3512_v42 }
 0xf82   :  { %v9197_v40 = vmul.f32 %v5642_v27, %v9773_v30  ;;  %v9210_v11 = vmul.f32 %v8977_v51, %v9773_v30 }
 0xf85   :  { %4726 = vrot.lane.b32.xlu0 %v4700_v4, %s5697_s14  ;;  %4740 = vrot.lane.b32.xlu1 %v4707_v18, %s5697_s14  ;;  %v9170_v36 = vpop.permute.xlu1 %4628  ;;  %v3736_v4 = vsel %vm3082_vm15, %v9771_v17, %v9774_v63  ;;  %v9775_v18 = vld [vmem:[#allocation23_spill] sm:$0xff]  ;;  %v3862_v17 = vadd.f32 %v9776_v31, %v3758_v62 }
 0xf86   :  { %v3838_v12 = vsel %vm3082_vm15, %v9776_v31, %v9775_v18  ;;  %v3763_v27 = vadd.f32 %v3736_v4, %v3515_v19  ;;  %v3839_v63 = vsel %vm3082_vm15, %v9775_v18, %v9756_v20  ;;  %v9785_v4 = vld [vmem:[#allocation10_spill] sm:$0xff] }
 0xf87   :  { %v4002_v15 = vadd.f32 %v3974_v57, %v3862_v17  ;;  %v3864_v20 = vadd.f32 %v3839_v63, %v3760_v45 }
 0xf89   :  { %4730 = vrot.lane.b32.xlu0 %v4702_v43, %s5697_s14  ;;  %4744 = vrot.lane.b32.xlu1 %v4709_v13, %s5697_s14  ;;  %v9777_v43 = vld [vmem:[#allocation39_spill] sm:$0xff] }
 0xf8a   :  { %v9778_v13 = vld [vmem:[#allocation47_spill] sm:$0xff] }
 0xf8b   :  { %v3977_v3 = vsel %vm112_vm2, %v9778_v13, %v9777_v43  ;;  %v3863_v13 = vadd.f32 %v3838_v12, %v3759_v41  ;;  %v9786_v12 = vld [vmem:[#allocation45_spill] sm:$0xff]  ;;  %v9787_v41 = vld [vmem:[#allocation32_spill] sm:$0xff] }
 0xf8c   :  { %v4006_v28 = vadd.f32 %v3977_v3, %v3866_v48  ;;  %v4406_v60 = vmul.f32 %v9787_v41, %v9786_v12 }
 0xf8d   :  { %4732 = vrot.lane.b32.xlu1 %v4703_v26, %s5697_s14  ;;  %v9779_v26 = vld [vmem:[#allocation12_spill] sm:$0xff] }
 0xf8e   :  { %v9168_v33 = vpop.permute.xlu0 %4787  ;;  %v3522_v55 = vmul.f32 %v8977_v51, %v9779_v26  ;;  %v3523_v46 = vmul.f32 %v9779_v26, %v9781_v37  ;;  %v3524_v18 = vmul.f32 %v9779_v26, %v9785_v4  ;;  %v4254_v48 = vadd.f32 %v9788_v59, %v4006_v28 }
 0xf8f   :  { %v3978_v28 = vsel %vm112_vm2, %v9777_v43, %v8767_v56  ;;  %v3985_v56 = vsel %vm112_vm2, %v8947_v10, %v8924_v50  ;;  %v4408_v10 = vmul.f32 %v8977_v51, %v9786_v12 }
 0xf92   :  { %v9172_v29 = vpop.permute.xlu0 %4722  ;;  %v9174_v24 = vpop.permute.xlu1 %4791 }
 0xf96   :  { %v9178_v23 = vpop.permute.xlu1 %4724 }
 0xfcf   :  { %v9176_v1 = vpop.permute.xlu0 %4640 }
 0xfd0   :  { %9766 = vst [vmem:[#allocation21_spill] sm:$0xff] %v9176_v1 }
 0xfd3   :  { %v9180_v52 = vpop.permute.xlu0 %4742 }
 0xfd4   :  { %9767 = vst [vmem:[#allocation7_spill] sm:$0xff] %v9180_v52  ;;  %v9784_v52 = vld [vmem:[#allocation38_spill] sm:$0xff] }
 0xfd5   :  { %v3975_v62 = vsel %vm112_vm2, %v9782_v7, %v9784_v52  ;;  %v5643_v7 = vld [vmem:[#allocation2 + $0x58] sm:$0xff] }
 0xfd6   :  { %v4003_v17 = vadd.f32 %v3975_v62, %v3863_v13  ;;  %v9792_v13 = vld [vmem:[#allocation49_spill] sm:$0xff] }
 0xfd7   :  { %v3729_v39 = vpop.permute.xlu1 %3728  ;;  %v3731_v6 = vpop.permute.xlu0 %3730 }
 0xfd8   :  { %v3740_v32 = vsel %vm3082_vm15, %v3729_v39, %v3731_v6  ;;  %v3770_v42 = vadd.f32 %v3729_v39, %v3522_v55 }
 0xfd9   :  { %v3771_v31 = vadd.f32 %v3740_v32, %v3523_v46  ;;  %v4407_v32 = vmul.f32 %v5643_v7, %v9786_v12  ;;  %v9789_v46 = vld [vmem:[#allocation14_spill] sm:$0xff] }
 0xfda   :  { %v3525_v39 = vmul.f32 %v9779_v26, %v9789_v46 }
 0xfdb   :  { %v3733_v21 = vpop.permute.xlu1 %3732  ;;  %v3835_v37 = vpop.permute.xlu0 %3834 }
 0xfdc   :  { %v3741_v19 = vsel %vm3082_vm15, %v3731_v6, %v3733_v21  ;;  %v3867_v6 = vadd.f32 %v3840_v14, %v3763_v27  ;;  %v3773_v43 = vadd.f32 %v3733_v21, %v3525_v39 }
 0xfdd   :  { %v3772_v57 = vadd.f32 %v3741_v19, %v3524_v18 }
 0xfdf   :  { %v3833_v1 = vpop.permute.xlu1 %3832 }
 0xfe0   :  { %v3844_v49 = vsel %vm3082_vm15, %v3833_v1, %v3835_v37  ;;  %v3874_v55 = vadd.f32 %v3833_v1, %v3770_v42  ;;  %v9791_v1 = vld [vmem:[#allocation48_spill] sm:$0xff]  ;;  %v4358_v42 = vadd.f32 %v8845_v5, %v4254_v48  ;;  %v4414_v5 = vmul.f32 %v9773_v30, %v9789_v46  ;;  %v9796_v46 = vld [vmem:[#allocation11_spill] sm:$0xff] }
 0xfe1   :  { %v3875_v3 = vadd.f32 %v3844_v49, %v3771_v31  ;;  %v3976_v31 = vsel %vm112_vm2, %v9784_v52, %v9757_v58  ;;  %v9790_v49 = vld [vmem:[#allocation44_spill] sm:$0xff]  ;;  %v4228_v58 = vsel %vm3082_vm15, %v9788_v59, %v8791_v16  ;;  %v4402_v16 = vmul.f32 %v9032_v2, %v9762_v25 }
 0xfe2   :  { %v4250_v41 = vadd.f32 %v9790_v49, %v4002_v15  ;;  %v4226_v27 = vsel %vm3082_vm15, %v9790_v49, %v9791_v1  ;;  %v4014_v62 = vadd.f32 %v8936_v61, %v3874_v55  ;;  %v4007_v15 = vadd.f32 %v3978_v28, %v3867_v6  ;;  %v5644_v61 = vld [vmem:[#allocation2 + $0x68] sm:$0xff]  ;;  %v9794_v6 = vld [vmem:[#allocation50_spill] sm:$0xff] }
 0xfe3   :  { %v3837_v45 = vpop.permute.xlu1 %3836  ;;  %v4221_v63 = vpop.permute.xlu0 %4220  ;;  %v4015_v4 = vadd.f32 %v8951_v9, %v3875_v3  ;;  %v4227_v9 = vsel %vm3082_vm15, %v9791_v1, %v9758_v34  ;;  %v4251_v3 = vadd.f32 %v4226_v27, %v4003_v17  ;;  %v4409_v21 = vmul.f32 %v5644_v61, %v9786_v12  ;;  %v9795_v17 = vld [vmem:[#allocation51_spill] sm:$0xff] }
 0xfe4   :  { %v3845_v26 = vsel %vm3082_vm15, %v3835_v37, %v3837_v45  ;;  %v4354_v14 = vadd.f32 %v9792_v13, %v4250_v41  ;;  %v4004_v37 = vadd.f32 %v3976_v31, %v3864_v20  ;;  %v3877_v59 = vadd.f32 %v3837_v45, %v3773_v43  ;;  %v9793_v20 = vld [vmem:[#allocation9_spill] sm:$0xff] }
 0xfe5   :  { %v3876_v52 = vadd.f32 %v3845_v26, %v3772_v57  ;;  %v4255_v49 = vadd.f32 %v4228_v58, %v4007_v15  ;;  %v4355_v48 = vadd.f32 %v9793_v20, %v4251_v3  ;;  %v4262_v55 = vadd.f32 %v4221_v63, %v4014_v62  ;;  %v9798_v3 = vld [vmem:[#allocation52_spill] sm:$0xff] }
 0xfe6   :  { %v4252_v57 = vadd.f32 %v4227_v9, %v4004_v37  ;;  %v4418_v39 = vadd.f32 %v4402_v16, %v4354_v14  ;;  %v4422_v31 = vadd.f32 %v4406_v60, %v4358_v42  ;;  %v4017_v27 = vadd.f32 %v8924_v50, %v3877_v59 }
 0xfe7   :  { %v4223_v19 = vpop.permute.xlu1 %4222  ;;  %v4016_v34 = vadd.f32 %v3985_v56, %v3876_v52  ;;  %v4225_v18 = vpop.permute.xlu0 %4224  ;;  %v4359_v45 = vadd.f32 %v9795_v17, %v4255_v49  ;;  %v4415_v58 = vmul.f32 %v9773_v30, %v9796_v46  ;;  %v4404_v13 = vmul.f32 %v8977_v51, %v9762_v25  ;;  %v9799_v49 = vld [vmem:[#allocation53_spill] sm:$0xff] }
 0xfe8   :  { %v4232_v7 = vsel %vm3082_vm15, %v4221_v63, %v4223_v19  ;;  %v4356_v2 = vadd.f32 %v9794_v6, %v4252_v57  ;;  %v4666_v1 = vadd.f32 %v9106_v8, %v4418_v39  ;;  %v9797_v63 = vld [vmem:[#allocation33_spill] sm:$0xff]  ;;  %v4233_v56 = vsel %vm3082_vm15, %v4223_v19, %v4225_v18 }
 0xfe9   :  { %v4263_v28 = vadd.f32 %v4232_v7, %v4015_v4  ;;  %v4403_v52 = vmul.f32 %v9797_v63, %v9762_v25  ;;  %v4670_v4 = vadd.f32 %v9166_v54, %v4422_v31  ;;  %v4423_v37 = vadd.f32 %v4407_v32, %v4359_v45 }
 0xfea   :  { %v4770_v14 = vadd.f32 %v9172_v29, %v4666_v1  ;;  %v4420_v62 = vadd.f32 %v4404_v13, %v4356_v2  ;;  %v4425_v16 = vadd.f32 %v4409_v21, %v9798_v3  ;;  %v4265_v59 = vadd.f32 %v4225_v18, %v4017_v27  ;;  %v9801_v1 = vld [vmem:[#allocation21_spill] sm:$0xff] }
 0xfeb   :  { %v4327_v41 = vpop.permute.xlu1 %4326  ;;  %v4325_v26 = vpop.permute.xlu0 %4324  ;;  %v4419_v43 = vadd.f32 %v4403_v52, %v4355_v48  ;;  %v4642_v57 = vsel %vm3082_vm15, %v9106_v8, %v9162_v44  ;;  %v4643_v19 = vsel %vm3082_vm15, %v9162_v44, %v9125_v38  ;;  %v4424_v61 = vadd.f32 %v4408_v10, %v9799_v49  ;;  %v9800_v48 = vld [vmem:[#allocation54_spill] sm:$0xff] }
 0xfec   :  { %v4336_v12 = vsel %vm3082_vm15, %v4325_v26, %v4327_v41  ;;  %v4366_v9 = vadd.f32 %v4325_v26, %v4262_v55  ;;  %v4264_v32 = vadd.f32 %v4233_v56, %v4016_v34  ;;  %v4802_v18 = vadd.f32 %v9168_v33, %v4770_v14  ;;  %v9804_v14 = vld [vmem:[#allocation55_spill] sm:$0xff] }
 0xfed   :  { %v4367_v60 = vadd.f32 %v4336_v12, %v4263_v28  ;;  %v9307_v39 = vadd.f32 %v9800_v48, %v9075_v47  ;;  %v9311_v8 = vadd.f32 %v9800_v48, %v9090_v22  ;;  %v9315_v38 = vadd.f32 %v9800_v48, %v9113_v35 }
 0xfee   :  { %v4430_v50 = vadd.f32 %v4414_v5, %v4366_v9  ;;  %v4644_v5 = vsel %vm3082_vm15, %v9166_v54, %v9164_v0  ;;  %v9319_v10 = vadd.f32 %v9800_v48, %v9115_v53  ;;  %v4667_v55 = vadd.f32 %v4642_v57, %v4419_v43 }
 0xfef   :  { %v4729_v15 = vpop.permute.xlu1 %4728  ;;  %v4329_v42 = vpop.permute.xlu0 %4328  ;;  %v4431_v30 = vadd.f32 %v4415_v58, %v4367_v60  ;;  %v4668_v2 = vadd.f32 %v4643_v19, %v4420_v62  ;;  %v4671_v17 = vadd.f32 %v4644_v5, %v4423_v37  ;;  %v4645_v22 = vsel %vm3082_vm15, %v9164_v0, %v9170_v36 }
 0xff0   :  { %v4774_v7 = vadd.f32 %v4729_v15, %v4670_v4  ;;  %v4337_v25 = vsel %vm3082_vm15, %v4327_v41, %v4329_v42  ;;  %v4369_v20 = vadd.f32 %v4329_v42, %v4265_v59  ;;  %v4746_v35 = vsel %vm3082_vm15, %v9172_v29, %v9178_v23  ;;  %v9802_v29 = vld [vmem:[#allocation7_spill] sm:$0xff] }
 0xff1   :  { %v4368_v44 = vadd.f32 %v4337_v25, %v4264_v32  ;;  %v4673_v41 = vadd.f32 %v9170_v36, %v4425_v16  ;;  %v4771_v52 = vadd.f32 %v4746_v35, %v4667_v55  ;;  %v9803_v36 = vld [vmem:[#allocation8_spill] sm:$0xff]  ;;  %v4672_v4 = vadd.f32 %v4645_v22, %v4424_v61 }
 0xff2   :  { %v4806_v21 = vadd.f32 %v9174_v24, %v4774_v7  ;;  %v4433_v31 = vadd.f32 %v9197_v40, %v4369_v20 }
 0xff3   :  { %v4639_v34 = vpop.permute.xlu1 %4638  ;;  %v4637_v54 = vpop.permute.xlu0 %4636  ;;  %v4432_v26 = vadd.f32 %v9210_v11, %v4368_v44  ;;  %v4803_v57 = vadd.f32 %v9168_v33, %v4771_v52 }
 0xff4   :  { %v9321_v6 = vpack.c.bf16 %v4806_v21, %v4802_v18  ;;  %v4648_v47 = vsel %vm3082_vm15, %v4637_v54, %v4639_v34  ;;  %v4678_v28 = vadd.f32 %v4637_v54, %v4430_v50  ;;  %v4649_v27 = vsel %vm3082_vm15, %v4639_v34, %v9801_v1 }
 0xff5   :  { %v4679_v12 = vadd.f32 %v4648_v47, %v4431_v30  ;;  %v4681_v43 = vadd.f32 %v9801_v1, %v4433_v31  ;;  %v4680_v62 = vadd.f32 %v4649_v27, %v4432_v26 }
 0xff6   :  { %v4826_v45 = vunpack.c.l.bf16 %v9321_v6  ;;  %v4830_v53 = vunpack.c.h.bf16 %v9321_v6 }
 0xff7   :  { %v4741_v0 = vpop.permute.xlu1 %4740  ;;  %v4727_v9 = vpop.permute.xlu0 %4726 }
 0xff8   :  { %v9337_v46 = vsub.f32 %v4806_v21, %v4830_v53  ;;  %v4752_v58 = vsel %vm3082_vm15, %v4741_v0, %v9802_v29  ;;  %v4782_v63 = vadd.f32 %v4741_v0, %v4678_v28  ;;  %v4747_v40 = vsel %vm3082_vm15, %v9178_v23, %v4727_v9 }
 0xff9   :  { %v4783_v13 = vadd.f32 %v4752_v58, %v4679_v12  ;;  %v4773_v60 = vadd.f32 %v4727_v9, %v9803_v36  ;;  %v9344_v11 = vsub.f32 %v4802_v18, %v4826_v45  ;;  %v4772_v50 = vadd.f32 %v4747_v40, %v4668_v2 }
 0xffa   :  { %v4814_v56 = vadd.f32 %v9804_v14, %v4782_v63 }
 0xffb   :  { %v4815_v37 = vadd.f32 %v9804_v14, %v4783_v13  ;;  %v4805_v42 = vadd.f32 %v9168_v33, %v4773_v60  ;;  %v4745_v30 = vpop.permute.xlu1 %4744  ;;  %v4731_v3 = vpop.permute.xlu0 %4730  ;;  %v4858_v23 = vpack.c.bf16 %v9337_v46, %v9344_v11  ;;  %v4804_v18 = vadd.f32 %v9168_v33, %v4772_v50 }
 0xffc   :  { %v9353_v16 = vpack.c.bf16 %v4814_v56, %v9307_v39  ;;  %v4753_v59 = vsel %vm3082_vm15, %v9802_v29, %v4745_v30  ;;  %v4785_v7 = vadd.f32 %v4745_v30, %v4681_v43  ;;  %v4748_v25 = vsel %vm3082_vm15, %v4729_v15, %v4731_v3 }
 0xffd   :  { %v4823_v19 = vpack.c.bf16 %v4815_v37, %v9315_v38  ;;  %v4784_v49 = vadd.f32 %v4753_v59, %v4680_v62  ;;  %v4775_v61 = vadd.f32 %v4748_v25, %v4671_v17 }
 0xffe   :  { %v4834_v32 = vunpack.c.l.bf16 %v9353_v16  ;;  %v4838_v5 = vunpack.c.h.bf16 %v9353_v16  ;;  %v4817_v21 = vadd.f32 %v9804_v14, %v4785_v7 }
 0xfff   :  { %v4835_v20 = vunpack.c.l.bf16 %v4823_v19  ;;  %v4839_v48 = vunpack.c.h.bf16 %v4823_v19  ;;  %v4816_v44 = vadd.f32 %v9804_v14, %v4784_v49  ;;  %v4807_v15 = vadd.f32 %v9174_v24, %v4775_v61  ;;  %v4733_v34 = vpop.permute.xlu1 %4732 }
0x1000   :  { %v4854_v54 = vsub.f32 %v4814_v56, %v4838_v5  ;;  %v4825_v55 = vpack.c.bf16 %v4817_v21, %v9311_v8  ;;  %v4749_v47 = vsel %vm3082_vm15, %v4731_v3, %v4733_v34  ;;  %v4777_v2 = vadd.f32 %v4733_v34, %v4673_v41 }
0x1001   :  { %v4855_v17 = vsub.f32 %v4815_v37, %v4839_v48  ;;  %v4824_v22 = vpack.c.bf16 %v4816_v44, %v9319_v10  ;;  %v4819_v35 = vpack.c.bf16 %v4807_v15, %v4803_v57  ;;  %v4776_v33 = vadd.f32 %v4749_v47, %v4672_v4 }
0x1002   :  { %v4837_v45 = vunpack.c.l.bf16 %v4825_v55  ;;  %v4841_v53 = vunpack.c.h.bf16 %v4825_v55  ;;  %v4809_v31 = vadd.f32 %v9174_v24, %v4777_v2  ;;  %v4850_v28 = vsub.f32 %v9307_v39, %v4834_v32 }
0x1003   :  { %v4836_v26 = vunpack.c.l.bf16 %v4824_v22  ;;  %v4840_v1 = vunpack.c.h.bf16 %v4824_v22  ;;  %v4827_v27 = vunpack.c.l.bf16 %v4819_v35  ;;  %v4831_v12 = vunpack.c.h.bf16 %v4819_v35 }
0x1004   :  { %v4857_v0 = vsub.f32 %v4817_v21, %v4841_v53  ;;  %v4808_v9 = vadd.f32 %v9174_v24, %v4776_v33  ;;  %v4821_v46 = vpack.c.bf16 %v4809_v31, %v4805_v42  ;;  %v4862_v41 = vpack.c.bf16 %v4854_v54, %v4850_v28 }
0x1005   :  { %v4856_v29 = vsub.f32 %v4816_v44, %v4840_v1  ;;  %v4847_v58 = vsub.f32 %v4807_v15, %v4831_v12  ;;  %v4843_v63 = vsub.f32 %v4803_v57, %v4827_v27  ;;  %v4852_v40 = vsub.f32 %v9319_v10, %v4836_v26 }
0x1006   :  { %v4820_v52 = vpack.c.bf16 %v4808_v9, %v4804_v18  ;;  %v4829_v13 = vunpack.c.l.bf16 %v4821_v46  ;;  %v4833_v36 = vunpack.c.h.bf16 %v4821_v46  ;;  %v4853_v60 = vsub.f32 %v9311_v8, %v4837_v45  ;;  %v9396_v8 = vld [vmem:[%s9457_s4] sm:$0xff] }
0x1007   :  { %v4859_v39 = vpack.c.bf16 %v4847_v58, %v4843_v63  ;;  %v4864_v11 = vpack.c.bf16 %v4856_v29, %v4852_v40  ;;  %v4851_v4 = vsub.f32 %v9315_v38, %v4835_v20  ;;  %v9805_v38 = vmov 14  }
0x1008   :  { %v4828_v14 = vunpack.c.l.bf16 %v4820_v52  ;;  %v4832_v56 = vunpack.c.h.bf16 %v4820_v52  ;;  %v4849_v50 = vsub.f32 %v4809_v31, %v4833_v36  ;;  %v4865_v24 = vpack.c.bf16 %v4857_v0, %v4853_v60  ;;  %v4867_v31 = vld [vmem:[%s9459_s3 + $0xc] sm:$0xf] }
0x1009   :  { %4878 = vrot.lane.b32.xlu1 %v4859_v39, %s5662_s10  ;;  %v4863_v43 = vpack.c.bf16 %v4855_v17, %v4851_v4  ;;  %v4845_v62 = vsub.f32 %v4805_v42, %v4829_v13  ;;  %v9806_v47 = vmov 0  }
0x100a   :  { %v4848_v37 = vsub.f32 %v4808_v9, %v4832_v56  ;;  %v4844_v30 = vsub.f32 %v4804_v18, %v4828_v14  ;;  %v4866_v18 = vld [vmem:[%s9458_s2 + $0xc] sm:$0xf] }
0x100b   :  { %v4861_v10 = vpack.c.bf16 %v4849_v50, %v4845_v62 }
0x100c   :  { %v4860_v3 = vpack.c.bf16 %v4848_v37, %v4844_v30  ;;  %v9807_v30 = vld [vmem:[#allocation5_spill] sm:$0xff] }
0x100d   :  { %4876 = vrot.lane.b32.xlu1 %v4858_v23, %s5662_s10 }
0x100e   :  { %4880 = vrot.lane.b32.xlu0 %v4860_v3, %s5662_s10 }
0x1011   :  { %4888 = vrot.lane.b32.xlu1 %v4864_v11, %s5662_s10 }
0x1012   :  { %4884 = vrot.lane.b32.xlu0 %v4862_v41, %s5662_s10 }
0x1015   :  { %5007 = vrot.lane.b32.xlu1 %v4823_v19, %s5662_s10 }
0x1016   :  { %4890 = vrot.lane.b32.xlu0 %v4865_v24, %s5662_s10 }
0x1019   :  { %4882 = vrot.lane.b32.xlu1 %v4861_v10, %s5662_s10 }
0x101a   :  { %4886 = vrot.lane.b32.xlu0 %v4863_v43, %s5662_s10 }
0x101d   :  { %4999 = vrot.lane.b32.xlu1 %v4819_v35, %s5662_s10 }
0x101e   :  { %5009 = vrot.lane.b32.xlu0 %v4824_v22, %s5662_s10 }
0x1021   :  { %4997 = vrot.lane.b32.xlu1 %v9321_v6, %s5662_s10 }
0x1022   :  { %5005 = vrot.lane.b32.xlu0 %v9353_v16, %s5662_s10 }
0x1025   :  { %5003 = vrot.lane.b32.xlu1 %v4821_v46, %s5662_s10 }
0x1026   :  { %5001 = vrot.lane.b32.xlu0 %v4820_v52, %s5662_s10 }
0x102a   :  { %5011 = vrot.lane.b32.xlu0 %v4825_v55, %s5662_s10 }
0x102e   :  { %5196 = vperm.xlu0 %5592, %v9396_v8  }
0x1032   :  { %5594 = vset.pattern.permute.xlu0 %v9805_v38 }
0x107b   :  { %v4879_v42 = vpop.permute.xlu1 %4878 }
0x107f   :  { %v4877_v6 = vpop.permute.xlu1 %4876 }
0x1080   :  { %v4881_v23 = vpop.permute.xlu0 %4880  ;;  %v4893_v44 = vsel %vm213_vm7, %v4877_v6, %v4879_v42 }
0x1081   :  { %v4894_v21 = vsel %vm213_vm7, %v4879_v42, %v4881_v23  ;;  %v9808_v42 = vld [vmem:[#allocation4_spill] sm:$0xff] }
0x1083   :  { %v4889_v59 = vpop.permute.xlu1 %4888 }
0x1084   :  { %v4885_v16 = vpop.permute.xlu0 %4884 }
0x1087   :  { %v5008_v7 = vpop.permute.xlu1 %5007 }
0x1088   :  { %v4891_v25 = vpop.permute.xlu0 %4890 }
0x1089   :  { %v4898_v57 = vsel %vm213_vm7, %v4889_v59, %v4891_v25  ;;  %v9809_v25 = vld [vmem:[#allocation6_spill] sm:$0xff] }
0x108a   :  { %5386 = vmatpush3.bf16.msra.mxu1 %v4898_v57 }
0x108b   :  { %v4883_v19 = vpop.permute.xlu1 %4882  ;;  %5387 = vmatprep.subr.bf16.mxu1 %v8977_v51 }
0x108c   :  { %v4887_v49 = vpop.permute.xlu0 %4886  ;;  %v4895_v61 = vsel %vm213_vm7, %v4881_v23, %v4883_v19 }
0x108d   :  { %v4896_v32 = vsel %vm213_vm7, %v4885_v16, %v4887_v49  ;;  %v4897_v5 = vsel %vm213_vm7, %v4887_v49, %v4889_v59 }
0x108e   :  { %4920 = vmatprep.subr.bf16.mxu0 %v4897_v5  ;;  %5388 = vmatpush3.bf16.msra.mxu1 %v4895_v61 }
0x108f   :  { %4921 = vmatpush1.bf16.msra.mxu0 %v4896_v32  ;;  %5393 = vmatprep.subr.bf16.mxu1 %v8977_v51  ;;  %v5000_v48 = vpop.permute.xlu1 %4999 }
0x1090   :  { %v5010_v20 = vpop.permute.xlu0 %5009  ;;  %4922 = vmatprep.subr.bf16.mxu0 %v4894_v21 }
0x1091   :  { %5390 = vmatmul.mubr.msk.bf16.vlgmr.msra.gmra.mxu1 %vm1322_vm12, %v4866_v18  ;;  %v5017_v15 = vsel %vm213_vm7, %v5008_v7, %v5010_v20 }
0x1092   :  { %5397 = vmatprep.mubr.msk.bf16.mxu1 %vm5664_vm9, %v8977_v51 }
0x1093   :  { %4923 = vmatpush1.bf16.msra.mxu0 %v4893_v44  ;;  %v4998_v55 = vpop.permute.xlu1 %4997 }
0x1094   :  { %v5006_v34 = vpop.permute.xlu0 %5005  ;;  %5037 = vmatprep.subr.bf16.mxu0 %v5017_v15  ;;  %v5013_v22 = vsel %vm213_vm7, %v4998_v55, %v5000_v48 }
0x1095   :  { %v5016_v54 = vsel %vm213_vm7, %v5006_v34, %v5008_v7 }
0x1096   :  { %5289 = vmatmul.mubr.msk.bf16.vlgmr.msra.gmra.mxu0 %vm1322_vm12, %v4866_v18 }
0x1097   :  { %5038 = vmatpush1.bf16.msra.mxu0 %v5016_v54  ;;  %5057 = vmatprep.mubr.bf16.mxu0 %v9806_v47  ;;  %v5004_v45 = vpop.permute.xlu1 %5003 }
0x1098   :  { %v5002_v2 = vpop.permute.xlu0 %5001 }
0x1099   :  { %v5014_v17 = vsel %vm213_vm7, %v5000_v48, %v5002_v2  ;;  %v5015_v53 = vsel %vm213_vm7, %v5002_v2, %v5004_v45 }
0x109a   :  { %5039 = vmatprep.subr.bf16.mxu0 %v5014_v17 }
0x109b   :  { %5040 = vmatpush1.bf16.msra.mxu0 %v5013_v22 }
0x109c   :  { %v5012_v35 = vpop.permute.xlu0 %5011  ;;  %5121 = vmatprep.subr.bf16.mxu0 %v5017_v15 }
0x109d   :  { %v5018_v33 = vsel %vm213_vm7, %v5010_v20, %v5012_v35  ;;  %v9810_v20 = vmov 15  }
0x109e   :  { %5291 = vmatmul.mubr.msk.bf16.vlgmr.msra.gmra.mxu0 %vm1322_vm12, %v4866_v18  ;;  %5394 = vmatpush3.bf16.msra.mxu1 %v5018_v33 }
0x109f   :  { %5122 = vmatpush1.bf16.msra.mxu0 %v5016_v54  ;;  %5395 = vmatprep.subr.bf16.mxu1 %v8977_v51 }
0x10a0   :  { %5123 = vmatprep.subr.bf16.mxu0 %v5014_v17  ;;  %5141 = vmatprep.mubr.bf16.mxu0 %v9806_v47 }
0x10a2   :  { %5396 = vmatpush3.bf16.msra.mxu1 %v5015_v53 }
0x10a3   :  { %5124 = vmatpush1.bf16.msra.mxu0 %v5013_v22  ;;  %5401 = vmatprep.subr.bf16.mxu1 %v8977_v51 }
0x10a5   :  { %5398 = vmatmul.mubr.msk.bf16.vlgmr.msra.gmra.mxu1 %vm1322_vm12, %v4866_v18 }
0x10a6   :  { %5293 = vmatmul.mubr.msk.bf16.vlgmr.msra.gmra.mxu0 %vm1322_vm12, %v4867_v31  ;;  %5402 = vmatpush3.bf16.msra.mxu1 %v5018_v33 }
0x10a7   :  { %5403 = vmatprep.subr.bf16.mxu1 %v8977_v51  ;;  %5405 = vmatprep.mubr.msk.bf16.mxu1 %vm5664_vm9, %v8977_v51 }
0x10a9   :  { %v5197_v39 = vpop.permute.xlu0 %5196 }
0x10aa   :  { %5404 = vmatpush3.bf16.msra.mxu1 %v5015_v53 }
0x10ad   :  { %5406 = vmatmul.mubr.msk.bf16.vlgmr.msra.gmra.mxu1 %vm1322_vm12, %v4867_v31 }
0x1151   :  { %v4983_v28 = vpop.f32.mrf.mxu1 }
0x1153   :  { %v5391_v26 = vpop.f32.mrf.mxu1 }
0x1155   :  { %v4986_v1 = vpop.f32.mrf.mxu1 }
0x1156   :  { %v4942_v27 = vpop.f32.mrf.mxu0 }
0x1157   :  { %v5392_v12 = vpop.f32.mrf.mxu1 }
0x1158   :  { %v4944_v0 = vpop.f32.mrf.mxu0 }
0x115a   :  { %v4946_v9 = vpop.f32.mrf.mxu0 }
0x115c   :  { %v4947_v46 = vpop.f32.mrf.mxu0 }
0x115e   :  { %v5059_v41 = vpop.f32.mrf.mxu0 }
0x115f   :  { %v5060_v40 = vadd.f32 %v5059_v41, %v4942_v27 }
0x1160   :  { %v5061_v29 = vpop.f32.mrf.mxu0 }
0x1161   :  { %v5062_v36 = vadd.f32 %v5061_v29, %v4944_v0 }
0x1162   :  { %v5063_v58 = vpop.f32.mrf.mxu0 }
0x1164   :  { %v5064_v63 = vpop.f32.mrf.mxu0 }
0x1165   :  { %v5100_v52 = vpop.f32.mrf.mxu1 }
0x1166   :  { %v5143_v13 = vpop.f32.mrf.mxu0  ;;  %v5101_v62 = vadd.f32 %v5100_v52, %v4983_v28 }
0x1167   :  { %v5190_v51 = vadd.f32 %v5143_v13, %v5060_v40  ;;  %v5399_v60 = vpop.f32.mrf.mxu1 }
0x1168   :  { %v5145_v11 = vpop.f32.mrf.mxu0 }
0x1169   :  { %v5191_v4 = vadd.f32 %v5145_v11, %v5062_v36  ;;  %v5103_v14 = vpop.f32.mrf.mxu1  ;;  %v5199_v56 = vadd.f32 %v5197_v39, %v5190_v51 }
0x116a   :  { %v5147_v50 = vpop.f32.mrf.mxu0 }
0x116b   :  { %v5200_v24 = vadd.f32 %v5197_v39, %v5191_v4  ;;  %v5400_v43 = vpop.f32.mrf.mxu1  ;;  %v5202_v6 = vmul.f32 %v5199_v56, %v9808_v42 }
0x116c   :  { %v5148_v37 = vpop.f32.mrf.mxu0 }
0x116d   :  { %v5203_v10 = vmul.f32 %v5200_v24, %v9807_v30  ;;  %v5184_v3 = vpop.f32.mrf.mxu1  ;;  %v5209_v49 = vmul.f32 %v5202_v6, %v5199_v56 }
0x116e   :  { %v5192_v38 = vadd.f32 %v5184_v3, %v5101_v62 }
0x116f   :  { %v5407_v23 = vpop.f32.mrf.mxu1  ;;  %v5210_v59 = vmul.f32 %v5203_v10, %v5200_v24  ;;  %v5205_v19 = vadd.f32 %v5203_v10, %v5202_v6 }
0x1170   :  { %v5201_v16 = vadd.f32 %v5197_v39, %v5192_v38 }
0x1171   :  { %v5187_v7 = vpop.f32.mrf.mxu1  ;;  %v5212_v18 = vadd.f32 %v5210_v59, %v5209_v49 }
0x1172   :  { %v5204_v57 = vmul.f32 %v5201_v16, %v9809_v25 }
0x1173   :  { %v5408_v61 = vpop.f32.mrf.mxu1 }
0x1174   :  { %v5206_v32 = vadd.f32 %v5205_v19, %v5204_v57  ;;  %v5211_v5 = vmul.f32 %v5204_v57, %v5201_v16 }
0x1176   :  { %5207 = vadd.xlane.f32.xlu1 %v5206_v32  ;;  %v5213_v21 = vadd.f32 %v5212_v18, %v5211_v5 }
0x1178   :  { %5214 = vadd.xlane.f32.xlu0 %v5213_v21 }
0x118e   :  { %5236 = vperm.xlu0 %5594, %v9396_v8  }
0x1192   :  { %5596 = vset.pattern.permute.xlu0 %v9810_v20 }
0x11ff   :  { %v5208_v48 = vpop.xlane.xlu1 %5207 }
0x1200   :  { %v5216_v44 = vmul.f32 0.00390625, %v5208_v48 }
0x1201   :  { %v5215_v15 = vpop.xlane.xlu0 %5214 }
0x1202   :  { %v5217_v34 = vmul.f32 0.00390625, %v5215_v15  ;;  %v5218_v54 = vmul.f32 %v5216_v44, %v5216_v44  ;;  %v5224_v35 = vsub.f32 %v5199_v56, %v5216_v44  ;;  %v5225_v33 = vsub.f32 %v5200_v24, %v5216_v44 }
0x1203   :  { %v5226_v45 = vsub.f32 %v5201_v16, %v5216_v44 }
0x1204   :  { %v5219_v55 = vsub.f32 %v5217_v34, %v5218_v54 }
0x1206   :  { %v5220_v47 = vmax.f32 %v5219_v55, 0.0 }
0x1208   :  { %v5221_v2 = vadd.f32 1e-05, %v5220_v47 }
0x1209   :  { %v5237_v31 = vpop.permute.xlu0 %5236 }
0x120a   :  { %5603 = vrsqrt.f32 %v5221_v2 }
0x1217   :  { %v5604_v17 = vpop.eup %5603 }
0x1218   :  { %v5223_v22 = vmul.f32 %v5604_v17, %v9396_v8 }
0x121a   :  { %5229 = vperm.xlu1 %5593, %v5223_v22  }
0x121e   :  { %5595 = vset.pattern.permute.xlu1 %v9810_v20 }
0x121f   :  { %5246 = vperm.xlu1 %5595, %v9396_v8  }
0x1295   :  { %v5230_v53 = vpop.permute.xlu1 %5229 }
0x1296   :  { %v5232_v28 = vmul.f32 %v5230_v53, %v5224_v35  ;;  %v5233_v26 = vmul.f32 %v5230_v53, %v5225_v33  ;;  %v5234_v1 = vmul.f32 %v5230_v53, %v5226_v45 }
0x1298   :  { %v5239_v27 = vadd.f32 %v5237_v31, %v5232_v28  ;;  %v5240_v12 = vadd.f32 %v5237_v31, %v5233_v26  ;;  %v5241_v0 = vadd.f32 %v5237_v31, %v5234_v1 }
0x129a   :  { %v5247_v9 = vpop.permute.xlu1 %5246  ;;  %vm5242_vm0 = vcmp.ge.f32.partialorder %v5239_v27, 0.0  ;;  %vm5243_vm1 = vcmp.ge.f32.partialorder %v5240_v12, 0.0  ;;  %vm5244_vm2 = vcmp.ge.f32.partialorder %v5241_v0, 0.0 }
0x129b   :  { %v5249_v46 = vmul.f32 %v5247_v9, %v5239_v27  ;;  %v5250_v41 = vmul.f32 %v5247_v9, %v5240_v12  ;;  %v5251_v29 = vmul.f32 %v5247_v9, %v5241_v0 }
0x129d   :  { %v5252_v58 = vsel %vm5242_vm0, %v5239_v27, %v5249_v46  ;;  %v5253_v8 = vsel %vm5243_vm1, %v5240_v12, %v5250_v41  ;;  %v5254_v63 = vsel %vm5244_vm2, %v5241_v0, %v5251_v29 }
0x129e   :  { %v5255_v40 = vmul.f32 %v5252_v58, %v9808_v42  ;;  %v5256_v52 = vmul.f32 %v5253_v8, %v9807_v30  ;;  %v5257_v13 = vmul.f32 %v5254_v63, %v9809_v25 }
0x12a0   :  { %5258 = vst [vmem:[%s9461_s6] sm:$0xff] %v5255_v40  ;;  %5259 = vst [vmem:[%s9461_s6 + $0x8] sm:$0xff] %v5256_v52 }
0x12a1   :  { %5260 = vst [vmem:[%s9461_s6 + $0x10] sm:$0xff] %v5257_v13 }

</bundles_post_ra>
